<compile_context>
chip_gen: v5e
topology: v5e:2x2
jax: 0.10.0
libtpu: 0.0.40
codegen_flags: <defaults>
</compile_context>

<pallas_src>
import jax
import jax.numpy as jnp
from jax.experimental import pallas as pl
from jax.experimental.pallas import tpu as pltpu


# ------------------------------ small helpers -------------------------------

def _round_up(x, m):
    return (x + m - 1) // m * m


# ------------------------------ Pallas kernel -------------------------------

def _make_disc_kernel(num_blocks):
    """Fused Discriminator kernel: `num_blocks` Dblocks + final Linear(., 1)."""

    def kernel(*refs):
        mel_ref, noise_ref = refs[0], refs[1]
        blk_refs = refs[2:2 + 4 * num_blocks]            # w1,b1,w2,b2 per block
        wp_ref = refs[2 + 4 * num_blocks]                 # (C_final, T)
        bp_ref = refs[3 + 4 * num_blocks]                 # (1, 1)
        out_ref = refs[4 + 4 * num_blocks]                # (B, 1)
        f_refs = refs[5 + 4 * num_blocks:5 + 5 * num_blocks]   # features (B, C, T)
        xcol_sc = refs[-1]                                # VMEM im2col scratch

        B, _, T = mel_ref.shape
        SLOT = T + 2        # per-batch column slot in the scratch (2 pad cols)

        # One-time zero (once per kernel, not per conv) so the weight-padded
        # rows of the first (Cin=4 -> Cpad=8) conv's im2col operand are finite.
        xcol_sc[...] = jnp.zeros_like(xcol_sc)

        def conv1d(x_slots, w_ref, bias_ref):
            """k=3, pad=1 Conv1d over all batch elements as ONE im2col matmul.

            x_slots: list of B values, each (C, T).
            Scratch band k holds the tap-k shifted input (x[:, t+k-1]); the
            whole (3*Cpad, B*SLOT) slab is contracted against the pre-packed
            (Cout, 3*Cpad) weight in a single MXU dot.  Only the two
            out-of-range boundary columns per batch are zeroed.
            Returns (Cout, B*SLOT); valid columns of batch b: [b*SLOT+1, +T).
            """
            C = x_slots[0].shape[0]
            cpad = _round_up(C, 8)                        # aligned band stride
            zcol = jnp.zeros((C, 1), jnp.float32)
            for b in range(B):
                off = b * SLOT
                for k in range(3):
                    # x[:, m] lands at col off+2-k+m -> reading col j gives x[:, j-off-2+k]
                    xcol_sc[k * cpad:k * cpad + C,
                            off + 2 - k:off + 2 - k + T] = x_slots[b]
                # boundary taps that fall outside [0, T) must read zero
                xcol_sc[0:C, off + 1:off + 2] = zcol                       # t-1 at t=0
                xcol_sc[2 * cpad:2 * cpad + C, off + T:off + T + 1] = zcol  # t+1 at t=T-1
            return (jnp.dot(w_ref[...], xcol_sc[0:3 * cpad, :],
                            preferred_element_type=jnp.float32)
                    + bias_ref[...])

        # Noisy input (noise added in-kernel), split per batch element.
        x_slots = [mel_ref[b] + noise_ref[b] for b in range(B)]

        for i in range(num_blocks):
            w1, b1, w2, b2 = blk_refs[4 * i:4 * i + 4]
            y1 = conv1d(x_slots, w1, b1)                  # (Cout, B*SLOT)
            # torch nn.LeakyReLU(0.2, inplace=True) mutates spec_sc1 in place,
            # so the residual uses the *activated* conv1 output.
            act = jnp.where(y1 > 0, y1, 0.2 * y1)
            act_slots = [act[:, b * SLOT + 1:b * SLOT + 1 + T] for b in range(B)]
            y2 = conv1d(act_slots, w2, b2)
            feat = act + y2                               # (Cout, B*SLOT)
            x_slots = [feat[:, b * SLOT + 1:b * SLOT + 1 + T] for b in range(B)]
            for b in range(B):
                f_refs[i][b] = x_slots[b]                 # feature in (B, C, T)

        # Fused spectral-norm Linear(C_final*T, 1) on the resident activation:
        # out[b] = sum_{c,t} wp[c, t] * x_b[c, t] + bp   (VPU mul + reductions)
        wp = wp_ref[...]                                  # (C_final, T)
        row = jax.lax.broadcasted_iota(jnp.int32, (B, 1), 0)
        out = jnp.zeros((B, 1), jnp.float32)
        for b in range(B):
            prod = x_slots[b] * wp
            v = jnp.sum(jnp.sum(prod, axis=1, keepdims=True), axis=0,
                        keepdims=True)                    # (1, 1)
            out = jnp.where(row == b, v, out)
        out_ref[...] = out + bp_ref[...]

    return kernel


# ----------------------------- kernel wrapper --------------------------------

def discriminator_forward(params, mel, noise):
    """One fused pallas_call: all Dblocks + projection. Returns (out, features)."""
    B, cin, T = mel.shape
    nb = len(params["blocks"])

    args = [mel, noise]
    feat_shapes = []
    conv_cins = []
    c = cin
    for blk in params["blocks"]:
        args += [blk["w1"], blk["b1"], blk["w2"], blk["b2"]]
        conv_cins.append(c)          # conv1 input channels
        c *= 2
        conv_cins.append(c)          # conv2 input channels
        feat_shapes.append(jax.ShapeDtypeStruct((B, c, T), jnp.float32))
    args += [params["proj"]["w"], params["proj"]["b"]]

    scratch_rows = 3 * max(_round_up(cc, 8) for cc in conv_cins)

    res = pl.pallas_call(
        _make_disc_kernel(nb),
        out_shape=tuple([jax.ShapeDtypeStruct((B, 1), jnp.float32)] + feat_shapes),
        scratch_shapes=[pltpu.VMEM((scratch_rows, B * (T + 2)), jnp.float32)],
    )(*args)
    return res[0], list(res[1:])


# --------------------------- parameter construction --------------------------

def _sigma(w2d, iters=50):
    """Largest singular value via deterministic power iteration (plain JAX)."""
    u = jnp.ones((w2d.shape[0],), jnp.float32)
    u = u / jnp.linalg.norm(u)
    v = jnp.zeros((w2d.shape[1],), jnp.float32)
    for _ in range(iters):
        v = w2d.T @ u
        v = v / (jnp.linalg.norm(v) + 1e-12)
        u = w2d @ v
        u = u / (jnp.linalg.norm(u) + 1e-12)
    return u @ (w2d @ v)


def _im2col_weight(w):
    """(Cout, Cin, K) conv weight -> (Cout, K*Cpad) im2col weight.

    Column block k holds tap-k weights; Cin is zero-padded to a multiple of 8
    so the kernel's scratch band strides stay sublane-aligned.
    """
    cout, cin, K = w.shape
    cpad = _round_up(cin, 8)
    wt = jnp.transpose(w, (0, 2, 1))                      # (Cout, K, Cin)
    wt = jnp.pad(wt, ((0, 0), (0, 0), (0, cpad - cin)))
    return wt.reshape(cout, K * cpad)


def init_discriminator_params(key, in_channel, seglen, kernel_size=3,
                              num_blocks=4):
    assert kernel_size == 3
    params = {"blocks": [], "proj": None}
    c = in_channel
    for _ in range(num_blocks):
        cout = 2 * c
        key, k1, k2, k3, k4 = jax.random.split(key, 5)
        bnd1 = 1.0 / (c * kernel_size) ** 0.5
        w1 = jax.random.uniform(k1, (cout, c, kernel_size), jnp.float32,
                                -bnd1, bnd1)
        b1 = jax.random.uniform(k2, (cout,), jnp.float32, -bnd1, bnd1)
        bnd2 = 1.0 / (cout * kernel_size) ** 0.5
        w2 = jax.random.uniform(k3, (cout, cout, kernel_size), jnp.float32,
                                -bnd2, bnd2)
        b2 = jax.random.uniform(k4, (cout,), jnp.float32, -bnd2, bnd2)
        # spectral norm (torch reshapes conv weight to (Cout, Cin*K))
        w1 = w1 / _sigma(w1.reshape(cout, -1))
        w2 = w2 / _sigma(w2.reshape(cout, -1))
        params["blocks"].append(dict(
            w1=_im2col_weight(w1), b1=b1.reshape(cout, 1),
            w2=_im2col_weight(w2), b2=b2.reshape(cout, 1)))
        c = cout
    F = c * seglen
    key, k1, k2 = jax.random.split(key, 3)
    bnd = 1.0 / F ** 0.5
    wp = jax.random.uniform(k1, (1, F), jnp.float32, -bnd, bnd)
    bp = jax.random.uniform(k2, (1,), jnp.float32, -bnd, bnd)
    wp = wp / _sigma(wp)
    # torch .view(B, -1) on (B, C, T) is C-major, T-minor  ->  (C_final, T)
    params["proj"] = dict(w=wp.reshape(c, seglen), b=bp.reshape(1, 1))
    return params


# ------------------------------ forward passes -------------------------------

def multi_discriminator_forward(all_params, mels, noise_key):
    outs, features = [], []
    for params, mel in zip(all_params, mels):
        noise_key, k = jax.random.split(noise_key)
        noise = jax.random.uniform(k, mel.shape, mel.dtype)   # torch.rand
        out, feat = discriminator_forward(params, mel, noise)
        outs.append(out)
        features.append(feat)
    return outs, features


# ----------------------------------- main ------------------------------------

if __name__ == "__main__":
    # small shapes: batch=2, in_channel=4, seglen=18, kernel_size=3,
    # num_blocks=4, num_dis=3  ->  per-discriminator seglens 18, 6, 2
    B, in_channel, seglen, ksz, num_blocks, num_dis = 2, 4, 18, 3, 4, 3

    key = jax.random.PRNGKey(0)
    key, pkey, nkey = jax.random.split(key, 3)

    all_params, seglens = [], []
    for i in range(num_dis):
        pkey, sub = jax.random.split(pkey)
        sl = seglen // (ksz ** i)
        seglens.append(sl)
        all_params.append(
            init_discriminator_params(sub, in_channel, sl, ksz, num_blocks))

    mels = []
    for sl in seglens:
        key, sub = jax.random.split(key)
        mels.append(jax.random.normal(sub, (B, in_channel, sl), jnp.float32))

    fwd = jax.jit(multi_discriminator_forward)
    outs, features = fwd(all_params, mels, nkey)

    for o in outs:
        jax.block_until_ready(o)
        assert o.shape == (B, 1)
    for feat_list, sl in zip(features, seglens):
        c = in_channel
        for f in feat_list:
            c *= 2
            jax.block_until_ready(f)
            assert f.shape == (B, c, sl)

    print("KERNEL_OK")
</pallas_src>

<mosaic_0001>
module attributes {stable_mosaic.version = 11 : i64} {
  func.func @kernel(%arg0: memref<2x4x2xf32, #tpu.memory_space<vmem>>, %arg1: memref<2x4x2xf32, #tpu.memory_space<vmem>>, %arg2: memref<8x24xf32, #tpu.memory_space<vmem>>, %arg3: memref<8x1xf32, #tpu.memory_space<vmem>>, %arg4: memref<8x24xf32, #tpu.memory_space<vmem>>, %arg5: memref<8x1xf32, #tpu.memory_space<vmem>>, %arg6: memref<16x24xf32, #tpu.memory_space<vmem>>, %arg7: memref<16x1xf32, #tpu.memory_space<vmem>>, %arg8: memref<16x48xf32, #tpu.memory_space<vmem>>, %arg9: memref<16x1xf32, #tpu.memory_space<vmem>>, %arg10: memref<32x48xf32, #tpu.memory_space<vmem>>, %arg11: memref<32x1xf32, #tpu.memory_space<vmem>>, %arg12: memref<32x96xf32, #tpu.memory_space<vmem>>, %arg13: memref<32x1xf32, #tpu.memory_space<vmem>>, %arg14: memref<64x96xf32, #tpu.memory_space<vmem>>, %arg15: memref<64x1xf32, #tpu.memory_space<vmem>>, %arg16: memref<64x192xf32, #tpu.memory_space<vmem>>, %arg17: memref<64x1xf32, #tpu.memory_space<vmem>>, %arg18: memref<64x2xf32, #tpu.memory_space<vmem>>, %arg19: memref<1x1xf32, #tpu.memory_space<vmem>>, %arg20: memref<2x1xf32, #tpu.memory_space<vmem>>, %arg21: memref<2x8x2xf32, #tpu.memory_space<vmem>>, %arg22: memref<2x16x2xf32, #tpu.memory_space<vmem>>, %arg23: memref<2x32x2xf32, #tpu.memory_space<vmem>>, %arg24: memref<2x64x2xf32, #tpu.memory_space<vmem>>, %arg25: memref<192x8xf32, #tpu.memory_space<vmem>>) attributes {dimension_semantics = [], scalar_prefetch = 0 : i64, scratch_operands = 1 : i64, tpu.core_type = #tpu.core_type<tc>} {
    %cst = arith.constant 0.000000e+00 : f32
    %0 = vector.broadcast %cst : f32 to vector<192x8xf32>
    %c0 = arith.constant 0 : index
    %c0_0 = arith.constant 0 : index
    %1 = vector.load %arg25[%c0, %c0_0] : memref<192x8xf32, #tpu.memory_space<vmem>>, vector<192x8xf32>
    tpu.vector_store %arg25[%c0, %c0_0], %0 {strides = array<i32>} : memref<192x8xf32, #tpu.memory_space<vmem>>, vector<192x8xf32>,
    %c0_1 = arith.constant 0 : index
    %c0_2 = arith.constant 0 : index
    %c0_3 = arith.constant 0 : index
    %2 = vector.load %arg0[%c0_1, %c0_2, %c0_3] : memref<2x4x2xf32, #tpu.memory_space<vmem>>, vector<1x4x2xf32>
    %3 = vector.shape_cast %2 : vector<1x4x2xf32> to vector<4x2xf32>
    %c0_4 = arith.constant 0 : index
    %c0_5 = arith.constant 0 : index
    %c0_6 = arith.constant 0 : index
    %4 = vector.load %arg1[%c0_4, %c0_5, %c0_6] : memref<2x4x2xf32, #tpu.memory_space<vmem>>, vector<1x4x2xf32>
    %5 = vector.shape_cast %4 : vector<1x4x2xf32> to vector<4x2xf32>
    %6 = arith.addf %3, %5 : vector<4x2xf32>
    %c1 = arith.constant 1 : index
    %c0_7 = arith.constant 0 : index
    %c0_8 = arith.constant 0 : index
    %7 = vector.load %arg0[%c1, %c0_7, %c0_8] : memref<2x4x2xf32, #tpu.memory_space<vmem>>, vector<1x4x2xf32>
    %8 = vector.shape_cast %7 : vector<1x4x2xf32> to vector<4x2xf32>
    %c1_9 = arith.constant 1 : index
    %c0_10 = arith.constant 0 : index
    %c0_11 = arith.constant 0 : index
    %9 = vector.load %arg1[%c1_9, %c0_10, %c0_11] : memref<2x4x2xf32, #tpu.memory_space<vmem>>, vector<1x4x2xf32>
    %10 = vector.shape_cast %9 : vector<1x4x2xf32> to vector<4x2xf32>
    %11 = arith.addf %8, %10 : vector<4x2xf32>
    %cst_12 = arith.constant 0.000000e+00 : f32
    %12 = vector.broadcast %cst_12 : f32 to vector<4x1xf32>
    %c0_13 = arith.constant 0 : index
    %c2 = arith.constant 2 : index
    %13 = vector.load %arg25[%c0_13, %c2] : memref<192x8xf32, #tpu.memory_space<vmem>>, vector<4x2xf32>
    tpu.vector_store %arg25[%c0_13, %c2], %6 {strides = array<i32>} : memref<192x8xf32, #tpu.memory_space<vmem>>, vector<4x2xf32>,
    %c8 = arith.constant 8 : index
    %c1_14 = arith.constant 1 : index
    %14 = vector.load %arg25[%c8, %c1_14] : memref<192x8xf32, #tpu.memory_space<vmem>>, vector<4x2xf32>
    tpu.vector_store %arg25[%c8, %c1_14], %6 {strides = array<i32>} : memref<192x8xf32, #tpu.memory_space<vmem>>, vector<4x2xf32>,
    %c16 = arith.constant 16 : index
    %c0_15 = arith.constant 0 : index
    %15 = vector.load %arg25[%c16, %c0_15] : memref<192x8xf32, #tpu.memory_space<vmem>>, vector<4x2xf32>
    tpu.vector_store %arg25[%c16, %c0_15], %6 {strides = array<i32>} : memref<192x8xf32, #tpu.memory_space<vmem>>, vector<4x2xf32>,
    %c0_16 = arith.constant 0 : index
    %c1_17 = arith.constant 1 : index
    %16 = vector.load %arg25[%c0_16, %c1_17] : memref<192x8xf32, #tpu.memory_space<vmem>>, vector<4x1xf32>
    tpu.vector_store %arg25[%c0_16, %c1_17], %12 {strides = array<i32>} : memref<192x8xf32, #tpu.memory_space<vmem>>, vector<4x1xf32>,
    %c16_18 = arith.constant 16 : index
    %c2_19 = arith.constant 2 : index
    %17 = vector.load %arg25[%c16_18, %c2_19] : memref<192x8xf32, #tpu.memory_space<vmem>>, vector<4x1xf32>
    tpu.vector_store %arg25[%c16_18, %c2_19], %12 {strides = array<i32>} : memref<192x8xf32, #tpu.memory_space<vmem>>, vector<4x1xf32>,
    %c0_20 = arith.constant 0 : index
    %c6 = arith.constant 6 : index
    %18 = vector.load %arg25[%c0_20, %c6] : memref<192x8xf32, #tpu.memory_space<vmem>>, vector<4x2xf32>
    tpu.vector_store %arg25[%c0_20, %c6], %11 {strides = array<i32>} : memref<192x8xf32, #tpu.memory_space<vmem>>, vector<4x2xf32>,
    %c8_21 = arith.constant 8 : index
    %c5 = arith.constant 5 : index
    %19 = vector.load %arg25[%c8_21, %c5] : memref<192x8xf32, #tpu.memory_space<vmem>>, vector<4x2xf32>
    tpu.vector_store %arg25[%c8_21, %c5], %11 {strides = array<i32>} : memref<192x8xf32, #tpu.memory_space<vmem>>, vector<4x2xf32>,
    %c16_22 = arith.constant 16 : index
    %c4 = arith.constant 4 : index
    %20 = vector.load %arg25[%c16_22, %c4] : memref<192x8xf32, #tpu.memory_space<vmem>>, vector<4x2xf32>
    tpu.vector_store %arg25[%c16_22, %c4], %11 {strides = array<i32>} : memref<192x8xf32, #tpu.memory_space<vmem>>, vector<4x2xf32>,
    %c0_23 = arith.constant 0 : index
    %c5_24 = arith.constant 5 : index
    %21 = vector.load %arg25[%c0_23, %c5_24] : memref<192x8xf32, #tpu.memory_space<vmem>>, vector<4x1xf32>
    tpu.vector_store %arg25[%c0_23, %c5_24], %12 {strides = array<i32>} : memref<192x8xf32, #tpu.memory_space<vmem>>, vector<4x1xf32>,
    %c16_25 = arith.constant 16 : index
    %c6_26 = arith.constant 6 : index
    %22 = vector.load %arg25[%c16_25, %c6_26] : memref<192x8xf32, #tpu.memory_space<vmem>>, vector<4x1xf32>
    tpu.vector_store %arg25[%c16_25, %c6_26], %12 {strides = array<i32>} : memref<192x8xf32, #tpu.memory_space<vmem>>, vector<4x1xf32>,
    %c0_27 = arith.constant 0 : index
    %c0_28 = arith.constant 0 : index
    %23 = vector.load %arg2[%c0_27, %c0_28] : memref<8x24xf32, #tpu.memory_space<vmem>>, vector<8x24xf32>
    %c0_29 = arith.constant 0 : index
    %c0_30 = arith.constant 0 : index
    %24 = vector.load %arg25[%c0_29, %c0_30] : memref<192x8xf32, #tpu.memory_space<vmem>>, vector<24x8xf32>
    %cst_31 = arith.constant dense<0.000000e+00> : vector<8x8xf32>
    %25 = tpu.matmul %23, %24, %cst_31 {dimension_numbers = #tpu.dot_dimension_numbers<[1], [0], [0], [1], [0, 0, 1, 1], [], []>} : vector<8x24xf32>, vector<24x8xf32>, vector<8x8xf32> -> vector<8x8xf32>
    %c0_32 = arith.constant 0 : index
    %c0_33 = arith.constant 0 : index
    %26 = vector.load %arg3[%c0_32, %c0_33] : memref<8x1xf32, #tpu.memory_space<vmem>>, vector<8x1xf32>
    %27 = vector.broadcast %26 : vector<8x1xf32> to vector<8x8xf32>
    %28 = arith.addf %25, %27 : vector<8x8xf32>
    %cst_34 = arith.constant 0.000000e+00 : f32
    %29 = vector.broadcast %cst_34 : f32 to vector<8x8xf32>
    %30 = arith.cmpf ogt, %28, %29 : vector<8x8xf32>
    %cst_35 = arith.constant 2.000000e-01 : f32
    %31 = vector.broadcast %cst_35 : f32 to vector<8x8xf32>
    %32 = arith.mulf %31, %28 : vector<8x8xf32>
    %33 = arith.select %30, %28, %32 : vector<8x8xi1>, vector<8x8xf32>
    %34 = vector.extract_strided_slice %33 {offsets = [0, 1], sizes = [8, 2], strides = [1, 1]} : vector<8x8xf32> to vector<8x2xf32>
    %35 = vector.extract_strided_slice %33 {offsets = [0, 5], sizes = [8, 2], strides = [1, 1]} : vector<8x8xf32> to vector<8x2xf32>
    %cst_36 = arith.constant 0.000000e+00 : f32
    %36 = vector.broadcast %cst_36 : f32 to vector<8x1xf32>
    %c0_37 = arith.constant 0 : index
    %c2_38 = arith.constant 2 : index
    %37 = vector.load %arg25[%c0_37, %c2_38] : memref<192x8xf32, #tpu.memory_space<vmem>>, vector<8x2xf32>
    tpu.vector_store %arg25[%c0_37, %c2_38], %34 {strides = array<i32>} : memref<192x8xf32, #tpu.memory_space<vmem>>, vector<8x2xf32>,
    %c8_39 = arith.constant 8 : index
    %c1_40 = arith.constant 1 : index
    %38 = vector.load %arg25[%c8_39, %c1_40] : memref<192x8xf32, #tpu.memory_space<vmem>>, vector<8x2xf32>
    tpu.vector_store %arg25[%c8_39, %c1_40], %34 {strides = array<i32>} : memref<192x8xf32, #tpu.memory_space<vmem>>, vector<8x2xf32>,
    %c16_41 = arith.constant 16 : index
    %c0_42 = arith.constant 0 : index
    %39 = vector.load %arg25[%c16_41, %c0_42] : memref<192x8xf32, #tpu.memory_space<vmem>>, vector<8x2xf32>
    tpu.vector_store %arg25[%c16_41, %c0_42], %34 {strides = array<i32>} : memref<192x8xf32, #tpu.memory_space<vmem>>, vector<8x2xf32>,
    %c0_43 = arith.constant 0 : index
    %c1_44 = arith.constant 1 : index
    %40 = vector.load %arg25[%c0_43, %c1_44] : memref<192x8xf32, #tpu.memory_space<vmem>>, vector<8x1xf32>
    tpu.vector_store %arg25[%c0_43, %c1_44], %36 {strides = array<i32>} : memref<192x8xf32, #tpu.memory_space<vmem>>, vector<8x1xf32>,
    %c16_45 = arith.constant 16 : index
    %c2_46 = arith.constant 2 : index
    %41 = vector.load %arg25[%c16_45, %c2_46] : memref<192x8xf32, #tpu.memory_space<vmem>>, vector<8x1xf32>
    tpu.vector_store %arg25[%c16_45, %c2_46], %36 {strides = array<i32>} : memref<192x8xf32, #tpu.memory_space<vmem>>, vector<8x1xf32>,
    %c0_47 = arith.constant 0 : index
    %c6_48 = arith.constant 6 : index
    %42 = vector.load %arg25[%c0_47, %c6_48] : memref<192x8xf32, #tpu.memory_space<vmem>>, vector<8x2xf32>
    tpu.vector_store %arg25[%c0_47, %c6_48], %35 {strides = array<i32>} : memref<192x8xf32, #tpu.memory_space<vmem>>, vector<8x2xf32>,
    %c8_49 = arith.constant 8 : index
    %c5_50 = arith.constant 5 : index
    %43 = vector.load %arg25[%c8_49, %c5_50] : memref<192x8xf32, #tpu.memory_space<vmem>>, vector<8x2xf32>
    tpu.vector_store %arg25[%c8_49, %c5_50], %35 {strides = array<i32>} : memref<192x8xf32, #tpu.memory_space<vmem>>, vector<8x2xf32>,
    %c16_51 = arith.constant 16 : index
    %c4_52 = arith.constant 4 : index
    %44 = vector.load %arg25[%c16_51, %c4_52] : memref<192x8xf32, #tpu.memory_space<vmem>>, vector<8x2xf32>
    tpu.vector_store %arg25[%c16_51, %c4_52], %35 {strides = array<i32>} : memref<192x8xf32, #tpu.memory_space<vmem>>, vector<8x2xf32>,
    %c0_53 = arith.constant 0 : index
    %c5_54 = arith.constant 5 : index
    %45 = vector.load %arg25[%c0_53, %c5_54] : memref<192x8xf32, #tpu.memory_space<vmem>>, vector<8x1xf32>
    tpu.vector_store %arg25[%c0_53, %c5_54], %36 {strides = array<i32>} : memref<192x8xf32, #tpu.memory_space<vmem>>, vector<8x1xf32>,
    %c16_55 = arith.constant 16 : index
    %c6_56 = arith.constant 6 : index
    %46 = vector.load %arg25[%c16_55, %c6_56] : memref<192x8xf32, #tpu.memory_space<vmem>>, vector<8x1xf32>
    tpu.vector_store %arg25[%c16_55, %c6_56], %36 {strides = array<i32>} : memref<192x8xf32, #tpu.memory_space<vmem>>, vector<8x1xf32>,
    %c0_57 = arith.constant 0 : index
    %c0_58 = arith.constant 0 : index
    %47 = vector.load %arg4[%c0_57, %c0_58] : memref<8x24xf32, #tpu.memory_space<vmem>>, vector<8x24xf32>
    %c0_59 = arith.constant 0 : index
    %c0_60 = arith.constant 0 : index
    %48 = vector.load %arg25[%c0_59, %c0_60] : memref<192x8xf32, #tpu.memory_space<vmem>>, vector<24x8xf32>
    %cst_61 = arith.constant dense<0.000000e+00> : vector<8x8xf32>
    %49 = tpu.matmul %47, %48, %cst_61 {dimension_numbers = #tpu.dot_dimension_numbers<[1], [0], [0], [1], [0, 0, 1, 1], [], []>} : vector<8x24xf32>, vector<24x8xf32>, vector<8x8xf32> -> vector<8x8xf32>
    %c0_62 = arith.constant 0 : index
    %c0_63 = arith.constant 0 : index
    %50 = vector.load %arg5[%c0_62, %c0_63] : memref<8x1xf32, #tpu.memory_space<vmem>>, vector<8x1xf32>
    %51 = vector.broadcast %50 : vector<8x1xf32> to vector<8x8xf32>
    %52 = arith.addf %49, %51 : vector<8x8xf32>
    %53 = arith.addf %33, %52 : vector<8x8xf32>
    %54 = vector.extract_strided_slice %53 {offsets = [0, 1], sizes = [8, 2], strides = [1, 1]} : vector<8x8xf32> to vector<8x2xf32>
    %55 = vector.extract_strided_slice %53 {offsets = [0, 5], sizes = [8, 2], strides = [1, 1]} : vector<8x8xf32> to vector<8x2xf32>
    %c0_64 = arith.constant 0 : index
    %c0_65 = arith.constant 0 : index
    %c0_66 = arith.constant 0 : index
    %56 = vector.load %arg21[%c0_64, %c0_65, %c0_66] : memref<2x8x2xf32, #tpu.memory_space<vmem>>, vector<1x8x2xf32>
    %57 = vector.shape_cast %56 : vector<1x8x2xf32> to vector<8x2xf32>
    %58 = vector.shape_cast %54 : vector<8x2xf32> to vector<1x8x2xf32>
    tpu.vector_store %arg21[%c0_64, %c0_65, %c0_66], %58 {strides = array<i32>} : memref<2x8x2xf32, #tpu.memory_space<vmem>>, vector<1x8x2xf32>,
    %c1_67 = arith.constant 1 : index
    %c0_68 = arith.constant 0 : index
    %c0_69 = arith.constant 0 : index
    %59 = vector.load %arg21[%c1_67, %c0_68, %c0_69] : memref<2x8x2xf32, #tpu.memory_space<vmem>>, vector<1x8x2xf32>
    %60 = vector.shape_cast %59 : vector<1x8x2xf32> to vector<8x2xf32>
    %61 = vector.shape_cast %55 : vector<8x2xf32> to vector<1x8x2xf32>
    tpu.vector_store %arg21[%c1_67, %c0_68, %c0_69], %61 {strides = array<i32>} : memref<2x8x2xf32, #tpu.memory_space<vmem>>, vector<1x8x2xf32>,
    %cst_70 = arith.constant 0.000000e+00 : f32
    %62 = vector.broadcast %cst_70 : f32 to vector<8x1xf32>
    %c0_71 = arith.constant 0 : index
    %c2_72 = arith.constant 2 : index
    %63 = vector.load %arg25[%c0_71, %c2_72] : memref<192x8xf32, #tpu.memory_space<vmem>>, vector<8x2xf32>
    tpu.vector_store %arg25[%c0_71, %c2_72], %54 {strides = array<i32>} : memref<192x8xf32, #tpu.memory_space<vmem>>, vector<8x2xf32>,
    %c8_73 = arith.constant 8 : index
    %c1_74 = arith.constant 1 : index
    %64 = vector.load %arg25[%c8_73, %c1_74] : memref<192x8xf32, #tpu.memory_space<vmem>>, vector<8x2xf32>
    tpu.vector_store %arg25[%c8_73, %c1_74], %54 {strides = array<i32>} : memref<192x8xf32, #tpu.memory_space<vmem>>, vector<8x2xf32>,
    %c16_75 = arith.constant 16 : index
    %c0_76 = arith.constant 0 : index
    %65 = vector.load %arg25[%c16_75, %c0_76] : memref<192x8xf32, #tpu.memory_space<vmem>>, vector<8x2xf32>
    tpu.vector_store %arg25[%c16_75, %c0_76], %54 {strides = array<i32>} : memref<192x8xf32, #tpu.memory_space<vmem>>, vector<8x2xf32>,
    %c0_77 = arith.constant 0 : index
    %c1_78 = arith.constant 1 : index
    %66 = vector.load %arg25[%c0_77, %c1_78] : memref<192x8xf32, #tpu.memory_space<vmem>>, vector<8x1xf32>
    tpu.vector_store %arg25[%c0_77, %c1_78], %62 {strides = array<i32>} : memref<192x8xf32, #tpu.memory_space<vmem>>, vector<8x1xf32>,
    %c16_79 = arith.constant 16 : index
    %c2_80 = arith.constant 2 : index
    %67 = vector.load %arg25[%c16_79, %c2_80] : memref<192x8xf32, #tpu.memory_space<vmem>>, vector<8x1xf32>
    tpu.vector_store %arg25[%c16_79, %c2_80], %62 {strides = array<i32>} : memref<192x8xf32, #tpu.memory_space<vmem>>, vector<8x1xf32>,
    %c0_81 = arith.constant 0 : index
    %c6_82 = arith.constant 6 : index
    %68 = vector.load %arg25[%c0_81, %c6_82] : memref<192x8xf32, #tpu.memory_space<vmem>>, vector<8x2xf32>
    tpu.vector_store %arg25[%c0_81, %c6_82], %55 {strides = array<i32>} : memref<192x8xf32, #tpu.memory_space<vmem>>, vector<8x2xf32>,
    %c8_83 = arith.constant 8 : index
    %c5_84 = arith.constant 5 : index
    %69 = vector.load %arg25[%c8_83, %c5_84] : memref<192x8xf32, #tpu.memory_space<vmem>>, vector<8x2xf32>
    tpu.vector_store %arg25[%c8_83, %c5_84], %55 {strides = array<i32>} : memref<192x8xf32, #tpu.memory_space<vmem>>, vector<8x2xf32>,
    %c16_85 = arith.constant 16 : index
    %c4_86 = arith.constant 4 : index
    %70 = vector.load %arg25[%c16_85, %c4_86] : memref<192x8xf32, #tpu.memory_space<vmem>>, vector<8x2xf32>
    tpu.vector_store %arg25[%c16_85, %c4_86], %55 {strides = array<i32>} : memref<192x8xf32, #tpu.memory_space<vmem>>, vector<8x2xf32>,
    %c0_87 = arith.constant 0 : index
    %c5_88 = arith.constant 5 : index
    %71 = vector.load %arg25[%c0_87, %c5_88] : memref<192x8xf32, #tpu.memory_space<vmem>>, vector<8x1xf32>
    tpu.vector_store %arg25[%c0_87, %c5_88], %62 {strides = array<i32>} : memref<192x8xf32, #tpu.memory_space<vmem>>, vector<8x1xf32>,
    %c16_89 = arith.constant 16 : index
    %c6_90 = arith.constant 6 : index
    %72 = vector.load %arg25[%c16_89, %c6_90] : memref<192x8xf32, #tpu.memory_space<vmem>>, vector<8x1xf32>
    tpu.vector_store %arg25[%c16_89, %c6_90], %62 {strides = array<i32>} : memref<192x8xf32, #tpu.memory_space<vmem>>, vector<8x1xf32>,
    %c0_91 = arith.constant 0 : index
    %c0_92 = arith.constant 0 : index
    %73 = vector.load %arg6[%c0_91, %c0_92] : memref<16x24xf32, #tpu.memory_space<vmem>>, vector<16x24xf32>
    %c0_93 = arith.constant 0 : index
    %c0_94 = arith.constant 0 : index
    %74 = vector.load %arg25[%c0_93, %c0_94] : memref<192x8xf32, #tpu.memory_space<vmem>>, vector<24x8xf32>
    %cst_95 = arith.constant dense<0.000000e+00> : vector<16x8xf32>
    %75 = tpu.matmul %73, %74, %cst_95 {dimension_numbers = #tpu.dot_dimension_numbers<[1], [0], [0], [1], [0, 0, 1, 1], [], []>} : vector<16x24xf32>, vector<24x8xf32>, vector<16x8xf32> -> vector<16x8xf32>
    %c0_96 = arith.constant 0 : index
    %c0_97 = arith.constant 0 : index
    %76 = vector.load %arg7[%c0_96, %c0_97] : memref<16x1xf32, #tpu.memory_space<vmem>>, vector<16x1xf32>
    %77 = vector.broadcast %76 : vector<16x1xf32> to vector<16x8xf32>
    %78 = arith.addf %75, %77 : vector<16x8xf32>
    %cst_98 = arith.constant 0.000000e+00 : f32
    %79 = vector.broadcast %cst_98 : f32 to vector<16x8xf32>
    %80 = arith.cmpf ogt, %78, %79 : vector<16x8xf32>
    %cst_99 = arith.constant 2.000000e-01 : f32
    %81 = vector.broadcast %cst_99 : f32 to vector<16x8xf32>
    %82 = arith.mulf %81, %78 : vector<16x8xf32>
    %83 = arith.select %80, %78, %82 : vector<16x8xi1>, vector<16x8xf32>
    %84 = vector.extract_strided_slice %83 {offsets = [0, 1], sizes = [16, 2], strides = [1, 1]} : vector<16x8xf32> to vector<16x2xf32>
    %85 = vector.extract_strided_slice %83 {offsets = [0, 5], sizes = [16, 2], strides = [1, 1]} : vector<16x8xf32> to vector<16x2xf32>
    %cst_100 = arith.constant 0.000000e+00 : f32
    %86 = vector.broadcast %cst_100 : f32 to vector<16x1xf32>
    %c0_101 = arith.constant 0 : index
    %c2_102 = arith.constant 2 : index
    %87 = vector.load %arg25[%c0_101, %c2_102] : memref<192x8xf32, #tpu.memory_space<vmem>>, vector<16x2xf32>
    tpu.vector_store %arg25[%c0_101, %c2_102], %84 {strides = array<i32>} : memref<192x8xf32, #tpu.memory_space<vmem>>, vector<16x2xf32>,
    %c16_103 = arith.constant 16 : index
    %c1_104 = arith.constant 1 : index
    %88 = vector.load %arg25[%c16_103, %c1_104] : memref<192x8xf32, #tpu.memory_space<vmem>>, vector<16x2xf32>
    tpu.vector_store %arg25[%c16_103, %c1_104], %84 {strides = array<i32>} : memref<192x8xf32, #tpu.memory_space<vmem>>, vector<16x2xf32>,
    %c32 = arith.constant 32 : index
    %c0_105 = arith.constant 0 : index
    %89 = vector.load %arg25[%c32, %c0_105] : memref<192x8xf32, #tpu.memory_space<vmem>>, vector<16x2xf32>
    tpu.vector_store %arg25[%c32, %c0_105], %84 {strides = array<i32>} : memref<192x8xf32, #tpu.memory_space<vmem>>, vector<16x2xf32>,
    %c0_106 = arith.constant 0 : index
    %c1_107 = arith.constant 1 : index
    %90 = vector.load %arg25[%c0_106, %c1_107] : memref<192x8xf32, #tpu.memory_space<vmem>>, vector<16x1xf32>
    tpu.vector_store %arg25[%c0_106, %c1_107], %86 {strides = array<i32>} : memref<192x8xf32, #tpu.memory_space<vmem>>, vector<16x1xf32>,
    %c32_108 = arith.constant 32 : index
    %c2_109 = arith.constant 2 : index
    %91 = vector.load %arg25[%c32_108, %c2_109] : memref<192x8xf32, #tpu.memory_space<vmem>>, vector<16x1xf32>
    tpu.vector_store %arg25[%c32_108, %c2_109], %86 {strides = array<i32>} : memref<192x8xf32, #tpu.memory_space<vmem>>, vector<16x1xf32>,
    %c0_110 = arith.constant 0 : index
    %c6_111 = arith.constant 6 : index
    %92 = vector.load %arg25[%c0_110, %c6_111] : memref<192x8xf32, #tpu.memory_space<vmem>>, vector<16x2xf32>
    tpu.vector_store %arg25[%c0_110, %c6_111], %85 {strides = array<i32>} : memref<192x8xf32, #tpu.memory_space<vmem>>, vector<16x2xf32>,
    %c16_112 = arith.constant 16 : index
    %c5_113 = arith.constant 5 : index
    %93 = vector.load %arg25[%c16_112, %c5_113] : memref<192x8xf32, #tpu.memory_space<vmem>>, vector<16x2xf32>
    tpu.vector_store %arg25[%c16_112, %c5_113], %85 {strides = array<i32>} : memref<192x8xf32, #tpu.memory_space<vmem>>, vector<16x2xf32>,
    %c32_114 = arith.constant 32 : index
    %c4_115 = arith.constant 4 : index
    %94 = vector.load %arg25[%c32_114, %c4_115] : memref<192x8xf32, #tpu.memory_space<vmem>>, vector<16x2xf32>
    tpu.vector_store %arg25[%c32_114, %c4_115], %85 {strides = array<i32>} : memref<192x8xf32, #tpu.memory_space<vmem>>, vector<16x2xf32>,
    %c0_116 = arith.constant 0 : index
    %c5_117 = arith.constant 5 : index
    %95 = vector.load %arg25[%c0_116, %c5_117] : memref<192x8xf32, #tpu.memory_space<vmem>>, vector<16x1xf32>
    tpu.vector_store %arg25[%c0_116, %c5_117], %86 {strides = array<i32>} : memref<192x8xf32, #tpu.memory_space<vmem>>, vector<16x1xf32>,
    %c32_118 = arith.constant 32 : index
    %c6_119 = arith.constant 6 : index
    %96 = vector.load %arg25[%c32_118, %c6_119] : memref<192x8xf32, #tpu.memory_space<vmem>>, vector<16x1xf32>
    tpu.vector_store %arg25[%c32_118, %c6_119], %86 {strides = array<i32>} : memref<192x8xf32, #tpu.memory_space<vmem>>, vector<16x1xf32>,
    %c0_120 = arith.constant 0 : index
    %c0_121 = arith.constant 0 : index
    %97 = vector.load %arg8[%c0_120, %c0_121] : memref<16x48xf32, #tpu.memory_space<vmem>>, vector<16x48xf32>
    %c0_122 = arith.constant 0 : index
    %c0_123 = arith.constant 0 : index
    %98 = vector.load %arg25[%c0_122, %c0_123] : memref<192x8xf32, #tpu.memory_space<vmem>>, vector<48x8xf32>
    %cst_124 = arith.constant dense<0.000000e+00> : vector<16x8xf32>
    %99 = tpu.matmul %97, %98, %cst_124 {dimension_numbers = #tpu.dot_dimension_numbers<[1], [0], [0], [1], [0, 0, 1, 1], [], []>} : vector<16x48xf32>, vector<48x8xf32>, vector<16x8xf32> -> vector<16x8xf32>
    %c0_125 = arith.constant 0 : index
    %c0_126 = arith.constant 0 : index
    %100 = vector.load %arg9[%c0_125, %c0_126] : memref<16x1xf32, #tpu.memory_space<vmem>>, vector<16x1xf32>
    %101 = vector.broadcast %100 : vector<16x1xf32> to vector<16x8xf32>
    %102 = arith.addf %99, %101 : vector<16x8xf32>
    %103 = arith.addf %83, %102 : vector<16x8xf32>
    %104 = vector.extract_strided_slice %103 {offsets = [0, 1], sizes = [16, 2], strides = [1, 1]} : vector<16x8xf32> to vector<16x2xf32>
    %105 = vector.extract_strided_slice %103 {offsets = [0, 5], sizes = [16, 2], strides = [1, 1]} : vector<16x8xf32> to vector<16x2xf32>
    %c0_127 = arith.constant 0 : index
    %c0_128 = arith.constant 0 : index
    %c0_129 = arith.constant 0 : index
    %106 = vector.load %arg22[%c0_127, %c0_128, %c0_129] : memref<2x16x2xf32, #tpu.memory_space<vmem>>, vector<1x16x2xf32>
    %107 = vector.shape_cast %106 : vector<1x16x2xf32> to vector<16x2xf32>
    %108 = vector.shape_cast %104 : vector<16x2xf32> to vector<1x16x2xf32>
    tpu.vector_store %arg22[%c0_127, %c0_128, %c0_129], %108 {strides = array<i32>} : memref<2x16x2xf32, #tpu.memory_space<vmem>>, vector<1x16x2xf32>,
    %c1_130 = arith.constant 1 : index
    %c0_131 = arith.constant 0 : index
    %c0_132 = arith.constant 0 : index
    %109 = vector.load %arg22[%c1_130, %c0_131, %c0_132] : memref<2x16x2xf32, #tpu.memory_space<vmem>>, vector<1x16x2xf32>
    %110 = vector.shape_cast %109 : vector<1x16x2xf32> to vector<16x2xf32>
    %111 = vector.shape_cast %105 : vector<16x2xf32> to vector<1x16x2xf32>
    tpu.vector_store %arg22[%c1_130, %c0_131, %c0_132], %111 {strides = array<i32>} : memref<2x16x2xf32, #tpu.memory_space<vmem>>, vector<1x16x2xf32>,
    %cst_133 = arith.constant 0.000000e+00 : f32
    %112 = vector.broadcast %cst_133 : f32 to vector<16x1xf32>
    %c0_134 = arith.constant 0 : index
    %c2_135 = arith.constant 2 : index
    %113 = vector.load %arg25[%c0_134, %c2_135] : memref<192x8xf32, #tpu.memory_space<vmem>>, vector<16x2xf32>
    tpu.vector_store %arg25[%c0_134, %c2_135], %104 {strides = array<i32>} : memref<192x8xf32, #tpu.memory_space<vmem>>, vector<16x2xf32>,
    %c16_136 = arith.constant 16 : index
    %c1_137 = arith.constant 1 : index
    %114 = vector.load %arg25[%c16_136, %c1_137] : memref<192x8xf32, #tpu.memory_space<vmem>>, vector<16x2xf32>
    tpu.vector_store %arg25[%c16_136, %c1_137], %104 {strides = array<i32>} : memref<192x8xf32, #tpu.memory_space<vmem>>, vector<16x2xf32>,
    %c32_138 = arith.constant 32 : index
    %c0_139 = arith.constant 0 : index
    %115 = vector.load %arg25[%c32_138, %c0_139] : memref<192x8xf32, #tpu.memory_space<vmem>>, vector<16x2xf32>
    tpu.vector_store %arg25[%c32_138, %c0_139], %104 {strides = array<i32>} : memref<192x8xf32, #tpu.memory_space<vmem>>, vector<16x2xf32>,
    %c0_140 = arith.constant 0 : index
    %c1_141 = arith.constant 1 : index
    %116 = vector.load %arg25[%c0_140, %c1_141] : memref<192x8xf32, #tpu.memory_space<vmem>>, vector<16x1xf32>
    tpu.vector_store %arg25[%c0_140, %c1_141], %112 {strides = array<i32>} : memref<192x8xf32, #tpu.memory_space<vmem>>, vector<16x1xf32>,
    %c32_142 = arith.constant 32 : index
    %c2_143 = arith.constant 2 : index
    %117 = vector.load %arg25[%c32_142, %c2_143] : memref<192x8xf32, #tpu.memory_space<vmem>>, vector<16x1xf32>
    tpu.vector_store %arg25[%c32_142, %c2_143], %112 {strides = array<i32>} : memref<192x8xf32, #tpu.memory_space<vmem>>, vector<16x1xf32>,
    %c0_144 = arith.constant 0 : index
    %c6_145 = arith.constant 6 : index
    %118 = vector.load %arg25[%c0_144, %c6_145] : memref<192x8xf32, #tpu.memory_space<vmem>>, vector<16x2xf32>
    tpu.vector_store %arg25[%c0_144, %c6_145], %105 {strides = array<i32>} : memref<192x8xf32, #tpu.memory_space<vmem>>, vector<16x2xf32>,
    %c16_146 = arith.constant 16 : index
    %c5_147 = arith.constant 5 : index
    %119 = vector.load %arg25[%c16_146, %c5_147] : memref<192x8xf32, #tpu.memory_space<vmem>>, vector<16x2xf32>
    tpu.vector_store %arg25[%c16_146, %c5_147], %105 {strides = array<i32>} : memref<192x8xf32, #tpu.memory_space<vmem>>, vector<16x2xf32>,
    %c32_148 = arith.constant 32 : index
    %c4_149 = arith.constant 4 : index
    %120 = vector.load %arg25[%c32_148, %c4_149] : memref<192x8xf32, #tpu.memory_space<vmem>>, vector<16x2xf32>
    tpu.vector_store %arg25[%c32_148, %c4_149], %105 {strides = array<i32>} : memref<192x8xf32, #tpu.memory_space<vmem>>, vector<16x2xf32>,
    %c0_150 = arith.constant 0 : index
    %c5_151 = arith.constant 5 : index
    %121 = vector.load %arg25[%c0_150, %c5_151] : memref<192x8xf32, #tpu.memory_space<vmem>>, vector<16x1xf32>
    tpu.vector_store %arg25[%c0_150, %c5_151], %112 {strides = array<i32>} : memref<192x8xf32, #tpu.memory_space<vmem>>, vector<16x1xf32>,
    %c32_152 = arith.constant 32 : index
    %c6_153 = arith.constant 6 : index
    %122 = vector.load %arg25[%c32_152, %c6_153] : memref<192x8xf32, #tpu.memory_space<vmem>>, vector<16x1xf32>
    tpu.vector_store %arg25[%c32_152, %c6_153], %112 {strides = array<i32>} : memref<192x8xf32, #tpu.memory_space<vmem>>, vector<16x1xf32>,
    %c0_154 = arith.constant 0 : index
    %c0_155 = arith.constant 0 : index
    %123 = vector.load %arg10[%c0_154, %c0_155] : memref<32x48xf32, #tpu.memory_space<vmem>>, vector<32x48xf32>
    %c0_156 = arith.constant 0 : index
    %c0_157 = arith.constant 0 : index
    %124 = vector.load %arg25[%c0_156, %c0_157] : memref<192x8xf32, #tpu.memory_space<vmem>>, vector<48x8xf32>
    %cst_158 = arith.constant dense<0.000000e+00> : vector<32x8xf32>
    %125 = tpu.matmul %123, %124, %cst_158 {dimension_numbers = #tpu.dot_dimension_numbers<[1], [0], [0], [1], [0, 0, 1, 1], [], []>} : vector<32x48xf32>, vector<48x8xf32>, vector<32x8xf32> -> vector<32x8xf32>
    %c0_159 = arith.constant 0 : index
    %c0_160 = arith.constant 0 : index
    %126 = vector.load %arg11[%c0_159, %c0_160] : memref<32x1xf32, #tpu.memory_space<vmem>>, vector<32x1xf32>
    %127 = vector.broadcast %126 : vector<32x1xf32> to vector<32x8xf32>
    %128 = arith.addf %125, %127 : vector<32x8xf32>
    %cst_161 = arith.constant 0.000000e+00 : f32
    %129 = vector.broadcast %cst_161 : f32 to vector<32x8xf32>
    %130 = arith.cmpf ogt, %128, %129 : vector<32x8xf32>
    %cst_162 = arith.constant 2.000000e-01 : f32
    %131 = vector.broadcast %cst_162 : f32 to vector<32x8xf32>
    %132 = arith.mulf %131, %128 : vector<32x8xf32>
    %133 = arith.select %130, %128, %132 : vector<32x8xi1>, vector<32x8xf32>
    %134 = vector.extract_strided_slice %133 {offsets = [0, 1], sizes = [32, 2], strides = [1, 1]} : vector<32x8xf32> to vector<32x2xf32>
    %135 = vector.extract_strided_slice %133 {offsets = [0, 5], sizes = [32, 2], strides = [1, 1]} : vector<32x8xf32> to vector<32x2xf32>
    %cst_163 = arith.constant 0.000000e+00 : f32
    %136 = vector.broadcast %cst_163 : f32 to vector<32x1xf32>
    %c0_164 = arith.constant 0 : index
    %c2_165 = arith.constant 2 : index
    %137 = vector.load %arg25[%c0_164, %c2_165] : memref<192x8xf32, #tpu.memory_space<vmem>>, vector<32x2xf32>
    tpu.vector_store %arg25[%c0_164, %c2_165], %134 {strides = array<i32>} : memref<192x8xf32, #tpu.memory_space<vmem>>, vector<32x2xf32>,
    %c32_166 = arith.constant 32 : index
    %c1_167 = arith.constant 1 : index
    %138 = vector.load %arg25[%c32_166, %c1_167] : memref<192x8xf32, #tpu.memory_space<vmem>>, vector<32x2xf32>
    tpu.vector_store %arg25[%c32_166, %c1_167], %134 {strides = array<i32>} : memref<192x8xf32, #tpu.memory_space<vmem>>, vector<32x2xf32>,
    %c64 = arith.constant 64 : index
    %c0_168 = arith.constant 0 : index
    %139 = vector.load %arg25[%c64, %c0_168] : memref<192x8xf32, #tpu.memory_space<vmem>>, vector<32x2xf32>
    tpu.vector_store %arg25[%c64, %c0_168], %134 {strides = array<i32>} : memref<192x8xf32, #tpu.memory_space<vmem>>, vector<32x2xf32>,
    %c0_169 = arith.constant 0 : index
    %c1_170 = arith.constant 1 : index
    %140 = vector.load %arg25[%c0_169, %c1_170] : memref<192x8xf32, #tpu.memory_space<vmem>>, vector<32x1xf32>
    tpu.vector_store %arg25[%c0_169, %c1_170], %136 {strides = array<i32>} : memref<192x8xf32, #tpu.memory_space<vmem>>, vector<32x1xf32>,
    %c64_171 = arith.constant 64 : index
    %c2_172 = arith.constant 2 : index
    %141 = vector.load %arg25[%c64_171, %c2_172] : memref<192x8xf32, #tpu.memory_space<vmem>>, vector<32x1xf32>
    tpu.vector_store %arg25[%c64_171, %c2_172], %136 {strides = array<i32>} : memref<192x8xf32, #tpu.memory_space<vmem>>, vector<32x1xf32>,
    %c0_173 = arith.constant 0 : index
    %c6_174 = arith.constant 6 : index
    %142 = vector.load %arg25[%c0_173, %c6_174] : memref<192x8xf32, #tpu.memory_space<vmem>>, vector<32x2xf32>
    tpu.vector_store %arg25[%c0_173, %c6_174], %135 {strides = array<i32>} : memref<192x8xf32, #tpu.memory_space<vmem>>, vector<32x2xf32>,
    %c32_175 = arith.constant 32 : index
    %c5_176 = arith.constant 5 : index
    %143 = vector.load %arg25[%c32_175, %c5_176] : memref<192x8xf32, #tpu.memory_space<vmem>>, vector<32x2xf32>
    tpu.vector_store %arg25[%c32_175, %c5_176], %135 {strides = array<i32>} : memref<192x8xf32, #tpu.memory_space<vmem>>, vector<32x2xf32>,
    %c64_177 = arith.constant 64 : index
    %c4_178 = arith.constant 4 : index
    %144 = vector.load %arg25[%c64_177, %c4_178] : memref<192x8xf32, #tpu.memory_space<vmem>>, vector<32x2xf32>
    tpu.vector_store %arg25[%c64_177, %c4_178], %135 {strides = array<i32>} : memref<192x8xf32, #tpu.memory_space<vmem>>, vector<32x2xf32>,
    %c0_179 = arith.constant 0 : index
    %c5_180 = arith.constant 5 : index
    %145 = vector.load %arg25[%c0_179, %c5_180] : memref<192x8xf32, #tpu.memory_space<vmem>>, vector<32x1xf32>
    tpu.vector_store %arg25[%c0_179, %c5_180], %136 {strides = array<i32>} : memref<192x8xf32, #tpu.memory_space<vmem>>, vector<32x1xf32>,
    %c64_181 = arith.constant 64 : index
    %c6_182 = arith.constant 6 : index
    %146 = vector.load %arg25[%c64_181, %c6_182] : memref<192x8xf32, #tpu.memory_space<vmem>>, vector<32x1xf32>
    tpu.vector_store %arg25[%c64_181, %c6_182], %136 {strides = array<i32>} : memref<192x8xf32, #tpu.memory_space<vmem>>, vector<32x1xf32>,
    %c0_183 = arith.constant 0 : index
    %c0_184 = arith.constant 0 : index
    %147 = vector.load %arg12[%c0_183, %c0_184] : memref<32x96xf32, #tpu.memory_space<vmem>>, vector<32x96xf32>
    %c0_185 = arith.constant 0 : index
    %c0_186 = arith.constant 0 : index
    %148 = vector.load %arg25[%c0_185, %c0_186] : memref<192x8xf32, #tpu.memory_space<vmem>>, vector<96x8xf32>
    %cst_187 = arith.constant dense<0.000000e+00> : vector<32x8xf32>
    %149 = tpu.matmul %147, %148, %cst_187 {dimension_numbers = #tpu.dot_dimension_numbers<[1], [0], [0], [1], [0, 0, 1, 1], [], []>} : vector<32x96xf32>, vector<96x8xf32>, vector<32x8xf32> -> vector<32x8xf32>
    %c0_188 = arith.constant 0 : index
    %c0_189 = arith.constant 0 : index
    %150 = vector.load %arg13[%c0_188, %c0_189] : memref<32x1xf32, #tpu.memory_space<vmem>>, vector<32x1xf32>
    %151 = vector.broadcast %150 : vector<32x1xf32> to vector<32x8xf32>
    %152 = arith.addf %149, %151 : vector<32x8xf32>
    %153 = arith.addf %133, %152 : vector<32x8xf32>
    %154 = vector.extract_strided_slice %153 {offsets = [0, 1], sizes = [32, 2], strides = [1, 1]} : vector<32x8xf32> to vector<32x2xf32>
    %155 = vector.extract_strided_slice %153 {offsets = [0, 5], sizes = [32, 2], strides = [1, 1]} : vector<32x8xf32> to vector<32x2xf32>
    %c0_190 = arith.constant 0 : index
    %c0_191 = arith.constant 0 : index
    %c0_192 = arith.constant 0 : index
    %156 = vector.load %arg23[%c0_190, %c0_191, %c0_192] : memref<2x32x2xf32, #tpu.memory_space<vmem>>, vector<1x32x2xf32>
    %157 = vector.shape_cast %156 : vector<1x32x2xf32> to vector<32x2xf32>
    %158 = vector.shape_cast %154 : vector<32x2xf32> to vector<1x32x2xf32>
    tpu.vector_store %arg23[%c0_190, %c0_191, %c0_192], %158 {strides = array<i32>} : memref<2x32x2xf32, #tpu.memory_space<vmem>>, vector<1x32x2xf32>,
    %c1_193 = arith.constant 1 : index
    %c0_194 = arith.constant 0 : index
    %c0_195 = arith.constant 0 : index
    %159 = vector.load %arg23[%c1_193, %c0_194, %c0_195] : memref<2x32x2xf32, #tpu.memory_space<vmem>>, vector<1x32x2xf32>
    %160 = vector.shape_cast %159 : vector<1x32x2xf32> to vector<32x2xf32>
    %161 = vector.shape_cast %155 : vector<32x2xf32> to vector<1x32x2xf32>
    tpu.vector_store %arg23[%c1_193, %c0_194, %c0_195], %161 {strides = array<i32>} : memref<2x32x2xf32, #tpu.memory_space<vmem>>, vector<1x32x2xf32>,
    %cst_196 = arith.constant 0.000000e+00 : f32
    %162 = vector.broadcast %cst_196 : f32 to vector<32x1xf32>
    %c0_197 = arith.constant 0 : index
    %c2_198 = arith.constant 2 : index
    %163 = vector.load %arg25[%c0_197, %c2_198] : memref<192x8xf32, #tpu.memory_space<vmem>>, vector<32x2xf32>
    tpu.vector_store %arg25[%c0_197, %c2_198], %154 {strides = array<i32>} : memref<192x8xf32, #tpu.memory_space<vmem>>, vector<32x2xf32>,
    %c32_199 = arith.constant 32 : index
    %c1_200 = arith.constant 1 : index
    %164 = vector.load %arg25[%c32_199, %c1_200] : memref<192x8xf32, #tpu.memory_space<vmem>>, vector<32x2xf32>
    tpu.vector_store %arg25[%c32_199, %c1_200], %154 {strides = array<i32>} : memref<192x8xf32, #tpu.memory_space<vmem>>, vector<32x2xf32>,
    %c64_201 = arith.constant 64 : index
    %c0_202 = arith.constant 0 : index
    %165 = vector.load %arg25[%c64_201, %c0_202] : memref<192x8xf32, #tpu.memory_space<vmem>>, vector<32x2xf32>
    tpu.vector_store %arg25[%c64_201, %c0_202], %154 {strides = array<i32>} : memref<192x8xf32, #tpu.memory_space<vmem>>, vector<32x2xf32>,
    %c0_203 = arith.constant 0 : index
    %c1_204 = arith.constant 1 : index
    %166 = vector.load %arg25[%c0_203, %c1_204] : memref<192x8xf32, #tpu.memory_space<vmem>>, vector<32x1xf32>
    tpu.vector_store %arg25[%c0_203, %c1_204], %162 {strides = array<i32>} : memref<192x8xf32, #tpu.memory_space<vmem>>, vector<32x1xf32>,
    %c64_205 = arith.constant 64 : index
    %c2_206 = arith.constant 2 : index
    %167 = vector.load %arg25[%c64_205, %c2_206] : memref<192x8xf32, #tpu.memory_space<vmem>>, vector<32x1xf32>
    tpu.vector_store %arg25[%c64_205, %c2_206], %162 {strides = array<i32>} : memref<192x8xf32, #tpu.memory_space<vmem>>, vector<32x1xf32>,
    %c0_207 = arith.constant 0 : index
    %c6_208 = arith.constant 6 : index
    %168 = vector.load %arg25[%c0_207, %c6_208] : memref<192x8xf32, #tpu.memory_space<vmem>>, vector<32x2xf32>
    tpu.vector_store %arg25[%c0_207, %c6_208], %155 {strides = array<i32>} : memref<192x8xf32, #tpu.memory_space<vmem>>, vector<32x2xf32>,
    %c32_209 = arith.constant 32 : index
    %c5_210 = arith.constant 5 : index
    %169 = vector.load %arg25[%c32_209, %c5_210] : memref<192x8xf32, #tpu.memory_space<vmem>>, vector<32x2xf32>
    tpu.vector_store %arg25[%c32_209, %c5_210], %155 {strides = array<i32>} : memref<192x8xf32, #tpu.memory_space<vmem>>, vector<32x2xf32>,
    %c64_211 = arith.constant 64 : index
    %c4_212 = arith.constant 4 : index
    %170 = vector.load %arg25[%c64_211, %c4_212] : memref<192x8xf32, #tpu.memory_space<vmem>>, vector<32x2xf32>
    tpu.vector_store %arg25[%c64_211, %c4_212], %155 {strides = array<i32>} : memref<192x8xf32, #tpu.memory_space<vmem>>, vector<32x2xf32>,
    %c0_213 = arith.constant 0 : index
    %c5_214 = arith.constant 5 : index
    %171 = vector.load %arg25[%c0_213, %c5_214] : memref<192x8xf32, #tpu.memory_space<vmem>>, vector<32x1xf32>
    tpu.vector_store %arg25[%c0_213, %c5_214], %162 {strides = array<i32>} : memref<192x8xf32, #tpu.memory_space<vmem>>, vector<32x1xf32>,
    %c64_215 = arith.constant 64 : index
    %c6_216 = arith.constant 6 : index
    %172 = vector.load %arg25[%c64_215, %c6_216] : memref<192x8xf32, #tpu.memory_space<vmem>>, vector<32x1xf32>
    tpu.vector_store %arg25[%c64_215, %c6_216], %162 {strides = array<i32>} : memref<192x8xf32, #tpu.memory_space<vmem>>, vector<32x1xf32>,
    %c0_217 = arith.constant 0 : index
    %c0_218 = arith.constant 0 : index
    %173 = vector.load %arg14[%c0_217, %c0_218] : memref<64x96xf32, #tpu.memory_space<vmem>>, vector<64x96xf32>
    %c0_219 = arith.constant 0 : index
    %c0_220 = arith.constant 0 : index
    %174 = vector.load %arg25[%c0_219, %c0_220] : memref<192x8xf32, #tpu.memory_space<vmem>>, vector<96x8xf32>
    %cst_221 = arith.constant dense<0.000000e+00> : vector<64x8xf32>
    %175 = tpu.matmul %173, %174, %cst_221 {dimension_numbers = #tpu.dot_dimension_numbers<[1], [0], [0], [1], [0, 0, 1, 1], [], []>} : vector<64x96xf32>, vector<96x8xf32>, vector<64x8xf32> -> vector<64x8xf32>
    %c0_222 = arith.constant 0 : index
    %c0_223 = arith.constant 0 : index
    %176 = vector.load %arg15[%c0_222, %c0_223] : memref<64x1xf32, #tpu.memory_space<vmem>>, vector<64x1xf32>
    %177 = vector.broadcast %176 : vector<64x1xf32> to vector<64x8xf32>
    %178 = arith.addf %175, %177 : vector<64x8xf32>
    %cst_224 = arith.constant 0.000000e+00 : f32
    %179 = vector.broadcast %cst_224 : f32 to vector<64x8xf32>
    %180 = arith.cmpf ogt, %178, %179 : vector<64x8xf32>
    %cst_225 = arith.constant 2.000000e-01 : f32
    %181 = vector.broadcast %cst_225 : f32 to vector<64x8xf32>
    %182 = arith.mulf %181, %178 : vector<64x8xf32>
    %183 = arith.select %180, %178, %182 : vector<64x8xi1>, vector<64x8xf32>
    %184 = vector.extract_strided_slice %183 {offsets = [0, 1], sizes = [64, 2], strides = [1, 1]} : vector<64x8xf32> to vector<64x2xf32>
    %185 = vector.extract_strided_slice %183 {offsets = [0, 5], sizes = [64, 2], strides = [1, 1]} : vector<64x8xf32> to vector<64x2xf32>
    %cst_226 = arith.constant 0.000000e+00 : f32
    %186 = vector.broadcast %cst_226 : f32 to vector<64x1xf32>
    %c0_227 = arith.constant 0 : index
    %c2_228 = arith.constant 2 : index
    %187 = vector.load %arg25[%c0_227, %c2_228] : memref<192x8xf32, #tpu.memory_space<vmem>>, vector<64x2xf32>
    tpu.vector_store %arg25[%c0_227, %c2_228], %184 {strides = array<i32>} : memref<192x8xf32, #tpu.memory_space<vmem>>, vector<64x2xf32>,
    %c64_229 = arith.constant 64 : index
    %c1_230 = arith.constant 1 : index
    %188 = vector.load %arg25[%c64_229, %c1_230] : memref<192x8xf32, #tpu.memory_space<vmem>>, vector<64x2xf32>
    tpu.vector_store %arg25[%c64_229, %c1_230], %184 {strides = array<i32>} : memref<192x8xf32, #tpu.memory_space<vmem>>, vector<64x2xf32>,
    %c128 = arith.constant 128 : index
    %c0_231 = arith.constant 0 : index
    %189 = vector.load %arg25[%c128, %c0_231] : memref<192x8xf32, #tpu.memory_space<vmem>>, vector<64x2xf32>
    tpu.vector_store %arg25[%c128, %c0_231], %184 {strides = array<i32>} : memref<192x8xf32, #tpu.memory_space<vmem>>, vector<64x2xf32>,
    %c0_232 = arith.constant 0 : index
    %c1_233 = arith.constant 1 : index
    %190 = vector.load %arg25[%c0_232, %c1_233] : memref<192x8xf32, #tpu.memory_space<vmem>>, vector<64x1xf32>
    tpu.vector_store %arg25[%c0_232, %c1_233], %186 {strides = array<i32>} : memref<192x8xf32, #tpu.memory_space<vmem>>, vector<64x1xf32>,
    %c128_234 = arith.constant 128 : index
    %c2_235 = arith.constant 2 : index
    %191 = vector.load %arg25[%c128_234, %c2_235] : memref<192x8xf32, #tpu.memory_space<vmem>>, vector<64x1xf32>
    tpu.vector_store %arg25[%c128_234, %c2_235], %186 {strides = array<i32>} : memref<192x8xf32, #tpu.memory_space<vmem>>, vector<64x1xf32>,
    %c0_236 = arith.constant 0 : index
    %c6_237 = arith.constant 6 : index
    %192 = vector.load %arg25[%c0_236, %c6_237] : memref<192x8xf32, #tpu.memory_space<vmem>>, vector<64x2xf32>
    tpu.vector_store %arg25[%c0_236, %c6_237], %185 {strides = array<i32>} : memref<192x8xf32, #tpu.memory_space<vmem>>, vector<64x2xf32>,
    %c64_238 = arith.constant 64 : index
    %c5_239 = arith.constant 5 : index
    %193 = vector.load %arg25[%c64_238, %c5_239] : memref<192x8xf32, #tpu.memory_space<vmem>>, vector<64x2xf32>
    tpu.vector_store %arg25[%c64_238, %c5_239], %185 {strides = array<i32>} : memref<192x8xf32, #tpu.memory_space<vmem>>, vector<64x2xf32>,
    %c128_240 = arith.constant 128 : index
    %c4_241 = arith.constant 4 : index
    %194 = vector.load %arg25[%c128_240, %c4_241] : memref<192x8xf32, #tpu.memory_space<vmem>>, vector<64x2xf32>
    tpu.vector_store %arg25[%c128_240, %c4_241], %185 {strides = array<i32>} : memref<192x8xf32, #tpu.memory_space<vmem>>, vector<64x2xf32>,
    %c0_242 = arith.constant 0 : index
    %c5_243 = arith.constant 5 : index
    %195 = vector.load %arg25[%c0_242, %c5_243] : memref<192x8xf32, #tpu.memory_space<vmem>>, vector<64x1xf32>
    tpu.vector_store %arg25[%c0_242, %c5_243], %186 {strides = array<i32>} : memref<192x8xf32, #tpu.memory_space<vmem>>, vector<64x1xf32>,
    %c128_244 = arith.constant 128 : index
    %c6_245 = arith.constant 6 : index
    %196 = vector.load %arg25[%c128_244, %c6_245] : memref<192x8xf32, #tpu.memory_space<vmem>>, vector<64x1xf32>
    tpu.vector_store %arg25[%c128_244, %c6_245], %186 {strides = array<i32>} : memref<192x8xf32, #tpu.memory_space<vmem>>, vector<64x1xf32>,
    %c0_246 = arith.constant 0 : index
    %c0_247 = arith.constant 0 : index
    %197 = vector.load %arg16[%c0_246, %c0_247] : memref<64x192xf32, #tpu.memory_space<vmem>>, vector<64x192xf32>
    %c0_248 = arith.constant 0 : index
    %c0_249 = arith.constant 0 : index
    %198 = vector.load %arg25[%c0_248, %c0_249] : memref<192x8xf32, #tpu.memory_space<vmem>>, vector<192x8xf32>
    %cst_250 = arith.constant dense<0.000000e+00> : vector<64x8xf32>
    %199 = tpu.matmul %197, %198, %cst_250 {dimension_numbers = #tpu.dot_dimension_numbers<[1], [0], [0], [1], [0, 0, 1, 1], [], []>} : vector<64x192xf32>, vector<192x8xf32>, vector<64x8xf32> -> vector<64x8xf32>
    %c0_251 = arith.constant 0 : index
    %c0_252 = arith.constant 0 : index
    %200 = vector.load %arg17[%c0_251, %c0_252] : memref<64x1xf32, #tpu.memory_space<vmem>>, vector<64x1xf32>
    %201 = vector.broadcast %200 : vector<64x1xf32> to vector<64x8xf32>
    %202 = arith.addf %199, %201 : vector<64x8xf32>
    %203 = arith.addf %183, %202 : vector<64x8xf32>
    %204 = vector.extract_strided_slice %203 {offsets = [0, 1], sizes = [64, 2], strides = [1, 1]} : vector<64x8xf32> to vector<64x2xf32>
    %205 = vector.extract_strided_slice %203 {offsets = [0, 5], sizes = [64, 2], strides = [1, 1]} : vector<64x8xf32> to vector<64x2xf32>
    %c0_253 = arith.constant 0 : index
    %c0_254 = arith.constant 0 : index
    %c0_255 = arith.constant 0 : index
    %206 = vector.load %arg24[%c0_253, %c0_254, %c0_255] : memref<2x64x2xf32, #tpu.memory_space<vmem>>, vector<1x64x2xf32>
    %207 = vector.shape_cast %206 : vector<1x64x2xf32> to vector<64x2xf32>
    %208 = vector.shape_cast %204 : vector<64x2xf32> to vector<1x64x2xf32>
    tpu.vector_store %arg24[%c0_253, %c0_254, %c0_255], %208 {strides = array<i32>} : memref<2x64x2xf32, #tpu.memory_space<vmem>>, vector<1x64x2xf32>,
    %c1_256 = arith.constant 1 : index
    %c0_257 = arith.constant 0 : index
    %c0_258 = arith.constant 0 : index
    %209 = vector.load %arg24[%c1_256, %c0_257, %c0_258] : memref<2x64x2xf32, #tpu.memory_space<vmem>>, vector<1x64x2xf32>
    %210 = vector.shape_cast %209 : vector<1x64x2xf32> to vector<64x2xf32>
    %211 = vector.shape_cast %205 : vector<64x2xf32> to vector<1x64x2xf32>
    tpu.vector_store %arg24[%c1_256, %c0_257, %c0_258], %211 {strides = array<i32>} : memref<2x64x2xf32, #tpu.memory_space<vmem>>, vector<1x64x2xf32>,
    %c0_259 = arith.constant 0 : index
    %c0_260 = arith.constant 0 : index
    %212 = vector.load %arg18[%c0_259, %c0_260] : memref<64x2xf32, #tpu.memory_space<vmem>>, vector<64x2xf32>
    %213 = tpu.iota {dimensions = array<i32: 0>} : vector<2x1xi32>
    %cst_261 = arith.constant 0.000000e+00 : f32
    %214 = vector.broadcast %cst_261 : f32 to vector<2x1xf32>
    %215 = arith.mulf %204, %212 : vector<64x2xf32>
    %cst_262 = arith.constant dense<0.000000e+00> : vector<64xf32>
    %216 = vector.multi_reduction <add>, %215, %cst_262 [1] : vector<64x2xf32> to vector<64xf32>
    %217 = vector.shape_cast %216 : vector<64xf32> to vector<64x1xf32>
    %cst_263 = arith.constant dense<0.000000e+00> : vector<1xf32>
    %218 = vector.multi_reduction <add>, %217, %cst_263 [0] : vector<64x1xf32> to vector<1xf32>
    %219 = vector.shape_cast %218 : vector<1xf32> to vector<1x1xf32>
    %c0_i32 = arith.constant 0 : i32
    %220 = vector.broadcast %c0_i32 : i32 to vector<2x1xi32>
    %221 = arith.cmpi eq, %213, %220 : vector<2x1xi32>
    %222 = vector.shape_cast %219 : vector<1x1xf32> to vector<1x1xf32>
    %223 = vector.broadcast %222 : vector<1x1xf32> to vector<2x1xf32>
    %224 = arith.select %221, %223, %214 : vector<2x1xi1>, vector<2x1xf32>
    %225 = arith.mulf %205, %212 : vector<64x2xf32>
    %cst_264 = arith.constant dense<0.000000e+00> : vector<64xf32>
    %226 = vector.multi_reduction <add>, %225, %cst_264 [1] : vector<64x2xf32> to vector<64xf32>
    %227 = vector.shape_cast %226 : vector<64xf32> to vector<64x1xf32>
    %cst_265 = arith.constant dense<0.000000e+00> : vector<1xf32>
    %228 = vector.multi_reduction <add>, %227, %cst_265 [0] : vector<64x1xf32> to vector<1xf32>
    %229 = vector.shape_cast %228 : vector<1xf32> to vector<1x1xf32>
    %c1_i32 = arith.constant 1 : i32
    %230 = vector.broadcast %c1_i32 : i32 to vector<2x1xi32>
    %231 = arith.cmpi eq, %213, %230 : vector<2x1xi32>
    %232 = vector.shape_cast %229 : vector<1x1xf32> to vector<1x1xf32>
    %233 = vector.broadcast %232 : vector<1x1xf32> to vector<2x1xf32>
    %234 = arith.select %231, %233, %224 : vector<2x1xi1>, vector<2x1xf32>
    %c0_266 = arith.constant 0 : index
    %c0_267 = arith.constant 0 : index
    %235 = vector.load %arg19[%c0_266, %c0_267] : memref<1x1xf32, #tpu.memory_space<vmem>>, vector<1x1xf32>
    %236 = vector.broadcast %235 : vector<1x1xf32> to vector<2x1xf32>
    %237 = arith.addf %234, %236 : vector<2x1xf32>
    %c0_268 = arith.constant 0 : index
    %c0_269 = arith.constant 0 : index
    %238 = vector.load %arg20[%c0_268, %c0_269] : memref<2x1xf32, #tpu.memory_space<vmem>>, vector<2x1xf32>
    tpu.vector_store %arg20[%c0_268, %c0_269], %237 {strides = array<i32>} : memref<2x1xf32, #tpu.memory_space<vmem>>, vector<2x1xf32>,
    return
  }
}

module attributes {stable_mosaic.version = 11 : i64} {
  func.func @kernel(%arg0: memref<2x4x6xf32, #tpu.memory_space<vmem>>, %arg1: memref<2x4x6xf32, #tpu.memory_space<vmem>>, %arg2: memref<8x24xf32, #tpu.memory_space<vmem>>, %arg3: memref<8x1xf32, #tpu.memory_space<vmem>>, %arg4: memref<8x24xf32, #tpu.memory_space<vmem>>, %arg5: memref<8x1xf32, #tpu.memory_space<vmem>>, %arg6: memref<16x24xf32, #tpu.memory_space<vmem>>, %arg7: memref<16x1xf32, #tpu.memory_space<vmem>>, %arg8: memref<16x48xf32, #tpu.memory_space<vmem>>, %arg9: memref<16x1xf32, #tpu.memory_space<vmem>>, %arg10: memref<32x48xf32, #tpu.memory_space<vmem>>, %arg11: memref<32x1xf32, #tpu.memory_space<vmem>>, %arg12: memref<32x96xf32, #tpu.memory_space<vmem>>, %arg13: memref<32x1xf32, #tpu.memory_space<vmem>>, %arg14: memref<64x96xf32, #tpu.memory_space<vmem>>, %arg15: memref<64x1xf32, #tpu.memory_space<vmem>>, %arg16: memref<64x192xf32, #tpu.memory_space<vmem>>, %arg17: memref<64x1xf32, #tpu.memory_space<vmem>>, %arg18: memref<64x6xf32, #tpu.memory_space<vmem>>, %arg19: memref<1x1xf32, #tpu.memory_space<vmem>>, %arg20: memref<2x1xf32, #tpu.memory_space<vmem>>, %arg21: memref<2x8x6xf32, #tpu.memory_space<vmem>>, %arg22: memref<2x16x6xf32, #tpu.memory_space<vmem>>, %arg23: memref<2x32x6xf32, #tpu.memory_space<vmem>>, %arg24: memref<2x64x6xf32, #tpu.memory_space<vmem>>, %arg25: memref<192x16xf32, #tpu.memory_space<vmem>>) attributes {dimension_semantics = [], scalar_prefetch = 0 : i64, scratch_operands = 1 : i64, tpu.core_type = #tpu.core_type<tc>} {
    %cst = arith.constant 0.000000e+00 : f32
    %0 = vector.broadcast %cst : f32 to vector<192x16xf32>
    %c0 = arith.constant 0 : index
    %c0_0 = arith.constant 0 : index
    %1 = vector.load %arg25[%c0, %c0_0] : memref<192x16xf32, #tpu.memory_space<vmem>>, vector<192x16xf32>
    tpu.vector_store %arg25[%c0, %c0_0], %0 {strides = array<i32>} : memref<192x16xf32, #tpu.memory_space<vmem>>, vector<192x16xf32>,
    %c0_1 = arith.constant 0 : index
    %c0_2 = arith.constant 0 : index
    %c0_3 = arith.constant 0 : index
    %2 = vector.load %arg0[%c0_1, %c0_2, %c0_3] : memref<2x4x6xf32, #tpu.memory_space<vmem>>, vector<1x4x6xf32>
    %3 = vector.shape_cast %2 : vector<1x4x6xf32> to vector<4x6xf32>
    %c0_4 = arith.constant 0 : index
    %c0_5 = arith.constant 0 : index
    %c0_6 = arith.constant 0 : index
    %4 = vector.load %arg1[%c0_4, %c0_5, %c0_6] : memref<2x4x6xf32, #tpu.memory_space<vmem>>, vector<1x4x6xf32>
    %5 = vector.shape_cast %4 : vector<1x4x6xf32> to vector<4x6xf32>
    %6 = arith.addf %3, %5 : vector<4x6xf32>
    %c1 = arith.constant 1 : index
    %c0_7 = arith.constant 0 : index
    %c0_8 = arith.constant 0 : index
    %7 = vector.load %arg0[%c1, %c0_7, %c0_8] : memref<2x4x6xf32, #tpu.memory_space<vmem>>, vector<1x4x6xf32>
    %8 = vector.shape_cast %7 : vector<1x4x6xf32> to vector<4x6xf32>
    %c1_9 = arith.constant 1 : index
    %c0_10 = arith.constant 0 : index
    %c0_11 = arith.constant 0 : index
    %9 = vector.load %arg1[%c1_9, %c0_10, %c0_11] : memref<2x4x6xf32, #tpu.memory_space<vmem>>, vector<1x4x6xf32>
    %10 = vector.shape_cast %9 : vector<1x4x6xf32> to vector<4x6xf32>
    %11 = arith.addf %8, %10 : vector<4x6xf32>
    %cst_12 = arith.constant 0.000000e+00 : f32
    %12 = vector.broadcast %cst_12 : f32 to vector<4x1xf32>
    %c0_13 = arith.constant 0 : index
    %c2 = arith.constant 2 : index
    %13 = vector.load %arg25[%c0_13, %c2] : memref<192x16xf32, #tpu.memory_space<vmem>>, vector<4x6xf32>
    tpu.vector_store %arg25[%c0_13, %c2], %6 {strides = array<i32>} : memref<192x16xf32, #tpu.memory_space<vmem>>, vector<4x6xf32>,
    %c8 = arith.constant 8 : index
    %c1_14 = arith.constant 1 : index
    %14 = vector.load %arg25[%c8, %c1_14] : memref<192x16xf32, #tpu.memory_space<vmem>>, vector<4x6xf32>
    tpu.vector_store %arg25[%c8, %c1_14], %6 {strides = array<i32>} : memref<192x16xf32, #tpu.memory_space<vmem>>, vector<4x6xf32>,
    %c16 = arith.constant 16 : index
    %c0_15 = arith.constant 0 : index
    %15 = vector.load %arg25[%c16, %c0_15] : memref<192x16xf32, #tpu.memory_space<vmem>>, vector<4x6xf32>
    tpu.vector_store %arg25[%c16, %c0_15], %6 {strides = array<i32>} : memref<192x16xf32, #tpu.memory_space<vmem>>, vector<4x6xf32>,
    %c0_16 = arith.constant 0 : index
    %c1_17 = arith.constant 1 : index
    %16 = vector.load %arg25[%c0_16, %c1_17] : memref<192x16xf32, #tpu.memory_space<vmem>>, vector<4x1xf32>
    tpu.vector_store %arg25[%c0_16, %c1_17], %12 {strides = array<i32>} : memref<192x16xf32, #tpu.memory_space<vmem>>, vector<4x1xf32>,
    %c16_18 = arith.constant 16 : index
    %c6 = arith.constant 6 : index
    %17 = vector.load %arg25[%c16_18, %c6] : memref<192x16xf32, #tpu.memory_space<vmem>>, vector<4x1xf32>
    tpu.vector_store %arg25[%c16_18, %c6], %12 {strides = array<i32>} : memref<192x16xf32, #tpu.memory_space<vmem>>, vector<4x1xf32>,
    %c0_19 = arith.constant 0 : index
    %c10 = arith.constant 10 : index
    %18 = vector.load %arg25[%c0_19, %c10] : memref<192x16xf32, #tpu.memory_space<vmem>>, vector<4x6xf32>
    tpu.vector_store %arg25[%c0_19, %c10], %11 {strides = array<i32>} : memref<192x16xf32, #tpu.memory_space<vmem>>, vector<4x6xf32>,
    %c8_20 = arith.constant 8 : index
    %c9 = arith.constant 9 : index
    %19 = vector.load %arg25[%c8_20, %c9] : memref<192x16xf32, #tpu.memory_space<vmem>>, vector<4x6xf32>
    tpu.vector_store %arg25[%c8_20, %c9], %11 {strides = array<i32>} : memref<192x16xf32, #tpu.memory_space<vmem>>, vector<4x6xf32>,
    %c16_21 = arith.constant 16 : index
    %c8_22 = arith.constant 8 : index
    %20 = vector.load %arg25[%c16_21, %c8_22] : memref<192x16xf32, #tpu.memory_space<vmem>>, vector<4x6xf32>
    tpu.vector_store %arg25[%c16_21, %c8_22], %11 {strides = array<i32>} : memref<192x16xf32, #tpu.memory_space<vmem>>, vector<4x6xf32>,
    %c0_23 = arith.constant 0 : index
    %c9_24 = arith.constant 9 : index
    %21 = vector.load %arg25[%c0_23, %c9_24] : memref<192x16xf32, #tpu.memory_space<vmem>>, vector<4x1xf32>
    tpu.vector_store %arg25[%c0_23, %c9_24], %12 {strides = array<i32>} : memref<192x16xf32, #tpu.memory_space<vmem>>, vector<4x1xf32>,
    %c16_25 = arith.constant 16 : index
    %c14 = arith.constant 14 : index
    %22 = vector.load %arg25[%c16_25, %c14] : memref<192x16xf32, #tpu.memory_space<vmem>>, vector<4x1xf32>
    tpu.vector_store %arg25[%c16_25, %c14], %12 {strides = array<i32>} : memref<192x16xf32, #tpu.memory_space<vmem>>, vector<4x1xf32>,
    %c0_26 = arith.constant 0 : index
    %c0_27 = arith.constant 0 : index
    %23 = vector.load %arg2[%c0_26, %c0_27] : memref<8x24xf32, #tpu.memory_space<vmem>>, vector<8x24xf32>
    %c0_28 = arith.constant 0 : index
    %c0_29 = arith.constant 0 : index
    %24 = vector.load %arg25[%c0_28, %c0_29] : memref<192x16xf32, #tpu.memory_space<vmem>>, vector<24x16xf32>
    %cst_30 = arith.constant dense<0.000000e+00> : vector<8x16xf32>
    %25 = tpu.matmul %23, %24, %cst_30 {dimension_numbers = #tpu.dot_dimension_numbers<[1], [0], [0], [1], [0, 0, 1, 1], [], []>} : vector<8x24xf32>, vector<24x16xf32>, vector<8x16xf32> -> vector<8x16xf32>
    %c0_31 = arith.constant 0 : index
    %c0_32 = arith.constant 0 : index
    %26 = vector.load %arg3[%c0_31, %c0_32] : memref<8x1xf32, #tpu.memory_space<vmem>>, vector<8x1xf32>
    %27 = vector.broadcast %26 : vector<8x1xf32> to vector<8x16xf32>
    %28 = arith.addf %25, %27 : vector<8x16xf32>
    %cst_33 = arith.constant 0.000000e+00 : f32
    %29 = vector.broadcast %cst_33 : f32 to vector<8x16xf32>
    %30 = arith.cmpf ogt, %28, %29 : vector<8x16xf32>
    %cst_34 = arith.constant 2.000000e-01 : f32
    %31 = vector.broadcast %cst_34 : f32 to vector<8x16xf32>
    %32 = arith.mulf %31, %28 : vector<8x16xf32>
    %33 = arith.select %30, %28, %32 : vector<8x16xi1>, vector<8x16xf32>
    %34 = vector.extract_strided_slice %33 {offsets = [0, 1], sizes = [8, 6], strides = [1, 1]} : vector<8x16xf32> to vector<8x6xf32>
    %35 = vector.extract_strided_slice %33 {offsets = [0, 9], sizes = [8, 6], strides = [1, 1]} : vector<8x16xf32> to vector<8x6xf32>
    %cst_35 = arith.constant 0.000000e+00 : f32
    %36 = vector.broadcast %cst_35 : f32 to vector<8x1xf32>
    %c0_36 = arith.constant 0 : index
    %c2_37 = arith.constant 2 : index
    %37 = vector.load %arg25[%c0_36, %c2_37] : memref<192x16xf32, #tpu.memory_space<vmem>>, vector<8x6xf32>
    tpu.vector_store %arg25[%c0_36, %c2_37], %34 {strides = array<i32>} : memref<192x16xf32, #tpu.memory_space<vmem>>, vector<8x6xf32>,
    %c8_38 = arith.constant 8 : index
    %c1_39 = arith.constant 1 : index
    %38 = vector.load %arg25[%c8_38, %c1_39] : memref<192x16xf32, #tpu.memory_space<vmem>>, vector<8x6xf32>
    tpu.vector_store %arg25[%c8_38, %c1_39], %34 {strides = array<i32>} : memref<192x16xf32, #tpu.memory_space<vmem>>, vector<8x6xf32>,
    %c16_40 = arith.constant 16 : index
    %c0_41 = arith.constant 0 : index
    %39 = vector.load %arg25[%c16_40, %c0_41] : memref<192x16xf32, #tpu.memory_space<vmem>>, vector<8x6xf32>
    tpu.vector_store %arg25[%c16_40, %c0_41], %34 {strides = array<i32>} : memref<192x16xf32, #tpu.memory_space<vmem>>, vector<8x6xf32>,
    %c0_42 = arith.constant 0 : index
    %c1_43 = arith.constant 1 : index
    %40 = vector.load %arg25[%c0_42, %c1_43] : memref<192x16xf32, #tpu.memory_space<vmem>>, vector<8x1xf32>
    tpu.vector_store %arg25[%c0_42, %c1_43], %36 {strides = array<i32>} : memref<192x16xf32, #tpu.memory_space<vmem>>, vector<8x1xf32>,
    %c16_44 = arith.constant 16 : index
    %c6_45 = arith.constant 6 : index
    %41 = vector.load %arg25[%c16_44, %c6_45] : memref<192x16xf32, #tpu.memory_space<vmem>>, vector<8x1xf32>
    tpu.vector_store %arg25[%c16_44, %c6_45], %36 {strides = array<i32>} : memref<192x16xf32, #tpu.memory_space<vmem>>, vector<8x1xf32>,
    %c0_46 = arith.constant 0 : index
    %c10_47 = arith.constant 10 : index
    %42 = vector.load %arg25[%c0_46, %c10_47] : memref<192x16xf32, #tpu.memory_space<vmem>>, vector<8x6xf32>
    tpu.vector_store %arg25[%c0_46, %c10_47], %35 {strides = array<i32>} : memref<192x16xf32, #tpu.memory_space<vmem>>, vector<8x6xf32>,
    %c8_48 = arith.constant 8 : index
    %c9_49 = arith.constant 9 : index
    %43 = vector.load %arg25[%c8_48, %c9_49] : memref<192x16xf32, #tpu.memory_space<vmem>>, vector<8x6xf32>
    tpu.vector_store %arg25[%c8_48, %c9_49], %35 {strides = array<i32>} : memref<192x16xf32, #tpu.memory_space<vmem>>, vector<8x6xf32>,
    %c16_50 = arith.constant 16 : index
    %c8_51 = arith.constant 8 : index
    %44 = vector.load %arg25[%c16_50, %c8_51] : memref<192x16xf32, #tpu.memory_space<vmem>>, vector<8x6xf32>
    tpu.vector_store %arg25[%c16_50, %c8_51], %35 {strides = array<i32>} : memref<192x16xf32, #tpu.memory_space<vmem>>, vector<8x6xf32>,
    %c0_52 = arith.constant 0 : index
    %c9_53 = arith.constant 9 : index
    %45 = vector.load %arg25[%c0_52, %c9_53] : memref<192x16xf32, #tpu.memory_space<vmem>>, vector<8x1xf32>
    tpu.vector_store %arg25[%c0_52, %c9_53], %36 {strides = array<i32>} : memref<192x16xf32, #tpu.memory_space<vmem>>, vector<8x1xf32>,
    %c16_54 = arith.constant 16 : index
    %c14_55 = arith.constant 14 : index
    %46 = vector.load %arg25[%c16_54, %c14_55] : memref<192x16xf32, #tpu.memory_space<vmem>>, vector<8x1xf32>
    tpu.vector_store %arg25[%c16_54, %c14_55], %36 {strides = array<i32>} : memref<192x16xf32, #tpu.memory_space<vmem>>, vector<8x1xf32>,
    %c0_56 = arith.constant 0 : index
    %c0_57 = arith.constant 0 : index
    %47 = vector.load %arg4[%c0_56, %c0_57] : memref<8x24xf32, #tpu.memory_space<vmem>>, vector<8x24xf32>
    %c0_58 = arith.constant 0 : index
    %c0_59 = arith.constant 0 : index
    %48 = vector.load %arg25[%c0_58, %c0_59] : memref<192x16xf32, #tpu.memory_space<vmem>>, vector<24x16xf32>
    %cst_60 = arith.constant dense<0.000000e+00> : vector<8x16xf32>
    %49 = tpu.matmul %47, %48, %cst_60 {dimension_numbers = #tpu.dot_dimension_numbers<[1], [0], [0], [1], [0, 0, 1, 1], [], []>} : vector<8x24xf32>, vector<24x16xf32>, vector<8x16xf32> -> vector<8x16xf32>
    %c0_61 = arith.constant 0 : index
    %c0_62 = arith.constant 0 : index
    %50 = vector.load %arg5[%c0_61, %c0_62] : memref<8x1xf32, #tpu.memory_space<vmem>>, vector<8x1xf32>
    %51 = vector.broadcast %50 : vector<8x1xf32> to vector<8x16xf32>
    %52 = arith.addf %49, %51 : vector<8x16xf32>
    %53 = arith.addf %33, %52 : vector<8x16xf32>
    %54 = vector.extract_strided_slice %53 {offsets = [0, 1], sizes = [8, 6], strides = [1, 1]} : vector<8x16xf32> to vector<8x6xf32>
    %55 = vector.extract_strided_slice %53 {offsets = [0, 9], sizes = [8, 6], strides = [1, 1]} : vector<8x16xf32> to vector<8x6xf32>
    %c0_63 = arith.constant 0 : index
    %c0_64 = arith.constant 0 : index
    %c0_65 = arith.constant 0 : index
    %56 = vector.load %arg21[%c0_63, %c0_64, %c0_65] : memref<2x8x6xf32, #tpu.memory_space<vmem>>, vector<1x8x6xf32>
    %57 = vector.shape_cast %56 : vector<1x8x6xf32> to vector<8x6xf32>
    %58 = vector.shape_cast %54 : vector<8x6xf32> to vector<1x8x6xf32>
    tpu.vector_store %arg21[%c0_63, %c0_64, %c0_65], %58 {strides = array<i32>} : memref<2x8x6xf32, #tpu.memory_space<vmem>>, vector<1x8x6xf32>,
    %c1_66 = arith.constant 1 : index
    %c0_67 = arith.constant 0 : index
    %c0_68 = arith.constant 0 : index
    %59 = vector.load %arg21[%c1_66, %c0_67, %c0_68] : memref<2x8x6xf32, #tpu.memory_space<vmem>>, vector<1x8x6xf32>
    %60 = vector.shape_cast %59 : vector<1x8x6xf32> to vector<8x6xf32>
    %61 = vector.shape_cast %55 : vector<8x6xf32> to vector<1x8x6xf32>
    tpu.vector_store %arg21[%c1_66, %c0_67, %c0_68], %61 {strides = array<i32>} : memref<2x8x6xf32, #tpu.memory_space<vmem>>, vector<1x8x6xf32>,
    %cst_69 = arith.constant 0.000000e+00 : f32
    %62 = vector.broadcast %cst_69 : f32 to vector<8x1xf32>
    %c0_70 = arith.constant 0 : index
    %c2_71 = arith.constant 2 : index
    %63 = vector.load %arg25[%c0_70, %c2_71] : memref<192x16xf32, #tpu.memory_space<vmem>>, vector<8x6xf32>
    tpu.vector_store %arg25[%c0_70, %c2_71], %54 {strides = array<i32>} : memref<192x16xf32, #tpu.memory_space<vmem>>, vector<8x6xf32>,
    %c8_72 = arith.constant 8 : index
    %c1_73 = arith.constant 1 : index
    %64 = vector.load %arg25[%c8_72, %c1_73] : memref<192x16xf32, #tpu.memory_space<vmem>>, vector<8x6xf32>
    tpu.vector_store %arg25[%c8_72, %c1_73], %54 {strides = array<i32>} : memref<192x16xf32, #tpu.memory_space<vmem>>, vector<8x6xf32>,
    %c16_74 = arith.constant 16 : index
    %c0_75 = arith.constant 0 : index
    %65 = vector.load %arg25[%c16_74, %c0_75] : memref<192x16xf32, #tpu.memory_space<vmem>>, vector<8x6xf32>
    tpu.vector_store %arg25[%c16_74, %c0_75], %54 {strides = array<i32>} : memref<192x16xf32, #tpu.memory_space<vmem>>, vector<8x6xf32>,
    %c0_76 = arith.constant 0 : index
    %c1_77 = arith.constant 1 : index
    %66 = vector.load %arg25[%c0_76, %c1_77] : memref<192x16xf32, #tpu.memory_space<vmem>>, vector<8x1xf32>
    tpu.vector_store %arg25[%c0_76, %c1_77], %62 {strides = array<i32>} : memref<192x16xf32, #tpu.memory_space<vmem>>, vector<8x1xf32>,
    %c16_78 = arith.constant 16 : index
    %c6_79 = arith.constant 6 : index
    %67 = vector.load %arg25[%c16_78, %c6_79] : memref<192x16xf32, #tpu.memory_space<vmem>>, vector<8x1xf32>
    tpu.vector_store %arg25[%c16_78, %c6_79], %62 {strides = array<i32>} : memref<192x16xf32, #tpu.memory_space<vmem>>, vector<8x1xf32>,
    %c0_80 = arith.constant 0 : index
    %c10_81 = arith.constant 10 : index
    %68 = vector.load %arg25[%c0_80, %c10_81] : memref<192x16xf32, #tpu.memory_space<vmem>>, vector<8x6xf32>
    tpu.vector_store %arg25[%c0_80, %c10_81], %55 {strides = array<i32>} : memref<192x16xf32, #tpu.memory_space<vmem>>, vector<8x6xf32>,
    %c8_82 = arith.constant 8 : index
    %c9_83 = arith.constant 9 : index
    %69 = vector.load %arg25[%c8_82, %c9_83] : memref<192x16xf32, #tpu.memory_space<vmem>>, vector<8x6xf32>
    tpu.vector_store %arg25[%c8_82, %c9_83], %55 {strides = array<i32>} : memref<192x16xf32, #tpu.memory_space<vmem>>, vector<8x6xf32>,
    %c16_84 = arith.constant 16 : index
    %c8_85 = arith.constant 8 : index
    %70 = vector.load %arg25[%c16_84, %c8_85] : memref<192x16xf32, #tpu.memory_space<vmem>>, vector<8x6xf32>
    tpu.vector_store %arg25[%c16_84, %c8_85], %55 {strides = array<i32>} : memref<192x16xf32, #tpu.memory_space<vmem>>, vector<8x6xf32>,
    %c0_86 = arith.constant 0 : index
    %c9_87 = arith.constant 9 : index
    %71 = vector.load %arg25[%c0_86, %c9_87] : memref<192x16xf32, #tpu.memory_space<vmem>>, vector<8x1xf32>
    tpu.vector_store %arg25[%c0_86, %c9_87], %62 {strides = array<i32>} : memref<192x16xf32, #tpu.memory_space<vmem>>, vector<8x1xf32>,
    %c16_88 = arith.constant 16 : index
    %c14_89 = arith.constant 14 : index
    %72 = vector.load %arg25[%c16_88, %c14_89] : memref<192x16xf32, #tpu.memory_space<vmem>>, vector<8x1xf32>
    tpu.vector_store %arg25[%c16_88, %c14_89], %62 {strides = array<i32>} : memref<192x16xf32, #tpu.memory_space<vmem>>, vector<8x1xf32>,
    %c0_90 = arith.constant 0 : index
    %c0_91 = arith.constant 0 : index
    %73 = vector.load %arg6[%c0_90, %c0_91] : memref<16x24xf32, #tpu.memory_space<vmem>>, vector<16x24xf32>
    %c0_92 = arith.constant 0 : index
    %c0_93 = arith.constant 0 : index
    %74 = vector.load %arg25[%c0_92, %c0_93] : memref<192x16xf32, #tpu.memory_space<vmem>>, vector<24x16xf32>
    %cst_94 = arith.constant dense<0.000000e+00> : vector<16x16xf32>
    %75 = tpu.matmul %73, %74, %cst_94 {dimension_numbers = #tpu.dot_dimension_numbers<[1], [0], [0], [1], [0, 0, 1, 1], [], []>} : vector<16x24xf32>, vector<24x16xf32>, vector<16x16xf32> -> vector<16x16xf32>
    %c0_95 = arith.constant 0 : index
    %c0_96 = arith.constant 0 : index
    %76 = vector.load %arg7[%c0_95, %c0_96] : memref<16x1xf32, #tpu.memory_space<vmem>>, vector<16x1xf32>
    %77 = vector.broadcast %76 : vector<16x1xf32> to vector<16x16xf32>
    %78 = arith.addf %75, %77 : vector<16x16xf32>
    %cst_97 = arith.constant 0.000000e+00 : f32
    %79 = vector.broadcast %cst_97 : f32 to vector<16x16xf32>
    %80 = arith.cmpf ogt, %78, %79 : vector<16x16xf32>
    %cst_98 = arith.constant 2.000000e-01 : f32
    %81 = vector.broadcast %cst_98 : f32 to vector<16x16xf32>
    %82 = arith.mulf %81, %78 : vector<16x16xf32>
    %83 = arith.select %80, %78, %82 : vector<16x16xi1>, vector<16x16xf32>
    %84 = vector.extract_strided_slice %83 {offsets = [0, 1], sizes = [16, 6], strides = [1, 1]} : vector<16x16xf32> to vector<16x6xf32>
    %85 = vector.extract_strided_slice %83 {offsets = [0, 9], sizes = [16, 6], strides = [1, 1]} : vector<16x16xf32> to vector<16x6xf32>
    %cst_99 = arith.constant 0.000000e+00 : f32
    %86 = vector.broadcast %cst_99 : f32 to vector<16x1xf32>
    %c0_100 = arith.constant 0 : index
    %c2_101 = arith.constant 2 : index
    %87 = vector.load %arg25[%c0_100, %c2_101] : memref<192x16xf32, #tpu.memory_space<vmem>>, vector<16x6xf32>
    tpu.vector_store %arg25[%c0_100, %c2_101], %84 {strides = array<i32>} : memref<192x16xf32, #tpu.memory_space<vmem>>, vector<16x6xf32>,
    %c16_102 = arith.constant 16 : index
    %c1_103 = arith.constant 1 : index
    %88 = vector.load %arg25[%c16_102, %c1_103] : memref<192x16xf32, #tpu.memory_space<vmem>>, vector<16x6xf32>
    tpu.vector_store %arg25[%c16_102, %c1_103], %84 {strides = array<i32>} : memref<192x16xf32, #tpu.memory_space<vmem>>, vector<16x6xf32>,
    %c32 = arith.constant 32 : index
    %c0_104 = arith.constant 0 : index
    %89 = vector.load %arg25[%c32, %c0_104] : memref<192x16xf32, #tpu.memory_space<vmem>>, vector<16x6xf32>
    tpu.vector_store %arg25[%c32, %c0_104], %84 {strides = array<i32>} : memref<192x16xf32, #tpu.memory_space<vmem>>, vector<16x6xf32>,
    %c0_105 = arith.constant 0 : index
    %c1_106 = arith.constant 1 : index
    %90 = vector.load %arg25[%c0_105, %c1_106] : memref<192x16xf32, #tpu.memory_space<vmem>>, vector<16x1xf32>
    tpu.vector_store %arg25[%c0_105, %c1_106], %86 {strides = array<i32>} : memref<192x16xf32, #tpu.memory_space<vmem>>, vector<16x1xf32>,
    %c32_107 = arith.constant 32 : index
    %c6_108 = arith.constant 6 : index
    %91 = vector.load %arg25[%c32_107, %c6_108] : memref<192x16xf32, #tpu.memory_space<vmem>>, vector<16x1xf32>
    tpu.vector_store %arg25[%c32_107, %c6_108], %86 {strides = array<i32>} : memref<192x16xf32, #tpu.memory_space<vmem>>, vector<16x1xf32>,
    %c0_109 = arith.constant 0 : index
    %c10_110 = arith.constant 10 : index
    %92 = vector.load %arg25[%c0_109, %c10_110] : memref<192x16xf32, #tpu.memory_space<vmem>>, vector<16x6xf32>
    tpu.vector_store %arg25[%c0_109, %c10_110], %85 {strides = array<i32>} : memref<192x16xf32, #tpu.memory_space<vmem>>, vector<16x6xf32>,
    %c16_111 = arith.constant 16 : index
    %c9_112 = arith.constant 9 : index
    %93 = vector.load %arg25[%c16_111, %c9_112] : memref<192x16xf32, #tpu.memory_space<vmem>>, vector<16x6xf32>
    tpu.vector_store %arg25[%c16_111, %c9_112], %85 {strides = array<i32>} : memref<192x16xf32, #tpu.memory_space<vmem>>, vector<16x6xf32>,
    %c32_113 = arith.constant 32 : index
    %c8_114 = arith.constant 8 : index
    %94 = vector.load %arg25[%c32_113, %c8_114] : memref<192x16xf32, #tpu.memory_space<vmem>>, vector<16x6xf32>
    tpu.vector_store %arg25[%c32_113, %c8_114], %85 {strides = array<i32>} : memref<192x16xf32, #tpu.memory_space<vmem>>, vector<16x6xf32>,
    %c0_115 = arith.constant 0 : index
    %c9_116 = arith.constant 9 : index
    %95 = vector.load %arg25[%c0_115, %c9_116] : memref<192x16xf32, #tpu.memory_space<vmem>>, vector<16x1xf32>
    tpu.vector_store %arg25[%c0_115, %c9_116], %86 {strides = array<i32>} : memref<192x16xf32, #tpu.memory_space<vmem>>, vector<16x1xf32>,
    %c32_117 = arith.constant 32 : index
    %c14_118 = arith.constant 14 : index
    %96 = vector.load %arg25[%c32_117, %c14_118] : memref<192x16xf32, #tpu.memory_space<vmem>>, vector<16x1xf32>
    tpu.vector_store %arg25[%c32_117, %c14_118], %86 {strides = array<i32>} : memref<192x16xf32, #tpu.memory_space<vmem>>, vector<16x1xf32>,
    %c0_119 = arith.constant 0 : index
    %c0_120 = arith.constant 0 : index
    %97 = vector.load %arg8[%c0_119, %c0_120] : memref<16x48xf32, #tpu.memory_space<vmem>>, vector<16x48xf32>
    %c0_121 = arith.constant 0 : index
    %c0_122 = arith.constant 0 : index
    %98 = vector.load %arg25[%c0_121, %c0_122] : memref<192x16xf32, #tpu.memory_space<vmem>>, vector<48x16xf32>
    %cst_123 = arith.constant dense<0.000000e+00> : vector<16x16xf32>
    %99 = tpu.matmul %97, %98, %cst_123 {dimension_numbers = #tpu.dot_dimension_numbers<[1], [0], [0], [1], [0, 0, 1, 1], [], []>} : vector<16x48xf32>, vector<48x16xf32>, vector<16x16xf32> -> vector<16x16xf32>
    %c0_124 = arith.constant 0 : index
    %c0_125 = arith.constant 0 : index
    %100 = vector.load %arg9[%c0_124, %c0_125] : memref<16x1xf32, #tpu.memory_space<vmem>>, vector<16x1xf32>
    %101 = vector.broadcast %100 : vector<16x1xf32> to vector<16x16xf32>
    %102 = arith.addf %99, %101 : vector<16x16xf32>
    %103 = arith.addf %83, %102 : vector<16x16xf32>
    %104 = vector.extract_strided_slice %103 {offsets = [0, 1], sizes = [16, 6], strides = [1, 1]} : vector<16x16xf32> to vector<16x6xf32>
    %105 = vector.extract_strided_slice %103 {offsets = [0, 9], sizes = [16, 6], strides = [1, 1]} : vector<16x16xf32> to vector<16x6xf32>
    %c0_126 = arith.constant 0 : index
    %c0_127 = arith.constant 0 : index
    %c0_128 = arith.constant 0 : index
    %106 = vector.load %arg22[%c0_126, %c0_127, %c0_128] : memref<2x16x6xf32, #tpu.memory_space<vmem>>, vector<1x16x6xf32>
    %107 = vector.shape_cast %106 : vector<1x16x6xf32> to vector<16x6xf32>
    %108 = vector.shape_cast %104 : vector<16x6xf32> to vector<1x16x6xf32>
    tpu.vector_store %arg22[%c0_126, %c0_127, %c0_128], %108 {strides = array<i32>} : memref<2x16x6xf32, #tpu.memory_space<vmem>>, vector<1x16x6xf32>,
    %c1_129 = arith.constant 1 : index
    %c0_130 = arith.constant 0 : index
    %c0_131 = arith.constant 0 : index
    %109 = vector.load %arg22[%c1_129, %c0_130, %c0_131] : memref<2x16x6xf32, #tpu.memory_space<vmem>>, vector<1x16x6xf32>
    %110 = vector.shape_cast %109 : vector<1x16x6xf32> to vector<16x6xf32>
    %111 = vector.shape_cast %105 : vector<16x6xf32> to vector<1x16x6xf32>
    tpu.vector_store %arg22[%c1_129, %c0_130, %c0_131], %111 {strides = array<i32>} : memref<2x16x6xf32, #tpu.memory_space<vmem>>, vector<1x16x6xf32>,
    %cst_132 = arith.constant 0.000000e+00 : f32
    %112 = vector.broadcast %cst_132 : f32 to vector<16x1xf32>
    %c0_133 = arith.constant 0 : index
    %c2_134 = arith.constant 2 : index
    %113 = vector.load %arg25[%c0_133, %c2_134] : memref<192x16xf32, #tpu.memory_space<vmem>>, vector<16x6xf32>
    tpu.vector_store %arg25[%c0_133, %c2_134], %104 {strides = array<i32>} : memref<192x16xf32, #tpu.memory_space<vmem>>, vector<16x6xf32>,
    %c16_135 = arith.constant 16 : index
    %c1_136 = arith.constant 1 : index
    %114 = vector.load %arg25[%c16_135, %c1_136] : memref<192x16xf32, #tpu.memory_space<vmem>>, vector<16x6xf32>
    tpu.vector_store %arg25[%c16_135, %c1_136], %104 {strides = array<i32>} : memref<192x16xf32, #tpu.memory_space<vmem>>, vector<16x6xf32>,
    %c32_137 = arith.constant 32 : index
    %c0_138 = arith.constant 0 : index
    %115 = vector.load %arg25[%c32_137, %c0_138] : memref<192x16xf32, #tpu.memory_space<vmem>>, vector<16x6xf32>
    tpu.vector_store %arg25[%c32_137, %c0_138], %104 {strides = array<i32>} : memref<192x16xf32, #tpu.memory_space<vmem>>, vector<16x6xf32>,
    %c0_139 = arith.constant 0 : index
    %c1_140 = arith.constant 1 : index
    %116 = vector.load %arg25[%c0_139, %c1_140] : memref<192x16xf32, #tpu.memory_space<vmem>>, vector<16x1xf32>
    tpu.vector_store %arg25[%c0_139, %c1_140], %112 {strides = array<i32>} : memref<192x16xf32, #tpu.memory_space<vmem>>, vector<16x1xf32>,
    %c32_141 = arith.constant 32 : index
    %c6_142 = arith.constant 6 : index
    %117 = vector.load %arg25[%c32_141, %c6_142] : memref<192x16xf32, #tpu.memory_space<vmem>>, vector<16x1xf32>
    tpu.vector_store %arg25[%c32_141, %c6_142], %112 {strides = array<i32>} : memref<192x16xf32, #tpu.memory_space<vmem>>, vector<16x1xf32>,
    %c0_143 = arith.constant 0 : index
    %c10_144 = arith.constant 10 : index
    %118 = vector.load %arg25[%c0_143, %c10_144] : memref<192x16xf32, #tpu.memory_space<vmem>>, vector<16x6xf32>
    tpu.vector_store %arg25[%c0_143, %c10_144], %105 {strides = array<i32>} : memref<192x16xf32, #tpu.memory_space<vmem>>, vector<16x6xf32>,
    %c16_145 = arith.constant 16 : index
    %c9_146 = arith.constant 9 : index
    %119 = vector.load %arg25[%c16_145, %c9_146] : memref<192x16xf32, #tpu.memory_space<vmem>>, vector<16x6xf32>
    tpu.vector_store %arg25[%c16_145, %c9_146], %105 {strides = array<i32>} : memref<192x16xf32, #tpu.memory_space<vmem>>, vector<16x6xf32>,
    %c32_147 = arith.constant 32 : index
    %c8_148 = arith.constant 8 : index
    %120 = vector.load %arg25[%c32_147, %c8_148] : memref<192x16xf32, #tpu.memory_space<vmem>>, vector<16x6xf32>
    tpu.vector_store %arg25[%c32_147, %c8_148], %105 {strides = array<i32>} : memref<192x16xf32, #tpu.memory_space<vmem>>, vector<16x6xf32>,
    %c0_149 = arith.constant 0 : index
    %c9_150 = arith.constant 9 : index
    %121 = vector.load %arg25[%c0_149, %c9_150] : memref<192x16xf32, #tpu.memory_space<vmem>>, vector<16x1xf32>
    tpu.vector_store %arg25[%c0_149, %c9_150], %112 {strides = array<i32>} : memref<192x16xf32, #tpu.memory_space<vmem>>, vector<16x1xf32>,
    %c32_151 = arith.constant 32 : index
    %c14_152 = arith.constant 14 : index
    %122 = vector.load %arg25[%c32_151, %c14_152] : memref<192x16xf32, #tpu.memory_space<vmem>>, vector<16x1xf32>
    tpu.vector_store %arg25[%c32_151, %c14_152], %112 {strides = array<i32>} : memref<192x16xf32, #tpu.memory_space<vmem>>, vector<16x1xf32>,
    %c0_153 = arith.constant 0 : index
    %c0_154 = arith.constant 0 : index
    %123 = vector.load %arg10[%c0_153, %c0_154] : memref<32x48xf32, #tpu.memory_space<vmem>>, vector<32x48xf32>
    %c0_155 = arith.constant 0 : index
    %c0_156 = arith.constant 0 : index
    %124 = vector.load %arg25[%c0_155, %c0_156] : memref<192x16xf32, #tpu.memory_space<vmem>>, vector<48x16xf32>
    %cst_157 = arith.constant dense<0.000000e+00> : vector<32x16xf32>
    %125 = tpu.matmul %123, %124, %cst_157 {dimension_numbers = #tpu.dot_dimension_numbers<[1], [0], [0], [1], [0, 0, 1, 1], [], []>} : vector<32x48xf32>, vector<48x16xf32>, vector<32x16xf32> -> vector<32x16xf32>
    %c0_158 = arith.constant 0 : index
    %c0_159 = arith.constant 0 : index
    %126 = vector.load %arg11[%c0_158, %c0_159] : memref<32x1xf32, #tpu.memory_space<vmem>>, vector<32x1xf32>
    %127 = vector.broadcast %126 : vector<32x1xf32> to vector<32x16xf32>
    %128 = arith.addf %125, %127 : vector<32x16xf32>
    %cst_160 = arith.constant 0.000000e+00 : f32
    %129 = vector.broadcast %cst_160 : f32 to vector<32x16xf32>
    %130 = arith.cmpf ogt, %128, %129 : vector<32x16xf32>
    %cst_161 = arith.constant 2.000000e-01 : f32
    %131 = vector.broadcast %cst_161 : f32 to vector<32x16xf32>
    %132 = arith.mulf %131, %128 : vector<32x16xf32>
    %133 = arith.select %130, %128, %132 : vector<32x16xi1>, vector<32x16xf32>
    %134 = vector.extract_strided_slice %133 {offsets = [0, 1], sizes = [32, 6], strides = [1, 1]} : vector<32x16xf32> to vector<32x6xf32>
    %135 = vector.extract_strided_slice %133 {offsets = [0, 9], sizes = [32, 6], strides = [1, 1]} : vector<32x16xf32> to vector<32x6xf32>
    %cst_162 = arith.constant 0.000000e+00 : f32
    %136 = vector.broadcast %cst_162 : f32 to vector<32x1xf32>
    %c0_163 = arith.constant 0 : index
    %c2_164 = arith.constant 2 : index
    %137 = vector.load %arg25[%c0_163, %c2_164] : memref<192x16xf32, #tpu.memory_space<vmem>>, vector<32x6xf32>
    tpu.vector_store %arg25[%c0_163, %c2_164], %134 {strides = array<i32>} : memref<192x16xf32, #tpu.memory_space<vmem>>, vector<32x6xf32>,
    %c32_165 = arith.constant 32 : index
    %c1_166 = arith.constant 1 : index
    %138 = vector.load %arg25[%c32_165, %c1_166] : memref<192x16xf32, #tpu.memory_space<vmem>>, vector<32x6xf32>
    tpu.vector_store %arg25[%c32_165, %c1_166], %134 {strides = array<i32>} : memref<192x16xf32, #tpu.memory_space<vmem>>, vector<32x6xf32>,
    %c64 = arith.constant 64 : index
    %c0_167 = arith.constant 0 : index
    %139 = vector.load %arg25[%c64, %c0_167] : memref<192x16xf32, #tpu.memory_space<vmem>>, vector<32x6xf32>
    tpu.vector_store %arg25[%c64, %c0_167], %134 {strides = array<i32>} : memref<192x16xf32, #tpu.memory_space<vmem>>, vector<32x6xf32>,
    %c0_168 = arith.constant 0 : index
    %c1_169 = arith.constant 1 : index
    %140 = vector.load %arg25[%c0_168, %c1_169] : memref<192x16xf32, #tpu.memory_space<vmem>>, vector<32x1xf32>
    tpu.vector_store %arg25[%c0_168, %c1_169], %136 {strides = array<i32>} : memref<192x16xf32, #tpu.memory_space<vmem>>, vector<32x1xf32>,
    %c64_170 = arith.constant 64 : index
    %c6_171 = arith.constant 6 : index
    %141 = vector.load %arg25[%c64_170, %c6_171] : memref<192x16xf32, #tpu.memory_space<vmem>>, vector<32x1xf32>
    tpu.vector_store %arg25[%c64_170, %c6_171], %136 {strides = array<i32>} : memref<192x16xf32, #tpu.memory_space<vmem>>, vector<32x1xf32>,
    %c0_172 = arith.constant 0 : index
    %c10_173 = arith.constant 10 : index
    %142 = vector.load %arg25[%c0_172, %c10_173] : memref<192x16xf32, #tpu.memory_space<vmem>>, vector<32x6xf32>
    tpu.vector_store %arg25[%c0_172, %c10_173], %135 {strides = array<i32>} : memref<192x16xf32, #tpu.memory_space<vmem>>, vector<32x6xf32>,
    %c32_174 = arith.constant 32 : index
    %c9_175 = arith.constant 9 : index
    %143 = vector.load %arg25[%c32_174, %c9_175] : memref<192x16xf32, #tpu.memory_space<vmem>>, vector<32x6xf32>
    tpu.vector_store %arg25[%c32_174, %c9_175], %135 {strides = array<i32>} : memref<192x16xf32, #tpu.memory_space<vmem>>, vector<32x6xf32>,
    %c64_176 = arith.constant 64 : index
    %c8_177 = arith.constant 8 : index
    %144 = vector.load %arg25[%c64_176, %c8_177] : memref<192x16xf32, #tpu.memory_space<vmem>>, vector<32x6xf32>
    tpu.vector_store %arg25[%c64_176, %c8_177], %135 {strides = array<i32>} : memref<192x16xf32, #tpu.memory_space<vmem>>, vector<32x6xf32>,
    %c0_178 = arith.constant 0 : index
    %c9_179 = arith.constant 9 : index
    %145 = vector.load %arg25[%c0_178, %c9_179] : memref<192x16xf32, #tpu.memory_space<vmem>>, vector<32x1xf32>
    tpu.vector_store %arg25[%c0_178, %c9_179], %136 {strides = array<i32>} : memref<192x16xf32, #tpu.memory_space<vmem>>, vector<32x1xf32>,
    %c64_180 = arith.constant 64 : index
    %c14_181 = arith.constant 14 : index
    %146 = vector.load %arg25[%c64_180, %c14_181] : memref<192x16xf32, #tpu.memory_space<vmem>>, vector<32x1xf32>
    tpu.vector_store %arg25[%c64_180, %c14_181], %136 {strides = array<i32>} : memref<192x16xf32, #tpu.memory_space<vmem>>, vector<32x1xf32>,
    %c0_182 = arith.constant 0 : index
    %c0_183 = arith.constant 0 : index
    %147 = vector.load %arg12[%c0_182, %c0_183] : memref<32x96xf32, #tpu.memory_space<vmem>>, vector<32x96xf32>
    %c0_184 = arith.constant 0 : index
    %c0_185 = arith.constant 0 : index
    %148 = vector.load %arg25[%c0_184, %c0_185] : memref<192x16xf32, #tpu.memory_space<vmem>>, vector<96x16xf32>
    %cst_186 = arith.constant dense<0.000000e+00> : vector<32x16xf32>
    %149 = tpu.matmul %147, %148, %cst_186 {dimension_numbers = #tpu.dot_dimension_numbers<[1], [0], [0], [1], [0, 0, 1, 1], [], []>} : vector<32x96xf32>, vector<96x16xf32>, vector<32x16xf32> -> vector<32x16xf32>
    %c0_187 = arith.constant 0 : index
    %c0_188 = arith.constant 0 : index
    %150 = vector.load %arg13[%c0_187, %c0_188] : memref<32x1xf32, #tpu.memory_space<vmem>>, vector<32x1xf32>
    %151 = vector.broadcast %150 : vector<32x1xf32> to vector<32x16xf32>
    %152 = arith.addf %149, %151 : vector<32x16xf32>
    %153 = arith.addf %133, %152 : vector<32x16xf32>
    %154 = vector.extract_strided_slice %153 {offsets = [0, 1], sizes = [32, 6], strides = [1, 1]} : vector<32x16xf32> to vector<32x6xf32>
    %155 = vector.extract_strided_slice %153 {offsets = [0, 9], sizes = [32, 6], strides = [1, 1]} : vector<32x16xf32> to vector<32x6xf32>
    %c0_189 = arith.constant 0 : index
    %c0_190 = arith.constant 0 : index
    %c0_191 = arith.constant 0 : index
    %156 = vector.load %arg23[%c0_189, %c0_190, %c0_191] : memref<2x32x6xf32, #tpu.memory_space<vmem>>, vector<1x32x6xf32>
    %157 = vector.shape_cast %156 : vector<1x32x6xf32> to vector<32x6xf32>
    %158 = vector.shape_cast %154 : vector<32x6xf32> to vector<1x32x6xf32>
    tpu.vector_store %arg23[%c0_189, %c0_190, %c0_191], %158 {strides = array<i32>} : memref<2x32x6xf32, #tpu.memory_space<vmem>>, vector<1x32x6xf32>,
    %c1_192 = arith.constant 1 : index
    %c0_193 = arith.constant 0 : index
    %c0_194 = arith.constant 0 : index
    %159 = vector.load %arg23[%c1_192, %c0_193, %c0_194] : memref<2x32x6xf32, #tpu.memory_space<vmem>>, vector<1x32x6xf32>
    %160 = vector.shape_cast %159 : vector<1x32x6xf32> to vector<32x6xf32>
    %161 = vector.shape_cast %155 : vector<32x6xf32> to vector<1x32x6xf32>
    tpu.vector_store %arg23[%c1_192, %c0_193, %c0_194], %161 {strides = array<i32>} : memref<2x32x6xf32, #tpu.memory_space<vmem>>, vector<1x32x6xf32>,
    %cst_195 = arith.constant 0.000000e+00 : f32
    %162 = vector.broadcast %cst_195 : f32 to vector<32x1xf32>
    %c0_196 = arith.constant 0 : index
    %c2_197 = arith.constant 2 : index
    %163 = vector.load %arg25[%c0_196, %c2_197] : memref<192x16xf32, #tpu.memory_space<vmem>>, vector<32x6xf32>
    tpu.vector_store %arg25[%c0_196, %c2_197], %154 {strides = array<i32>} : memref<192x16xf32, #tpu.memory_space<vmem>>, vector<32x6xf32>,
    %c32_198 = arith.constant 32 : index
    %c1_199 = arith.constant 1 : index
    %164 = vector.load %arg25[%c32_198, %c1_199] : memref<192x16xf32, #tpu.memory_space<vmem>>, vector<32x6xf32>
    tpu.vector_store %arg25[%c32_198, %c1_199], %154 {strides = array<i32>} : memref<192x16xf32, #tpu.memory_space<vmem>>, vector<32x6xf32>,
    %c64_200 = arith.constant 64 : index
    %c0_201 = arith.constant 0 : index
    %165 = vector.load %arg25[%c64_200, %c0_201] : memref<192x16xf32, #tpu.memory_space<vmem>>, vector<32x6xf32>
    tpu.vector_store %arg25[%c64_200, %c0_201], %154 {strides = array<i32>} : memref<192x16xf32, #tpu.memory_space<vmem>>, vector<32x6xf32>,
    %c0_202 = arith.constant 0 : index
    %c1_203 = arith.constant 1 : index
    %166 = vector.load %arg25[%c0_202, %c1_203] : memref<192x16xf32, #tpu.memory_space<vmem>>, vector<32x1xf32>
    tpu.vector_store %arg25[%c0_202, %c1_203], %162 {strides = array<i32>} : memref<192x16xf32, #tpu.memory_space<vmem>>, vector<32x1xf32>,
    %c64_204 = arith.constant 64 : index
    %c6_205 = arith.constant 6 : index
    %167 = vector.load %arg25[%c64_204, %c6_205] : memref<192x16xf32, #tpu.memory_space<vmem>>, vector<32x1xf32>
    tpu.vector_store %arg25[%c64_204, %c6_205], %162 {strides = array<i32>} : memref<192x16xf32, #tpu.memory_space<vmem>>, vector<32x1xf32>,
    %c0_206 = arith.constant 0 : index
    %c10_207 = arith.constant 10 : index
    %168 = vector.load %arg25[%c0_206, %c10_207] : memref<192x16xf32, #tpu.memory_space<vmem>>, vector<32x6xf32>
    tpu.vector_store %arg25[%c0_206, %c10_207], %155 {strides = array<i32>} : memref<192x16xf32, #tpu.memory_space<vmem>>, vector<32x6xf32>,
    %c32_208 = arith.constant 32 : index
    %c9_209 = arith.constant 9 : index
    %169 = vector.load %arg25[%c32_208, %c9_209] : memref<192x16xf32, #tpu.memory_space<vmem>>, vector<32x6xf32>
    tpu.vector_store %arg25[%c32_208, %c9_209], %155 {strides = array<i32>} : memref<192x16xf32, #tpu.memory_space<vmem>>, vector<32x6xf32>,
    %c64_210 = arith.constant 64 : index
    %c8_211 = arith.constant 8 : index
    %170 = vector.load %arg25[%c64_210, %c8_211] : memref<192x16xf32, #tpu.memory_space<vmem>>, vector<32x6xf32>
    tpu.vector_store %arg25[%c64_210, %c8_211], %155 {strides = array<i32>} : memref<192x16xf32, #tpu.memory_space<vmem>>, vector<32x6xf32>,
    %c0_212 = arith.constant 0 : index
    %c9_213 = arith.constant 9 : index
    %171 = vector.load %arg25[%c0_212, %c9_213] : memref<192x16xf32, #tpu.memory_space<vmem>>, vector<32x1xf32>
    tpu.vector_store %arg25[%c0_212, %c9_213], %162 {strides = array<i32>} : memref<192x16xf32, #tpu.memory_space<vmem>>, vector<32x1xf32>,
    %c64_214 = arith.constant 64 : index
    %c14_215 = arith.constant 14 : index
    %172 = vector.load %arg25[%c64_214, %c14_215] : memref<192x16xf32, #tpu.memory_space<vmem>>, vector<32x1xf32>
    tpu.vector_store %arg25[%c64_214, %c14_215], %162 {strides = array<i32>} : memref<192x16xf32, #tpu.memory_space<vmem>>, vector<32x1xf32>,
    %c0_216 = arith.constant 0 : index
    %c0_217 = arith.constant 0 : index
    %173 = vector.load %arg14[%c0_216, %c0_217] : memref<64x96xf32, #tpu.memory_space<vmem>>, vector<64x96xf32>
    %c0_218 = arith.constant 0 : index
    %c0_219 = arith.constant 0 : index
    %174 = vector.load %arg25[%c0_218, %c0_219] : memref<192x16xf32, #tpu.memory_space<vmem>>, vector<96x16xf32>
    %cst_220 = arith.constant dense<0.000000e+00> : vector<64x16xf32>
    %175 = tpu.matmul %173, %174, %cst_220 {dimension_numbers = #tpu.dot_dimension_numbers<[1], [0], [0], [1], [0, 0, 1, 1], [], []>} : vector<64x96xf32>, vector<96x16xf32>, vector<64x16xf32> -> vector<64x16xf32>
    %c0_221 = arith.constant 0 : index
    %c0_222 = arith.constant 0 : index
    %176 = vector.load %arg15[%c0_221, %c0_222] : memref<64x1xf32, #tpu.memory_space<vmem>>, vector<64x1xf32>
    %177 = vector.broadcast %176 : vector<64x1xf32> to vector<64x16xf32>
    %178 = arith.addf %175, %177 : vector<64x16xf32>
    %cst_223 = arith.constant 0.000000e+00 : f32
    %179 = vector.broadcast %cst_223 : f32 to vector<64x16xf32>
    %180 = arith.cmpf ogt, %178, %179 : vector<64x16xf32>
    %cst_224 = arith.constant 2.000000e-01 : f32
    %181 = vector.broadcast %cst_224 : f32 to vector<64x16xf32>
    %182 = arith.mulf %181, %178 : vector<64x16xf32>
    %183 = arith.select %180, %178, %182 : vector<64x16xi1>, vector<64x16xf32>
    %184 = vector.extract_strided_slice %183 {offsets = [0, 1], sizes = [64, 6], strides = [1, 1]} : vector<64x16xf32> to vector<64x6xf32>
    %185 = vector.extract_strided_slice %183 {offsets = [0, 9], sizes = [64, 6], strides = [1, 1]} : vector<64x16xf32> to vector<64x6xf32>
    %cst_225 = arith.constant 0.000000e+00 : f32
    %186 = vector.broadcast %cst_225 : f32 to vector<64x1xf32>
    %c0_226 = arith.constant 0 : index
    %c2_227 = arith.constant 2 : index
    %187 = vector.load %arg25[%c0_226, %c2_227] : memref<192x16xf32, #tpu.memory_space<vmem>>, vector<64x6xf32>
    tpu.vector_store %arg25[%c0_226, %c2_227], %184 {strides = array<i32>} : memref<192x16xf32, #tpu.memory_space<vmem>>, vector<64x6xf32>,
    %c64_228 = arith.constant 64 : index
    %c1_229 = arith.constant 1 : index
    %188 = vector.load %arg25[%c64_228, %c1_229] : memref<192x16xf32, #tpu.memory_space<vmem>>, vector<64x6xf32>
    tpu.vector_store %arg25[%c64_228, %c1_229], %184 {strides = array<i32>} : memref<192x16xf32, #tpu.memory_space<vmem>>, vector<64x6xf32>,
    %c128 = arith.constant 128 : index
    %c0_230 = arith.constant 0 : index
    %189 = vector.load %arg25[%c128, %c0_230] : memref<192x16xf32, #tpu.memory_space<vmem>>, vector<64x6xf32>
    tpu.vector_store %arg25[%c128, %c0_230], %184 {strides = array<i32>} : memref<192x16xf32, #tpu.memory_space<vmem>>, vector<64x6xf32>,
    %c0_231 = arith.constant 0 : index
    %c1_232 = arith.constant 1 : index
    %190 = vector.load %arg25[%c0_231, %c1_232] : memref<192x16xf32, #tpu.memory_space<vmem>>, vector<64x1xf32>
    tpu.vector_store %arg25[%c0_231, %c1_232], %186 {strides = array<i32>} : memref<192x16xf32, #tpu.memory_space<vmem>>, vector<64x1xf32>,
    %c128_233 = arith.constant 128 : index
    %c6_234 = arith.constant 6 : index
    %191 = vector.load %arg25[%c128_233, %c6_234] : memref<192x16xf32, #tpu.memory_space<vmem>>, vector<64x1xf32>
    tpu.vector_store %arg25[%c128_233, %c6_234], %186 {strides = array<i32>} : memref<192x16xf32, #tpu.memory_space<vmem>>, vector<64x1xf32>,
    %c0_235 = arith.constant 0 : index
    %c10_236 = arith.constant 10 : index
    %192 = vector.load %arg25[%c0_235, %c10_236] : memref<192x16xf32, #tpu.memory_space<vmem>>, vector<64x6xf32>
    tpu.vector_store %arg25[%c0_235, %c10_236], %185 {strides = array<i32>} : memref<192x16xf32, #tpu.memory_space<vmem>>, vector<64x6xf32>,
    %c64_237 = arith.constant 64 : index
    %c9_238 = arith.constant 9 : index
    %193 = vector.load %arg25[%c64_237, %c9_238] : memref<192x16xf32, #tpu.memory_space<vmem>>, vector<64x6xf32>
    tpu.vector_store %arg25[%c64_237, %c9_238], %185 {strides = array<i32>} : memref<192x16xf32, #tpu.memory_space<vmem>>, vector<64x6xf32>,
    %c128_239 = arith.constant 128 : index
    %c8_240 = arith.constant 8 : index
    %194 = vector.load %arg25[%c128_239, %c8_240] : memref<192x16xf32, #tpu.memory_space<vmem>>, vector<64x6xf32>
    tpu.vector_store %arg25[%c128_239, %c8_240], %185 {strides = array<i32>} : memref<192x16xf32, #tpu.memory_space<vmem>>, vector<64x6xf32>,
    %c0_241 = arith.constant 0 : index
    %c9_242 = arith.constant 9 : index
    %195 = vector.load %arg25[%c0_241, %c9_242] : memref<192x16xf32, #tpu.memory_space<vmem>>, vector<64x1xf32>
    tpu.vector_store %arg25[%c0_241, %c9_242], %186 {strides = array<i32>} : memref<192x16xf32, #tpu.memory_space<vmem>>, vector<64x1xf32>,
    %c128_243 = arith.constant 128 : index
    %c14_244 = arith.constant 14 : index
    %196 = vector.load %arg25[%c128_243, %c14_244] : memref<192x16xf32, #tpu.memory_space<vmem>>, vector<64x1xf32>
    tpu.vector_store %arg25[%c128_243, %c14_244], %186 {strides = array<i32>} : memref<192x16xf32, #tpu.memory_space<vmem>>, vector<64x1xf32>,
    %c0_245 = arith.constant 0 : index
    %c0_246 = arith.constant 0 : index
    %197 = vector.load %arg16[%c0_245, %c0_246] : memref<64x192xf32, #tpu.memory_space<vmem>>, vector<64x192xf32>
    %c0_247 = arith.constant 0 : index
    %c0_248 = arith.constant 0 : index
    %198 = vector.load %arg25[%c0_247, %c0_248] : memref<192x16xf32, #tpu.memory_space<vmem>>, vector<192x16xf32>
    %cst_249 = arith.constant dense<0.000000e+00> : vector<64x16xf32>
    %199 = tpu.matmul %197, %198, %cst_249 {dimension_numbers = #tpu.dot_dimension_numbers<[1], [0], [0], [1], [0, 0, 1, 1], [], []>} : vector<64x192xf32>, vector<192x16xf32>, vector<64x16xf32> -> vector<64x16xf32>
    %c0_250 = arith.constant 0 : index
    %c0_251 = arith.constant 0 : index
    %200 = vector.load %arg17[%c0_250, %c0_251] : memref<64x1xf32, #tpu.memory_space<vmem>>, vector<64x1xf32>
    %201 = vector.broadcast %200 : vector<64x1xf32> to vector<64x16xf32>
    %202 = arith.addf %199, %201 : vector<64x16xf32>
    %203 = arith.addf %183, %202 : vector<64x16xf32>
    %204 = vector.extract_strided_slice %203 {offsets = [0, 1], sizes = [64, 6], strides = [1, 1]} : vector<64x16xf32> to vector<64x6xf32>
    %205 = vector.extract_strided_slice %203 {offsets = [0, 9], sizes = [64, 6], strides = [1, 1]} : vector<64x16xf32> to vector<64x6xf32>
    %c0_252 = arith.constant 0 : index
    %c0_253 = arith.constant 0 : index
    %c0_254 = arith.constant 0 : index
    %206 = vector.load %arg24[%c0_252, %c0_253, %c0_254] : memref<2x64x6xf32, #tpu.memory_space<vmem>>, vector<1x64x6xf32>
    %207 = vector.shape_cast %206 : vector<1x64x6xf32> to vector<64x6xf32>
    %208 = vector.shape_cast %204 : vector<64x6xf32> to vector<1x64x6xf32>
    tpu.vector_store %arg24[%c0_252, %c0_253, %c0_254], %208 {strides = array<i32>} : memref<2x64x6xf32, #tpu.memory_space<vmem>>, vector<1x64x6xf32>,
    %c1_255 = arith.constant 1 : index
    %c0_256 = arith.constant 0 : index
    %c0_257 = arith.constant 0 : index
    %209 = vector.load %arg24[%c1_255, %c0_256, %c0_257] : memref<2x64x6xf32, #tpu.memory_space<vmem>>, vector<1x64x6xf32>
    %210 = vector.shape_cast %209 : vector<1x64x6xf32> to vector<64x6xf32>
    %211 = vector.shape_cast %205 : vector<64x6xf32> to vector<1x64x6xf32>
    tpu.vector_store %arg24[%c1_255, %c0_256, %c0_257], %211 {strides = array<i32>} : memref<2x64x6xf32, #tpu.memory_space<vmem>>, vector<1x64x6xf32>,
    %c0_258 = arith.constant 0 : index
    %c0_259 = arith.constant 0 : index
    %212 = vector.load %arg18[%c0_258, %c0_259] : memref<64x6xf32, #tpu.memory_space<vmem>>, vector<64x6xf32>
    %213 = tpu.iota {dimensions = array<i32: 0>} : vector<2x1xi32>
    %cst_260 = arith.constant 0.000000e+00 : f32
    %214 = vector.broadcast %cst_260 : f32 to vector<2x1xf32>
    %215 = arith.mulf %204, %212 : vector<64x6xf32>
    %cst_261 = arith.constant dense<0.000000e+00> : vector<64xf32>
    %216 = vector.multi_reduction <add>, %215, %cst_261 [1] : vector<64x6xf32> to vector<64xf32>
    %217 = vector.shape_cast %216 : vector<64xf32> to vector<64x1xf32>
    %cst_262 = arith.constant dense<0.000000e+00> : vector<1xf32>
    %218 = vector.multi_reduction <add>, %217, %cst_262 [0] : vector<64x1xf32> to vector<1xf32>
    %219 = vector.shape_cast %218 : vector<1xf32> to vector<1x1xf32>
    %c0_i32 = arith.constant 0 : i32
    %220 = vector.broadcast %c0_i32 : i32 to vector<2x1xi32>
    %221 = arith.cmpi eq, %213, %220 : vector<2x1xi32>
    %222 = vector.shape_cast %219 : vector<1x1xf32> to vector<1x1xf32>
    %223 = vector.broadcast %222 : vector<1x1xf32> to vector<2x1xf32>
    %224 = arith.select %221, %223, %214 : vector<2x1xi1>, vector<2x1xf32>
    %225 = arith.mulf %205, %212 : vector<64x6xf32>
    %cst_263 = arith.constant dense<0.000000e+00> : vector<64xf32>
    %226 = vector.multi_reduction <add>, %225, %cst_263 [1] : vector<64x6xf32> to vector<64xf32>
    %227 = vector.shape_cast %226 : vector<64xf32> to vector<64x1xf32>
    %cst_264 = arith.constant dense<0.000000e+00> : vector<1xf32>
    %228 = vector.multi_reduction <add>, %227, %cst_264 [0] : vector<64x1xf32> to vector<1xf32>
    %229 = vector.shape_cast %228 : vector<1xf32> to vector<1x1xf32>
    %c1_i32 = arith.constant 1 : i32
    %230 = vector.broadcast %c1_i32 : i32 to vector<2x1xi32>
    %231 = arith.cmpi eq, %213, %230 : vector<2x1xi32>
    %232 = vector.shape_cast %229 : vector<1x1xf32> to vector<1x1xf32>
    %233 = vector.broadcast %232 : vector<1x1xf32> to vector<2x1xf32>
    %234 = arith.select %231, %233, %224 : vector<2x1xi1>, vector<2x1xf32>
    %c0_265 = arith.constant 0 : index
    %c0_266 = arith.constant 0 : index
    %235 = vector.load %arg19[%c0_265, %c0_266] : memref<1x1xf32, #tpu.memory_space<vmem>>, vector<1x1xf32>
    %236 = vector.broadcast %235 : vector<1x1xf32> to vector<2x1xf32>
    %237 = arith.addf %234, %236 : vector<2x1xf32>
    %c0_267 = arith.constant 0 : index
    %c0_268 = arith.constant 0 : index
    %238 = vector.load %arg20[%c0_267, %c0_268] : memref<2x1xf32, #tpu.memory_space<vmem>>, vector<2x1xf32>
    tpu.vector_store %arg20[%c0_267, %c0_268], %237 {strides = array<i32>} : memref<2x1xf32, #tpu.memory_space<vmem>>, vector<2x1xf32>,
    return
  }
}

module attributes {stable_mosaic.version = 11 : i64} {
  func.func @kernel(%arg0: memref<2x4x18xf32, #tpu.memory_space<vmem>>, %arg1: memref<2x4x18xf32, #tpu.memory_space<vmem>>, %arg2: memref<8x24xf32, #tpu.memory_space<vmem>>, %arg3: memref<8x1xf32, #tpu.memory_space<vmem>>, %arg4: memref<8x24xf32, #tpu.memory_space<vmem>>, %arg5: memref<8x1xf32, #tpu.memory_space<vmem>>, %arg6: memref<16x24xf32, #tpu.memory_space<vmem>>, %arg7: memref<16x1xf32, #tpu.memory_space<vmem>>, %arg8: memref<16x48xf32, #tpu.memory_space<vmem>>, %arg9: memref<16x1xf32, #tpu.memory_space<vmem>>, %arg10: memref<32x48xf32, #tpu.memory_space<vmem>>, %arg11: memref<32x1xf32, #tpu.memory_space<vmem>>, %arg12: memref<32x96xf32, #tpu.memory_space<vmem>>, %arg13: memref<32x1xf32, #tpu.memory_space<vmem>>, %arg14: memref<64x96xf32, #tpu.memory_space<vmem>>, %arg15: memref<64x1xf32, #tpu.memory_space<vmem>>, %arg16: memref<64x192xf32, #tpu.memory_space<vmem>>, %arg17: memref<64x1xf32, #tpu.memory_space<vmem>>, %arg18: memref<64x18xf32, #tpu.memory_space<vmem>>, %arg19: memref<1x1xf32, #tpu.memory_space<vmem>>, %arg20: memref<2x1xf32, #tpu.memory_space<vmem>>, %arg21: memref<2x8x18xf32, #tpu.memory_space<vmem>>, %arg22: memref<2x16x18xf32, #tpu.memory_space<vmem>>, %arg23: memref<2x32x18xf32, #tpu.memory_space<vmem>>, %arg24: memref<2x64x18xf32, #tpu.memory_space<vmem>>, %arg25: memref<192x40xf32, #tpu.memory_space<vmem>>) attributes {dimension_semantics = [], scalar_prefetch = 0 : i64, scratch_operands = 1 : i64, tpu.core_type = #tpu.core_type<tc>} {
    %cst = arith.constant 0.000000e+00 : f32
    %0 = vector.broadcast %cst : f32 to vector<192x40xf32>
    %c0 = arith.constant 0 : index
    %c0_0 = arith.constant 0 : index
    %1 = vector.load %arg25[%c0, %c0_0] : memref<192x40xf32, #tpu.memory_space<vmem>>, vector<192x40xf32>
    tpu.vector_store %arg25[%c0, %c0_0], %0 {strides = array<i32>} : memref<192x40xf32, #tpu.memory_space<vmem>>, vector<192x40xf32>,
    %c0_1 = arith.constant 0 : index
    %c0_2 = arith.constant 0 : index
    %c0_3 = arith.constant 0 : index
    %2 = vector.load %arg0[%c0_1, %c0_2, %c0_3] : memref<2x4x18xf32, #tpu.memory_space<vmem>>, vector<1x4x18xf32>
    %3 = vector.shape_cast %2 : vector<1x4x18xf32> to vector<4x18xf32>
    %c0_4 = arith.constant 0 : index
    %c0_5 = arith.constant 0 : index
    %c0_6 = arith.constant 0 : index
    %4 = vector.load %arg1[%c0_4, %c0_5, %c0_6] : memref<2x4x18xf32, #tpu.memory_space<vmem>>, vector<1x4x18xf32>
    %5 = vector.shape_cast %4 : vector<1x4x18xf32> to vector<4x18xf32>
    %6 = arith.addf %3, %5 : vector<4x18xf32>
    %c1 = arith.constant 1 : index
    %c0_7 = arith.constant 0 : index
    %c0_8 = arith.constant 0 : index
    %7 = vector.load %arg0[%c1, %c0_7, %c0_8] : memref<2x4x18xf32, #tpu.memory_space<vmem>>, vector<1x4x18xf32>
    %8 = vector.shape_cast %7 : vector<1x4x18xf32> to vector<4x18xf32>
    %c1_9 = arith.constant 1 : index
    %c0_10 = arith.constant 0 : index
    %c0_11 = arith.constant 0 : index
    %9 = vector.load %arg1[%c1_9, %c0_10, %c0_11] : memref<2x4x18xf32, #tpu.memory_space<vmem>>, vector<1x4x18xf32>
    %10 = vector.shape_cast %9 : vector<1x4x18xf32> to vector<4x18xf32>
    %11 = arith.addf %8, %10 : vector<4x18xf32>
    %cst_12 = arith.constant 0.000000e+00 : f32
    %12 = vector.broadcast %cst_12 : f32 to vector<4x1xf32>
    %c0_13 = arith.constant 0 : index
    %c2 = arith.constant 2 : index
    %13 = vector.load %arg25[%c0_13, %c2] : memref<192x40xf32, #tpu.memory_space<vmem>>, vector<4x18xf32>
    tpu.vector_store %arg25[%c0_13, %c2], %6 {strides = array<i32>} : memref<192x40xf32, #tpu.memory_space<vmem>>, vector<4x18xf32>,
    %c8 = arith.constant 8 : index
    %c1_14 = arith.constant 1 : index
    %14 = vector.load %arg25[%c8, %c1_14] : memref<192x40xf32, #tpu.memory_space<vmem>>, vector<4x18xf32>
    tpu.vector_store %arg25[%c8, %c1_14], %6 {strides = array<i32>} : memref<192x40xf32, #tpu.memory_space<vmem>>, vector<4x18xf32>,
    %c16 = arith.constant 16 : index
    %c0_15 = arith.constant 0 : index
    %15 = vector.load %arg25[%c16, %c0_15] : memref<192x40xf32, #tpu.memory_space<vmem>>, vector<4x18xf32>
    tpu.vector_store %arg25[%c16, %c0_15], %6 {strides = array<i32>} : memref<192x40xf32, #tpu.memory_space<vmem>>, vector<4x18xf32>,
    %c0_16 = arith.constant 0 : index
    %c1_17 = arith.constant 1 : index
    %16 = vector.load %arg25[%c0_16, %c1_17] : memref<192x40xf32, #tpu.memory_space<vmem>>, vector<4x1xf32>
    tpu.vector_store %arg25[%c0_16, %c1_17], %12 {strides = array<i32>} : memref<192x40xf32, #tpu.memory_space<vmem>>, vector<4x1xf32>,
    %c16_18 = arith.constant 16 : index
    %c18 = arith.constant 18 : index
    %17 = vector.load %arg25[%c16_18, %c18] : memref<192x40xf32, #tpu.memory_space<vmem>>, vector<4x1xf32>
    tpu.vector_store %arg25[%c16_18, %c18], %12 {strides = array<i32>} : memref<192x40xf32, #tpu.memory_space<vmem>>, vector<4x1xf32>,
    %c0_19 = arith.constant 0 : index
    %c22 = arith.constant 22 : index
    %18 = vector.load %arg25[%c0_19, %c22] : memref<192x40xf32, #tpu.memory_space<vmem>>, vector<4x18xf32>
    tpu.vector_store %arg25[%c0_19, %c22], %11 {strides = array<i32>} : memref<192x40xf32, #tpu.memory_space<vmem>>, vector<4x18xf32>,
    %c8_20 = arith.constant 8 : index
    %c21 = arith.constant 21 : index
    %19 = vector.load %arg25[%c8_20, %c21] : memref<192x40xf32, #tpu.memory_space<vmem>>, vector<4x18xf32>
    tpu.vector_store %arg25[%c8_20, %c21], %11 {strides = array<i32>} : memref<192x40xf32, #tpu.memory_space<vmem>>, vector<4x18xf32>,
    %c16_21 = arith.constant 16 : index
    %c20 = arith.constant 20 : index
    %20 = vector.load %arg25[%c16_21, %c20] : memref<192x40xf32, #tpu.memory_space<vmem>>, vector<4x18xf32>
    tpu.vector_store %arg25[%c16_21, %c20], %11 {strides = array<i32>} : memref<192x40xf32, #tpu.memory_space<vmem>>, vector<4x18xf32>,
    %c0_22 = arith.constant 0 : index
    %c21_23 = arith.constant 21 : index
    %21 = vector.load %arg25[%c0_22, %c21_23] : memref<192x40xf32, #tpu.memory_space<vmem>>, vector<4x1xf32>
    tpu.vector_store %arg25[%c0_22, %c21_23], %12 {strides = array<i32>} : memref<192x40xf32, #tpu.memory_space<vmem>>, vector<4x1xf32>,
    %c16_24 = arith.constant 16 : index
    %c38 = arith.constant 38 : index
    %22 = vector.load %arg25[%c16_24, %c38] : memref<192x40xf32, #tpu.memory_space<vmem>>, vector<4x1xf32>
    tpu.vector_store %arg25[%c16_24, %c38], %12 {strides = array<i32>} : memref<192x40xf32, #tpu.memory_space<vmem>>, vector<4x1xf32>,
    %c0_25 = arith.constant 0 : index
    %c0_26 = arith.constant 0 : index
    %23 = vector.load %arg2[%c0_25, %c0_26] : memref<8x24xf32, #tpu.memory_space<vmem>>, vector<8x24xf32>
    %c0_27 = arith.constant 0 : index
    %c0_28 = arith.constant 0 : index
    %24 = vector.load %arg25[%c0_27, %c0_28] : memref<192x40xf32, #tpu.memory_space<vmem>>, vector<24x40xf32>
    %cst_29 = arith.constant dense<0.000000e+00> : vector<8x40xf32>
    %25 = tpu.matmul %23, %24, %cst_29 {dimension_numbers = #tpu.dot_dimension_numbers<[1], [0], [0], [1], [0, 0, 1, 1], [], []>} : vector<8x24xf32>, vector<24x40xf32>, vector<8x40xf32> -> vector<8x40xf32>
    %c0_30 = arith.constant 0 : index
    %c0_31 = arith.constant 0 : index
    %26 = vector.load %arg3[%c0_30, %c0_31] : memref<8x1xf32, #tpu.memory_space<vmem>>, vector<8x1xf32>
    %27 = vector.broadcast %26 : vector<8x1xf32> to vector<8x40xf32>
    %28 = arith.addf %25, %27 : vector<8x40xf32>
    %cst_32 = arith.constant 0.000000e+00 : f32
    %29 = vector.broadcast %cst_32 : f32 to vector<8x40xf32>
    %30 = arith.cmpf ogt, %28, %29 : vector<8x40xf32>
    %cst_33 = arith.constant 2.000000e-01 : f32
    %31 = vector.broadcast %cst_33 : f32 to vector<8x40xf32>
    %32 = arith.mulf %31, %28 : vector<8x40xf32>
    %33 = arith.select %30, %28, %32 : vector<8x40xi1>, vector<8x40xf32>
    %34 = vector.extract_strided_slice %33 {offsets = [0, 1], sizes = [8, 18], strides = [1, 1]} : vector<8x40xf32> to vector<8x18xf32>
    %35 = vector.extract_strided_slice %33 {offsets = [0, 21], sizes = [8, 18], strides = [1, 1]} : vector<8x40xf32> to vector<8x18xf32>
    %cst_34 = arith.constant 0.000000e+00 : f32
    %36 = vector.broadcast %cst_34 : f32 to vector<8x1xf32>
    %c0_35 = arith.constant 0 : index
    %c2_36 = arith.constant 2 : index
    %37 = vector.load %arg25[%c0_35, %c2_36] : memref<192x40xf32, #tpu.memory_space<vmem>>, vector<8x18xf32>
    tpu.vector_store %arg25[%c0_35, %c2_36], %34 {strides = array<i32>} : memref<192x40xf32, #tpu.memory_space<vmem>>, vector<8x18xf32>,
    %c8_37 = arith.constant 8 : index
    %c1_38 = arith.constant 1 : index
    %38 = vector.load %arg25[%c8_37, %c1_38] : memref<192x40xf32, #tpu.memory_space<vmem>>, vector<8x18xf32>
    tpu.vector_store %arg25[%c8_37, %c1_38], %34 {strides = array<i32>} : memref<192x40xf32, #tpu.memory_space<vmem>>, vector<8x18xf32>,
    %c16_39 = arith.constant 16 : index
    %c0_40 = arith.constant 0 : index
    %39 = vector.load %arg25[%c16_39, %c0_40] : memref<192x40xf32, #tpu.memory_space<vmem>>, vector<8x18xf32>
    tpu.vector_store %arg25[%c16_39, %c0_40], %34 {strides = array<i32>} : memref<192x40xf32, #tpu.memory_space<vmem>>, vector<8x18xf32>,
    %c0_41 = arith.constant 0 : index
    %c1_42 = arith.constant 1 : index
    %40 = vector.load %arg25[%c0_41, %c1_42] : memref<192x40xf32, #tpu.memory_space<vmem>>, vector<8x1xf32>
    tpu.vector_store %arg25[%c0_41, %c1_42], %36 {strides = array<i32>} : memref<192x40xf32, #tpu.memory_space<vmem>>, vector<8x1xf32>,
    %c16_43 = arith.constant 16 : index
    %c18_44 = arith.constant 18 : index
    %41 = vector.load %arg25[%c16_43, %c18_44] : memref<192x40xf32, #tpu.memory_space<vmem>>, vector<8x1xf32>
    tpu.vector_store %arg25[%c16_43, %c18_44], %36 {strides = array<i32>} : memref<192x40xf32, #tpu.memory_space<vmem>>, vector<8x1xf32>,
    %c0_45 = arith.constant 0 : index
    %c22_46 = arith.constant 22 : index
    %42 = vector.load %arg25[%c0_45, %c22_46] : memref<192x40xf32, #tpu.memory_space<vmem>>, vector<8x18xf32>
    tpu.vector_store %arg25[%c0_45, %c22_46], %35 {strides = array<i32>} : memref<192x40xf32, #tpu.memory_space<vmem>>, vector<8x18xf32>,
    %c8_47 = arith.constant 8 : index
    %c21_48 = arith.constant 21 : index
    %43 = vector.load %arg25[%c8_47, %c21_48] : memref<192x40xf32, #tpu.memory_space<vmem>>, vector<8x18xf32>
    tpu.vector_store %arg25[%c8_47, %c21_48], %35 {strides = array<i32>} : memref<192x40xf32, #tpu.memory_space<vmem>>, vector<8x18xf32>,
    %c16_49 = arith.constant 16 : index
    %c20_50 = arith.constant 20 : index
    %44 = vector.load %arg25[%c16_49, %c20_50] : memref<192x40xf32, #tpu.memory_space<vmem>>, vector<8x18xf32>
    tpu.vector_store %arg25[%c16_49, %c20_50], %35 {strides = array<i32>} : memref<192x40xf32, #tpu.memory_space<vmem>>, vector<8x18xf32>,
    %c0_51 = arith.constant 0 : index
    %c21_52 = arith.constant 21 : index
    %45 = vector.load %arg25[%c0_51, %c21_52] : memref<192x40xf32, #tpu.memory_space<vmem>>, vector<8x1xf32>
    tpu.vector_store %arg25[%c0_51, %c21_52], %36 {strides = array<i32>} : memref<192x40xf32, #tpu.memory_space<vmem>>, vector<8x1xf32>,
    %c16_53 = arith.constant 16 : index
    %c38_54 = arith.constant 38 : index
    %46 = vector.load %arg25[%c16_53, %c38_54] : memref<192x40xf32, #tpu.memory_space<vmem>>, vector<8x1xf32>
    tpu.vector_store %arg25[%c16_53, %c38_54], %36 {strides = array<i32>} : memref<192x40xf32, #tpu.memory_space<vmem>>, vector<8x1xf32>,
    %c0_55 = arith.constant 0 : index
    %c0_56 = arith.constant 0 : index
    %47 = vector.load %arg4[%c0_55, %c0_56] : memref<8x24xf32, #tpu.memory_space<vmem>>, vector<8x24xf32>
    %c0_57 = arith.constant 0 : index
    %c0_58 = arith.constant 0 : index
    %48 = vector.load %arg25[%c0_57, %c0_58] : memref<192x40xf32, #tpu.memory_space<vmem>>, vector<24x40xf32>
    %cst_59 = arith.constant dense<0.000000e+00> : vector<8x40xf32>
    %49 = tpu.matmul %47, %48, %cst_59 {dimension_numbers = #tpu.dot_dimension_numbers<[1], [0], [0], [1], [0, 0, 1, 1], [], []>} : vector<8x24xf32>, vector<24x40xf32>, vector<8x40xf32> -> vector<8x40xf32>
    %c0_60 = arith.constant 0 : index
    %c0_61 = arith.constant 0 : index
    %50 = vector.load %arg5[%c0_60, %c0_61] : memref<8x1xf32, #tpu.memory_space<vmem>>, vector<8x1xf32>
    %51 = vector.broadcast %50 : vector<8x1xf32> to vector<8x40xf32>
    %52 = arith.addf %49, %51 : vector<8x40xf32>
    %53 = arith.addf %33, %52 : vector<8x40xf32>
    %54 = vector.extract_strided_slice %53 {offsets = [0, 1], sizes = [8, 18], strides = [1, 1]} : vector<8x40xf32> to vector<8x18xf32>
    %55 = vector.extract_strided_slice %53 {offsets = [0, 21], sizes = [8, 18], strides = [1, 1]} : vector<8x40xf32> to vector<8x18xf32>
    %c0_62 = arith.constant 0 : index
    %c0_63 = arith.constant 0 : index
    %c0_64 = arith.constant 0 : index
    %56 = vector.load %arg21[%c0_62, %c0_63, %c0_64] : memref<2x8x18xf32, #tpu.memory_space<vmem>>, vector<1x8x18xf32>
    %57 = vector.shape_cast %56 : vector<1x8x18xf32> to vector<8x18xf32>
    %58 = vector.shape_cast %54 : vector<8x18xf32> to vector<1x8x18xf32>
    tpu.vector_store %arg21[%c0_62, %c0_63, %c0_64], %58 {strides = array<i32>} : memref<2x8x18xf32, #tpu.memory_space<vmem>>, vector<1x8x18xf32>,
    %c1_65 = arith.constant 1 : index
    %c0_66 = arith.constant 0 : index
    %c0_67 = arith.constant 0 : index
    %59 = vector.load %arg21[%c1_65, %c0_66, %c0_67] : memref<2x8x18xf32, #tpu.memory_space<vmem>>, vector<1x8x18xf32>
    %60 = vector.shape_cast %59 : vector<1x8x18xf32> to vector<8x18xf32>
    %61 = vector.shape_cast %55 : vector<8x18xf32> to vector<1x8x18xf32>
    tpu.vector_store %arg21[%c1_65, %c0_66, %c0_67], %61 {strides = array<i32>} : memref<2x8x18xf32, #tpu.memory_space<vmem>>, vector<1x8x18xf32>,
    %cst_68 = arith.constant 0.000000e+00 : f32
    %62 = vector.broadcast %cst_68 : f32 to vector<8x1xf32>
    %c0_69 = arith.constant 0 : index
    %c2_70 = arith.constant 2 : index
    %63 = vector.load %arg25[%c0_69, %c2_70] : memref<192x40xf32, #tpu.memory_space<vmem>>, vector<8x18xf32>
    tpu.vector_store %arg25[%c0_69, %c2_70], %54 {strides = array<i32>} : memref<192x40xf32, #tpu.memory_space<vmem>>, vector<8x18xf32>,
    %c8_71 = arith.constant 8 : index
    %c1_72 = arith.constant 1 : index
    %64 = vector.load %arg25[%c8_71, %c1_72] : memref<192x40xf32, #tpu.memory_space<vmem>>, vector<8x18xf32>
    tpu.vector_store %arg25[%c8_71, %c1_72], %54 {strides = array<i32>} : memref<192x40xf32, #tpu.memory_space<vmem>>, vector<8x18xf32>,
    %c16_73 = arith.constant 16 : index
    %c0_74 = arith.constant 0 : index
    %65 = vector.load %arg25[%c16_73, %c0_74] : memref<192x40xf32, #tpu.memory_space<vmem>>, vector<8x18xf32>
    tpu.vector_store %arg25[%c16_73, %c0_74], %54 {strides = array<i32>} : memref<192x40xf32, #tpu.memory_space<vmem>>, vector<8x18xf32>,
    %c0_75 = arith.constant 0 : index
    %c1_76 = arith.constant 1 : index
    %66 = vector.load %arg25[%c0_75, %c1_76] : memref<192x40xf32, #tpu.memory_space<vmem>>, vector<8x1xf32>
    tpu.vector_store %arg25[%c0_75, %c1_76], %62 {strides = array<i32>} : memref<192x40xf32, #tpu.memory_space<vmem>>, vector<8x1xf32>,
    %c16_77 = arith.constant 16 : index
    %c18_78 = arith.constant 18 : index
    %67 = vector.load %arg25[%c16_77, %c18_78] : memref<192x40xf32, #tpu.memory_space<vmem>>, vector<8x1xf32>
    tpu.vector_store %arg25[%c16_77, %c18_78], %62 {strides = array<i32>} : memref<192x40xf32, #tpu.memory_space<vmem>>, vector<8x1xf32>,
    %c0_79 = arith.constant 0 : index
    %c22_80 = arith.constant 22 : index
    %68 = vector.load %arg25[%c0_79, %c22_80] : memref<192x40xf32, #tpu.memory_space<vmem>>, vector<8x18xf32>
    tpu.vector_store %arg25[%c0_79, %c22_80], %55 {strides = array<i32>} : memref<192x40xf32, #tpu.memory_space<vmem>>, vector<8x18xf32>,
    %c8_81 = arith.constant 8 : index
    %c21_82 = arith.constant 21 : index
    %69 = vector.load %arg25[%c8_81, %c21_82] : memref<192x40xf32, #tpu.memory_space<vmem>>, vector<8x18xf32>
    tpu.vector_store %arg25[%c8_81, %c21_82], %55 {strides = array<i32>} : memref<192x40xf32, #tpu.memory_space<vmem>>, vector<8x18xf32>,
    %c16_83 = arith.constant 16 : index
    %c20_84 = arith.constant 20 : index
    %70 = vector.load %arg25[%c16_83, %c20_84] : memref<192x40xf32, #tpu.memory_space<vmem>>, vector<8x18xf32>
    tpu.vector_store %arg25[%c16_83, %c20_84], %55 {strides = array<i32>} : memref<192x40xf32, #tpu.memory_space<vmem>>, vector<8x18xf32>,
    %c0_85 = arith.constant 0 : index
    %c21_86 = arith.constant 21 : index
    %71 = vector.load %arg25[%c0_85, %c21_86] : memref<192x40xf32, #tpu.memory_space<vmem>>, vector<8x1xf32>
    tpu.vector_store %arg25[%c0_85, %c21_86], %62 {strides = array<i32>} : memref<192x40xf32, #tpu.memory_space<vmem>>, vector<8x1xf32>,
    %c16_87 = arith.constant 16 : index
    %c38_88 = arith.constant 38 : index
    %72 = vector.load %arg25[%c16_87, %c38_88] : memref<192x40xf32, #tpu.memory_space<vmem>>, vector<8x1xf32>
    tpu.vector_store %arg25[%c16_87, %c38_88], %62 {strides = array<i32>} : memref<192x40xf32, #tpu.memory_space<vmem>>, vector<8x1xf32>,
    %c0_89 = arith.constant 0 : index
    %c0_90 = arith.constant 0 : index
    %73 = vector.load %arg6[%c0_89, %c0_90] : memref<16x24xf32, #tpu.memory_space<vmem>>, vector<16x24xf32>
    %c0_91 = arith.constant 0 : index
    %c0_92 = arith.constant 0 : index
    %74 = vector.load %arg25[%c0_91, %c0_92] : memref<192x40xf32, #tpu.memory_space<vmem>>, vector<24x40xf32>
    %cst_93 = arith.constant dense<0.000000e+00> : vector<16x40xf32>
    %75 = tpu.matmul %73, %74, %cst_93 {dimension_numbers = #tpu.dot_dimension_numbers<[1], [0], [0], [1], [0, 0, 1, 1], [], []>} : vector<16x24xf32>, vector<24x40xf32>, vector<16x40xf32> -> vector<16x40xf32>
    %c0_94 = arith.constant 0 : index
    %c0_95 = arith.constant 0 : index
    %76 = vector.load %arg7[%c0_94, %c0_95] : memref<16x1xf32, #tpu.memory_space<vmem>>, vector<16x1xf32>
    %77 = vector.broadcast %76 : vector<16x1xf32> to vector<16x40xf32>
    %78 = arith.addf %75, %77 : vector<16x40xf32>
    %cst_96 = arith.constant 0.000000e+00 : f32
    %79 = vector.broadcast %cst_96 : f32 to vector<16x40xf32>
    %80 = arith.cmpf ogt, %78, %79 : vector<16x40xf32>
    %cst_97 = arith.constant 2.000000e-01 : f32
    %81 = vector.broadcast %cst_97 : f32 to vector<16x40xf32>
    %82 = arith.mulf %81, %78 : vector<16x40xf32>
    %83 = arith.select %80, %78, %82 : vector<16x40xi1>, vector<16x40xf32>
    %84 = vector.extract_strided_slice %83 {offsets = [0, 1], sizes = [16, 18], strides = [1, 1]} : vector<16x40xf32> to vector<16x18xf32>
    %85 = vector.extract_strided_slice %83 {offsets = [0, 21], sizes = [16, 18], strides = [1, 1]} : vector<16x40xf32> to vector<16x18xf32>
    %cst_98 = arith.constant 0.000000e+00 : f32
    %86 = vector.broadcast %cst_98 : f32 to vector<16x1xf32>
    %c0_99 = arith.constant 0 : index
    %c2_100 = arith.constant 2 : index
    %87 = vector.load %arg25[%c0_99, %c2_100] : memref<192x40xf32, #tpu.memory_space<vmem>>, vector<16x18xf32>
    tpu.vector_store %arg25[%c0_99, %c2_100], %84 {strides = array<i32>} : memref<192x40xf32, #tpu.memory_space<vmem>>, vector<16x18xf32>,
    %c16_101 = arith.constant 16 : index
    %c1_102 = arith.constant 1 : index
    %88 = vector.load %arg25[%c16_101, %c1_102] : memref<192x40xf32, #tpu.memory_space<vmem>>, vector<16x18xf32>
    tpu.vector_store %arg25[%c16_101, %c1_102], %84 {strides = array<i32>} : memref<192x40xf32, #tpu.memory_space<vmem>>, vector<16x18xf32>,
    %c32 = arith.constant 32 : index
    %c0_103 = arith.constant 0 : index
    %89 = vector.load %arg25[%c32, %c0_103] : memref<192x40xf32, #tpu.memory_space<vmem>>, vector<16x18xf32>
    tpu.vector_store %arg25[%c32, %c0_103], %84 {strides = array<i32>} : memref<192x40xf32, #tpu.memory_space<vmem>>, vector<16x18xf32>,
    %c0_104 = arith.constant 0 : index
    %c1_105 = arith.constant 1 : index
    %90 = vector.load %arg25[%c0_104, %c1_105] : memref<192x40xf32, #tpu.memory_space<vmem>>, vector<16x1xf32>
    tpu.vector_store %arg25[%c0_104, %c1_105], %86 {strides = array<i32>} : memref<192x40xf32, #tpu.memory_space<vmem>>, vector<16x1xf32>,
    %c32_106 = arith.constant 32 : index
    %c18_107 = arith.constant 18 : index
    %91 = vector.load %arg25[%c32_106, %c18_107] : memref<192x40xf32, #tpu.memory_space<vmem>>, vector<16x1xf32>
    tpu.vector_store %arg25[%c32_106, %c18_107], %86 {strides = array<i32>} : memref<192x40xf32, #tpu.memory_space<vmem>>, vector<16x1xf32>,
    %c0_108 = arith.constant 0 : index
    %c22_109 = arith.constant 22 : index
    %92 = vector.load %arg25[%c0_108, %c22_109] : memref<192x40xf32, #tpu.memory_space<vmem>>, vector<16x18xf32>
    tpu.vector_store %arg25[%c0_108, %c22_109], %85 {strides = array<i32>} : memref<192x40xf32, #tpu.memory_space<vmem>>, vector<16x18xf32>,
    %c16_110 = arith.constant 16 : index
    %c21_111 = arith.constant 21 : index
    %93 = vector.load %arg25[%c16_110, %c21_111] : memref<192x40xf32, #tpu.memory_space<vmem>>, vector<16x18xf32>
    tpu.vector_store %arg25[%c16_110, %c21_111], %85 {strides = array<i32>} : memref<192x40xf32, #tpu.memory_space<vmem>>, vector<16x18xf32>,
    %c32_112 = arith.constant 32 : index
    %c20_113 = arith.constant 20 : index
    %94 = vector.load %arg25[%c32_112, %c20_113] : memref<192x40xf32, #tpu.memory_space<vmem>>, vector<16x18xf32>
    tpu.vector_store %arg25[%c32_112, %c20_113], %85 {strides = array<i32>} : memref<192x40xf32, #tpu.memory_space<vmem>>, vector<16x18xf32>,
    %c0_114 = arith.constant 0 : index
    %c21_115 = arith.constant 21 : index
    %95 = vector.load %arg25[%c0_114, %c21_115] : memref<192x40xf32, #tpu.memory_space<vmem>>, vector<16x1xf32>
    tpu.vector_store %arg25[%c0_114, %c21_115], %86 {strides = array<i32>} : memref<192x40xf32, #tpu.memory_space<vmem>>, vector<16x1xf32>,
    %c32_116 = arith.constant 32 : index
    %c38_117 = arith.constant 38 : index
    %96 = vector.load %arg25[%c32_116, %c38_117] : memref<192x40xf32, #tpu.memory_space<vmem>>, vector<16x1xf32>
    tpu.vector_store %arg25[%c32_116, %c38_117], %86 {strides = array<i32>} : memref<192x40xf32, #tpu.memory_space<vmem>>, vector<16x1xf32>,
    %c0_118 = arith.constant 0 : index
    %c0_119 = arith.constant 0 : index
    %97 = vector.load %arg8[%c0_118, %c0_119] : memref<16x48xf32, #tpu.memory_space<vmem>>, vector<16x48xf32>
    %c0_120 = arith.constant 0 : index
    %c0_121 = arith.constant 0 : index
    %98 = vector.load %arg25[%c0_120, %c0_121] : memref<192x40xf32, #tpu.memory_space<vmem>>, vector<48x40xf32>
    %cst_122 = arith.constant dense<0.000000e+00> : vector<16x40xf32>
    %99 = tpu.matmul %97, %98, %cst_122 {dimension_numbers = #tpu.dot_dimension_numbers<[1], [0], [0], [1], [0, 0, 1, 1], [], []>} : vector<16x48xf32>, vector<48x40xf32>, vector<16x40xf32> -> vector<16x40xf32>
    %c0_123 = arith.constant 0 : index
    %c0_124 = arith.constant 0 : index
    %100 = vector.load %arg9[%c0_123, %c0_124] : memref<16x1xf32, #tpu.memory_space<vmem>>, vector<16x1xf32>
    %101 = vector.broadcast %100 : vector<16x1xf32> to vector<16x40xf32>
    %102 = arith.addf %99, %101 : vector<16x40xf32>
    %103 = arith.addf %83, %102 : vector<16x40xf32>
    %104 = vector.extract_strided_slice %103 {offsets = [0, 1], sizes = [16, 18], strides = [1, 1]} : vector<16x40xf32> to vector<16x18xf32>
    %105 = vector.extract_strided_slice %103 {offsets = [0, 21], sizes = [16, 18], strides = [1, 1]} : vector<16x40xf32> to vector<16x18xf32>
    %c0_125 = arith.constant 0 : index
    %c0_126 = arith.constant 0 : index
    %c0_127 = arith.constant 0 : index
    %106 = vector.load %arg22[%c0_125, %c0_126, %c0_127] : memref<2x16x18xf32, #tpu.memory_space<vmem>>, vector<1x16x18xf32>
    %107 = vector.shape_cast %106 : vector<1x16x18xf32> to vector<16x18xf32>
    %108 = vector.shape_cast %104 : vector<16x18xf32> to vector<1x16x18xf32>
    tpu.vector_store %arg22[%c0_125, %c0_126, %c0_127], %108 {strides = array<i32>} : memref<2x16x18xf32, #tpu.memory_space<vmem>>, vector<1x16x18xf32>,
    %c1_128 = arith.constant 1 : index
    %c0_129 = arith.constant 0 : index
    %c0_130 = arith.constant 0 : index
    %109 = vector.load %arg22[%c1_128, %c0_129, %c0_130] : memref<2x16x18xf32, #tpu.memory_space<vmem>>, vector<1x16x18xf32>
    %110 = vector.shape_cast %109 : vector<1x16x18xf32> to vector<16x18xf32>
    %111 = vector.shape_cast %105 : vector<16x18xf32> to vector<1x16x18xf32>
    tpu.vector_store %arg22[%c1_128, %c0_129, %c0_130], %111 {strides = array<i32>} : memref<2x16x18xf32, #tpu.memory_space<vmem>>, vector<1x16x18xf32>,
    %cst_131 = arith.constant 0.000000e+00 : f32
    %112 = vector.broadcast %cst_131 : f32 to vector<16x1xf32>
    %c0_132 = arith.constant 0 : index
    %c2_133 = arith.constant 2 : index
    %113 = vector.load %arg25[%c0_132, %c2_133] : memref<192x40xf32, #tpu.memory_space<vmem>>, vector<16x18xf32>
    tpu.vector_store %arg25[%c0_132, %c2_133], %104 {strides = array<i32>} : memref<192x40xf32, #tpu.memory_space<vmem>>, vector<16x18xf32>,
    %c16_134 = arith.constant 16 : index
    %c1_135 = arith.constant 1 : index
    %114 = vector.load %arg25[%c16_134, %c1_135] : memref<192x40xf32, #tpu.memory_space<vmem>>, vector<16x18xf32>
    tpu.vector_store %arg25[%c16_134, %c1_135], %104 {strides = array<i32>} : memref<192x40xf32, #tpu.memory_space<vmem>>, vector<16x18xf32>,
    %c32_136 = arith.constant 32 : index
    %c0_137 = arith.constant 0 : index
    %115 = vector.load %arg25[%c32_136, %c0_137] : memref<192x40xf32, #tpu.memory_space<vmem>>, vector<16x18xf32>
    tpu.vector_store %arg25[%c32_136, %c0_137], %104 {strides = array<i32>} : memref<192x40xf32, #tpu.memory_space<vmem>>, vector<16x18xf32>,
    %c0_138 = arith.constant 0 : index
    %c1_139 = arith.constant 1 : index
    %116 = vector.load %arg25[%c0_138, %c1_139] : memref<192x40xf32, #tpu.memory_space<vmem>>, vector<16x1xf32>
    tpu.vector_store %arg25[%c0_138, %c1_139], %112 {strides = array<i32>} : memref<192x40xf32, #tpu.memory_space<vmem>>, vector<16x1xf32>,
    %c32_140 = arith.constant 32 : index
    %c18_141 = arith.constant 18 : index
    %117 = vector.load %arg25[%c32_140, %c18_141] : memref<192x40xf32, #tpu.memory_space<vmem>>, vector<16x1xf32>
    tpu.vector_store %arg25[%c32_140, %c18_141], %112 {strides = array<i32>} : memref<192x40xf32, #tpu.memory_space<vmem>>, vector<16x1xf32>,
    %c0_142 = arith.constant 0 : index
    %c22_143 = arith.constant 22 : index
    %118 = vector.load %arg25[%c0_142, %c22_143] : memref<192x40xf32, #tpu.memory_space<vmem>>, vector<16x18xf32>
    tpu.vector_store %arg25[%c0_142, %c22_143], %105 {strides = array<i32>} : memref<192x40xf32, #tpu.memory_space<vmem>>, vector<16x18xf32>,
    %c16_144 = arith.constant 16 : index
    %c21_145 = arith.constant 21 : index
    %119 = vector.load %arg25[%c16_144, %c21_145] : memref<192x40xf32, #tpu.memory_space<vmem>>, vector<16x18xf32>
    tpu.vector_store %arg25[%c16_144, %c21_145], %105 {strides = array<i32>} : memref<192x40xf32, #tpu.memory_space<vmem>>, vector<16x18xf32>,
    %c32_146 = arith.constant 32 : index
    %c20_147 = arith.constant 20 : index
    %120 = vector.load %arg25[%c32_146, %c20_147] : memref<192x40xf32, #tpu.memory_space<vmem>>, vector<16x18xf32>
    tpu.vector_store %arg25[%c32_146, %c20_147], %105 {strides = array<i32>} : memref<192x40xf32, #tpu.memory_space<vmem>>, vector<16x18xf32>,
    %c0_148 = arith.constant 0 : index
    %c21_149 = arith.constant 21 : index
    %121 = vector.load %arg25[%c0_148, %c21_149] : memref<192x40xf32, #tpu.memory_space<vmem>>, vector<16x1xf32>
    tpu.vector_store %arg25[%c0_148, %c21_149], %112 {strides = array<i32>} : memref<192x40xf32, #tpu.memory_space<vmem>>, vector<16x1xf32>,
    %c32_150 = arith.constant 32 : index
    %c38_151 = arith.constant 38 : index
    %122 = vector.load %arg25[%c32_150, %c38_151] : memref<192x40xf32, #tpu.memory_space<vmem>>, vector<16x1xf32>
    tpu.vector_store %arg25[%c32_150, %c38_151], %112 {strides = array<i32>} : memref<192x40xf32, #tpu.memory_space<vmem>>, vector<16x1xf32>,
    %c0_152 = arith.constant 0 : index
    %c0_153 = arith.constant 0 : index
    %123 = vector.load %arg10[%c0_152, %c0_153] : memref<32x48xf32, #tpu.memory_space<vmem>>, vector<32x48xf32>
    %c0_154 = arith.constant 0 : index
    %c0_155 = arith.constant 0 : index
    %124 = vector.load %arg25[%c0_154, %c0_155] : memref<192x40xf32, #tpu.memory_space<vmem>>, vector<48x40xf32>
    %cst_156 = arith.constant dense<0.000000e+00> : vector<32x40xf32>
    %125 = tpu.matmul %123, %124, %cst_156 {dimension_numbers = #tpu.dot_dimension_numbers<[1], [0], [0], [1], [0, 0, 1, 1], [], []>} : vector<32x48xf32>, vector<48x40xf32>, vector<32x40xf32> -> vector<32x40xf32>
    %c0_157 = arith.constant 0 : index
    %c0_158 = arith.constant 0 : index
    %126 = vector.load %arg11[%c0_157, %c0_158] : memref<32x1xf32, #tpu.memory_space<vmem>>, vector<32x1xf32>
    %127 = vector.broadcast %126 : vector<32x1xf32> to vector<32x40xf32>
    %128 = arith.addf %125, %127 : vector<32x40xf32>
    %cst_159 = arith.constant 0.000000e+00 : f32
    %129 = vector.broadcast %cst_159 : f32 to vector<32x40xf32>
    %130 = arith.cmpf ogt, %128, %129 : vector<32x40xf32>
    %cst_160 = arith.constant 2.000000e-01 : f32
    %131 = vector.broadcast %cst_160 : f32 to vector<32x40xf32>
    %132 = arith.mulf %131, %128 : vector<32x40xf32>
    %133 = arith.select %130, %128, %132 : vector<32x40xi1>, vector<32x40xf32>
    %134 = vector.extract_strided_slice %133 {offsets = [0, 1], sizes = [32, 18], strides = [1, 1]} : vector<32x40xf32> to vector<32x18xf32>
    %135 = vector.extract_strided_slice %133 {offsets = [0, 21], sizes = [32, 18], strides = [1, 1]} : vector<32x40xf32> to vector<32x18xf32>
    %cst_161 = arith.constant 0.000000e+00 : f32
    %136 = vector.broadcast %cst_161 : f32 to vector<32x1xf32>
    %c0_162 = arith.constant 0 : index
    %c2_163 = arith.constant 2 : index
    %137 = vector.load %arg25[%c0_162, %c2_163] : memref<192x40xf32, #tpu.memory_space<vmem>>, vector<32x18xf32>
    tpu.vector_store %arg25[%c0_162, %c2_163], %134 {strides = array<i32>} : memref<192x40xf32, #tpu.memory_space<vmem>>, vector<32x18xf32>,
    %c32_164 = arith.constant 32 : index
    %c1_165 = arith.constant 1 : index
    %138 = vector.load %arg25[%c32_164, %c1_165] : memref<192x40xf32, #tpu.memory_space<vmem>>, vector<32x18xf32>
    tpu.vector_store %arg25[%c32_164, %c1_165], %134 {strides = array<i32>} : memref<192x40xf32, #tpu.memory_space<vmem>>, vector<32x18xf32>,
    %c64 = arith.constant 64 : index
    %c0_166 = arith.constant 0 : index
    %139 = vector.load %arg25[%c64, %c0_166] : memref<192x40xf32, #tpu.memory_space<vmem>>, vector<32x18xf32>
    tpu.vector_store %arg25[%c64, %c0_166], %134 {strides = array<i32>} : memref<192x40xf32, #tpu.memory_space<vmem>>, vector<32x18xf32>,
    %c0_167 = arith.constant 0 : index
    %c1_168 = arith.constant 1 : index
    %140 = vector.load %arg25[%c0_167, %c1_168] : memref<192x40xf32, #tpu.memory_space<vmem>>, vector<32x1xf32>
    tpu.vector_store %arg25[%c0_167, %c1_168], %136 {strides = array<i32>} : memref<192x40xf32, #tpu.memory_space<vmem>>, vector<32x1xf32>,
    %c64_169 = arith.constant 64 : index
    %c18_170 = arith.constant 18 : index
    %141 = vector.load %arg25[%c64_169, %c18_170] : memref<192x40xf32, #tpu.memory_space<vmem>>, vector<32x1xf32>
    tpu.vector_store %arg25[%c64_169, %c18_170], %136 {strides = array<i32>} : memref<192x40xf32, #tpu.memory_space<vmem>>, vector<32x1xf32>,
    %c0_171 = arith.constant 0 : index
    %c22_172 = arith.constant 22 : index
    %142 = vector.load %arg25[%c0_171, %c22_172] : memref<192x40xf32, #tpu.memory_space<vmem>>, vector<32x18xf32>
    tpu.vector_store %arg25[%c0_171, %c22_172], %135 {strides = array<i32>} : memref<192x40xf32, #tpu.memory_space<vmem>>, vector<32x18xf32>,
    %c32_173 = arith.constant 32 : index
    %c21_174 = arith.constant 21 : index
    %143 = vector.load %arg25[%c32_173, %c21_174] : memref<192x40xf32, #tpu.memory_space<vmem>>, vector<32x18xf32>
    tpu.vector_store %arg25[%c32_173, %c21_174], %135 {strides = array<i32>} : memref<192x40xf32, #tpu.memory_space<vmem>>, vector<32x18xf32>,
    %c64_175 = arith.constant 64 : index
    %c20_176 = arith.constant 20 : index
    %144 = vector.load %arg25[%c64_175, %c20_176] : memref<192x40xf32, #tpu.memory_space<vmem>>, vector<32x18xf32>
    tpu.vector_store %arg25[%c64_175, %c20_176], %135 {strides = array<i32>} : memref<192x40xf32, #tpu.memory_space<vmem>>, vector<32x18xf32>,
    %c0_177 = arith.constant 0 : index
    %c21_178 = arith.constant 21 : index
    %145 = vector.load %arg25[%c0_177, %c21_178] : memref<192x40xf32, #tpu.memory_space<vmem>>, vector<32x1xf32>
    tpu.vector_store %arg25[%c0_177, %c21_178], %136 {strides = array<i32>} : memref<192x40xf32, #tpu.memory_space<vmem>>, vector<32x1xf32>,
    %c64_179 = arith.constant 64 : index
    %c38_180 = arith.constant 38 : index
    %146 = vector.load %arg25[%c64_179, %c38_180] : memref<192x40xf32, #tpu.memory_space<vmem>>, vector<32x1xf32>
    tpu.vector_store %arg25[%c64_179, %c38_180], %136 {strides = array<i32>} : memref<192x40xf32, #tpu.memory_space<vmem>>, vector<32x1xf32>,
    %c0_181 = arith.constant 0 : index
    %c0_182 = arith.constant 0 : index
    %147 = vector.load %arg12[%c0_181, %c0_182] : memref<32x96xf32, #tpu.memory_space<vmem>>, vector<32x96xf32>
    %c0_183 = arith.constant 0 : index
    %c0_184 = arith.constant 0 : index
    %148 = vector.load %arg25[%c0_183, %c0_184] : memref<192x40xf32, #tpu.memory_space<vmem>>, vector<96x40xf32>
    %cst_185 = arith.constant dense<0.000000e+00> : vector<32x40xf32>
    %149 = tpu.matmul %147, %148, %cst_185 {dimension_numbers = #tpu.dot_dimension_numbers<[1], [0], [0], [1], [0, 0, 1, 1], [], []>} : vector<32x96xf32>, vector<96x40xf32>, vector<32x40xf32> -> vector<32x40xf32>
    %c0_186 = arith.constant 0 : index
    %c0_187 = arith.constant 0 : index
    %150 = vector.load %arg13[%c0_186, %c0_187] : memref<32x1xf32, #tpu.memory_space<vmem>>, vector<32x1xf32>
    %151 = vector.broadcast %150 : vector<32x1xf32> to vector<32x40xf32>
    %152 = arith.addf %149, %151 : vector<32x40xf32>
    %153 = arith.addf %133, %152 : vector<32x40xf32>
    %154 = vector.extract_strided_slice %153 {offsets = [0, 1], sizes = [32, 18], strides = [1, 1]} : vector<32x40xf32> to vector<32x18xf32>
    %155 = vector.extract_strided_slice %153 {offsets = [0, 21], sizes = [32, 18], strides = [1, 1]} : vector<32x40xf32> to vector<32x18xf32>
    %c0_188 = arith.constant 0 : index
    %c0_189 = arith.constant 0 : index
    %c0_190 = arith.constant 0 : index
    %156 = vector.load %arg23[%c0_188, %c0_189, %c0_190] : memref<2x32x18xf32, #tpu.memory_space<vmem>>, vector<1x32x18xf32>
    %157 = vector.shape_cast %156 : vector<1x32x18xf32> to vector<32x18xf32>
    %158 = vector.shape_cast %154 : vector<32x18xf32> to vector<1x32x18xf32>
    tpu.vector_store %arg23[%c0_188, %c0_189, %c0_190], %158 {strides = array<i32>} : memref<2x32x18xf32, #tpu.memory_space<vmem>>, vector<1x32x18xf32>,
    %c1_191 = arith.constant 1 : index
    %c0_192 = arith.constant 0 : index
    %c0_193 = arith.constant 0 : index
    %159 = vector.load %arg23[%c1_191, %c0_192, %c0_193] : memref<2x32x18xf32, #tpu.memory_space<vmem>>, vector<1x32x18xf32>
    %160 = vector.shape_cast %159 : vector<1x32x18xf32> to vector<32x18xf32>
    %161 = vector.shape_cast %155 : vector<32x18xf32> to vector<1x32x18xf32>
    tpu.vector_store %arg23[%c1_191, %c0_192, %c0_193], %161 {strides = array<i32>} : memref<2x32x18xf32, #tpu.memory_space<vmem>>, vector<1x32x18xf32>,
    %cst_194 = arith.constant 0.000000e+00 : f32
    %162 = vector.broadcast %cst_194 : f32 to vector<32x1xf32>
    %c0_195 = arith.constant 0 : index
    %c2_196 = arith.constant 2 : index
    %163 = vector.load %arg25[%c0_195, %c2_196] : memref<192x40xf32, #tpu.memory_space<vmem>>, vector<32x18xf32>
    tpu.vector_store %arg25[%c0_195, %c2_196], %154 {strides = array<i32>} : memref<192x40xf32, #tpu.memory_space<vmem>>, vector<32x18xf32>,
    %c32_197 = arith.constant 32 : index
    %c1_198 = arith.constant 1 : index
    %164 = vector.load %arg25[%c32_197, %c1_198] : memref<192x40xf32, #tpu.memory_space<vmem>>, vector<32x18xf32>
    tpu.vector_store %arg25[%c32_197, %c1_198], %154 {strides = array<i32>} : memref<192x40xf32, #tpu.memory_space<vmem>>, vector<32x18xf32>,
    %c64_199 = arith.constant 64 : index
    %c0_200 = arith.constant 0 : index
    %165 = vector.load %arg25[%c64_199, %c0_200] : memref<192x40xf32, #tpu.memory_space<vmem>>, vector<32x18xf32>
    tpu.vector_store %arg25[%c64_199, %c0_200], %154 {strides = array<i32>} : memref<192x40xf32, #tpu.memory_space<vmem>>, vector<32x18xf32>,
    %c0_201 = arith.constant 0 : index
    %c1_202 = arith.constant 1 : index
    %166 = vector.load %arg25[%c0_201, %c1_202] : memref<192x40xf32, #tpu.memory_space<vmem>>, vector<32x1xf32>
    tpu.vector_store %arg25[%c0_201, %c1_202], %162 {strides = array<i32>} : memref<192x40xf32, #tpu.memory_space<vmem>>, vector<32x1xf32>,
    %c64_203 = arith.constant 64 : index
    %c18_204 = arith.constant 18 : index
    %167 = vector.load %arg25[%c64_203, %c18_204] : memref<192x40xf32, #tpu.memory_space<vmem>>, vector<32x1xf32>
    tpu.vector_store %arg25[%c64_203, %c18_204], %162 {strides = array<i32>} : memref<192x40xf32, #tpu.memory_space<vmem>>, vector<32x1xf32>,
    %c0_205 = arith.constant 0 : index
    %c22_206 = arith.constant 22 : index
    %168 = vector.load %arg25[%c0_205, %c22_206] : memref<192x40xf32, #tpu.memory_space<vmem>>, vector<32x18xf32>
    tpu.vector_store %arg25[%c0_205, %c22_206], %155 {strides = array<i32>} : memref<192x40xf32, #tpu.memory_space<vmem>>, vector<32x18xf32>,
    %c32_207 = arith.constant 32 : index
    %c21_208 = arith.constant 21 : index
    %169 = vector.load %arg25[%c32_207, %c21_208] : memref<192x40xf32, #tpu.memory_space<vmem>>, vector<32x18xf32>
    tpu.vector_store %arg25[%c32_207, %c21_208], %155 {strides = array<i32>} : memref<192x40xf32, #tpu.memory_space<vmem>>, vector<32x18xf32>,
    %c64_209 = arith.constant 64 : index
    %c20_210 = arith.constant 20 : index
    %170 = vector.load %arg25[%c64_209, %c20_210] : memref<192x40xf32, #tpu.memory_space<vmem>>, vector<32x18xf32>
    tpu.vector_store %arg25[%c64_209, %c20_210], %155 {strides = array<i32>} : memref<192x40xf32, #tpu.memory_space<vmem>>, vector<32x18xf32>,
    %c0_211 = arith.constant 0 : index
    %c21_212 = arith.constant 21 : index
    %171 = vector.load %arg25[%c0_211, %c21_212] : memref<192x40xf32, #tpu.memory_space<vmem>>, vector<32x1xf32>
    tpu.vector_store %arg25[%c0_211, %c21_212], %162 {strides = array<i32>} : memref<192x40xf32, #tpu.memory_space<vmem>>, vector<32x1xf32>,
    %c64_213 = arith.constant 64 : index
    %c38_214 = arith.constant 38 : index
    %172 = vector.load %arg25[%c64_213, %c38_214] : memref<192x40xf32, #tpu.memory_space<vmem>>, vector<32x1xf32>
    tpu.vector_store %arg25[%c64_213, %c38_214], %162 {strides = array<i32>} : memref<192x40xf32, #tpu.memory_space<vmem>>, vector<32x1xf32>,
    %c0_215 = arith.constant 0 : index
    %c0_216 = arith.constant 0 : index
    %173 = vector.load %arg14[%c0_215, %c0_216] : memref<64x96xf32, #tpu.memory_space<vmem>>, vector<64x96xf32>
    %c0_217 = arith.constant 0 : index
    %c0_218 = arith.constant 0 : index
    %174 = vector.load %arg25[%c0_217, %c0_218] : memref<192x40xf32, #tpu.memory_space<vmem>>, vector<96x40xf32>
    %cst_219 = arith.constant dense<0.000000e+00> : vector<64x40xf32>
    %175 = tpu.matmul %173, %174, %cst_219 {dimension_numbers = #tpu.dot_dimension_numbers<[1], [0], [0], [1], [0, 0, 1, 1], [], []>} : vector<64x96xf32>, vector<96x40xf32>, vector<64x40xf32> -> vector<64x40xf32>
    %c0_220 = arith.constant 0 : index
    %c0_221 = arith.constant 0 : index
    %176 = vector.load %arg15[%c0_220, %c0_221] : memref<64x1xf32, #tpu.memory_space<vmem>>, vector<64x1xf32>
    %177 = vector.broadcast %176 : vector<64x1xf32> to vector<64x40xf32>
    %178 = arith.addf %175, %177 : vector<64x40xf32>
    %cst_222 = arith.constant 0.000000e+00 : f32
    %179 = vector.broadcast %cst_222 : f32 to vector<64x40xf32>
    %180 = arith.cmpf ogt, %178, %179 : vector<64x40xf32>
    %cst_223 = arith.constant 2.000000e-01 : f32
    %181 = vector.broadcast %cst_223 : f32 to vector<64x40xf32>
    %182 = arith.mulf %181, %178 : vector<64x40xf32>
    %183 = arith.select %180, %178, %182 : vector<64x40xi1>, vector<64x40xf32>
    %184 = vector.extract_strided_slice %183 {offsets = [0, 1], sizes = [64, 18], strides = [1, 1]} : vector<64x40xf32> to vector<64x18xf32>
    %185 = vector.extract_strided_slice %183 {offsets = [0, 21], sizes = [64, 18], strides = [1, 1]} : vector<64x40xf32> to vector<64x18xf32>
    %cst_224 = arith.constant 0.000000e+00 : f32
    %186 = vector.broadcast %cst_224 : f32 to vector<64x1xf32>
    %c0_225 = arith.constant 0 : index
    %c2_226 = arith.constant 2 : index
    %187 = vector.load %arg25[%c0_225, %c2_226] : memref<192x40xf32, #tpu.memory_space<vmem>>, vector<64x18xf32>
    tpu.vector_store %arg25[%c0_225, %c2_226], %184 {strides = array<i32>} : memref<192x40xf32, #tpu.memory_space<vmem>>, vector<64x18xf32>,
    %c64_227 = arith.constant 64 : index
    %c1_228 = arith.constant 1 : index
    %188 = vector.load %arg25[%c64_227, %c1_228] : memref<192x40xf32, #tpu.memory_space<vmem>>, vector<64x18xf32>
    tpu.vector_store %arg25[%c64_227, %c1_228], %184 {strides = array<i32>} : memref<192x40xf32, #tpu.memory_space<vmem>>, vector<64x18xf32>,
    %c128 = arith.constant 128 : index
    %c0_229 = arith.constant 0 : index
    %189 = vector.load %arg25[%c128, %c0_229] : memref<192x40xf32, #tpu.memory_space<vmem>>, vector<64x18xf32>
    tpu.vector_store %arg25[%c128, %c0_229], %184 {strides = array<i32>} : memref<192x40xf32, #tpu.memory_space<vmem>>, vector<64x18xf32>,
    %c0_230 = arith.constant 0 : index
    %c1_231 = arith.constant 1 : index
    %190 = vector.load %arg25[%c0_230, %c1_231] : memref<192x40xf32, #tpu.memory_space<vmem>>, vector<64x1xf32>
    tpu.vector_store %arg25[%c0_230, %c1_231], %186 {strides = array<i32>} : memref<192x40xf32, #tpu.memory_space<vmem>>, vector<64x1xf32>,
    %c128_232 = arith.constant 128 : index
    %c18_233 = arith.constant 18 : index
    %191 = vector.load %arg25[%c128_232, %c18_233] : memref<192x40xf32, #tpu.memory_space<vmem>>, vector<64x1xf32>
    tpu.vector_store %arg25[%c128_232, %c18_233], %186 {strides = array<i32>} : memref<192x40xf32, #tpu.memory_space<vmem>>, vector<64x1xf32>,
    %c0_234 = arith.constant 0 : index
    %c22_235 = arith.constant 22 : index
    %192 = vector.load %arg25[%c0_234, %c22_235] : memref<192x40xf32, #tpu.memory_space<vmem>>, vector<64x18xf32>
    tpu.vector_store %arg25[%c0_234, %c22_235], %185 {strides = array<i32>} : memref<192x40xf32, #tpu.memory_space<vmem>>, vector<64x18xf32>,
    %c64_236 = arith.constant 64 : index
    %c21_237 = arith.constant 21 : index
    %193 = vector.load %arg25[%c64_236, %c21_237] : memref<192x40xf32, #tpu.memory_space<vmem>>, vector<64x18xf32>
    tpu.vector_store %arg25[%c64_236, %c21_237], %185 {strides = array<i32>} : memref<192x40xf32, #tpu.memory_space<vmem>>, vector<64x18xf32>,
    %c128_238 = arith.constant 128 : index
    %c20_239 = arith.constant 20 : index
    %194 = vector.load %arg25[%c128_238, %c20_239] : memref<192x40xf32, #tpu.memory_space<vmem>>, vector<64x18xf32>
    tpu.vector_store %arg25[%c128_238, %c20_239], %185 {strides = array<i32>} : memref<192x40xf32, #tpu.memory_space<vmem>>, vector<64x18xf32>,
    %c0_240 = arith.constant 0 : index
    %c21_241 = arith.constant 21 : index
    %195 = vector.load %arg25[%c0_240, %c21_241] : memref<192x40xf32, #tpu.memory_space<vmem>>, vector<64x1xf32>
    tpu.vector_store %arg25[%c0_240, %c21_241], %186 {strides = array<i32>} : memref<192x40xf32, #tpu.memory_space<vmem>>, vector<64x1xf32>,
    %c128_242 = arith.constant 128 : index
    %c38_243 = arith.constant 38 : index
    %196 = vector.load %arg25[%c128_242, %c38_243] : memref<192x40xf32, #tpu.memory_space<vmem>>, vector<64x1xf32>
    tpu.vector_store %arg25[%c128_242, %c38_243], %186 {strides = array<i32>} : memref<192x40xf32, #tpu.memory_space<vmem>>, vector<64x1xf32>,
    %c0_244 = arith.constant 0 : index
    %c0_245 = arith.constant 0 : index
    %197 = vector.load %arg16[%c0_244, %c0_245] : memref<64x192xf32, #tpu.memory_space<vmem>>, vector<64x192xf32>
    %c0_246 = arith.constant 0 : index
    %c0_247 = arith.constant 0 : index
    %198 = vector.load %arg25[%c0_246, %c0_247] : memref<192x40xf32, #tpu.memory_space<vmem>>, vector<192x40xf32>
    %cst_248 = arith.constant dense<0.000000e+00> : vector<64x40xf32>
    %199 = tpu.matmul %197, %198, %cst_248 {dimension_numbers = #tpu.dot_dimension_numbers<[1], [0], [0], [1], [0, 0, 1, 1], [], []>} : vector<64x192xf32>, vector<192x40xf32>, vector<64x40xf32> -> vector<64x40xf32>
    %c0_249 = arith.constant 0 : index
    %c0_250 = arith.constant 0 : index
    %200 = vector.load %arg17[%c0_249, %c0_250] : memref<64x1xf32, #tpu.memory_space<vmem>>, vector<64x1xf32>
    %201 = vector.broadcast %200 : vector<64x1xf32> to vector<64x40xf32>
    %202 = arith.addf %199, %201 : vector<64x40xf32>
    %203 = arith.addf %183, %202 : vector<64x40xf32>
    %204 = vector.extract_strided_slice %203 {offsets = [0, 1], sizes = [64, 18], strides = [1, 1]} : vector<64x40xf32> to vector<64x18xf32>
    %205 = vector.extract_strided_slice %203 {offsets = [0, 21], sizes = [64, 18], strides = [1, 1]} : vector<64x40xf32> to vector<64x18xf32>
    %c0_251 = arith.constant 0 : index
    %c0_252 = arith.constant 0 : index
    %c0_253 = arith.constant 0 : index
    %206 = vector.load %arg24[%c0_251, %c0_252, %c0_253] : memref<2x64x18xf32, #tpu.memory_space<vmem>>, vector<1x64x18xf32>
    %207 = vector.shape_cast %206 : vector<1x64x18xf32> to vector<64x18xf32>
    %208 = vector.shape_cast %204 : vector<64x18xf32> to vector<1x64x18xf32>
    tpu.vector_store %arg24[%c0_251, %c0_252, %c0_253], %208 {strides = array<i32>} : memref<2x64x18xf32, #tpu.memory_space<vmem>>, vector<1x64x18xf32>,
    %c1_254 = arith.constant 1 : index
    %c0_255 = arith.constant 0 : index
    %c0_256 = arith.constant 0 : index
    %209 = vector.load %arg24[%c1_254, %c0_255, %c0_256] : memref<2x64x18xf32, #tpu.memory_space<vmem>>, vector<1x64x18xf32>
    %210 = vector.shape_cast %209 : vector<1x64x18xf32> to vector<64x18xf32>
    %211 = vector.shape_cast %205 : vector<64x18xf32> to vector<1x64x18xf32>
    tpu.vector_store %arg24[%c1_254, %c0_255, %c0_256], %211 {strides = array<i32>} : memref<2x64x18xf32, #tpu.memory_space<vmem>>, vector<1x64x18xf32>,
    %c0_257 = arith.constant 0 : index
    %c0_258 = arith.constant 0 : index
    %212 = vector.load %arg18[%c0_257, %c0_258] : memref<64x18xf32, #tpu.memory_space<vmem>>, vector<64x18xf32>
    %213 = tpu.iota {dimensions = array<i32: 0>} : vector<2x1xi32>
    %cst_259 = arith.constant 0.000000e+00 : f32
    %214 = vector.broadcast %cst_259 : f32 to vector<2x1xf32>
    %215 = arith.mulf %204, %212 : vector<64x18xf32>
    %cst_260 = arith.constant dense<0.000000e+00> : vector<64xf32>
    %216 = vector.multi_reduction <add>, %215, %cst_260 [1] : vector<64x18xf32> to vector<64xf32>
    %217 = vector.shape_cast %216 : vector<64xf32> to vector<64x1xf32>
    %cst_261 = arith.constant dense<0.000000e+00> : vector<1xf32>
    %218 = vector.multi_reduction <add>, %217, %cst_261 [0] : vector<64x1xf32> to vector<1xf32>
    %219 = vector.shape_cast %218 : vector<1xf32> to vector<1x1xf32>
    %c0_i32 = arith.constant 0 : i32
    %220 = vector.broadcast %c0_i32 : i32 to vector<2x1xi32>
    %221 = arith.cmpi eq, %213, %220 : vector<2x1xi32>
    %222 = vector.shape_cast %219 : vector<1x1xf32> to vector<1x1xf32>
    %223 = vector.broadcast %222 : vector<1x1xf32> to vector<2x1xf32>
    %224 = arith.select %221, %223, %214 : vector<2x1xi1>, vector<2x1xf32>
    %225 = arith.mulf %205, %212 : vector<64x18xf32>
    %cst_262 = arith.constant dense<0.000000e+00> : vector<64xf32>
    %226 = vector.multi_reduction <add>, %225, %cst_262 [1] : vector<64x18xf32> to vector<64xf32>
    %227 = vector.shape_cast %226 : vector<64xf32> to vector<64x1xf32>
    %cst_263 = arith.constant dense<0.000000e+00> : vector<1xf32>
    %228 = vector.multi_reduction <add>, %227, %cst_263 [0] : vector<64x1xf32> to vector<1xf32>
    %229 = vector.shape_cast %228 : vector<1xf32> to vector<1x1xf32>
    %c1_i32 = arith.constant 1 : i32
    %230 = vector.broadcast %c1_i32 : i32 to vector<2x1xi32>
    %231 = arith.cmpi eq, %213, %230 : vector<2x1xi32>
    %232 = vector.shape_cast %229 : vector<1x1xf32> to vector<1x1xf32>
    %233 = vector.broadcast %232 : vector<1x1xf32> to vector<2x1xf32>
    %234 = arith.select %231, %233, %224 : vector<2x1xi1>, vector<2x1xf32>
    %c0_264 = arith.constant 0 : index
    %c0_265 = arith.constant 0 : index
    %235 = vector.load %arg19[%c0_264, %c0_265] : memref<1x1xf32, #tpu.memory_space<vmem>>, vector<1x1xf32>
    %236 = vector.broadcast %235 : vector<1x1xf32> to vector<2x1xf32>
    %237 = arith.addf %234, %236 : vector<2x1xf32>
    %c0_266 = arith.constant 0 : index
    %c0_267 = arith.constant 0 : index
    %238 = vector.load %arg20[%c0_266, %c0_267] : memref<2x1xf32, #tpu.memory_space<vmem>>, vector<2x1xf32>
    tpu.vector_store %arg20[%c0_266, %c0_267], %237 {strides = array<i32>} : memref<2x1xf32, #tpu.memory_space<vmem>>, vector<2x1xf32>,
    return
  }
}

</mosaic_0001>

<bundles_post_ra>
// kernel: multi_discriminator_forward.5
= control target key start
LH: loop header
LB: loop body
LE: loop exit
PB: predicated region body
PF: predicated region fallthrough
CT: control target
= control target key end

     0   :  { %vm72_vm0 = vcmask 64512   ;;  %v1656_v5 = vmov 0.0   ;;  %vm116_vm1 = vcmask 11264   ;;  %vm120_vm2 = vcmask 19472   ;;  %s1658_s25 = smov 6   ;;  %s2818_s0 = inlined_call_operand.vmem [shape: f32[2,4,2], index: 0, kind: input, shape index: {}]   ;;  %s2819_s1 = inlined_call_operand.vmem [shape: f32[2,4,2], index: 1, kind: input, shape index: {}]   ;;  %s2820_s3 = inlined_call_operand.vmem [shape: f32[8,1], index: 3, kind: input, shape index: {}]   ;;  %s2821_s5 = inlined_call_operand.vmem [shape: f32[8,1], index: 5, kind: input, shape index: {}]   ;;  %s2822_s7 = inlined_call_operand.vmem [shape: f32[16,1], index: 7, kind: input, shape index: {}]   ;;  %s2823_s2 = inlined_call_operand.vmem [shape: f32[8,24], index: 2, kind: input, shape index: {}]   ;;  %s2824_s4 = inlined_call_operand.vmem [shape: f32[8,24], index: 4, kind: input, shape index: {}]   ;;  %s2825_s9 = inlined_call_operand.vmem [shape: f32[16,1], index: 9, kind: input, shape index: {}]   ;;  %s2826_s21 = inlined_call_operand.vmem [shape: f32[2,8,2], index: 21, kind: output, shape index: {1}]   ;;  %s2827_s6 = inlined_call_operand.vmem [shape: f32[16,24], index: 6, kind: input, shape index: {}]   ;;  %s2828_s8 = inlined_call_operand.vmem [shape: f32[16,48], index: 8, kind: input, shape index: {}]   ;;  %s2829_s11 = inlined_call_operand.vmem [shape: f32[32,1], index: 11, kind: input, shape index: {}]   ;;  %s2830_s22 = inlined_call_operand.vmem [shape: f32[2,16,2], index: 22, kind: output, shape index: {2}]   ;;  %s2831_s10 = inlined_call_operand.vmem [shape: f32[32,48], index: 10, kind: input, shape index: {}]   ;;  %s2832_s13 = inlined_call_operand.vmem [shape: f32[32,1], index: 13, kind: input, shape index: {}]   ;;  %s2833_s12 = inlined_call_operand.vmem [shape: f32[32,96], index: 12, kind: input, shape index: {}]   ;;  %s2834_s15 = inlined_call_operand.vmem [shape: f32[64,1], index: 15, kind: input, shape index: {}]   ;;  %s2835_s23 = inlined_call_operand.vmem [shape: f32[2,32,2], index: 23, kind: output, shape index: {3}]   ;;  %s2836_s14 = inlined_call_operand.vmem [shape: f32[64,96], index: 14, kind: input, shape index: {}]   ;;  %s2837_s17 = inlined_call_operand.vmem [shape: f32[64,1], index: 17, kind: input, shape index: {}]   ;;  %s2838_s18 = inlined_call_operand.vmem [shape: f32[64,2], index: 18, kind: input, shape index: {}]   ;;  %s2839_s16 = inlined_call_operand.vmem [shape: f32[64,192], index: 16, kind: input, shape index: {}]   ;;  %s2840_s24 = inlined_call_operand.vmem [shape: f32[2,64,2], index: 24, kind: output, shape index: {4}]   ;;  %s2841_s19 = inlined_call_operand.<no memory space> [shape: f32[1,1], index: 19, kind: input, shape index: {}]   ;;  %s2842_s20 = inlined_call_operand.vmem [shape: f32[2,1], index: 20, kind: output, shape index: {0}]  }
   0x1   :  { %2848 = sst [smem:[#allocation4_spill]] %s2818_s0  ;;  %75 = vst.msk [vmem:[#allocation2 + $0x10] sm:$0xff] %vm72_vm0, %v1656_v5  ;;  %v1662_v8 = vmov 0   ;;  %vm136_vm3 = vcmask 44064   ;;  %vm140_vm4 = vcmask 52272   ;;  %vm114_vm5 = vcmask 19464  }
   0x2   :  { %2849 = sst [smem:[#allocation5_spill]] %s2819_s1  ;;  %73 = vst.msk [vmem:[#allocation2] sm:$0xff] %vm72_vm0, %v1656_v5  ;;  %s1661_s1 = smov 5   ;;  %1652 = vset.pattern.permute.xlu2 %v1662_v8  ;;  %1653 = vset.pattern.permute.xlu0 %v1662_v8  ;;  %vm109_vm6 = vcmask 27664   ;;  %vm131_vm7 = vcmask 52264   ;;  %vm118_vm8 = vcmask 11272  }
   0x3   :  { %2850 = sst [smem:[#allocation6_spill]] %s2820_s3  ;;  %74 = vst.msk [vmem:[#allocation2 + $0x8] sm:$0xff] %vm72_vm0, %v1656_v5  ;;  %1654 = vset.pattern.permute.xlu1 %v1662_v8  ;;  %vm126_vm9 = vcmask 60464   ;;  %vm138_vm10 = vcmask 44072   ;;  %vm152_vm11 = vcmask 195584   ;;  %vm185_vm13 = vcmask 23560  }
   0x4   :  { %2851 = sst [smem:[#allocation7_spill]] %s2821_s5  ;;  %s1657_s5 = smov 4   ;;  %76 = vst.msk [vmem:[#allocation2 + $0x18] sm:$0xff] %vm72_vm0, %v1656_v5  ;;  %vm198_vm14 = vcmask 56360   ;;  %vm183_vm15 = vcmask 31760   ;;  %v263_v42 = vld [vmem:[%s2827_s6] sm:$0xff] }
   0x5   :  { %2852 = sst [smem:[#allocation8_spill]] %s2822_s7  ;;  %77 = vst.msk [vmem:[#allocation2 + $0x20] sm:$0xff] %vm72_vm0, %v1656_v5  ;;  %s1660_s7 = smov 2   ;;  %v264_v43 = vld [vmem:[%s2827_s6 + $0x8] sm:$0xff] }
   0x6   :  { %2853 = sst [smem:[#allocation9_spill]] %s2823_s2  ;;  %78 = vst.msk [vmem:[#allocation2 + $0x28] sm:$0xff] %vm72_vm0, %v1656_v5 }
   0x7   :  { %2854 = sst [smem:[#allocation10_spill]] %s2824_s4  ;;  %79 = vst.msk [vmem:[#allocation2 + $0x30] sm:$0xff] %vm72_vm0, %v1656_v5 }
   0x8   :  { %2855 = sst [smem:[#allocation11_spill]] %s2825_s9  ;;  %80 = vst.msk [vmem:[#allocation2 + $0x38] sm:$0xff] %vm72_vm0, %v1656_v5 }
   0x9   :  { %2856 = sst [smem:[#allocation12_spill]] %s2826_s21  ;;  %s1659_s21 = smov 1   ;;  %81 = vst.msk [vmem:[#allocation2 + $0x40] sm:$0xff] %vm72_vm0, %v1656_v5 }
   0xa   :  { %s2857_s27 = sld [smem:[#allocation4_spill]]  ;;  %82 = vst.msk [vmem:[#allocation2 + $0x48] sm:$0xff] %vm72_vm0, %v1656_v5 }
   0xb   :  { %s2858_s3 = sld [smem:[#allocation5_spill]]  ;;  %83 = vst.msk [vmem:[#allocation2 + $0x50] sm:$0xff] %vm72_vm0, %v1656_v5 }
   0xc   :  { %84 = vst.msk [vmem:[#allocation2 + $0x58] sm:$0xff] %vm72_vm0, %v1656_v5  ;;  %s2861_s9 = sld [smem:[#allocation8_spill]] }
   0xd   :  { %85 = vst.msk [vmem:[#allocation2 + $0x60] sm:$0xff] %vm72_vm0, %v1656_v5  ;;  %s2864_s0 = sld [smem:[#allocation11_spill]] }
   0xe   :  { %86 = vst.msk [vmem:[#allocation2 + $0x68] sm:$0xff] %vm72_vm0, %v1656_v5 }
   0xf   :  { %87 = vst.msk [vmem:[#allocation2 + $0x70] sm:$0xff] %vm72_vm0, %v1656_v5 }
  0x10   :  { %v1596_v0 = vld [vmem:[%s2857_s27 + $0x4] sm:$0xf]  ;;  %v97_v2 = vld [vmem:[%s2857_s27] sm:$0xf]  ;;  %88 = vst.msk [vmem:[#allocation2 + $0x78] sm:$0xff] %vm72_vm0, %v1656_v5  ;;  %s2859_s27 = sld [smem:[#allocation6_spill]] }
  0x11   :  { %v1597_v1 = vld [vmem:[%s2858_s3 + $0x4] sm:$0xf]  ;;  %v98_v4 = vld [vmem:[%s2858_s3] sm:$0xf]  ;;  %89 = vst.msk [vmem:[#allocation2 + $0x80] sm:$0xff] %vm72_vm0, %v1656_v5  ;;  %s2860_s3 = sld [smem:[#allocation7_spill]] }
  0x12   :  { %v104_v3 = vadd.f32 %v1597_v1, %v1596_v0  ;;  %v99_v6 = vadd.f32 %v98_v4, %v97_v2  ;;  %90 = vst.msk [vmem:[#allocation2 + $0x88] sm:$0xff] %vm72_vm0, %v1656_v5  ;;  %v269_v12 = vld [vmem:[%s2861_s9 + $0x8] sm:$0xff]  ;;  %v268_v35 = vld [vmem:[%s2861_s9] sm:$0xff] }
  0x13   :  { %91 = vst.msk [vmem:[#allocation2 + $0x90] sm:$0xff] %vm72_vm0, %v1656_v5  ;;  %v358_v38 = vld [vmem:[%s2864_s0 + $0x8] sm:$0xff]  ;;  %v357_v56 = vld [vmem:[%s2864_s0] sm:$0xff] }
  0x14   :  { %133 = vrot.lane.b32.xlu0 %v104_v3, %s1657_s5  ;;  %123 = vrot.lane.b32.xlu2 %v104_v3, %s1658_s25  ;;  %117 = vst.msk [vmem:[#allocation2 + $0x10] sm:$0xf] %vm116_vm1, %v99_v6  ;;  %s2862_s25 = sld [smem:[#allocation9_spill]]  ;;  %vm196_vm1 = vcmask 64560   ;;  %v349_v1 = vld [vmem:[%s2828_s8] sm:$0xff]  ;;  %v350_v2 = vld [vmem:[%s2828_s8 + $0x8] sm:$0xff] }
  0x15   :  { %111 = vrot.lane.b32.xlu1 %v99_v6, %s1659_s21  ;;  %121 = vst.msk [vmem:[#allocation2 + $0x10] sm:$0xf] %vm120_vm2, %v1656_v5  ;;  %vm202_vm2 = vcmask 48168   ;;  %s2865_s5 = sld [smem:[#allocation12_spill]] }
  0x16   :  { %92 = vst.msk [vmem:[#allocation2 + $0x98] sm:$0xff] %vm72_vm0, %v1656_v5  ;;  %v146_v7 = vld [vmem:[%s2859_s27] sm:$0xff]  ;;  %s2863_s27 = sld [smem:[#allocation10_spill]] }
  0x17   :  { %93 = vst.msk [vmem:[#allocation2 + $0xa0] sm:$0xff] %vm72_vm0, %v1656_v5  ;;  %v210_v9 = vld [vmem:[%s2860_s3] sm:$0xff] }
  0x18   :  { %94 = vst.msk [vmem:[#allocation2 + $0xa8] sm:$0xff] %vm72_vm0, %v1656_v5 }
  0x19   :  { %95 = vst.msk [vmem:[#allocation2 + $0xb0] sm:$0xff] %vm72_vm0, %v1656_v5 }
  0x1a   :  { %96 = vst.msk [vmem:[#allocation2 + $0xb8] sm:$0xff] %vm72_vm0, %v1656_v5  ;;  %v142_v18 = vld [vmem:[%s2862_s25] sm:$0xff]  ;;  %vm192_vm0 = vcmask 15368  }
  0x1c   :  { %106 = vrot.lane.b32.xlu0 %v99_v6, %s1660_s7  ;;  %149 = vperm.xlu2 %1652, %v146_v7   ;;  %s1663_s7 = smov 127   ;;  %v206_v30 = vld [vmem:[%s2863_s27] sm:$0xff] }
  0x1d   :  { %128 = vrot.lane.b32.xlu1 %v104_v3, %s1661_s1 }
  0x24   :  { %213 = vperm.xlu2 %1652, %v210_v9  }
  0x2c   :  { %277 = vperm.xlu2 %1652, %v269_v12   ;;  %v459_v12 = vld [vmem:[%s2829_s11 + $0x18] sm:$0xff] }
  0x6e   :  { %v124_v15 = vpop.permute.xlu2 %123 }
  0x76   :  { %v150_v20 = vpop.permute.xlu2 %149 }
  0x7e   :  { %v214_v31 = vpop.permute.xlu2 %213 }
  0x86   :  { %v134_v10 = vpop.permute.xlu0 %133  ;;  %v278_v49 = vpop.permute.xlu2 %277 }
  0x87   :  { %137 = vst.msk [vmem:[#allocation2 + $0x10] sm:$0xf] %vm136_vm3, %v134_v10  ;;  %v112_v11 = vpop.permute.xlu1 %111  ;;  %vm190_vm3 = vcmask 15360  }
  0x88   :  { %141 = vst.msk [vmem:[#allocation2 + $0x10] sm:$0xf] %vm140_vm4, %v1656_v5  ;;  %vm194_vm4 = vcmask 23568  }
  0x89   :  { %115 = vst.msk [vmem:[#allocation2 + $0x8] sm:$0xf] %vm114_vm5, %v112_v11  ;;  %vm200_vm5 = vcmask 48160  }
  0x8e   :  { %v107_v13 = vpop.permute.xlu0 %106 }
  0x8f   :  { %110 = vst.msk [vmem:[#allocation2] sm:$0xf] %vm109_vm6, %v107_v13  ;;  %v129_v14 = vpop.permute.xlu1 %128  ;;  %v145_v16 = vld [vmem:[#allocation2 + $0x10] sm:$0xff]  ;;  %vm204_vm6 = vcmask 56368  }
  0x90   :  { %132 = vst.msk [vmem:[#allocation2 + $0x8] sm:$0xf] %vm131_vm7, %v129_v14  ;;  %169 = vmatpush.msra.mxu0 %v145_v16  ;;  %v458_v13 = vld [vmem:[%s2829_s11 + $0x10] sm:$0xff]  ;;  %v456_v14 = vld [vmem:[%s2829_s11] sm:$0xff] }
  0x91   :  { %119 = vst.msk [vmem:[#allocation2] sm:$0xf] %vm118_vm8, %v1656_v5 }
  0x92   :  { %127 = vst.msk [vmem:[#allocation2] sm:$0xf] %vm126_vm9, %v124_v15  ;;  %vm369_vm9 = vcmask 392192   ;;  %v457_v15 = vld [vmem:[%s2829_s11 + $0x8] sm:$0xff] }
  0x93   :  { %139 = vst.msk [vmem:[#allocation2] sm:$0xf] %vm138_vm10, %v1656_v5 }
  0x97   :  { %v144_v17 = vld [vmem:[#allocation2 + $0x8] sm:$0xff] }
  0x98   :  { %170 = vmatpush.msra.mxu0 %v144_v17 }
  0x9a   :  { %v143_v19 = vld [vmem:[#allocation2] sm:$0xff] }
  0x9b   :  { %171 = vmatpush.msra.mxu0 %v143_v19 }
  0x9c   :  { %1598 = vmatmul.msk.f32.vlgmr.msra.gmra.mxu0 %vm152_vm11, %v142_v18 }
 0x119   :  { %v173_v21 = vpop.f32.mrf.mxu0 }
 0x11a   :  { %v174_v22 = vadd.f32 %v173_v21, %v150_v20 }
 0x11c   :  { %vm176_vm12 = vcmp.gt.f32.partialorder %v174_v22, 0.0  ;;  %v177_v23 = vmul.f32 0.2, %v174_v22 }
 0x11e   :  { %v178_v24 = vsel %vm176_vm12, %v174_v22, %v177_v23 }
 0x11f   :  { %186 = vst.msk [vmem:[#allocation2 + $0x8] sm:$0xff] %vm185_vm13, %v178_v24  ;;  %180 = vrot.lane.b32.xlu1 %v178_v24, %s1659_s21  ;;  %187 = vrot.lane.b32.xlu0 %v178_v24, %s1663_s7 }
 0x120   :  { %199 = vst.msk [vmem:[#allocation2 + $0x8] sm:$0xff] %vm198_vm14, %v178_v24 }
 0x127   :  { %v208_v28 = vld [vmem:[#allocation2 + $0x8] sm:$0xff] }
 0x191   :  { %v181_v25 = vpop.permute.xlu1 %180  ;;  %v188_v26 = vpop.permute.xlu0 %187 }
 0x192   :  { %184 = vst.msk [vmem:[#allocation2] sm:$0xff] %vm183_vm15, %v181_v25 }
 0x193   :  { %193 = vst.msk [vmem:[#allocation2] sm:$0xff] %vm192_vm0, %v1656_v5 }
 0x194   :  { %197 = vst.msk [vmem:[#allocation2] sm:$0xff] %vm196_vm1, %v181_v25 }
 0x195   :  { %203 = vst.msk [vmem:[#allocation2] sm:$0xff] %vm202_vm2, %v1656_v5 }
 0x196   :  { %191 = vst.msk [vmem:[#allocation2 + $0x10] sm:$0xff] %vm190_vm3, %v188_v26 }
 0x197   :  { %195 = vst.msk [vmem:[#allocation2 + $0x10] sm:$0xff] %vm194_vm4, %v1656_v5 }
 0x198   :  { %201 = vst.msk [vmem:[#allocation2 + $0x10] sm:$0xff] %vm200_vm5, %v188_v26  ;;  %v446_v26 = vld [vmem:[%s2831_s10] sm:$0xff] }
 0x199   :  { %205 = vst.msk [vmem:[#allocation2 + $0x10] sm:$0xff] %vm204_vm6, %v1656_v5 }
 0x19c   :  { %v207_v29 = vld [vmem:[#allocation2] sm:$0xff] }
 0x1a0   :  { %v209_v27 = vld [vmem:[#allocation2 + $0x10] sm:$0xff] }
 0x1a1   :  { %232 = vmatpush.msrb.mxu0 %v209_v27  ;;  %v447_v27 = vld [vmem:[%s2831_s10 + $0x8] sm:$0xff] }
 0x1a3   :  { %233 = vmatpush.msrb.mxu0 %v208_v28  ;;  %v448_v28 = vld [vmem:[%s2831_s10 + $0x10] sm:$0xff] }
 0x1a5   :  { %234 = vmatpush.msrb.mxu0 %v207_v29  ;;  %v449_v29 = vld [vmem:[%s2831_s10 + $0x18] sm:$0xff] }
 0x1a6   :  { %1599 = vmatmul.msk.f32.vlgmr.msrb.gmra.mxu0 %vm152_vm11, %v206_v30 }
 0x223   :  { %v236_v32 = vpop.f32.mrf.mxu0 }
 0x224   :  { %v237_v33 = vadd.f32 %v236_v32, %v214_v31 }
 0x226   :  { %v1889_v34 = vadd.f32 %v237_v33, %v178_v24 }
 0x228   :  { %254 = vst.msk [vmem:[#allocation2 + $0x8] sm:$0xff] %vm185_vm13, %v1889_v34  ;;  %250 = vrot.lane.b32.xlu1 %v1889_v34, %s1659_s21  ;;  %241 = vrot.lane.b32.xlu0 %v1889_v34, %s1663_s7 }
 0x229   :  { %259 = vst.msk [vmem:[#allocation2 + $0x8] sm:$0xff] %vm198_vm14, %v1889_v34 }
 0x230   :  { %272 = vperm.xlu0 %1653, %v268_v35   ;;  %v266_v40 = vld [vmem:[#allocation2 + $0x8] sm:$0xff] }
 0x238   :  { %366 = vperm.xlu0 %1653, %v358_v38  }
 0x29a   :  { %v251_v36 = vpop.permute.xlu1 %250  ;;  %v242_v37 = vpop.permute.xlu0 %241 }
 0x29b   :  { %253 = vst.msk [vmem:[#allocation2] sm:$0xff] %vm183_vm15, %v251_v36 }
 0x29c   :  { %256 = vst.msk [vmem:[#allocation2] sm:$0xff] %vm192_vm0, %v1656_v5 }
 0x29d   :  { %258 = vst.msk [vmem:[#allocation2] sm:$0xff] %vm196_vm1, %v251_v36 }
 0x29e   :  { %261 = vst.msk [vmem:[#allocation2] sm:$0xff] %vm202_vm2, %v1656_v5 }
 0x29f   :  { %244 = vst.msk [vmem:[%s2865_s5] sm:$0xff] %vm190_vm3, %v242_v37 }
 0x2a0   :  { %255 = vst.msk [vmem:[#allocation2 + $0x10] sm:$0xff] %vm190_vm3, %v242_v37 }
 0x2a1   :  { %257 = vst.msk [vmem:[#allocation2 + $0x10] sm:$0xff] %vm194_vm4, %v1656_v5 }
 0x2a2   :  { %260 = vst.msk [vmem:[#allocation2 + $0x10] sm:$0xff] %vm200_vm5, %v242_v37  ;;  %v273_v44 = vpop.permute.xlu0 %272 }
 0x2a3   :  { %262 = vst.msk [vmem:[#allocation2 + $0x10] sm:$0xff] %vm204_vm6, %v1656_v5 }
 0x2a5   :  { %v265_v41 = vld [vmem:[#allocation2] sm:$0xff] }
 0x2aa   :  { %v267_v39 = vld [vmem:[#allocation2 + $0x10] sm:$0xff]  ;;  %v367_v8 = vpop.permute.xlu0 %366 }
 0x2ab   :  { %299 = vmatpush.msra.mxu2 %v267_v39 }
 0x2ad   :  { %300 = vmatpush.msra.mxu2 %v266_v40 }
 0x2af   :  { %301 = vmatpush.msra.mxu2 %v265_v41 }
 0x2b0   :  { %1601 = vmatmul.msk.f32.vlgmr.msra.gmra.mxu2 %vm152_vm11, %v263_v42 }
 0x2b8   :  { %1602 = vmatmul.msk.f32.gmra.mxu2 %vm152_vm11, %v264_v43 }
 0x333   :  { %v303_v45 = vpop.f32.mrf.mxu2 }
 0x334   :  { %v304_v46 = vadd.f32 %v303_v45, %v273_v44 }
 0x336   :  { %vm309_vm7 = vcmp.gt.f32.partialorder %v304_v46, 0.0  ;;  %v311_v47 = vmul.f32 0.2, %v304_v46 }
 0x338   :  { %v313_v48 = vsel %vm309_vm7, %v304_v46, %v311_v47 }
 0x339   :  { %325 = vst.msk [vmem:[#allocation2 + $0x10] sm:$0xff] %vm185_vm13, %v313_v48  ;;  %327 = vrot.lane.b32.xlu2 %v313_v48, %s1663_s7 }
 0x33a   :  { %341 = vst.msk [vmem:[#allocation2 + $0x10] sm:$0xff] %vm198_vm14, %v313_v48 }
 0x33b   :  { %v306_v50 = vpop.f32.mrf.mxu2 }
 0x33c   :  { %v307_v51 = vadd.f32 %v306_v50, %v278_v49  ;;  %v620_v50 = vld [vmem:[%s2832_s13 + $0x18] sm:$0xff] }
 0x33e   :  { %vm310_vm8 = vcmp.gt.f32.partialorder %v307_v51, 0.0  ;;  %v312_v52 = vmul.f32 0.2, %v307_v51 }
 0x340   :  { %v314_v53 = vsel %vm310_vm8, %v307_v51, %v312_v52  ;;  %v617_v52 = vld [vmem:[%s2832_s13] sm:$0xff]  ;;  %vm641_vm8 = vcmask 785408  }
 0x341   :  { %326 = vst.msk [vmem:[#allocation2 + $0x18] sm:$0xff] %vm185_vm13, %v314_v53  ;;  %329 = vrot.lane.b32.xlu1 %v314_v53, %s1663_s7  ;;  %317 = vrot.lane.b32.xlu2 %v313_v48, %s1659_s21  ;;  %v353_v62 = vld [vmem:[#allocation2 + $0x10] sm:$0xff] }
 0x342   :  { %342 = vst.msk [vmem:[#allocation2 + $0x18] sm:$0xff] %vm198_vm14, %v314_v53 }
 0x349   :  { %319 = vrot.lane.b32.xlu1 %v314_v53, %s1659_s21  ;;  %v354_v61 = vld [vmem:[#allocation2 + $0x18] sm:$0xff] }
 0x351   :  { %361 = vperm.xlu1 %1654, %v357_v56  }
 0x393   :  { %v328_v54 = vpop.permute.xlu2 %327 }
 0x394   :  { %333 = vst.msk [vmem:[#allocation2 + $0x20] sm:$0xff] %vm190_vm3, %v328_v54 }
 0x395   :  { %337 = vst.msk [vmem:[#allocation2 + $0x20] sm:$0xff] %vm194_vm4, %v1656_v5 }
 0x396   :  { %343 = vst.msk [vmem:[#allocation2 + $0x20] sm:$0xff] %vm200_vm5, %v328_v54  ;;  %v619_v54 = vld [vmem:[%s2832_s13 + $0x10] sm:$0xff] }
 0x397   :  { %347 = vst.msk [vmem:[#allocation2 + $0x20] sm:$0xff] %vm204_vm6, %v1656_v5 }
 0x39b   :  { %v318_v55 = vpop.permute.xlu2 %317 }
 0x39c   :  { %323 = vst.msk [vmem:[#allocation2] sm:$0xff] %vm183_vm15, %v318_v55 }
 0x39d   :  { %335 = vst.msk [vmem:[#allocation2] sm:$0xff] %vm192_vm0, %v1656_v5 }
 0x39e   :  { %339 = vst.msk [vmem:[#allocation2] sm:$0xff] %vm196_vm1, %v318_v55  ;;  %v355_v60 = vld [vmem:[#allocation2 + $0x20] sm:$0xff] }
 0x39f   :  { %345 = vst.msk [vmem:[#allocation2] sm:$0xff] %vm202_vm2, %v1656_v5 }
 0x3a6   :  { %v351_v0 = vld [vmem:[#allocation2] sm:$0xff] }
 0x3b3   :  { %v330_v57 = vpop.permute.xlu1 %329 }
 0x3b4   :  { %334 = vst.msk [vmem:[#allocation2 + $0x28] sm:$0xff] %vm190_vm3, %v330_v57 }
 0x3b5   :  { %338 = vst.msk [vmem:[#allocation2 + $0x28] sm:$0xff] %vm194_vm4, %v1656_v5 }
 0x3b6   :  { %344 = vst.msk [vmem:[#allocation2 + $0x28] sm:$0xff] %vm200_vm5, %v330_v57 }
 0x3b7   :  { %348 = vst.msk [vmem:[#allocation2 + $0x28] sm:$0xff] %vm204_vm6, %v1656_v5 }
 0x3bb   :  { %v320_v58 = vpop.permute.xlu1 %319 }
 0x3bc   :  { %324 = vst.msk [vmem:[#allocation2 + $0x8] sm:$0xff] %vm183_vm15, %v320_v58 }
 0x3bd   :  { %336 = vst.msk [vmem:[#allocation2 + $0x8] sm:$0xff] %vm192_vm0, %v1656_v5 }
 0x3be   :  { %340 = vst.msk [vmem:[#allocation2 + $0x8] sm:$0xff] %vm196_vm1, %v320_v58  ;;  %v356_v59 = vld [vmem:[#allocation2 + $0x28] sm:$0xff] }
 0x3bf   :  { %346 = vst.msk [vmem:[#allocation2 + $0x8] sm:$0xff] %vm202_vm2, %v1656_v5  ;;  %386 = vmatpush.msra.mxu1 %v356_v59 }
 0x3c1   :  { %387 = vmatpush.msra.mxu1 %v355_v60 }
 0x3c3   :  { %388 = vmatpush.msra.mxu1 %v354_v61  ;;  %v362_v3 = vpop.permute.xlu1 %361 }
 0x3c5   :  { %389 = vmatpush.msra.mxu1 %v353_v62 }
 0x3c6   :  { %v352_v63 = vld [vmem:[#allocation2 + $0x8] sm:$0xff] }
 0x3c7   :  { %390 = vmatpush.msra.mxu1 %v352_v63 }
 0x3c9   :  { %391 = vmatpush.msra.mxu1 %v351_v0 }
 0x3ca   :  { %1603 = vmatmul.msk.f32.vlgmr.msra.gmra.mxu1 %vm369_vm9, %v349_v1 }
 0x3d2   :  { %1604 = vmatmul.msk.f32.gmra.mxu1 %vm369_vm9, %v350_v2 }
 0x447   :  { %v393_v4 = vpop.f32.mrf.mxu1 }
 0x448   :  { %v394_v6 = vadd.f32 %v393_v4, %v362_v3 }
 0x44a   :  { %v1972_v7 = vadd.f32 %v394_v6, %v313_v48 }
 0x44c   :  { %428 = vst.msk [vmem:[#allocation2 + $0x10] sm:$0xff] %vm185_vm13, %v1972_v7  ;;  %403 = vrot.lane.b32.xlu0 %v1972_v7, %s1663_s7 }
 0x44d   :  { %438 = vst.msk [vmem:[#allocation2 + $0x10] sm:$0xff] %vm198_vm14, %v1972_v7 }
 0x44f   :  { %v396_v9 = vpop.f32.mrf.mxu1 }
 0x450   :  { %v397_v10 = vadd.f32 %v396_v9, %v367_v8 }
 0x452   :  { %v1980_v11 = vadd.f32 %v397_v10, %v314_v53  ;;  %v618_v53 = vld [vmem:[%s2832_s13 + $0x8] sm:$0xff] }
 0x454   :  { %429 = vst.msk [vmem:[#allocation2 + $0x18] sm:$0xff] %vm185_vm13, %v1980_v11  ;;  %422 = vrot.lane.b32.xlu1 %v1980_v11, %s1659_s21  ;;  %405 = vrot.lane.b32.xlu2 %v1980_v11, %s1663_s7  ;;  %v452_v23 = vld [vmem:[#allocation2 + $0x10] sm:$0xff] }
 0x455   :  { %439 = vst.msk [vmem:[#allocation2 + $0x18] sm:$0xff] %vm198_vm14, %v1980_v11  ;;  %477 = vperm.xlu0 %1653, %v459_v12  }
 0x45c   :  { %472 = vperm.xlu1 %1654, %v458_v13   ;;  %420 = vrot.lane.b32.xlu2 %v1972_v7, %s1659_s21  ;;  %v453_v22 = vld [vmem:[#allocation2 + $0x18] sm:$0xff] }
 0x45d   :  { %462 = vperm.xlu0 %1653, %v456_v14   ;;  %v601_v14 = vld [vmem:[%s2833_s12] sm:$0xff] }
 0x464   :  { %467 = vperm.xlu2 %1652, %v457_v15   ;;  %v602_v15 = vld [vmem:[%s2833_s12 + $0x8] sm:$0xff] }
 0x4ae   :  { %v406_v16 = vpop.permute.xlu2 %405 }
 0x4af   :  { %410 = vst.msk [vmem:[%s2830_s22 + $0x8] sm:$0xff] %vm190_vm3, %v406_v16 }
 0x4b0   :  { %431 = vst.msk [vmem:[#allocation2 + $0x28] sm:$0xff] %vm190_vm3, %v406_v16 }
 0x4b1   :  { %435 = vst.msk [vmem:[#allocation2 + $0x28] sm:$0xff] %vm194_vm4, %v1656_v5 }
 0x4b2   :  { %441 = vst.msk [vmem:[#allocation2 + $0x28] sm:$0xff] %vm200_vm5, %v406_v16  ;;  %v603_v16 = vld [vmem:[%s2833_s12 + $0x10] sm:$0xff] }
 0x4b3   :  { %445 = vst.msk [vmem:[#allocation2 + $0x28] sm:$0xff] %vm204_vm6, %v1656_v5 }
 0x4b6   :  { %v421_v17 = vpop.permute.xlu2 %420 }
 0x4b7   :  { %426 = vst.msk [vmem:[#allocation2] sm:$0xff] %vm183_vm15, %v421_v17 }
 0x4b8   :  { %432 = vst.msk [vmem:[#allocation2] sm:$0xff] %vm192_vm0, %v1656_v5 }
 0x4b9   :  { %436 = vst.msk [vmem:[#allocation2] sm:$0xff] %vm196_vm1, %v421_v17  ;;  %v604_v17 = vld [vmem:[%s2833_s12 + $0x18] sm:$0xff] }
 0x4ba   :  { %442 = vst.msk [vmem:[#allocation2] sm:$0xff] %vm202_vm2, %v1656_v5  ;;  %v455_v18 = vld [vmem:[#allocation2 + $0x28] sm:$0xff] }
 0x4bb   :  { %502 = vmatpush.msrb.mxu1 %v455_v18 }
 0x4be   :  { %v404_v19 = vpop.permute.xlu0 %403  ;;  %v468_v37 = vpop.permute.xlu2 %467 }
 0x4bf   :  { %409 = vst.msk [vmem:[%s2830_s22] sm:$0xff] %vm190_vm3, %v404_v19 }
 0x4c0   :  { %430 = vst.msk [vmem:[#allocation2 + $0x20] sm:$0xff] %vm190_vm3, %v404_v19 }
 0x4c1   :  { %434 = vst.msk [vmem:[#allocation2 + $0x20] sm:$0xff] %vm194_vm4, %v1656_v5  ;;  %v450_v25 = vld [vmem:[#allocation2] sm:$0xff] }
 0x4c2   :  { %440 = vst.msk [vmem:[#allocation2 + $0x20] sm:$0xff] %vm200_vm5, %v404_v19 }
 0x4c3   :  { %444 = vst.msk [vmem:[#allocation2 + $0x20] sm:$0xff] %vm204_vm6, %v1656_v5 }
 0x4c6   :  { %v423_v20 = vpop.permute.xlu1 %422 }
 0x4c7   :  { %427 = vst.msk [vmem:[#allocation2 + $0x8] sm:$0xff] %vm183_vm15, %v423_v20  ;;  %v478_v30 = vpop.permute.xlu0 %477 }
 0x4c8   :  { %433 = vst.msk [vmem:[#allocation2 + $0x8] sm:$0xff] %vm192_vm0, %v1656_v5 }
 0x4c9   :  { %437 = vst.msk [vmem:[#allocation2 + $0x8] sm:$0xff] %vm196_vm1, %v423_v20 }
 0x4ca   :  { %443 = vst.msk [vmem:[#allocation2 + $0x8] sm:$0xff] %vm202_vm2, %v1656_v5  ;;  %v454_v21 = vld [vmem:[#allocation2 + $0x20] sm:$0xff] }
 0x4cb   :  { %503 = vmatpush.msrb.mxu1 %v454_v21 }
 0x4cd   :  { %504 = vmatpush.msrb.mxu1 %v453_v22 }
 0x4ce   :  { %v473_v42 = vpop.permute.xlu1 %472 }
 0x4cf   :  { %505 = vmatpush.msrb.mxu1 %v452_v23  ;;  %v463_v31 = vpop.permute.xlu0 %462 }
 0x4d1   :  { %v451_v24 = vld [vmem:[#allocation2 + $0x8] sm:$0xff] }
 0x4d2   :  { %506 = vmatpush.msrb.mxu1 %v451_v24 }
 0x4d4   :  { %507 = vmatpush.msrb.mxu1 %v450_v25 }
 0x4d5   :  { %1607 = vmatmul.msk.f32.vlgmr.msrb.gmra.mxu1 %vm369_vm9, %v446_v26 }
 0x4dd   :  { %1608 = vmatmul.msk.f32.gmra.mxu1 %vm369_vm9, %v447_v27 }
 0x4e5   :  { %1609 = vmatmul.msk.f32.gmra.mxu1 %vm369_vm9, %v448_v28 }
 0x4ed   :  { %1610 = vmatmul.msk.f32.gmra.mxu1 %vm369_vm9, %v449_v29 }
 0x552   :  { %v509_v32 = vpop.f32.mrf.mxu1 }
 0x553   :  { %v510_v33 = vadd.f32 %v509_v32, %v463_v31 }
 0x555   :  { %vm521_vm10 = vcmp.gt.f32.partialorder %v510_v33, 0.0  ;;  %v525_v35 = vmul.f32 0.2, %v510_v33 }
 0x557   :  { %v2052_v36 = vsel %vm521_vm10, %v510_v33, %v525_v35  ;;  %v803_v35 = vld [vmem:[%s2834_s15 + $0x38] sm:$0xff] }
 0x558   :  { %553 = vst.msk [vmem:[#allocation2 + $0x20] sm:$0xff] %vm185_vm13, %v2052_v36 }
 0x559   :  { %585 = vst.msk [vmem:[#allocation2 + $0x20] sm:$0xff] %vm198_vm14, %v2052_v36 }
 0x55a   :  { %v512_v38 = vpop.f32.mrf.mxu1 }
 0x55b   :  { %v513_v39 = vadd.f32 %v512_v38, %v468_v37  ;;  %v801_v37 = vld [vmem:[%s2834_s15 + $0x28] sm:$0xff] }
 0x55c   :  { %v797_v38 = vld [vmem:[%s2834_s15 + $0x8] sm:$0xff] }
 0x55d   :  { %vm522_vm11 = vcmp.gt.f32.partialorder %v513_v39, 0.0  ;;  %v526_v40 = vmul.f32 0.2, %v513_v39 }
 0x55f   :  { %v2058_v41 = vsel %vm522_vm11, %v513_v39, %v526_v40  ;;  %v798_v39 = vld [vmem:[%s2834_s15 + $0x10] sm:$0xff] }
 0x560   :  { %554 = vst.msk [vmem:[#allocation2 + $0x28] sm:$0xff] %vm185_vm13, %v2058_v41  ;;  %559 = vrot.lane.b32.xlu0 %v2058_v41, %s1663_s7  ;;  %v609_v8 = vld [vmem:[#allocation2 + $0x20] sm:$0xff]  ;;  %v802_v40 = vld [vmem:[%s2834_s15 + $0x30] sm:$0xff] }
 0x561   :  { %586 = vst.msk [vmem:[#allocation2 + $0x28] sm:$0xff] %vm198_vm14, %v2058_v41 }
 0x562   :  { %v515_v43 = vpop.f32.mrf.mxu1 }
 0x563   :  { %v516_v44 = vadd.f32 %v515_v43, %v473_v42  ;;  %v796_v42 = vld [vmem:[%s2834_s15] sm:$0xff] }
 0x565   :  { %vm523_vm12 = vcmp.gt.f32.partialorder %v516_v44, 0.0  ;;  %v527_v45 = vmul.f32 0.2, %v516_v44 }
 0x567   :  { %v2066_v46 = vsel %vm523_vm12, %v516_v44, %v527_v45 }
 0x568   :  { %555 = vst.msk [vmem:[#allocation2 + $0x30] sm:$0xff] %vm185_vm13, %v2066_v46  ;;  %561 = vrot.lane.b32.xlu2 %v2066_v46, %s1663_s7  ;;  %541 = vrot.lane.b32.xlu0 %v2066_v46, %s1659_s21  ;;  %v610_v6 = vld [vmem:[#allocation2 + $0x28] sm:$0xff] }
 0x569   :  { %587 = vst.msk [vmem:[#allocation2 + $0x30] sm:$0xff] %vm198_vm14, %v2066_v46 }
 0x56a   :  { %v518_v47 = vpop.f32.mrf.mxu1 }
 0x56b   :  { %v519_v48 = vadd.f32 %v518_v47, %v478_v30 }
 0x56d   :  { %vm524_vm7 = vcmp.gt.f32.partialorder %v519_v48, 0.0  ;;  %v528_v49 = vmul.f32 0.2, %v519_v48 }
 0x56f   :  { %v2079_v51 = vsel %vm524_vm7, %v519_v48, %v528_v49 }
 0x570   :  { %556 = vst.msk [vmem:[#allocation2 + $0x38] sm:$0xff] %vm185_vm13, %v2079_v51  ;;  %563 = vrot.lane.b32.xlu1 %v2079_v51, %s1663_s7  ;;  %543 = vrot.lane.b32.xlu2 %v2079_v51, %s1659_s21  ;;  %v611_v4 = vld [vmem:[#allocation2 + $0x30] sm:$0xff] }
 0x571   :  { %588 = vst.msk [vmem:[#allocation2 + $0x38] sm:$0xff] %vm198_vm14, %v2079_v51  ;;  %638 = vperm.xlu0 %1653, %v620_v50  }
 0x578   :  { %537 = vrot.lane.b32.xlu2 %v2052_v36, %s1659_s21  ;;  %557 = vrot.lane.b32.xlu1 %v2052_v36, %s1663_s7  ;;  %v612_v3 = vld [vmem:[#allocation2 + $0x38] sm:$0xff] }
 0x579   :  { %623 = vperm.xlu0 %1653, %v617_v52  }
 0x580   :  { %628 = vperm.xlu2 %1652, %v618_v53   ;;  %539 = vrot.lane.b32.xlu1 %v2058_v41, %s1659_s21 }
 0x588   :  { %633 = vperm.xlu1 %1654, %v619_v54  }
 0x5c2   :  { %v562_v55 = vpop.permute.xlu2 %561 }
 0x5c3   :  { %571 = vst.msk [vmem:[#allocation2 + $0x50] sm:$0xff] %vm190_vm3, %v562_v55 }
 0x5c4   :  { %579 = vst.msk [vmem:[#allocation2 + $0x50] sm:$0xff] %vm194_vm4, %v1656_v5 }
 0x5c5   :  { %591 = vst.msk [vmem:[#allocation2 + $0x50] sm:$0xff] %vm200_vm5, %v562_v55 }
 0x5c6   :  { %599 = vst.msk [vmem:[#allocation2 + $0x50] sm:$0xff] %vm204_vm6, %v1656_v5 }
 0x5ca   :  { %v544_v56 = vpop.permute.xlu2 %543 }
 0x5cb   :  { %552 = vst.msk [vmem:[#allocation2 + $0x18] sm:$0xff] %vm183_vm15, %v544_v56 }
 0x5cc   :  { %576 = vst.msk [vmem:[#allocation2 + $0x18] sm:$0xff] %vm192_vm0, %v1656_v5 }
 0x5cd   :  { %584 = vst.msk [vmem:[#allocation2 + $0x18] sm:$0xff] %vm196_vm1, %v544_v56  ;;  %v615_v63 = vld [vmem:[#allocation2 + $0x50] sm:$0xff] }
 0x5ce   :  { %596 = vst.msk [vmem:[#allocation2 + $0x18] sm:$0xff] %vm202_vm2, %v1656_v5 }
 0x5d2   :  { %v560_v57 = vpop.permute.xlu0 %559  ;;  %v538_v58 = vpop.permute.xlu2 %537 }
 0x5d3   :  { %570 = vst.msk [vmem:[#allocation2 + $0x48] sm:$0xff] %vm190_vm3, %v560_v57 }
 0x5d4   :  { %578 = vst.msk [vmem:[#allocation2 + $0x48] sm:$0xff] %vm194_vm4, %v1656_v5 }
 0x5d5   :  { %590 = vst.msk [vmem:[#allocation2 + $0x48] sm:$0xff] %vm200_vm5, %v560_v57  ;;  %v608_v9 = vld [vmem:[#allocation2 + $0x18] sm:$0xff] }
 0x5d6   :  { %598 = vst.msk [vmem:[#allocation2 + $0x48] sm:$0xff] %vm204_vm6, %v1656_v5 }
 0x5d7   :  { %549 = vst.msk [vmem:[#allocation2] sm:$0xff] %vm183_vm15, %v538_v58 }
 0x5d8   :  { %573 = vst.msk [vmem:[#allocation2] sm:$0xff] %vm192_vm0, %v1656_v5 }
 0x5d9   :  { %581 = vst.msk [vmem:[#allocation2] sm:$0xff] %vm196_vm1, %v538_v58 }
 0x5da   :  { %593 = vst.msk [vmem:[#allocation2] sm:$0xff] %vm202_vm2, %v1656_v5  ;;  %v542_v59 = vpop.permute.xlu0 %541  ;;  %v629_v23 = vpop.permute.xlu2 %628 }
 0x5db   :  { %551 = vst.msk [vmem:[#allocation2 + $0x10] sm:$0xff] %vm183_vm15, %v542_v59 }
 0x5dc   :  { %575 = vst.msk [vmem:[#allocation2 + $0x10] sm:$0xff] %vm192_vm0, %v1656_v5 }
 0x5dd   :  { %583 = vst.msk [vmem:[#allocation2 + $0x10] sm:$0xff] %vm196_vm1, %v542_v59  ;;  %v614_v0 = vld [vmem:[#allocation2 + $0x48] sm:$0xff] }
 0x5de   :  { %595 = vst.msk [vmem:[#allocation2 + $0x10] sm:$0xff] %vm202_vm2, %v1656_v5 }
 0x5e1   :  { %v605_v13 = vld [vmem:[#allocation2] sm:$0xff] }
 0x5e2   :  { %v564_v60 = vpop.permute.xlu1 %563 }
 0x5e3   :  { %572 = vst.msk [vmem:[#allocation2 + $0x58] sm:$0xff] %vm190_vm3, %v564_v60  ;;  %v639_v18 = vpop.permute.xlu0 %638 }
 0x5e4   :  { %580 = vst.msk [vmem:[#allocation2 + $0x58] sm:$0xff] %vm194_vm4, %v1656_v5 }
 0x5e5   :  { %592 = vst.msk [vmem:[#allocation2 + $0x58] sm:$0xff] %vm200_vm5, %v564_v60  ;;  %v607_v10 = vld [vmem:[#allocation2 + $0x10] sm:$0xff] }
 0x5e6   :  { %600 = vst.msk [vmem:[#allocation2 + $0x58] sm:$0xff] %vm204_vm6, %v1656_v5 }
 0x5ea   :  { %v558_v61 = vpop.permute.xlu1 %557 }
 0x5eb   :  { %569 = vst.msk [vmem:[#allocation2 + $0x40] sm:$0xff] %vm190_vm3, %v558_v61  ;;  %v624_v19 = vpop.permute.xlu0 %623 }
 0x5ec   :  { %577 = vst.msk [vmem:[#allocation2 + $0x40] sm:$0xff] %vm194_vm4, %v1656_v5 }
 0x5ed   :  { %589 = vst.msk [vmem:[#allocation2 + $0x40] sm:$0xff] %vm200_vm5, %v558_v61  ;;  %v616_v62 = vld [vmem:[#allocation2 + $0x58] sm:$0xff] }
 0x5ee   :  { %597 = vst.msk [vmem:[#allocation2 + $0x40] sm:$0xff] %vm204_vm6, %v1656_v5  ;;  %658 = vmatpush.msra.mxu1 %v616_v62 }
 0x5f0   :  { %659 = vmatpush.msra.mxu1 %v615_v63  ;;  %v776_v63 = vld [vmem:[%s2836_s14] sm:$0xff] }
 0x5f2   :  { %v540_v1 = vpop.permute.xlu1 %539  ;;  %660 = vmatpush.msra.mxu1 %v614_v0  ;;  %v777_v0 = vld [vmem:[%s2836_s14 + $0x8] sm:$0xff] }
 0x5f3   :  { %550 = vst.msk [vmem:[#allocation2 + $0x8] sm:$0xff] %vm183_vm15, %v540_v1 }
 0x5f4   :  { %574 = vst.msk [vmem:[#allocation2 + $0x8] sm:$0xff] %vm192_vm0, %v1656_v5 }
 0x5f5   :  { %582 = vst.msk [vmem:[#allocation2 + $0x8] sm:$0xff] %vm196_vm1, %v540_v1  ;;  %v613_v2 = vld [vmem:[#allocation2 + $0x40] sm:$0xff]  ;;  %v778_v1 = vld [vmem:[%s2836_s14 + $0x10] sm:$0xff] }
 0x5f6   :  { %594 = vst.msk [vmem:[#allocation2 + $0x8] sm:$0xff] %vm202_vm2, %v1656_v5  ;;  %661 = vmatpush.msra.mxu1 %v613_v2  ;;  %v779_v2 = vld [vmem:[%s2836_s14 + $0x18] sm:$0xff] }
 0x5f8   :  { %662 = vmatpush.msra.mxu1 %v612_v3  ;;  %v780_v3 = vld [vmem:[%s2836_s14 + $0x20] sm:$0xff] }
 0x5fa   :  { %663 = vmatpush.msra.mxu1 %v611_v4  ;;  %v634_v27 = vpop.permute.xlu1 %633  ;;  %v781_v4 = vld [vmem:[%s2836_s14 + $0x28] sm:$0xff] }
 0x5fc   :  { %664 = vmatpush.msra.mxu1 %v610_v6  ;;  %v782_v6 = vld [vmem:[%s2836_s14 + $0x30] sm:$0xff] }
 0x5fd   :  { %v606_v12 = vld [vmem:[#allocation2 + $0x8] sm:$0xff] }
 0x5fe   :  { %665 = vmatpush.msra.mxu1 %v609_v8  ;;  %v783_v8 = vld [vmem:[%s2836_s14 + $0x38] sm:$0xff]  ;;  %s1664_s14 = smov 123  }
 0x600   :  { %666 = vmatpush.msra.mxu1 %v608_v9 }
 0x602   :  { %667 = vmatpush.msra.mxu1 %v607_v10 }
 0x604   :  { %668 = vmatpush.msra.mxu1 %v606_v12 }
 0x606   :  { %669 = vmatpush.msra.mxu1 %v605_v13 }
 0x607   :  { %1611 = vmatmul.msk.f32.vlgmr.msra.gmra.mxu1 %vm641_vm8, %v601_v14 }
 0x60f   :  { %1612 = vmatmul.msk.f32.gmra.mxu1 %vm641_vm8, %v602_v15 }
 0x617   :  { %1613 = vmatmul.msk.f32.gmra.mxu1 %vm641_vm8, %v603_v16 }
 0x61f   :  { %1614 = vmatmul.msk.f32.gmra.mxu1 %vm641_vm8, %v604_v17 }
 0x684   :  { %v671_v20 = vpop.f32.mrf.mxu1 }
 0x685   :  { %v672_v21 = vadd.f32 %v671_v20, %v624_v19 }
 0x687   :  { %v2169_v22 = vadd.f32 %v672_v21, %v2052_v36  ;;  %v800_v36 = vld [vmem:[%s2834_s15 + $0x20] sm:$0xff] }
 0x689   :  { %740 = vst.msk [vmem:[#allocation2 + $0x20] sm:$0xff] %vm185_vm13, %v2169_v22 }
 0x68a   :  { %760 = vst.msk [vmem:[#allocation2 + $0x20] sm:$0xff] %vm198_vm14, %v2169_v22 }
 0x68c   :  { %v674_v24 = vpop.f32.mrf.mxu1 }
 0x68d   :  { %v675_v25 = vadd.f32 %v674_v24, %v629_v23 }
 0x68f   :  { %v2176_v26 = vadd.f32 %v675_v25, %v2058_v41  ;;  %v799_v41 = vld [vmem:[%s2834_s15 + $0x18] sm:$0xff] }
 0x691   :  { %741 = vst.msk [vmem:[#allocation2 + $0x28] sm:$0xff] %vm185_vm13, %v2176_v26  ;;  %693 = vrot.lane.b32.xlu0 %v2176_v26, %s1663_s7  ;;  %v788_v58 = vld [vmem:[#allocation2 + $0x20] sm:$0xff] }
 0x692   :  { %761 = vst.msk [vmem:[#allocation2 + $0x28] sm:$0xff] %vm198_vm14, %v2176_v26 }
 0x694   :  { %v677_v28 = vpop.f32.mrf.mxu1 }
 0x695   :  { %v678_v29 = vadd.f32 %v677_v28, %v634_v27 }
 0x697   :  { %v2185_v30 = vadd.f32 %v678_v29, %v2066_v46 }
 0x699   :  { %742 = vst.msk [vmem:[#allocation2 + $0x30] sm:$0xff] %vm185_vm13, %v2185_v30  ;;  %695 = vrot.lane.b32.xlu2 %v2185_v30, %s1663_s7  ;;  %728 = vrot.lane.b32.xlu0 %v2185_v30, %s1659_s21  ;;  %v789_v57 = vld [vmem:[#allocation2 + $0x28] sm:$0xff] }
 0x69a   :  { %762 = vst.msk [vmem:[#allocation2 + $0x30] sm:$0xff] %vm198_vm14, %v2185_v30 }
 0x69c   :  { %v680_v31 = vpop.f32.mrf.mxu1 }
 0x69d   :  { %v681_v32 = vadd.f32 %v680_v31, %v639_v18 }
 0x69f   :  { %v2196_v33 = vadd.f32 %v681_v32, %v2079_v51 }
 0x6a1   :  { %743 = vst.msk [vmem:[#allocation2 + $0x38] sm:$0xff] %vm185_vm13, %v2196_v33  ;;  %697 = vrot.lane.b32.xlu1 %v2196_v33, %s1663_s7  ;;  %730 = vrot.lane.b32.xlu2 %v2196_v33, %s1659_s21  ;;  %v790_v56 = vld [vmem:[#allocation2 + $0x30] sm:$0xff] }
 0x6a2   :  { %763 = vst.msk [vmem:[#allocation2 + $0x38] sm:$0xff] %vm198_vm14, %v2196_v33  ;;  %841 = vperm.xlu0 %1653, %v803_v35  }
 0x6a9   :  { %724 = vrot.lane.b32.xlu2 %v2169_v22, %s1659_s21  ;;  %691 = vrot.lane.b32.xlu1 %v2169_v22, %s1663_s7  ;;  %v791_v55 = vld [vmem:[#allocation2 + $0x38] sm:$0xff] }
 0x6aa   :  { %826 = vperm.xlu0 %1653, %v800_v36  }
 0x6b1   :  { %831 = vperm.xlu2 %1652, %v801_v37   ;;  %726 = vrot.lane.b32.xlu1 %v2176_v26, %s1659_s21 }
 0x6b2   :  { %811 = vperm.xlu0 %1653, %v797_v38  }
 0x6b9   :  { %816 = vperm.xlu2 %1652, %v798_v39   ;;  %836 = vperm.xlu1 %1654, %v802_v40  }
 0x6c1   :  { %821 = vperm.xlu1 %1654, %v799_v41  }
 0x6c9   :  { %806 = vperm.xlu1 %1654, %v796_v42  }
 0x6f3   :  { %v696_v43 = vpop.permute.xlu2 %695 }
 0x6f4   :  { %705 = vst.msk [vmem:[%s2835_s23 + $0x10] sm:$0xff] %vm190_vm3, %v696_v43 }
 0x6f5   :  { %746 = vst.msk [vmem:[#allocation2 + $0x50] sm:$0xff] %vm190_vm3, %v696_v43 }
 0x6f6   :  { %754 = vst.msk [vmem:[#allocation2 + $0x50] sm:$0xff] %vm194_vm4, %v1656_v5 }
 0x6f7   :  { %766 = vst.msk [vmem:[#allocation2 + $0x50] sm:$0xff] %vm200_vm5, %v696_v43 }
 0x6f8   :  { %774 = vst.msk [vmem:[#allocation2 + $0x50] sm:$0xff] %vm204_vm6, %v1656_v5 }
 0x6fb   :  { %v731_v44 = vpop.permute.xlu2 %730 }
 0x6fc   :  { %739 = vst.msk [vmem:[#allocation2 + $0x18] sm:$0xff] %vm183_vm15, %v731_v44 }
 0x6fd   :  { %751 = vst.msk [vmem:[#allocation2 + $0x18] sm:$0xff] %vm192_vm0, %v1656_v5 }
 0x6fe   :  { %759 = vst.msk [vmem:[#allocation2 + $0x18] sm:$0xff] %vm196_vm1, %v731_v44 }
 0x6ff   :  { %771 = vst.msk [vmem:[#allocation2 + $0x18] sm:$0xff] %vm202_vm2, %v1656_v5  ;;  %v794_v51 = vld [vmem:[#allocation2 + $0x50] sm:$0xff] }
 0x703   :  { %v694_v45 = vpop.permute.xlu0 %693  ;;  %v725_v46 = vpop.permute.xlu2 %724 }
 0x704   :  { %704 = vst.msk [vmem:[%s2835_s23 + $0x8] sm:$0xff] %vm190_vm3, %v694_v45 }
 0x705   :  { %745 = vst.msk [vmem:[#allocation2 + $0x48] sm:$0xff] %vm190_vm3, %v694_v45 }
 0x706   :  { %753 = vst.msk [vmem:[#allocation2 + $0x48] sm:$0xff] %vm194_vm4, %v1656_v5  ;;  %v787_v59 = vld [vmem:[#allocation2 + $0x18] sm:$0xff] }
 0x707   :  { %765 = vst.msk [vmem:[#allocation2 + $0x48] sm:$0xff] %vm200_vm5, %v694_v45 }
 0x708   :  { %773 = vst.msk [vmem:[#allocation2 + $0x48] sm:$0xff] %vm204_vm6, %v1656_v5 }
 0x709   :  { %736 = vst.msk [vmem:[#allocation2] sm:$0xff] %vm183_vm15, %v725_v46 }
 0x70a   :  { %748 = vst.msk [vmem:[#allocation2] sm:$0xff] %vm192_vm0, %v1656_v5 }
 0x70b   :  { %756 = vst.msk [vmem:[#allocation2] sm:$0xff] %vm196_vm1, %v725_v46  ;;  %v729_v47 = vpop.permute.xlu0 %728  ;;  %v832_v19 = vpop.permute.xlu2 %831 }
 0x70c   :  { %768 = vst.msk [vmem:[#allocation2] sm:$0xff] %vm202_vm2, %v1656_v5 }
 0x70d   :  { %738 = vst.msk [vmem:[#allocation2 + $0x10] sm:$0xff] %vm183_vm15, %v729_v47 }
 0x70e   :  { %750 = vst.msk [vmem:[#allocation2 + $0x10] sm:$0xff] %vm192_vm0, %v1656_v5 }
 0x70f   :  { %758 = vst.msk [vmem:[#allocation2 + $0x10] sm:$0xff] %vm196_vm1, %v729_v47  ;;  %v793_v52 = vld [vmem:[#allocation2 + $0x48] sm:$0xff] }
 0x710   :  { %770 = vst.msk [vmem:[#allocation2 + $0x10] sm:$0xff] %vm202_vm2, %v1656_v5 }
 0x713   :  { %v698_v48 = vpop.permute.xlu1 %697  ;;  %v784_v62 = vld [vmem:[#allocation2] sm:$0xff]  ;;  %v817_v27 = vpop.permute.xlu2 %816 }
 0x714   :  { %706 = vst.msk [vmem:[%s2835_s23 + $0x18] sm:$0xff] %vm190_vm3, %v698_v48  ;;  %v2332_v10 = vpop.permute.xlu0 %841 }
 0x715   :  { %747 = vst.msk [vmem:[#allocation2 + $0x58] sm:$0xff] %vm190_vm3, %v698_v48 }
 0x716   :  { %755 = vst.msk [vmem:[#allocation2 + $0x58] sm:$0xff] %vm194_vm4, %v1656_v5 }
 0x717   :  { %767 = vst.msk [vmem:[#allocation2 + $0x58] sm:$0xff] %vm200_vm5, %v698_v48  ;;  %v786_v60 = vld [vmem:[#allocation2 + $0x10] sm:$0xff] }
 0x718   :  { %775 = vst.msk [vmem:[#allocation2 + $0x58] sm:$0xff] %vm204_vm6, %v1656_v5 }
 0x71b   :  { %v692_v49 = vpop.permute.xlu1 %691 }
 0x71c   :  { %703 = vst.msk [vmem:[%s2835_s23] sm:$0xff] %vm190_vm3, %v692_v49  ;;  %v827_v13 = vpop.permute.xlu0 %826 }
 0x71d   :  { %744 = vst.msk [vmem:[#allocation2 + $0x40] sm:$0xff] %vm190_vm3, %v692_v49 }
 0x71e   :  { %752 = vst.msk [vmem:[#allocation2 + $0x40] sm:$0xff] %vm194_vm4, %v1656_v5 }
 0x71f   :  { %764 = vst.msk [vmem:[#allocation2 + $0x40] sm:$0xff] %vm200_vm5, %v692_v49  ;;  %v795_v50 = vld [vmem:[#allocation2 + $0x58] sm:$0xff] }
 0x720   :  { %772 = vst.msk [vmem:[#allocation2 + $0x40] sm:$0xff] %vm204_vm6, %v1656_v5  ;;  %872 = vmatpush.msrb.mxu2 %v795_v50 }
 0x722   :  { %873 = vmatpush.msrb.mxu2 %v794_v51 }
 0x723   :  { %v727_v53 = vpop.permute.xlu1 %726 }
 0x724   :  { %737 = vst.msk [vmem:[#allocation2 + $0x8] sm:$0xff] %vm183_vm15, %v727_v53  ;;  %874 = vmatpush.msrb.mxu2 %v793_v52  ;;  %v812_v20 = vpop.permute.xlu0 %811 }
 0x725   :  { %749 = vst.msk [vmem:[#allocation2 + $0x8] sm:$0xff] %vm192_vm0, %v1656_v5 }
 0x726   :  { %757 = vst.msk [vmem:[#allocation2 + $0x8] sm:$0xff] %vm196_vm1, %v727_v53 }
 0x727   :  { %769 = vst.msk [vmem:[#allocation2 + $0x8] sm:$0xff] %vm202_vm2, %v1656_v5  ;;  %v792_v54 = vld [vmem:[#allocation2 + $0x40] sm:$0xff] }
 0x728   :  { %875 = vmatpush.msrb.mxu2 %v792_v54 }
 0x72a   :  { %876 = vmatpush.msrb.mxu2 %v791_v55 }
 0x72b   :  { %v837_v9 = vpop.permute.xlu1 %836 }
 0x72c   :  { %877 = vmatpush.msrb.mxu2 %v790_v56 }
 0x72e   :  { %878 = vmatpush.msrb.mxu2 %v789_v57  ;;  %v785_v61 = vld [vmem:[#allocation2 + $0x8] sm:$0xff] }
 0x730   :  { %879 = vmatpush.msrb.mxu2 %v788_v58 }
 0x732   :  { %880 = vmatpush.msrb.mxu2 %v787_v59 }
 0x733   :  { %v822_v12 = vpop.permute.xlu1 %821 }
 0x734   :  { %881 = vmatpush.msrb.mxu2 %v786_v60 }
 0x736   :  { %882 = vmatpush.msrb.mxu2 %v785_v61 }
 0x738   :  { %883 = vmatpush.msrb.mxu2 %v784_v62 }
 0x739   :  { %1619 = vmatmul.msk.f32.vlgmr.msrb.gmra.mxu2 %vm641_vm8, %v776_v63  ;;  %v1109_v63 = vld [vmem:[%s2837_s17] sm:$0xff] }
 0x73b   :  { %v807_v14 = vpop.permute.xlu1 %806 }
 0x741   :  { %1620 = vmatmul.msk.f32.gmra.mxu2 %vm641_vm8, %v777_v0  ;;  %v1116_v0 = vld [vmem:[%s2837_s17 + $0x38] sm:$0xff] }
 0x749   :  { %1621 = vmatmul.msk.f32.gmra.mxu2 %vm641_vm8, %v778_v1 }
 0x751   :  { %1622 = vmatmul.msk.f32.gmra.mxu2 %vm641_vm8, %v779_v2 }
 0x759   :  { %1623 = vmatmul.msk.f32.gmra.mxu2 %vm641_vm8, %v780_v3 }
 0x761   :  { %1624 = vmatmul.msk.f32.gmra.mxu2 %vm641_vm8, %v781_v4 }
 0x769   :  { %1625 = vmatmul.msk.f32.gmra.mxu2 %vm641_vm8, %v782_v6 }
 0x771   :  { %1626 = vmatmul.msk.f32.gmra.mxu2 %vm641_vm8, %v783_v8 }
 0x7bc   :  { %v885_v15 = vpop.f32.mrf.mxu2 }
 0x7bd   :  { %v886_v16 = vadd.f32 %v885_v15, %v807_v14 }
 0x7bf   :  { %vm909_vm9 = vcmp.gt.f32.partialorder %v886_v16, 0.0  ;;  %v917_v17 = vmul.f32 0.2, %v886_v16 }
 0x7c1   :  { %v2334_v18 = vsel %vm909_vm9, %v886_v16, %v917_v17 }
 0x7c2   :  { %973 = vst.msk [vmem:[#allocation2 + $0x40] sm:$0xff] %vm185_vm13, %v2334_v18 }
 0x7c3   :  { %1037 = vst.msk [vmem:[#allocation2 + $0x40] sm:$0xff] %vm198_vm14, %v2334_v18 }
 0x7c4   :  { %v888_v21 = vpop.f32.mrf.mxu2 }
 0x7c5   :  { %v889_v23 = vadd.f32 %v888_v21, %v812_v20 }
 0x7c7   :  { %vm910_vm10 = vcmp.gt.f32.partialorder %v889_v23, 0.0  ;;  %v918_v24 = vmul.f32 0.2, %v889_v23 }
 0x7c9   :  { %v2340_v25 = vsel %vm910_vm10, %v889_v23, %v918_v24 }
 0x7ca   :  { %974 = vst.msk [vmem:[#allocation2 + $0x48] sm:$0xff] %vm185_vm13, %v2340_v25  ;;  %943 = vrot.lane.b32.xlu1 %v2340_v25, %s1659_s21  ;;  %v1093_v62 = vld [vmem:[#allocation2 + $0x40] sm:$0xff] }
 0x7cb   :  { %1038 = vst.msk [vmem:[#allocation2 + $0x48] sm:$0xff] %vm198_vm14, %v2340_v25 }
 0x7cc   :  { %v891_v28 = vpop.f32.mrf.mxu2 }
 0x7cd   :  { %v892_v29 = vadd.f32 %v891_v28, %v817_v27 }
 0x7cf   :  { %vm911_vm11 = vcmp.gt.f32.partialorder %v892_v29, 0.0  ;;  %v919_v31 = vmul.f32 0.2, %v892_v29 }
 0x7d1   :  { %v2348_v32 = vsel %vm911_vm11, %v892_v29, %v919_v31  ;;  %v2531_v29 = vld [vmem:[%s2838_s18] sm:$0xff]  ;;  %v1347_v31 = vld [vmem:[%s2838_s18 + $0x10] sm:$0xff] }
 0x7d2   :  { %975 = vst.msk [vmem:[#allocation2 + $0x50] sm:$0xff] %vm185_vm13, %v2348_v32  ;;  %945 = vrot.lane.b32.xlu2 %v2348_v32, %s1659_s21  ;;  %v1094_v61 = vld [vmem:[#allocation2 + $0x48] sm:$0xff] }
 0x7d3   :  { %1039 = vst.msk [vmem:[#allocation2 + $0x50] sm:$0xff] %vm198_vm14, %v2348_v32 }
 0x7d4   :  { %v894_v35 = vpop.f32.mrf.mxu2 }
 0x7d5   :  { %v895_v36 = vadd.f32 %v894_v35, %v822_v12 }
 0x7d7   :  { %vm912_vm12 = vcmp.gt.f32.partialorder %v895_v36, 0.0  ;;  %v920_v37 = vmul.f32 0.2, %v895_v36 }
 0x7d9   :  { %v2356_v38 = vsel %vm912_vm12, %v895_v36, %v920_v37 }
 0x7da   :  { %976 = vst.msk [vmem:[#allocation2 + $0x58] sm:$0xff] %vm185_vm13, %v2356_v38  ;;  %947 = vrot.lane.b32.xlu0 %v2356_v38, %s1659_s21  ;;  %v1095_v60 = vld [vmem:[#allocation2 + $0x50] sm:$0xff] }
 0x7db   :  { %1040 = vst.msk [vmem:[#allocation2 + $0x58] sm:$0xff] %vm198_vm14, %v2356_v38 }
 0x7dc   :  { %v897_v39 = vpop.f32.mrf.mxu2 }
 0x7dd   :  { %v898_v40 = vadd.f32 %v897_v39, %v827_v13 }
 0x7df   :  { %vm913_vm7 = vcmp.gt.f32.partialorder %v898_v40, 0.0  ;;  %v921_v41 = vmul.f32 0.2, %v898_v40 }
 0x7e1   :  { %v2364_v42 = vsel %vm913_vm7, %v898_v40, %v921_v41  ;;  %v1348_v41 = vld [vmem:[%s2838_s18 + $0x18] sm:$0xff] }
 0x7e2   :  { %977 = vst.msk [vmem:[#allocation2 + $0x60] sm:$0xff] %vm185_vm13, %v2364_v42  ;;  %949 = vrot.lane.b32.xlu2 %v2364_v42, %s1659_s21  ;;  %v1096_v59 = vld [vmem:[#allocation2 + $0x58] sm:$0xff] }
 0x7e3   :  { %1041 = vst.msk [vmem:[#allocation2 + $0x60] sm:$0xff] %vm198_vm14, %v2364_v42 }
 0x7e4   :  { %v900_v43 = vpop.f32.mrf.mxu2 }
 0x7e5   :  { %v901_v44 = vadd.f32 %v900_v43, %v832_v19  ;;  %v1350_v43 = vld [vmem:[%s2838_s18 + $0x28] sm:$0xff] }
 0x7e7   :  { %vm914_vm8 = vcmp.gt.f32.partialorder %v901_v44, 0.0  ;;  %v922_v45 = vmul.f32 0.2, %v901_v44 }
 0x7e9   :  { %v2372_v46 = vsel %vm914_vm8, %v901_v44, %v922_v45 }
 0x7ea   :  { %978 = vst.msk [vmem:[#allocation2 + $0x68] sm:$0xff] %vm185_vm13, %v2372_v46  ;;  %951 = vrot.lane.b32.xlu1 %v2372_v46, %s1659_s21  ;;  %v1097_v58 = vld [vmem:[#allocation2 + $0x60] sm:$0xff] }
 0x7eb   :  { %1042 = vst.msk [vmem:[#allocation2 + $0x68] sm:$0xff] %vm198_vm14, %v2372_v46 }
 0x7ec   :  { %v903_v47 = vpop.f32.mrf.mxu2 }
 0x7ed   :  { %v904_v48 = vadd.f32 %v903_v47, %v837_v9 }
 0x7ef   :  { %vm915_vm9 = vcmp.gt.f32.partialorder %v904_v48, 0.0  ;;  %v923_v49 = vmul.f32 0.2, %v904_v48 }
 0x7f1   :  { %v2380_v50 = vsel %vm915_vm9, %v904_v48, %v923_v49 }
 0x7f2   :  { %979 = vst.msk [vmem:[#allocation2 + $0x70] sm:$0xff] %vm185_vm13, %v2380_v50  ;;  %953 = vrot.lane.b32.xlu0 %v2380_v50, %s1659_s21  ;;  %v1098_v57 = vld [vmem:[#allocation2 + $0x68] sm:$0xff] }
 0x7f3   :  { %1043 = vst.msk [vmem:[#allocation2 + $0x70] sm:$0xff] %vm198_vm14, %v2380_v50 }
 0x7f4   :  { %v906_v51 = vpop.f32.mrf.mxu2 }
 0x7f5   :  { %v907_v52 = vadd.f32 %v906_v51, %v2332_v10  ;;  %v1069_v51 = vld [vmem:[%s2839_s16] sm:$0xff] }
 0x7f7   :  { %vm916_vm10 = vcmp.gt.f32.partialorder %v907_v52, 0.0  ;;  %v924_v53 = vmul.f32 0.2, %v907_v52 }
 0x7f9   :  { %v2389_v54 = vsel %vm916_vm10, %v907_v52, %v924_v53  ;;  %v1351_v53 = vld [vmem:[%s2838_s18 + $0x30] sm:$0xff] }
 0x7fa   :  { %980 = vst.msk [vmem:[#allocation2 + $0x78] sm:$0xff] %vm185_vm13, %v2389_v54  ;;  %993 = vrot.lane.b32.xlu0 %v2380_v50, %s1663_s7  ;;  %955 = vrot.lane.b32.xlu2 %v2389_v54, %s1659_s21  ;;  %v1099_v56 = vld [vmem:[#allocation2 + $0x70] sm:$0xff]  ;;  %vm1157_vm13 = vcmask 523264  }
 0x7fb   :  { %1044 = vst.msk [vmem:[#allocation2 + $0x78] sm:$0xff] %vm198_vm14, %v2389_v54  ;;  %995 = vrot.lane.b32.xlu1 %v2389_v54, %s1663_s7 }
 0x802   :  { %991 = vrot.lane.b32.xlu2 %v2372_v46, %s1663_s7  ;;  %941 = vrot.lane.b32.xlu0 %v2334_v18, %s1659_s21  ;;  %v1100_v55 = vld [vmem:[#allocation2 + $0x78] sm:$0xff] }
 0x803   :  { %989 = vrot.lane.b32.xlu1 %v2364_v42, %s1663_s7  ;;  %1182 = vmatpush.msra.mxu3 %v1100_v55  ;;  %v1346_v55 = vld [vmem:[%s2838_s18 + $0x8] sm:$0xff] }
 0x805   :  { %1183 = vmatpush.msra.mxu3 %v1099_v56 }
 0x807   :  { %1184 = vmatpush.msra.mxu3 %v1098_v57  ;;  %v1071_v57 = vld [vmem:[%s2839_s16 + $0x10] sm:$0xff] }
 0x809   :  { %1185 = vmatpush.msra.mxu3 %v1097_v58 }
 0x80a   :  { %987 = vrot.lane.b32.xlu2 %v2356_v38, %s1663_s7  ;;  %985 = vrot.lane.b32.xlu0 %v2348_v32, %s1663_s7 }
 0x80b   :  { %983 = vrot.lane.b32.xlu1 %v2340_v25, %s1663_s7  ;;  %1186 = vmatpush.msra.mxu3 %v1096_v59 }
 0x80d   :  { %1187 = vmatpush.msra.mxu3 %v1095_v60  ;;  %v1349_v60 = vld [vmem:[%s2838_s18 + $0x20] sm:$0xff] }
 0x80f   :  { %1188 = vmatpush.msra.mxu3 %v1094_v61 }
 0x811   :  { %1189 = vmatpush.msra.mxu3 %v1093_v62  ;;  %v1070_v62 = vld [vmem:[%s2839_s16 + $0x8] sm:$0xff] }
 0x812   :  { %981 = vrot.lane.b32.xlu2 %v2334_v18, %s1663_s7  ;;  %245 = vrot.lane.b32.xlu0 %v1889_v34, %s1664_s14  ;;  %v1110_v34 = vld [vmem:[%s2837_s17 + $0x8] sm:$0xff] }
 0x813   :  { %411 = vrot.lane.b32.xlu1 %v1972_v7, %s1664_s14  ;;  %v1111_v7 = vld [vmem:[%s2837_s17 + $0x10] sm:$0xff] }
 0x81a   :  { %413 = vrot.lane.b32.xlu2 %v1980_v11, %s1664_s14  ;;  %707 = vrot.lane.b32.xlu0 %v2169_v22, %s1664_s14  ;;  %v1112_v11 = vld [vmem:[%s2837_s17 + $0x18] sm:$0xff] }
 0x81b   :  { %709 = vrot.lane.b32.xlu1 %v2176_v26, %s1664_s14  ;;  %v1113_v26 = vld [vmem:[%s2837_s17 + $0x20] sm:$0xff] }
 0x822   :  { %711 = vrot.lane.b32.xlu2 %v2185_v30, %s1664_s14  ;;  %713 = vrot.lane.b32.xlu0 %v2196_v33, %s1664_s14  ;;  %v1114_v30 = vld [vmem:[%s2837_s17 + $0x28] sm:$0xff]  ;;  %v1115_v33 = vld [vmem:[%s2837_s17 + $0x30] sm:$0xff] }
 0x823   :  { %1119 = vperm.xlu1 %1654, %v1109_v63  }
 0x82a   :  { %1124 = vperm.xlu2 %1652, %v1110_v34   ;;  %1129 = vperm.xlu0 %1653, %v1111_v7   ;;  %v1073_v34 = vld [vmem:[%s2839_s16 + $0x20] sm:$0xff]  ;;  %v1072_v7 = vld [vmem:[%s2839_s16 + $0x18] sm:$0xff] }
 0x82b   :  { %1134 = vperm.xlu1 %1654, %v1112_v11   ;;  %v1075_v11 = vld [vmem:[%s2839_s16 + $0x30] sm:$0xff] }
 0x82c   :  { %v946_v22 = vpop.permute.xlu2 %945 }
 0x82d   :  { %967 = vst.msk [vmem:[#allocation2 + $0x10] sm:$0xff] %vm183_vm15, %v946_v22 }
 0x82e   :  { %1015 = vst.msk [vmem:[#allocation2 + $0x10] sm:$0xff] %vm192_vm0, %v1656_v5 }
 0x82f   :  { %1031 = vst.msk [vmem:[#allocation2 + $0x10] sm:$0xff] %vm196_vm1, %v946_v22  ;;  %v1074_v22 = vld [vmem:[%s2839_s16 + $0x28] sm:$0xff] }
 0x830   :  { %1055 = vst.msk [vmem:[#allocation2 + $0x10] sm:$0xff] %vm202_vm2, %v1656_v5 }
 0x832   :  { %1139 = vperm.xlu2 %1652, %v1113_v26   ;;  %1144 = vperm.xlu0 %1653, %v1114_v30   ;;  %v1077_v26 = vld [vmem:[%s2839_s16 + $0x40] sm:$0xff]  ;;  %v1076_v30 = vld [vmem:[%s2839_s16 + $0x38] sm:$0xff] }
 0x833   :  { %1149 = vperm.xlu1 %1654, %v1115_v33   ;;  %v1079_v33 = vld [vmem:[%s2839_s16 + $0x50] sm:$0xff] }
 0x837   :  { %v1087_v24 = vld [vmem:[#allocation2 + $0x10] sm:$0xff] }
 0x83a   :  { %1154 = vperm.xlu2 %1652, %v1116_v0   ;;  %1367 = vrot.lane.b32.xlu0 %v1347_v31, %s1659_s21  ;;  %v1352_v0 = vld [vmem:[%s2838_s18 + $0x38] sm:$0xff] }
 0x83b   :  { %1363 = vrot.lane.b32.xlu1 %v2531_v29, %s1659_s21 }
 0x83c   :  { %v950_v1 = vpop.permute.xlu2 %949  ;;  %v944_v2 = vpop.permute.xlu1 %943 }
 0x83d   :  { %969 = vst.msk [vmem:[#allocation2 + $0x20] sm:$0xff] %vm183_vm15, %v950_v1 }
 0x83e   :  { %1017 = vst.msk [vmem:[#allocation2 + $0x20] sm:$0xff] %vm192_vm0, %v1656_v5 }
 0x83f   :  { %1033 = vst.msk [vmem:[#allocation2 + $0x20] sm:$0xff] %vm196_vm1, %v950_v1  ;;  %v1078_v1 = vld [vmem:[%s2839_s16 + $0x48] sm:$0xff] }
 0x840   :  { %1057 = vst.msk [vmem:[#allocation2 + $0x20] sm:$0xff] %vm202_vm2, %v1656_v5 }
 0x841   :  { %966 = vst.msk [vmem:[#allocation2 + $0x8] sm:$0xff] %vm183_vm15, %v944_v2 }
 0x842   :  { %1014 = vst.msk [vmem:[#allocation2 + $0x8] sm:$0xff] %vm192_vm0, %v1656_v5  ;;  %1373 = vrot.lane.b32.xlu0 %v1350_v43, %s1659_s21  ;;  %1365 = vrot.lane.b32.xlu2 %v1346_v55, %s1659_s21 }
 0x843   :  { %1030 = vst.msk [vmem:[#allocation2 + $0x8] sm:$0xff] %vm196_vm1, %v944_v2  ;;  %1369 = vrot.lane.b32.xlu1 %v1348_v41, %s1659_s21  ;;  %v1081_v2 = vld [vmem:[%s2839_s16 + $0x60] sm:$0xff] }
 0x844   :  { %1054 = vst.msk [vmem:[#allocation2 + $0x8] sm:$0xff] %vm202_vm2, %v1656_v5 }
 0x847   :  { %v1089_v19 = vld [vmem:[#allocation2 + $0x20] sm:$0xff] }
 0x84a   :  { %1468 = vrot.lane.b32.xlu0 %v1346_v55, %s1661_s1  ;;  %1371 = vrot.lane.b32.xlu2 %v1349_v60, %s1659_s21 }
 0x84b   :  { %v1086_v27 = vld [vmem:[#allocation2 + $0x8] sm:$0xff]  ;;  %1375 = vrot.lane.b32.xlu1 %v1351_v53, %s1659_s21 }
 0x84c   :  { %v948_v3 = vpop.permute.xlu0 %947 }
 0x84d   :  { %968 = vst.msk [vmem:[#allocation2 + $0x18] sm:$0xff] %vm183_vm15, %v948_v3 }
 0x84e   :  { %1016 = vst.msk [vmem:[#allocation2 + $0x18] sm:$0xff] %vm192_vm0, %v1656_v5 }
 0x84f   :  { %1032 = vst.msk [vmem:[#allocation2 + $0x18] sm:$0xff] %vm196_vm1, %v948_v3  ;;  %v1080_v3 = vld [vmem:[%s2839_s16 + $0x58] sm:$0xff] }
 0x850   :  { %1056 = vst.msk [vmem:[#allocation2 + $0x18] sm:$0xff] %vm202_vm2, %v1656_v5 }
 0x852   :  { %1474 = vrot.lane.b32.xlu0 %v1349_v60, %s1661_s1  ;;  %1466 = vrot.lane.b32.xlu2 %v2531_v29, %s1661_s1 }
 0x853   :  { %1470 = vrot.lane.b32.xlu1 %v1347_v31, %s1661_s1 }
 0x854   :  { %v956_v4 = vpop.permute.xlu2 %955 }
 0x855   :  { %972 = vst.msk [vmem:[#allocation2 + $0x38] sm:$0xff] %vm183_vm15, %v956_v4 }
 0x856   :  { %1020 = vst.msk [vmem:[#allocation2 + $0x38] sm:$0xff] %vm192_vm0, %v1656_v5 }
 0x857   :  { %1036 = vst.msk [vmem:[#allocation2 + $0x38] sm:$0xff] %vm196_vm1, %v956_v4  ;;  %v1088_v20 = vld [vmem:[#allocation2 + $0x18] sm:$0xff]  ;;  %v1083_v4 = vld [vmem:[%s2839_s16 + $0x70] sm:$0xff] }
 0x858   :  { %1060 = vst.msk [vmem:[#allocation2 + $0x38] sm:$0xff] %vm202_vm2, %v1656_v5 }
 0x85a   :  { %1472 = vrot.lane.b32.xlu2 %v1348_v41, %s1661_s1  ;;  %1377 = vrot.lane.b32.xlu0 %v1352_v0, %s1659_s21 }
 0x85b   :  { %1476 = vrot.lane.b32.xlu1 %v1350_v43, %s1661_s1 }
 0x85c   :  { %v992_v6 = vpop.permute.xlu2 %991  ;;  %v952_v8 = vpop.permute.xlu1 %951 }
 0x85d   :  { %1010 = vst.msk [vmem:[#allocation2 + $0xa8] sm:$0xff] %vm190_vm3, %v992_v6 }
 0x85e   :  { %1026 = vst.msk [vmem:[#allocation2 + $0xa8] sm:$0xff] %vm194_vm4, %v1656_v5 }
 0x85f   :  { %1050 = vst.msk [vmem:[#allocation2 + $0xa8] sm:$0xff] %vm200_vm5, %v992_v6  ;;  %v1092_v9 = vld [vmem:[#allocation2 + $0x38] sm:$0xff]  ;;  %v1082_v6 = vld [vmem:[%s2839_s16 + $0x68] sm:$0xff] }
 0x860   :  { %1066 = vst.msk [vmem:[#allocation2 + $0xa8] sm:$0xff] %vm204_vm6, %v1656_v5  ;;  %1190 = vmatpush.msra.mxu3 %v1092_v9 }
 0x861   :  { %970 = vst.msk [vmem:[#allocation2 + $0x28] sm:$0xff] %vm183_vm15, %v952_v8 }
 0x862   :  { %1018 = vst.msk [vmem:[#allocation2 + $0x28] sm:$0xff] %vm192_vm0, %v1656_v5  ;;  %1478 = vrot.lane.b32.xlu2 %v1351_v53, %s1661_s1 }
 0x863   :  { %1034 = vst.msk [vmem:[#allocation2 + $0x28] sm:$0xff] %vm196_vm1, %v952_v8  ;;  %1480 = vrot.lane.b32.xlu1 %v1352_v0, %s1661_s1  ;;  %v1084_v8 = vld [vmem:[%s2839_s16 + $0x78] sm:$0xff] }
 0x864   :  { %1058 = vst.msk [vmem:[#allocation2 + $0x28] sm:$0xff] %vm202_vm2, %v1656_v5  ;;  %v954_v10 = vpop.permute.xlu0 %953  ;;  %v988_v12 = vpop.permute.xlu2 %987 }
 0x865   :  { %971 = vst.msk [vmem:[#allocation2 + $0x30] sm:$0xff] %vm183_vm15, %v954_v10 }
 0x866   :  { %1019 = vst.msk [vmem:[#allocation2 + $0x30] sm:$0xff] %vm192_vm0, %v1656_v5 }
 0x867   :  { %1035 = vst.msk [vmem:[#allocation2 + $0x30] sm:$0xff] %vm196_vm1, %v954_v10  ;;  %v1106_v40 = vld [vmem:[#allocation2 + $0xa8] sm:$0xff] }
 0x868   :  { %1059 = vst.msk [vmem:[#allocation2 + $0x30] sm:$0xff] %vm202_vm2, %v1656_v5 }
 0x869   :  { %1008 = vst.msk [vmem:[#allocation2 + $0x98] sm:$0xff] %vm190_vm3, %v988_v12 }
 0x86a   :  { %1024 = vst.msk [vmem:[#allocation2 + $0x98] sm:$0xff] %vm194_vm4, %v1656_v5 }
 0x86b   :  { %1048 = vst.msk [vmem:[#allocation2 + $0x98] sm:$0xff] %vm200_vm5, %v988_v12  ;;  %v1090_v17 = vld [vmem:[#allocation2 + $0x28] sm:$0xff] }
 0x86c   :  { %1064 = vst.msk [vmem:[#allocation2 + $0x98] sm:$0xff] %vm204_vm6, %v1656_v5  ;;  %v994_v13 = vpop.permute.xlu0 %993  ;;  %v982_v15 = vpop.permute.xlu2 %981 }
 0x86d   :  { %1011 = vst.msk [vmem:[#allocation2 + $0xb0] sm:$0xff] %vm190_vm3, %v994_v13  ;;  %v996_v14 = vpop.permute.xlu1 %995 }
 0x86e   :  { %1027 = vst.msk [vmem:[#allocation2 + $0xb0] sm:$0xff] %vm194_vm4, %v1656_v5 }
 0x86f   :  { %1051 = vst.msk [vmem:[#allocation2 + $0xb0] sm:$0xff] %vm200_vm5, %v994_v13  ;;  %v1091_v16 = vld [vmem:[#allocation2 + $0x30] sm:$0xff] }
 0x870   :  { %1067 = vst.msk [vmem:[#allocation2 + $0xb0] sm:$0xff] %vm204_vm6, %v1656_v5  ;;  %1191 = vmatpush.msra.mxu3 %v1091_v16 }
 0x871   :  { %1012 = vst.msk [vmem:[#allocation2 + $0xb8] sm:$0xff] %vm190_vm3, %v996_v14 }
 0x872   :  { %1028 = vst.msk [vmem:[#allocation2 + $0xb8] sm:$0xff] %vm194_vm4, %v1656_v5  ;;  %1192 = vmatpush.msra.mxu3 %v1090_v17 }
 0x873   :  { %1052 = vst.msk [vmem:[#allocation2 + $0xb8] sm:$0xff] %vm200_vm5, %v996_v14  ;;  %v1104_v47 = vld [vmem:[#allocation2 + $0x98] sm:$0xff] }
 0x874   :  { %1068 = vst.msk [vmem:[#allocation2 + $0xb8] sm:$0xff] %vm204_vm6, %v1656_v5  ;;  %v942_v21 = vpop.permute.xlu0 %941  ;;  %1193 = vmatpush.msra.mxu3 %v1089_v19  ;;  %v414_v28 = vpop.permute.xlu2 %413 }
 0x875   :  { %1005 = vst.msk [vmem:[#allocation2 + $0x80] sm:$0xff] %vm190_vm3, %v982_v15  ;;  %v990_v23 = vpop.permute.xlu1 %989 }
 0x876   :  { %1021 = vst.msk [vmem:[#allocation2 + $0x80] sm:$0xff] %vm194_vm4, %v1656_v5  ;;  %1194 = vmatpush.msra.mxu3 %v1088_v20 }
 0x877   :  { %1045 = vst.msk [vmem:[#allocation2 + $0x80] sm:$0xff] %vm200_vm5, %v982_v15  ;;  %v1107_v36 = vld [vmem:[#allocation2 + $0xb0] sm:$0xff] }
 0x878   :  { %1061 = vst.msk [vmem:[#allocation2 + $0x80] sm:$0xff] %vm204_vm6, %v1656_v5  ;;  %1195 = vmatpush.msra.mxu3 %v1087_v24 }
 0x879   :  { %1009 = vst.msk [vmem:[#allocation2 + $0xa0] sm:$0xff] %vm190_vm3, %v990_v23 }
 0x87a   :  { %1025 = vst.msk [vmem:[#allocation2 + $0xa0] sm:$0xff] %vm194_vm4, %v1656_v5  ;;  %1196 = vmatpush.msra.mxu3 %v1086_v27 }
 0x87b   :  { %1049 = vst.msk [vmem:[#allocation2 + $0xa0] sm:$0xff] %vm200_vm5, %v990_v23  ;;  %v1108_v35 = vld [vmem:[#allocation2 + $0xb8] sm:$0xff] }
 0x87c   :  { %1065 = vst.msk [vmem:[#allocation2 + $0xa0] sm:$0xff] %vm204_vm6, %v1656_v5  ;;  %v986_v37 = vpop.permute.xlu0 %985  ;;  %1231 = vmatpush.msra.mxu0 %v1108_v35  ;;  %v712_v44 = vpop.permute.xlu2 %711 }
 0x87d   :  { %1606 = vst.msk [vmem:[%s2830_s22 + $0x18] sm:$0xff] %vm190_vm3, %v414_v28  ;;  %v984_v39 = vpop.permute.xlu1 %983 }
 0x87e   :  { %965 = vst.msk [vmem:[#allocation2] sm:$0xff] %vm183_vm15, %v942_v21  ;;  %1232 = vmatpush.msra.mxu0 %v1107_v36 }
 0x87f   :  { %1013 = vst.msk [vmem:[#allocation2] sm:$0xff] %vm192_vm0, %v1656_v5  ;;  %v1101_v61 = vld [vmem:[#allocation2 + $0x80] sm:$0xff]  ;;  %vm1574_vm0 = vcmask 1024  }
 0x880   :  { %1029 = vst.msk [vmem:[#allocation2] sm:$0xff] %vm196_vm1, %v942_v21  ;;  %1233 = vmatpush.msra.mxu0 %v1106_v40 }
 0x881   :  { %1053 = vst.msk [vmem:[#allocation2] sm:$0xff] %vm202_vm2, %v1656_v5 }
 0x882   :  { %1006 = vst.msk [vmem:[#allocation2 + $0x88] sm:$0xff] %vm190_vm3, %v984_v39 }
 0x883   :  { %1022 = vst.msk [vmem:[#allocation2 + $0x88] sm:$0xff] %vm194_vm4, %v1656_v5  ;;  %v1105_v45 = vld [vmem:[#allocation2 + $0xa0] sm:$0xff] }
 0x884   :  { %1046 = vst.msk [vmem:[#allocation2 + $0x88] sm:$0xff] %vm200_vm5, %v984_v39  ;;  %1234 = vmatpush.msra.mxu0 %v1105_v45  ;;  %v246_v48 = vpop.permute.xlu0 %245  ;;  %v1125_v9 = vpop.permute.xlu2 %1124 }
 0x885   :  { %1062 = vst.msk [vmem:[#allocation2 + $0x88] sm:$0xff] %vm204_vm6, %v1656_v5  ;;  %v412_v49 = vpop.permute.xlu1 %411 }
 0x886   :  { %1617 = vst.msk [vmem:[%s2835_s23 + $0x30] sm:$0xff] %vm190_vm3, %v712_v44  ;;  %1235 = vmatpush.msra.mxu0 %v1104_v47 }
 0x887   :  { %1007 = vst.msk [vmem:[#allocation2 + $0x90] sm:$0xff] %vm190_vm3, %v986_v37 }
 0x888   :  { %1023 = vst.msk [vmem:[#allocation2 + $0x90] sm:$0xff] %vm194_vm4, %v1656_v5  ;;  %v1085_v52 = vld [vmem:[#allocation2] sm:$0xff] }
 0x889   :  { %1047 = vst.msk [vmem:[#allocation2 + $0x90] sm:$0xff] %vm200_vm5, %v986_v37  ;;  %1197 = vmatpush.msra.mxu3 %v1085_v52 }
 0x88a   :  { %1063 = vst.msk [vmem:[#allocation2 + $0x90] sm:$0xff] %vm204_vm6, %v1656_v5  ;;  %1198 = vmatmul.f32.vlgmr.msra.gmra.mxu3 %v1069_v51 }
 0x88b   :  { %1605 = vst.msk [vmem:[%s2830_s22 + $0x10] sm:$0xff] %vm190_vm3, %v412_v49 }
 0x88c   :  { %1600 = vst.msk [vmem:[%s2865_s5 + $0x8] sm:$0xff] %vm190_vm3, %v246_v48  ;;  %v708_v5 = vpop.permute.xlu0 %707  ;;  %v1102_v59 = vld [vmem:[#allocation2 + $0x88] sm:$0xff]  ;;  %v1140_v10 = vpop.permute.xlu2 %1139 }
 0x88d   :  { %v710_v56 = vpop.permute.xlu1 %709  ;;  %1615 = vst.msk [vmem:[%s2835_s23 + $0x20] sm:$0xff] %vm190_vm3, %v708_v5 }
 0x88e   :  { %1616 = vst.msk [vmem:[%s2835_s23 + $0x28] sm:$0xff] %vm190_vm3, %v710_v56 }
 0x891   :  { %v1103_v58 = vld [vmem:[#allocation2 + $0x90] sm:$0xff] }
 0x892   :  { %1236 = vmatpush.msra.mxu0 %v1103_v58  ;;  %1201 = vmatmul.f32.gmra.mxu3 %v1071_v57 }
 0x894   :  { %1237 = vmatpush.msra.mxu0 %v1102_v59  ;;  %v714_v63 = vpop.permute.xlu0 %713  ;;  %v2677_v13 = vpop.permute.xlu2 %1154 }
 0x895   :  { %1618 = vst.msk [vmem:[%s2835_s23 + $0x38] sm:$0xff] %vm190_vm3, %v714_v63  ;;  %v1120_v12 = vpop.permute.xlu1 %1119 }
 0x896   :  { %1238 = vmatpush.msra.mxu0 %v1101_v61 }
 0x897   :  { %1627 = vmatmul.msk.f32.vlgmr.msra.gmra.mxu0 %vm1157_vm13, %v1070_v62 }
 0x89a   :  { %1204 = vmatmul.f32.gmra.mxu3 %v1073_v34 }
 0x89c   :  { %v1130_v15 = vpop.permute.xlu0 %1129  ;;  %v1366_v16 = vpop.permute.xlu2 %1365 }
 0x89d   :  { %v1135_v14 = vpop.permute.xlu1 %1134 }
 0x89f   :  { %1628 = vmatmul.msk.f32.gmra.mxu0 %vm1157_vm13, %v1072_v7 }
 0x8a2   :  { %1207 = vmatmul.f32.gmra.mxu3 %v1075_v11 }
 0x8a4   :  { %v2681_v19 = vpop.permute.xlu0 %1144  ;;  %v2683_v20 = vpop.permute.xlu2 %1371 }
 0x8a5   :  { %v2679_v17 = vpop.permute.xlu1 %1149 }
 0x8a7   :  { %1629 = vmatmul.msk.f32.gmra.mxu0 %vm1157_vm13, %v1074_v22 }
 0x8aa   :  { %1210 = vmatmul.f32.gmra.mxu3 %v1077_v26 }
 0x8ac   :  { %v1368_v24 = vpop.permute.xlu0 %1367  ;;  %v1467_v35 = vpop.permute.xlu2 %1466 }
 0x8ad   :  { %v1364_v23 = vpop.permute.xlu1 %1363 }
 0x8af   :  { %1630 = vmatmul.msk.f32.gmra.mxu0 %vm1157_vm13, %v1076_v30 }
 0x8b2   :  { %1213 = vmatmul.f32.gmra.mxu3 %v1079_v33 }
 0x8b4   :  { %v1374_v40 = vpop.permute.xlu0 %1373  ;;  %v1473_v7 = vpop.permute.xlu2 %1472 }
 0x8b5   :  { %v1370_v37 = vpop.permute.xlu1 %1369 }
 0x8b7   :  { %1631 = vmatmul.msk.f32.gmra.mxu0 %vm1157_vm13, %v1078_v1 }
 0x8ba   :  { %1216 = vmatmul.f32.gmra.mxu3 %v1081_v2 }
 0x8bc   :  { %v1469_v51 = vpop.permute.xlu0 %1468 }
 0x8bf   :  { %1632 = vmatmul.msk.f32.gmra.mxu0 %vm1157_vm13, %v1080_v3 }
 0x8c2   :  { %1219 = vmatmul.f32.gmra.mxu3 %v1083_v4 }
 0x8c4   :  { %v1475_v2 = vpop.permute.xlu0 %1474 }
 0x8c7   :  { %1633 = vmatmul.msk.f32.gmra.mxu0 %vm1157_vm13, %v1082_v6 }
 0x8cf   :  { %1634 = vmatmul.msk.f32.gmra.mxu0 %vm1157_vm13, %v1084_v8 }
 0x90d   :  { %v1199_v21 = vpop.f32.mrf.mxu3 }
 0x90e   :  { %v1200_v27 = vadd.f32 %v1199_v21, %v1120_v12 }
 0x914   :  { %v1240_v28 = vpop.f32.mrf.mxu0 }
 0x915   :  { %v1241_v29 = vadd.f32 %v1240_v28, %v1200_v27  ;;  %v1202_v31 = vpop.f32.mrf.mxu3  ;;  %v1378_v27 = vpop.permute.xlu0 %1377 }
 0x916   :  { %v1203_v41 = vadd.f32 %v1202_v31, %v1125_v9 }
 0x917   :  { %v1264_v36 = vadd.f32 %v1241_v29, %v2334_v18  ;;  %v2692_v18 = vpop.permute.xlu1 %1375 }
 0x919   :  { %v1490_v39 = vmul.f32 %v1467_v35, %v1264_v36  ;;  %1312 = vrot.lane.b32.xlu2 %v1264_v36, %s1664_s14  ;;  %1280 = vrot.lane.b32.xlu0 %v1264_v36, %s1663_s7  ;;  %v1387_v48 = vmul.f32 %v1364_v23, %v1264_v36 }
 0x91b   :  { %1506 = vrot.lane.b32.xlu1 %v1490_v39, %s1664_s14 }
 0x91c   :  { %v1243_v43 = vpop.f32.mrf.mxu0 }
 0x91d   :  { %v1244_v44 = vadd.f32 %v1243_v43, %v1203_v41  ;;  %v1205_v45 = vpop.f32.mrf.mxu3 }
 0x91e   :  { %v1206_v49 = vadd.f32 %v1205_v45, %v1130_v15 }
 0x91f   :  { %v1265_v47 = vadd.f32 %v1244_v44, %v2340_v25  ;;  %v1471_v25 = vpop.permute.xlu1 %1470 }
 0x921   :  { %1314 = vrot.lane.b32.xlu0 %v1265_v47, %s1664_s14  ;;  %1403 = vrot.lane.b32.xlu2 %v1387_v48, %s1663_s7  ;;  %v1491_v55 = vmul.f32 %v1469_v51, %v1265_v47  ;;  %v1388_v5 = vmul.f32 %v1366_v16, %v1265_v47 }
 0x923   :  { %1282 = vrot.lane.b32.xlu1 %v1265_v47, %s1663_s7 }
 0x924   :  { %v1246_v52 = vpop.f32.mrf.mxu0 }
 0x925   :  { %v1247_v53 = vadd.f32 %v1246_v52, %v1206_v49  ;;  %v1208_v56 = vpop.f32.mrf.mxu3 }
 0x926   :  { %v1209_v59 = vadd.f32 %v1208_v56, %v1135_v14 }
 0x927   :  { %v1266_v57 = vadd.f32 %v1247_v53, %v2348_v32 }
 0x929   :  { %1405 = vrot.lane.b32.xlu0 %v1388_v5, %s1663_s7  ;;  %1508 = vrot.lane.b32.xlu2 %v1491_v55, %s1664_s14  ;;  %v1492_v60 = vmul.f32 %v1471_v25, %v1266_v57  ;;  %v1389_v62 = vmul.f32 %v1368_v24, %v1266_v57 }
 0x92b   :  { %1316 = vrot.lane.b32.xlu1 %v1266_v57, %s1664_s14 }
 0x92c   :  { %v1249_v58 = vpop.f32.mrf.mxu0 }
 0x92d   :  { %v1250_v61 = vadd.f32 %v1249_v58, %v1209_v59  ;;  %v1211_v63 = vpop.f32.mrf.mxu3 }
 0x92e   :  { %v1212_v11 = vadd.f32 %v1211_v63, %v1140_v10 }
 0x92f   :  { %v1267_v34 = vadd.f32 %v1250_v61, %v2356_v38 }
 0x931   :  { %1510 = vrot.lane.b32.xlu0 %v1492_v60, %s1664_s14  ;;  %1284 = vrot.lane.b32.xlu2 %v1266_v57, %s1663_s7  ;;  %v1493_v22 = vmul.f32 %v1473_v7, %v1267_v34  ;;  %v1390_v1 = vmul.f32 %v1370_v37, %v1267_v34 }
 0x933   :  { %1407 = vrot.lane.b32.xlu1 %v1389_v62, %s1663_s7 }
 0x934   :  { %v1252_v32 = vpop.f32.mrf.mxu0 }
 0x935   :  { %v1253_v26 = vadd.f32 %v1252_v32, %v1212_v11  ;;  %v1214_v30 = vpop.f32.mrf.mxu3 }
 0x936   :  { %v1215_v38 = vadd.f32 %v1214_v30, %v2681_v19 }
 0x937   :  { %v1268_v0 = vadd.f32 %v1253_v26, %v2364_v42  ;;  %v1477_v42 = vpop.permute.xlu1 %1476 }
 0x939   :  { %1286 = vrot.lane.b32.xlu0 %v1267_v34, %s1663_s7  ;;  %1318 = vrot.lane.b32.xlu2 %v1267_v34, %s1664_s14  ;;  %v1494_v6 = vmul.f32 %v1475_v2, %v1268_v0  ;;  %v1391_v8 = vmul.f32 %v2683_v20, %v1268_v0 }
 0x93b   :  { %1512 = vrot.lane.b32.xlu1 %v1493_v22, %s1664_s14 }
 0x93c   :  { %v1255_v33 = vpop.f32.mrf.mxu0 }
 0x93d   :  { %v1256_v3 = vadd.f32 %v1255_v33, %v1215_v38  ;;  %v1217_v4 = vpop.f32.mrf.mxu3 }
 0x93e   :  { %v1218_v15 = vadd.f32 %v1217_v4, %v2679_v17  ;;  %v1479_v17 = vpop.permute.xlu2 %1478 }
 0x93f   :  { %v1269_v10 = vadd.f32 %v1256_v3, %v2372_v46 }
 0x941   :  { %1320 = vrot.lane.b32.xlu0 %v1268_v0, %s1664_s14  ;;  %1409 = vrot.lane.b32.xlu2 %v1390_v1, %s1663_s7  ;;  %v1392_v12 = vmul.f32 %v1374_v40, %v1269_v10  ;;  %v1495_v16 = vmul.f32 %v1477_v42, %v1269_v10 }
 0x943   :  { %1288 = vrot.lane.b32.xlu1 %v1268_v0, %s1663_s7 }
 0x944   :  { %v1258_v9 = vpop.f32.mrf.mxu0 }
 0x945   :  { %v1220_v14 = vpop.f32.mrf.mxu3  ;;  %v1259_v20 = vadd.f32 %v1258_v9, %v1218_v15 }
 0x946   :  { %v1221_v46 = vadd.f32 %v1220_v14, %v2677_v13 }
 0x947   :  { %v1270_v23 = vadd.f32 %v1259_v20, %v2380_v50  ;;  %v1481_v50 = vpop.permute.xlu1 %1480 }
 0x949   :  { %1411 = vrot.lane.b32.xlu0 %v1391_v8, %s1663_s7  ;;  %1514 = vrot.lane.b32.xlu2 %v1494_v6, %s1664_s14  ;;  %v1496_v28 = vmul.f32 %v1479_v17, %v1270_v23  ;;  %v1393_v29 = vmul.f32 %v2692_v18, %v1270_v23 }
 0x94b   :  { %1322 = vrot.lane.b32.xlu1 %v1269_v10, %s1664_s14 }
 0x94c   :  { %v1261_v19 = vpop.f32.mrf.mxu0 }
 0x94d   :  { %v1262_v21 = vadd.f32 %v1261_v19, %v1221_v46 }
 0x94f   :  { %v1271_v24 = vadd.f32 %v1262_v21, %v2389_v54 }
 0x951   :  { %1413 = vrot.lane.b32.xlu0 %v1392_v12, %s1663_s7  ;;  %1290 = vrot.lane.b32.xlu2 %v1269_v10, %s1663_s7  ;;  %v1394_v31 = vmul.f32 %v1378_v27, %v1271_v24  ;;  %v1497_v54 = vmul.f32 %v1481_v50, %v1271_v24 }
 0x953   :  { %1516 = vrot.lane.b32.xlu1 %v1495_v16, %s1664_s14 }
 0x959   :  { %1292 = vrot.lane.b32.xlu0 %v1270_v23, %s1663_s7  ;;  %1324 = vrot.lane.b32.xlu2 %v1270_v23, %s1664_s14  ;;  %v30_v23 = vstv %s2841_s19 }
 0x95a   :  { %31 = vst [vmem:[#allocation3] sm:$0x1] %v30_v23 }
 0x95b   :  { %1294 = vrot.lane.b32.xlu1 %v1271_v24, %s1663_s7 }
 0x961   :  { %1518 = vrot.lane.b32.xlu0 %v1496_v28, %s1664_s14  ;;  %1415 = vrot.lane.b32.xlu2 %v1393_v29, %s1663_s7 }
 0x963   :  { %1417 = vrot.lane.b32.xlu1 %v1394_v31, %s1663_s7 }
 0x969   :  { %1326 = vrot.lane.b32.xlu0 %v1271_v24, %s1664_s14  ;;  %1520 = vrot.lane.b32.xlu2 %v1497_v54, %s1664_s14 }
 0x973   :  { %v1313_v13 = vpop.permute.xlu2 %1312 }
 0x974   :  { %1635 = vst.msk [vmem:[%s2840_s24 + $0x40] sm:$0xff] %vm190_vm3, %v1313_v13 }
 0x97b   :  { %v1404_v35 = vpop.permute.xlu2 %1403 }
 0x97c   :  { %v1427_v43 = vsel %vm190_vm3, %v1404_v35, 0.0 }
 0x983   :  { %v1509_v36 = vpop.permute.xlu2 %1508 }
 0x984   :  { %v1533_v48 = vsel %vm190_vm3, %v1509_v36, 0.0 }
 0x98b   :  { %v1281_v37 = vpop.permute.xlu0 %1280  ;;  %v1285_v39 = vpop.permute.xlu2 %1284 }
 0x98c   :  { %1304 = vst.msk [vmem:[%s2840_s24] sm:$0xff] %vm190_vm3, %v1281_v37 }
 0x98d   :  { %1306 = vst.msk [vmem:[%s2840_s24 + $0x10] sm:$0xff] %vm190_vm3, %v1285_v39  ;;  %v1507_v40 = vpop.permute.xlu1 %1506 }
 0x98e   :  { %v1530_v41 = vsel %vm190_vm3, %v1507_v40, 0.0 }
 0x992   :  { %1531 = vadd.xlane.f32.xlu2 %v1530_v41 }
 0x993   :  { %v1315_v44 = vpop.permute.xlu0 %1314  ;;  %1428 = vadd.xlane.f32.xlu0 %v1427_v43  ;;  %v1319_v45 = vpop.permute.xlu2 %1318 }
 0x994   :  { %1636 = vst.msk [vmem:[%s2840_s24 + $0x48] sm:$0xff] %vm190_vm3, %v1315_v44 }
 0x995   :  { %1638 = vst.msk [vmem:[%s2840_s24 + $0x58] sm:$0xff] %vm190_vm3, %v1319_v45  ;;  %v1283_v47 = vpop.permute.xlu1 %1282 }
 0x996   :  { %1305 = vst.msk [vmem:[%s2840_s24 + $0x8] sm:$0xff] %vm190_vm3, %v1283_v47 }
 0x99a   :  { %1534 = vadd.xlane.f32.xlu2 %v1533_v48 }
 0x99b   :  { %v1406_v18 = vpop.permute.xlu0 %1405  ;;  %v1410_v49 = vpop.permute.xlu2 %1409 }
 0x99c   :  { %v1430_v51 = vsel %vm190_vm3, %v1406_v18, 0.0  ;;  %v1436_v53 = vsel %vm190_vm3, %v1410_v49, 0.0 }
 0x99d   :  { %1431 = vadd.xlane.f32.xlu1 %v1430_v51  ;;  %v1317_v52 = vpop.permute.xlu1 %1316 }
 0x99e   :  { %1637 = vst.msk [vmem:[%s2840_s24 + $0x50] sm:$0xff] %vm190_vm3, %v1317_v52 }
 0x9a2   :  { %1437 = vadd.xlane.f32.xlu2 %v1436_v53 }
 0x9a3   :  { %v1511_v55 = vpop.permute.xlu0 %1510  ;;  %v1515_v5 = vpop.permute.xlu2 %1514 }
 0x9a4   :  { %v1536_v56 = vsel %vm190_vm3, %v1511_v55, 0.0  ;;  %v1542_v58 = vsel %vm190_vm3, %v1515_v5, 0.0  ;;  %v1353_v55 = vlaneseq }
 0x9a5   :  { %1537 = vadd.xlane.f32.xlu1 %v1536_v56  ;;  %v1408_v57 = vpop.permute.xlu1 %1407 }
 0x9a6   :  { %v1433_v25 = vsel %vm190_vm3, %v1408_v57, 0.0 }
 0x9a7   :  { %1434 = vadd.xlane.f32.xlu0 %v1433_v25 }
 0x9aa   :  { %1543 = vadd.xlane.f32.xlu2 %v1542_v58  ;;  %v1354_v58 = vshrl.u32 %v1353_v55, 7 }
 0x9ab   :  { %v1287_v59 = vpop.permute.xlu0 %1286  ;;  %v1291_v60 = vpop.permute.xlu2 %1290 }
 0x9ac   :  { %1307 = vst.msk [vmem:[%s2840_s24 + $0x18] sm:$0xff] %vm190_vm3, %v1287_v59  ;;  %vm1464_vm14 = vcmp.eq.s32.totalorder %v1354_v58, 0  ;;  %vm1567_vm15 = vcmp.eq.s32.totalorder %v1354_v58, 1 }
 0x9ad   :  { %1309 = vst.msk [vmem:[%s2840_s24 + $0x28] sm:$0xff] %vm190_vm3, %v1291_v60  ;;  %v1513_v61 = vpop.permute.xlu1 %1512 }
 0x9ae   :  { %v1539_v62 = vsel %vm190_vm3, %v1513_v61, 0.0 }
 0x9af   :  { %1540 = vadd.xlane.f32.xlu0 %v1539_v62 }
 0x9b3   :  { %v1321_v63 = vpop.permute.xlu0 %1320  ;;  %v1325_v32 = vpop.permute.xlu2 %1324 }
 0x9b4   :  { %1639 = vst.msk [vmem:[%s2840_s24 + $0x60] sm:$0xff] %vm190_vm3, %v1321_v63 }
 0x9b5   :  { %1641 = vst.msk [vmem:[%s2840_s24 + $0x70] sm:$0xff] %vm190_vm3, %v1325_v32  ;;  %v1289_v34 = vpop.permute.xlu1 %1288  ;;  %v1655_v32 = vld [vmem:[#allocation3] ss:$0 sm:$0xff] }
 0x9b6   :  { %1308 = vst.msk [vmem:[%s2840_s24 + $0x20] sm:$0xff] %vm190_vm3, %v1289_v34 }
 0x9bb   :  { %v1412_v7 = vpop.permute.xlu0 %1411  ;;  %v1416_v11 = vpop.permute.xlu2 %1415 }
 0x9bc   :  { %v1445_v22 = vsel %vm190_vm3, %v1416_v11, 0.0  ;;  %v1439_v26 = vsel %vm190_vm3, %v1412_v7, 0.0 }
 0x9bd   :  { %1440 = vadd.xlane.f32.xlu1 %v1439_v26  ;;  %v1323_v30 = vpop.permute.xlu1 %1322  ;;  %1446 = vadd.xlane.f32.xlu2 %v1445_v22 }
 0x9be   :  { %1640 = vst.msk [vmem:[%s2840_s24 + $0x68] sm:$0xff] %vm190_vm3, %v1323_v30 }
 0x9c3   :  { %v1414_v33 = vpop.permute.xlu0 %1413  ;;  %v1521_v0 = vpop.permute.xlu2 %1520 }
 0x9c4   :  { %v1551_v1 = vsel %vm190_vm3, %v1521_v0, 0.0  ;;  %v1442_v38 = vsel %vm190_vm3, %v1414_v33, 0.0 }
 0x9c5   :  { %v1517_v2 = vpop.permute.xlu1 %1516  ;;  %1443 = vadd.xlane.f32.xlu0 %v1442_v38  ;;  %1552 = vadd.xlane.f32.xlu2 %v1551_v1 }
 0x9c6   :  { %v1545_v3 = vsel %vm190_vm3, %v1517_v2, 0.0 }
 0x9c7   :  { %1546 = vadd.xlane.f32.xlu1 %v1545_v3 }
 0x9cb   :  { %v1293_v4 = vpop.permute.xlu0 %1292 }
 0x9cc   :  { %1310 = vst.msk [vmem:[%s2840_s24 + $0x30] sm:$0xff] %vm190_vm3, %v1293_v4 }
 0x9cd   :  { %v1295_v6 = vpop.permute.xlu1 %1294 }
 0x9ce   :  { %1311 = vst.msk [vmem:[%s2840_s24 + $0x38] sm:$0xff] %vm190_vm3, %v1295_v6 }
 0x9d3   :  { %v1519_v8 = vpop.permute.xlu0 %1518 }
 0x9d4   :  { %v1548_v9 = vsel %vm190_vm3, %v1519_v8, 0.0 }
 0x9d5   :  { %v1418_v10 = vpop.permute.xlu1 %1417  ;;  %1549 = vadd.xlane.f32.xlu0 %v1548_v9 }
 0x9d6   :  { %v1448_v42 = vsel %vm190_vm3, %v1418_v10, 0.0 }
 0x9d7   :  { %1449 = vadd.xlane.f32.xlu1 %v1448_v42 }
 0x9db   :  { %v1327_v12 = vpop.permute.xlu0 %1326 }
 0x9dc   :  { %1642 = vst.msk [vmem:[%s2840_s24 + $0x78] sm:$0xff] %vm190_vm3, %v1327_v12 }
 0xa05   :  { %v1532_v14 = vpop.xlane.xlu2 %1531 }
 0xa06   :  { %v1429_v16 = vpop.xlane.xlu0 %1428 }
 0xa0d   :  { %v1535_v15 = vpop.xlane.xlu2 %1534 }
 0xa0e   :  { %v1554_v29 = vadd.f32 %v1535_v15, %v1532_v14 }
 0xa10   :  { %v1432_v19 = vpop.xlane.xlu1 %1431 }
 0xa11   :  { %v1451_v28 = vadd.f32 %v1432_v19, %v1429_v16 }
 0xa15   :  { %v1438_v20 = vpop.xlane.xlu2 %1437 }
 0xa18   :  { %v1538_v21 = vpop.xlane.xlu1 %1537 }
 0xa19   :  { %v1555_v50 = vadd.f32 %v1554_v29, %v1538_v21 }
 0xa1a   :  { %v1435_v46 = vpop.xlane.xlu0 %1434 }
 0xa1b   :  { %v1452_v31 = vadd.f32 %v1451_v28, %v1435_v46 }
 0xa1d   :  { %v1544_v24 = vpop.xlane.xlu2 %1543  ;;  %v1453_v36 = vadd.f32 %v1452_v31, %v1438_v20 }
 0xa22   :  { %v1541_v17 = vpop.xlane.xlu0 %1540 }
 0xa23   :  { %v1556_v35 = vadd.f32 %v1555_v50, %v1541_v17 }
 0xa25   :  { %v1557_v41 = vadd.f32 %v1556_v35, %v1544_v24 }
 0xa30   :  { %v1441_v27 = vpop.xlane.xlu1 %1440  ;;  %v1447_v54 = vpop.xlane.xlu2 %1446 }
 0xa31   :  { %v1454_v39 = vadd.f32 %v1453_v36, %v1441_v27 }
 0xa38   :  { %v1444_v13 = vpop.xlane.xlu0 %1443  ;;  %v1553_v48 = vpop.xlane.xlu2 %1552 }
 0xa39   :  { %v1455_v40 = vadd.f32 %v1454_v39, %v1444_v13 }
 0xa3a   :  { %v1547_v37 = vpop.xlane.xlu1 %1546 }
 0xa3b   :  { %v1558_v43 = vadd.f32 %v1557_v41, %v1547_v37  ;;  %v1456_v47 = vadd.f32 %v1455_v40, %v1447_v54 }
 0xa48   :  { %v1550_v44 = vpop.xlane.xlu0 %1549 }
 0xa49   :  { %v1559_v45 = vadd.f32 %v1558_v43, %v1550_v44 }
 0xa4a   :  { %v1450_v18 = vpop.xlane.xlu1 %1449 }
 0xa4b   :  { %v1560_v49 = vadd.f32 %v1559_v45, %v1553_v48  ;;  %v1457_v51 = vadd.f32 %v1456_v47, %v1450_v18 }
 0xa4d   :  { %v1561_v52 = vrot.slane %v1560_v49, 4  ;;  %v1458_v53 = vrot.slane %v1457_v51, 4 }
 0xa4f   :  { %v1562_v5 = vadd.f32 %v1561_v52, %v1560_v49  ;;  %v1459_v56 = vadd.f32 %v1458_v53, %v1457_v51 }
 0xa51   :  { %v1563_v57 = vrot.slane %v1562_v5, 2  ;;  %v1460_v25 = vrot.slane %v1459_v56, 2 }
 0xa53   :  { %v1564_v59 = vadd.f32 %v1563_v57, %v1562_v5  ;;  %v1461_v60 = vadd.f32 %v1460_v25, %v1459_v56 }
 0xa55   :  { %v1565_v61 = vrot.slane %v1564_v59, 1  ;;  %v1462_v62 = vrot.slane %v1461_v60, 1 }
 0xa57   :  { %v1566_v63 = vadd.f32 %v1565_v61, %v1564_v59  ;;  %v1463_v34 = vadd.f32 %v1462_v62, %v1461_v60 }
 0xa59   :  { %v1465_v7 = vsel %vm1464_vm14, %v1463_v34, 0.0 }
 0xa5a   :  { %v1568_v11 = vsel %vm1567_vm15, %v1566_v63, %v1465_v7 }
 0xa5b   :  { %v1573_v22 = vadd.f32 %v1655_v32, %v1568_v11 }
 0xa5d   :  { %1575 = vst.msk [vmem:[%s2842_s20] sm:$0x3] %vm1574_vm0, %v1573_v22 }

// kernel: multi_discriminator_forward.4
= control target key start
LH: loop header
LB: loop body
LE: loop exit
PB: predicated region body
PF: predicated region fallthrough
CT: control target
= control target key end

     0   :  { %vm72_vm0 = vcmask 130048   ;;  %v1656_v5 = vmov 0.0   ;;  %vm116_vm1 = vcmask 44032   ;;  %vm120_vm2 = vcmask 52272   ;;  %s1658_s25 = smov 10   ;;  %s2818_s0 = inlined_call_operand.vmem [shape: f32[2,4,6], index: 0, kind: input, shape index: {}]   ;;  %s2819_s1 = inlined_call_operand.vmem [shape: f32[2,4,6], index: 1, kind: input, shape index: {}]   ;;  %s2820_s3 = inlined_call_operand.vmem [shape: f32[8,1], index: 3, kind: input, shape index: {}]   ;;  %s2821_s5 = inlined_call_operand.vmem [shape: f32[8,1], index: 5, kind: input, shape index: {}]   ;;  %s2822_s7 = inlined_call_operand.vmem [shape: f32[16,1], index: 7, kind: input, shape index: {}]   ;;  %s2823_s2 = inlined_call_operand.vmem [shape: f32[8,24], index: 2, kind: input, shape index: {}]   ;;  %s2824_s4 = inlined_call_operand.vmem [shape: f32[8,24], index: 4, kind: input, shape index: {}]   ;;  %s2825_s9 = inlined_call_operand.vmem [shape: f32[16,1], index: 9, kind: input, shape index: {}]   ;;  %s2826_s21 = inlined_call_operand.vmem [shape: f32[2,8,6], index: 21, kind: output, shape index: {1}]   ;;  %s2827_s6 = inlined_call_operand.vmem [shape: f32[16,24], index: 6, kind: input, shape index: {}]   ;;  %s2828_s8 = inlined_call_operand.vmem [shape: f32[16,48], index: 8, kind: input, shape index: {}]   ;;  %s2829_s11 = inlined_call_operand.vmem [shape: f32[32,1], index: 11, kind: input, shape index: {}]   ;;  %s2830_s22 = inlined_call_operand.vmem [shape: f32[2,16,6], index: 22, kind: output, shape index: {2}]   ;;  %s2831_s10 = inlined_call_operand.vmem [shape: f32[32,48], index: 10, kind: input, shape index: {}]   ;;  %s2832_s13 = inlined_call_operand.vmem [shape: f32[32,1], index: 13, kind: input, shape index: {}]   ;;  %s2833_s12 = inlined_call_operand.vmem [shape: f32[32,96], index: 12, kind: input, shape index: {}]   ;;  %s2834_s15 = inlined_call_operand.vmem [shape: f32[64,1], index: 15, kind: input, shape index: {}]   ;;  %s2835_s23 = inlined_call_operand.vmem [shape: f32[2,32,6], index: 23, kind: output, shape index: {3}]   ;;  %s2836_s14 = inlined_call_operand.vmem [shape: f32[64,96], index: 14, kind: input, shape index: {}]   ;;  %s2837_s17 = inlined_call_operand.vmem [shape: f32[64,1], index: 17, kind: input, shape index: {}]   ;;  %s2838_s18 = inlined_call_operand.vmem [shape: f32[64,6], index: 18, kind: input, shape index: {}]   ;;  %s2839_s16 = inlined_call_operand.vmem [shape: f32[64,192], index: 16, kind: input, shape index: {}]   ;;  %s2840_s24 = inlined_call_operand.vmem [shape: f32[2,64,6], index: 24, kind: output, shape index: {4}]   ;;  %s2841_s19 = inlined_call_operand.<no memory space> [shape: f32[1,1], index: 19, kind: input, shape index: {}]   ;;  %s2842_s20 = inlined_call_operand.vmem [shape: f32[2,1], index: 20, kind: output, shape index: {0}]  }
   0x1   :  { %2848 = sst [smem:[#allocation4_spill]] %s2818_s0  ;;  %75 = vst.msk [vmem:[#allocation2 + $0x10] sm:$0xff] %vm72_vm0, %v1656_v5  ;;  %v1662_v8 = vmov 0   ;;  %vm136_vm3 = vcmask 109632   ;;  %vm140_vm4 = vcmask 117872   ;;  %vm114_vm5 = vcmask 52232  }
   0x2   :  { %2849 = sst [smem:[#allocation5_spill]] %s2819_s1  ;;  %73 = vst.msk [vmem:[#allocation2] sm:$0xff] %vm72_vm0, %v1656_v5  ;;  %s1661_s1 = smov 9   ;;  %1652 = vset.pattern.permute.xlu2 %v1662_v8  ;;  %1653 = vset.pattern.permute.xlu0 %v1662_v8  ;;  %vm109_vm6 = vcmask 60432   ;;  %vm131_vm7 = vcmask 117832   ;;  %vm118_vm8 = vcmask 11272  }
   0x3   :  { %2850 = sst [smem:[#allocation6_spill]] %s2820_s3  ;;  %74 = vst.msk [vmem:[#allocation2 + $0x8] sm:$0xff] %vm72_vm0, %v1656_v5  ;;  %1654 = vset.pattern.permute.xlu1 %v1662_v8  ;;  %vm126_vm9 = vcmask 126032   ;;  %vm138_vm10 = vcmask 76872   ;;  %vm152_vm11 = vcmask 195584   ;;  %vm185_vm13 = vcmask 56328  }
   0x4   :  { %2851 = sst [smem:[#allocation7_spill]] %s2821_s5  ;;  %s1657_s5 = smov 8   ;;  %76 = vst.msk [vmem:[#allocation2 + $0x18] sm:$0xff] %vm72_vm0, %v1656_v5  ;;  %vm198_vm14 = vcmask 121928   ;;  %vm183_vm15 = vcmask 64528   ;;  %v263_v42 = vld [vmem:[%s2827_s6] sm:$0xff] }
   0x5   :  { %2852 = sst [smem:[#allocation8_spill]] %s2822_s7  ;;  %77 = vst.msk [vmem:[#allocation2 + $0x20] sm:$0xff] %vm72_vm0, %v1656_v5  ;;  %s1660_s7 = smov 2   ;;  %v264_v43 = vld [vmem:[%s2827_s6 + $0x8] sm:$0xff] }
   0x6   :  { %2853 = sst [smem:[#allocation9_spill]] %s2823_s2  ;;  %78 = vst.msk [vmem:[#allocation2 + $0x28] sm:$0xff] %vm72_vm0, %v1656_v5 }
   0x7   :  { %2854 = sst [smem:[#allocation10_spill]] %s2824_s4  ;;  %79 = vst.msk [vmem:[#allocation2 + $0x30] sm:$0xff] %vm72_vm0, %v1656_v5 }
   0x8   :  { %2855 = sst [smem:[#allocation11_spill]] %s2825_s9  ;;  %80 = vst.msk [vmem:[#allocation2 + $0x38] sm:$0xff] %vm72_vm0, %v1656_v5 }
   0x9   :  { %2856 = sst [smem:[#allocation12_spill]] %s2826_s21  ;;  %s1659_s21 = smov 1   ;;  %81 = vst.msk [vmem:[#allocation2 + $0x40] sm:$0xff] %vm72_vm0, %v1656_v5 }
   0xa   :  { %s2857_s27 = sld [smem:[#allocation4_spill]]  ;;  %82 = vst.msk [vmem:[#allocation2 + $0x48] sm:$0xff] %vm72_vm0, %v1656_v5 }
   0xb   :  { %s2858_s3 = sld [smem:[#allocation5_spill]]  ;;  %83 = vst.msk [vmem:[#allocation2 + $0x50] sm:$0xff] %vm72_vm0, %v1656_v5 }
   0xc   :  { %84 = vst.msk [vmem:[#allocation2 + $0x58] sm:$0xff] %vm72_vm0, %v1656_v5  ;;  %s2861_s9 = sld [smem:[#allocation8_spill]] }
   0xd   :  { %85 = vst.msk [vmem:[#allocation2 + $0x60] sm:$0xff] %vm72_vm0, %v1656_v5  ;;  %s2864_s0 = sld [smem:[#allocation11_spill]] }
   0xe   :  { %86 = vst.msk [vmem:[#allocation2 + $0x68] sm:$0xff] %vm72_vm0, %v1656_v5 }
   0xf   :  { %87 = vst.msk [vmem:[#allocation2 + $0x70] sm:$0xff] %vm72_vm0, %v1656_v5 }
  0x10   :  { %v1596_v0 = vld [vmem:[%s2857_s27 + $0x4] sm:$0xf]  ;;  %v97_v2 = vld [vmem:[%s2857_s27] sm:$0xf]  ;;  %88 = vst.msk [vmem:[#allocation2 + $0x78] sm:$0xff] %vm72_vm0, %v1656_v5  ;;  %s2859_s27 = sld [smem:[#allocation6_spill]] }
  0x11   :  { %v1597_v1 = vld [vmem:[%s2858_s3 + $0x4] sm:$0xf]  ;;  %v98_v4 = vld [vmem:[%s2858_s3] sm:$0xf]  ;;  %89 = vst.msk [vmem:[#allocation2 + $0x80] sm:$0xff] %vm72_vm0, %v1656_v5  ;;  %s2860_s3 = sld [smem:[#allocation7_spill]] }
  0x12   :  { %v104_v3 = vadd.f32 %v1597_v1, %v1596_v0  ;;  %v99_v6 = vadd.f32 %v98_v4, %v97_v2  ;;  %90 = vst.msk [vmem:[#allocation2 + $0x88] sm:$0xff] %vm72_vm0, %v1656_v5  ;;  %v269_v12 = vld [vmem:[%s2861_s9 + $0x8] sm:$0xff]  ;;  %v268_v35 = vld [vmem:[%s2861_s9] sm:$0xff] }
  0x13   :  { %91 = vst.msk [vmem:[#allocation2 + $0x90] sm:$0xff] %vm72_vm0, %v1656_v5  ;;  %v358_v38 = vld [vmem:[%s2864_s0 + $0x8] sm:$0xff]  ;;  %v357_v56 = vld [vmem:[%s2864_s0] sm:$0xff] }
  0x14   :  { %133 = vrot.lane.b32.xlu0 %v104_v3, %s1657_s5  ;;  %123 = vrot.lane.b32.xlu2 %v104_v3, %s1658_s25  ;;  %117 = vst.msk [vmem:[#allocation2 + $0x10] sm:$0xf] %vm116_vm1, %v99_v6  ;;  %s2862_s25 = sld [smem:[#allocation9_spill]]  ;;  %vm196_vm1 = vcmask 130128   ;;  %v349_v1 = vld [vmem:[%s2828_s8] sm:$0xff]  ;;  %v350_v2 = vld [vmem:[%s2828_s8 + $0x8] sm:$0xff] }
  0x15   :  { %111 = vrot.lane.b32.xlu1 %v99_v6, %s1659_s21  ;;  %121 = vst.msk [vmem:[#allocation2 + $0x10] sm:$0xf] %vm120_vm2, %v1656_v5  ;;  %vm202_vm2 = vcmask 80968   ;;  %s2865_s5 = sld [smem:[#allocation12_spill]] }
  0x16   :  { %92 = vst.msk [vmem:[#allocation2 + $0x98] sm:$0xff] %vm72_vm0, %v1656_v5  ;;  %v146_v7 = vld [vmem:[%s2859_s27] sm:$0xff]  ;;  %s2863_s27 = sld [smem:[#allocation10_spill]] }
  0x17   :  { %93 = vst.msk [vmem:[#allocation2 + $0xa0] sm:$0xff] %vm72_vm0, %v1656_v5  ;;  %v210_v9 = vld [vmem:[%s2860_s3] sm:$0xff] }
  0x18   :  { %94 = vst.msk [vmem:[#allocation2 + $0xa8] sm:$0xff] %vm72_vm0, %v1656_v5 }
  0x19   :  { %95 = vst.msk [vmem:[#allocation2 + $0xb0] sm:$0xff] %vm72_vm0, %v1656_v5 }
  0x1a   :  { %96 = vst.msk [vmem:[#allocation2 + $0xb8] sm:$0xff] %vm72_vm0, %v1656_v5  ;;  %v142_v18 = vld [vmem:[%s2862_s25] sm:$0xff]  ;;  %vm192_vm0 = vcmask 15368  }
  0x1c   :  { %106 = vrot.lane.b32.xlu0 %v99_v6, %s1660_s7  ;;  %149 = vperm.xlu2 %1652, %v146_v7   ;;  %s1663_s7 = smov 127   ;;  %v206_v30 = vld [vmem:[%s2863_s27] sm:$0xff] }
  0x1d   :  { %128 = vrot.lane.b32.xlu1 %v104_v3, %s1661_s1 }
  0x24   :  { %213 = vperm.xlu2 %1652, %v210_v9  }
  0x2c   :  { %277 = vperm.xlu2 %1652, %v269_v12   ;;  %v459_v12 = vld [vmem:[%s2829_s11 + $0x18] sm:$0xff] }
  0x6e   :  { %v124_v15 = vpop.permute.xlu2 %123 }
  0x76   :  { %v150_v20 = vpop.permute.xlu2 %149 }
  0x7e   :  { %v214_v31 = vpop.permute.xlu2 %213 }
  0x86   :  { %v134_v10 = vpop.permute.xlu0 %133  ;;  %v278_v49 = vpop.permute.xlu2 %277 }
  0x87   :  { %137 = vst.msk [vmem:[#allocation2 + $0x10] sm:$0xf] %vm136_vm3, %v134_v10  ;;  %v112_v11 = vpop.permute.xlu1 %111  ;;  %vm190_vm3 = vcmask 48128  }
  0x88   :  { %141 = vst.msk [vmem:[#allocation2 + $0x10] sm:$0xf] %vm140_vm4, %v1656_v5  ;;  %vm194_vm4 = vcmask 56368  }
  0x89   :  { %115 = vst.msk [vmem:[#allocation2 + $0x8] sm:$0xf] %vm114_vm5, %v112_v11  ;;  %vm200_vm5 = vcmask 113728  }
  0x8e   :  { %v107_v13 = vpop.permute.xlu0 %106 }
  0x8f   :  { %110 = vst.msk [vmem:[#allocation2] sm:$0xf] %vm109_vm6, %v107_v13  ;;  %v129_v14 = vpop.permute.xlu1 %128  ;;  %v145_v16 = vld [vmem:[#allocation2 + $0x10] sm:$0xff]  ;;  %vm204_vm6 = vcmask 121968  }
  0x90   :  { %132 = vst.msk [vmem:[#allocation2 + $0x8] sm:$0xf] %vm131_vm7, %v129_v14  ;;  %169 = vmatpush.msra.mxu0 %v145_v16  ;;  %v458_v13 = vld [vmem:[%s2829_s11 + $0x10] sm:$0xff]  ;;  %v456_v14 = vld [vmem:[%s2829_s11] sm:$0xff] }
  0x91   :  { %119 = vst.msk [vmem:[#allocation2] sm:$0xf] %vm118_vm8, %v1656_v5 }
  0x92   :  { %127 = vst.msk [vmem:[#allocation2] sm:$0xf] %vm126_vm9, %v124_v15  ;;  %vm369_vm9 = vcmask 392192   ;;  %v457_v15 = vld [vmem:[%s2829_s11 + $0x8] sm:$0xff] }
  0x93   :  { %139 = vst.msk [vmem:[#allocation2] sm:$0xf] %vm138_vm10, %v1656_v5 }
  0x97   :  { %v144_v17 = vld [vmem:[#allocation2 + $0x8] sm:$0xff] }
  0x98   :  { %170 = vmatpush.msra.mxu0 %v144_v17 }
  0x9a   :  { %v143_v19 = vld [vmem:[#allocation2] sm:$0xff] }
  0x9b   :  { %171 = vmatpush.msra.mxu0 %v143_v19 }
  0x9c   :  { %1598 = vmatmul.msk.f32.vlgmr.msra.gmra.mxu0 %vm152_vm11, %v142_v18 }
 0x119   :  { %v173_v21 = vpop.f32.mrf.mxu0 }
 0x11a   :  { %v174_v22 = vadd.f32 %v173_v21, %v150_v20 }
 0x11c   :  { %vm176_vm12 = vcmp.gt.f32.partialorder %v174_v22, 0.0  ;;  %v177_v23 = vmul.f32 0.2, %v174_v22 }
 0x11e   :  { %v178_v24 = vsel %vm176_vm12, %v174_v22, %v177_v23 }
 0x11f   :  { %186 = vst.msk [vmem:[#allocation2 + $0x8] sm:$0xff] %vm185_vm13, %v178_v24  ;;  %180 = vrot.lane.b32.xlu1 %v178_v24, %s1659_s21  ;;  %187 = vrot.lane.b32.xlu0 %v178_v24, %s1663_s7 }
 0x120   :  { %199 = vst.msk [vmem:[#allocation2 + $0x8] sm:$0xff] %vm198_vm14, %v178_v24 }
 0x127   :  { %v208_v28 = vld [vmem:[#allocation2 + $0x8] sm:$0xff] }
 0x191   :  { %v181_v25 = vpop.permute.xlu1 %180  ;;  %v188_v26 = vpop.permute.xlu0 %187 }
 0x192   :  { %184 = vst.msk [vmem:[#allocation2] sm:$0xff] %vm183_vm15, %v181_v25 }
 0x193   :  { %193 = vst.msk [vmem:[#allocation2] sm:$0xff] %vm192_vm0, %v1656_v5 }
 0x194   :  { %197 = vst.msk [vmem:[#allocation2] sm:$0xff] %vm196_vm1, %v181_v25 }
 0x195   :  { %203 = vst.msk [vmem:[#allocation2] sm:$0xff] %vm202_vm2, %v1656_v5 }
 0x196   :  { %191 = vst.msk [vmem:[#allocation2 + $0x10] sm:$0xff] %vm190_vm3, %v188_v26 }
 0x197   :  { %195 = vst.msk [vmem:[#allocation2 + $0x10] sm:$0xff] %vm194_vm4, %v1656_v5 }
 0x198   :  { %201 = vst.msk [vmem:[#allocation2 + $0x10] sm:$0xff] %vm200_vm5, %v188_v26  ;;  %v446_v26 = vld [vmem:[%s2831_s10] sm:$0xff] }
 0x199   :  { %205 = vst.msk [vmem:[#allocation2 + $0x10] sm:$0xff] %vm204_vm6, %v1656_v5 }
 0x19c   :  { %v207_v29 = vld [vmem:[#allocation2] sm:$0xff] }
 0x1a0   :  { %v209_v27 = vld [vmem:[#allocation2 + $0x10] sm:$0xff] }
 0x1a1   :  { %232 = vmatpush.msrb.mxu0 %v209_v27  ;;  %v447_v27 = vld [vmem:[%s2831_s10 + $0x8] sm:$0xff] }
 0x1a3   :  { %233 = vmatpush.msrb.mxu0 %v208_v28  ;;  %v448_v28 = vld [vmem:[%s2831_s10 + $0x10] sm:$0xff] }
 0x1a5   :  { %234 = vmatpush.msrb.mxu0 %v207_v29  ;;  %v449_v29 = vld [vmem:[%s2831_s10 + $0x18] sm:$0xff] }
 0x1a6   :  { %1599 = vmatmul.msk.f32.vlgmr.msrb.gmra.mxu0 %vm152_vm11, %v206_v30 }
 0x223   :  { %v236_v32 = vpop.f32.mrf.mxu0 }
 0x224   :  { %v237_v33 = vadd.f32 %v236_v32, %v214_v31 }
 0x226   :  { %v1889_v34 = vadd.f32 %v237_v33, %v178_v24 }
 0x228   :  { %254 = vst.msk [vmem:[#allocation2 + $0x8] sm:$0xff] %vm185_vm13, %v1889_v34  ;;  %250 = vrot.lane.b32.xlu1 %v1889_v34, %s1659_s21  ;;  %241 = vrot.lane.b32.xlu0 %v1889_v34, %s1663_s7 }
 0x229   :  { %259 = vst.msk [vmem:[#allocation2 + $0x8] sm:$0xff] %vm198_vm14, %v1889_v34 }
 0x230   :  { %272 = vperm.xlu0 %1653, %v268_v35   ;;  %v266_v40 = vld [vmem:[#allocation2 + $0x8] sm:$0xff] }
 0x238   :  { %366 = vperm.xlu0 %1653, %v358_v38  }
 0x29a   :  { %v251_v36 = vpop.permute.xlu1 %250  ;;  %v242_v37 = vpop.permute.xlu0 %241 }
 0x29b   :  { %253 = vst.msk [vmem:[#allocation2] sm:$0xff] %vm183_vm15, %v251_v36 }
 0x29c   :  { %256 = vst.msk [vmem:[#allocation2] sm:$0xff] %vm192_vm0, %v1656_v5 }
 0x29d   :  { %258 = vst.msk [vmem:[#allocation2] sm:$0xff] %vm196_vm1, %v251_v36 }
 0x29e   :  { %261 = vst.msk [vmem:[#allocation2] sm:$0xff] %vm202_vm2, %v1656_v5 }
 0x29f   :  { %244 = vst.msk [vmem:[%s2865_s5] sm:$0xff] %vm190_vm3, %v242_v37 }
 0x2a0   :  { %255 = vst.msk [vmem:[#allocation2 + $0x10] sm:$0xff] %vm190_vm3, %v242_v37 }
 0x2a1   :  { %257 = vst.msk [vmem:[#allocation2 + $0x10] sm:$0xff] %vm194_vm4, %v1656_v5 }
 0x2a2   :  { %260 = vst.msk [vmem:[#allocation2 + $0x10] sm:$0xff] %vm200_vm5, %v242_v37  ;;  %v273_v44 = vpop.permute.xlu0 %272 }
 0x2a3   :  { %262 = vst.msk [vmem:[#allocation2 + $0x10] sm:$0xff] %vm204_vm6, %v1656_v5 }
 0x2a5   :  { %v265_v41 = vld [vmem:[#allocation2] sm:$0xff] }
 0x2aa   :  { %v267_v39 = vld [vmem:[#allocation2 + $0x10] sm:$0xff]  ;;  %v367_v8 = vpop.permute.xlu0 %366 }
 0x2ab   :  { %299 = vmatpush.msra.mxu2 %v267_v39 }
 0x2ad   :  { %300 = vmatpush.msra.mxu2 %v266_v40 }
 0x2af   :  { %301 = vmatpush.msra.mxu2 %v265_v41 }
 0x2b0   :  { %1601 = vmatmul.msk.f32.vlgmr.msra.gmra.mxu2 %vm152_vm11, %v263_v42 }
 0x2b8   :  { %1602 = vmatmul.msk.f32.gmra.mxu2 %vm152_vm11, %v264_v43 }
 0x333   :  { %v303_v45 = vpop.f32.mrf.mxu2 }
 0x334   :  { %v304_v46 = vadd.f32 %v303_v45, %v273_v44 }
 0x336   :  { %vm309_vm7 = vcmp.gt.f32.partialorder %v304_v46, 0.0  ;;  %v311_v47 = vmul.f32 0.2, %v304_v46 }
 0x338   :  { %v313_v48 = vsel %vm309_vm7, %v304_v46, %v311_v47 }
 0x339   :  { %325 = vst.msk [vmem:[#allocation2 + $0x10] sm:$0xff] %vm185_vm13, %v313_v48  ;;  %327 = vrot.lane.b32.xlu2 %v313_v48, %s1663_s7 }
 0x33a   :  { %341 = vst.msk [vmem:[#allocation2 + $0x10] sm:$0xff] %vm198_vm14, %v313_v48 }
 0x33b   :  { %v306_v50 = vpop.f32.mrf.mxu2 }
 0x33c   :  { %v307_v51 = vadd.f32 %v306_v50, %v278_v49  ;;  %v620_v50 = vld [vmem:[%s2832_s13 + $0x18] sm:$0xff] }
 0x33e   :  { %vm310_vm8 = vcmp.gt.f32.partialorder %v307_v51, 0.0  ;;  %v312_v52 = vmul.f32 0.2, %v307_v51 }
 0x340   :  { %v314_v53 = vsel %vm310_vm8, %v307_v51, %v312_v52  ;;  %v617_v52 = vld [vmem:[%s2832_s13] sm:$0xff]  ;;  %vm641_vm8 = vcmask 785408  }
 0x341   :  { %326 = vst.msk [vmem:[#allocation2 + $0x18] sm:$0xff] %vm185_vm13, %v314_v53  ;;  %329 = vrot.lane.b32.xlu1 %v314_v53, %s1663_s7  ;;  %317 = vrot.lane.b32.xlu2 %v313_v48, %s1659_s21  ;;  %v353_v62 = vld [vmem:[#allocation2 + $0x10] sm:$0xff] }
 0x342   :  { %342 = vst.msk [vmem:[#allocation2 + $0x18] sm:$0xff] %vm198_vm14, %v314_v53 }
 0x349   :  { %319 = vrot.lane.b32.xlu1 %v314_v53, %s1659_s21  ;;  %v354_v61 = vld [vmem:[#allocation2 + $0x18] sm:$0xff] }
 0x351   :  { %361 = vperm.xlu1 %1654, %v357_v56  }
 0x393   :  { %v328_v54 = vpop.permute.xlu2 %327 }
 0x394   :  { %333 = vst.msk [vmem:[#allocation2 + $0x20] sm:$0xff] %vm190_vm3, %v328_v54 }
 0x395   :  { %337 = vst.msk [vmem:[#allocation2 + $0x20] sm:$0xff] %vm194_vm4, %v1656_v5 }
 0x396   :  { %343 = vst.msk [vmem:[#allocation2 + $0x20] sm:$0xff] %vm200_vm5, %v328_v54  ;;  %v619_v54 = vld [vmem:[%s2832_s13 + $0x10] sm:$0xff] }
 0x397   :  { %347 = vst.msk [vmem:[#allocation2 + $0x20] sm:$0xff] %vm204_vm6, %v1656_v5 }
 0x39b   :  { %v318_v55 = vpop.permute.xlu2 %317 }
 0x39c   :  { %323 = vst.msk [vmem:[#allocation2] sm:$0xff] %vm183_vm15, %v318_v55 }
 0x39d   :  { %335 = vst.msk [vmem:[#allocation2] sm:$0xff] %vm192_vm0, %v1656_v5 }
 0x39e   :  { %339 = vst.msk [vmem:[#allocation2] sm:$0xff] %vm196_vm1, %v318_v55  ;;  %v355_v60 = vld [vmem:[#allocation2 + $0x20] sm:$0xff] }
 0x39f   :  { %345 = vst.msk [vmem:[#allocation2] sm:$0xff] %vm202_vm2, %v1656_v5 }
 0x3a6   :  { %v351_v0 = vld [vmem:[#allocation2] sm:$0xff] }
 0x3b3   :  { %v330_v57 = vpop.permute.xlu1 %329 }
 0x3b4   :  { %334 = vst.msk [vmem:[#allocation2 + $0x28] sm:$0xff] %vm190_vm3, %v330_v57 }
 0x3b5   :  { %338 = vst.msk [vmem:[#allocation2 + $0x28] sm:$0xff] %vm194_vm4, %v1656_v5 }
 0x3b6   :  { %344 = vst.msk [vmem:[#allocation2 + $0x28] sm:$0xff] %vm200_vm5, %v330_v57 }
 0x3b7   :  { %348 = vst.msk [vmem:[#allocation2 + $0x28] sm:$0xff] %vm204_vm6, %v1656_v5 }
 0x3bb   :  { %v320_v58 = vpop.permute.xlu1 %319 }
 0x3bc   :  { %324 = vst.msk [vmem:[#allocation2 + $0x8] sm:$0xff] %vm183_vm15, %v320_v58 }
 0x3bd   :  { %336 = vst.msk [vmem:[#allocation2 + $0x8] sm:$0xff] %vm192_vm0, %v1656_v5 }
 0x3be   :  { %340 = vst.msk [vmem:[#allocation2 + $0x8] sm:$0xff] %vm196_vm1, %v320_v58  ;;  %v356_v59 = vld [vmem:[#allocation2 + $0x28] sm:$0xff] }
 0x3bf   :  { %346 = vst.msk [vmem:[#allocation2 + $0x8] sm:$0xff] %vm202_vm2, %v1656_v5  ;;  %386 = vmatpush.msra.mxu1 %v356_v59 }
 0x3c1   :  { %387 = vmatpush.msra.mxu1 %v355_v60 }
 0x3c3   :  { %388 = vmatpush.msra.mxu1 %v354_v61  ;;  %v362_v3 = vpop.permute.xlu1 %361 }
 0x3c5   :  { %389 = vmatpush.msra.mxu1 %v353_v62 }
 0x3c6   :  { %v352_v63 = vld [vmem:[#allocation2 + $0x8] sm:$0xff] }
 0x3c7   :  { %390 = vmatpush.msra.mxu1 %v352_v63 }
 0x3c9   :  { %391 = vmatpush.msra.mxu1 %v351_v0 }
 0x3ca   :  { %1603 = vmatmul.msk.f32.vlgmr.msra.gmra.mxu1 %vm369_vm9, %v349_v1 }
 0x3d2   :  { %1604 = vmatmul.msk.f32.gmra.mxu1 %vm369_vm9, %v350_v2 }
 0x447   :  { %v393_v4 = vpop.f32.mrf.mxu1 }
 0x448   :  { %v394_v6 = vadd.f32 %v393_v4, %v362_v3 }
 0x44a   :  { %v1972_v7 = vadd.f32 %v394_v6, %v313_v48 }
 0x44c   :  { %428 = vst.msk [vmem:[#allocation2 + $0x10] sm:$0xff] %vm185_vm13, %v1972_v7  ;;  %403 = vrot.lane.b32.xlu0 %v1972_v7, %s1663_s7 }
 0x44d   :  { %438 = vst.msk [vmem:[#allocation2 + $0x10] sm:$0xff] %vm198_vm14, %v1972_v7 }
 0x44f   :  { %v396_v9 = vpop.f32.mrf.mxu1 }
 0x450   :  { %v397_v10 = vadd.f32 %v396_v9, %v367_v8 }
 0x452   :  { %v1980_v11 = vadd.f32 %v397_v10, %v314_v53  ;;  %v618_v53 = vld [vmem:[%s2832_s13 + $0x8] sm:$0xff] }
 0x454   :  { %429 = vst.msk [vmem:[#allocation2 + $0x18] sm:$0xff] %vm185_vm13, %v1980_v11  ;;  %422 = vrot.lane.b32.xlu1 %v1980_v11, %s1659_s21  ;;  %405 = vrot.lane.b32.xlu2 %v1980_v11, %s1663_s7  ;;  %v452_v23 = vld [vmem:[#allocation2 + $0x10] sm:$0xff] }
 0x455   :  { %439 = vst.msk [vmem:[#allocation2 + $0x18] sm:$0xff] %vm198_vm14, %v1980_v11  ;;  %477 = vperm.xlu0 %1653, %v459_v12  }
 0x45c   :  { %472 = vperm.xlu1 %1654, %v458_v13   ;;  %420 = vrot.lane.b32.xlu2 %v1972_v7, %s1659_s21  ;;  %v453_v22 = vld [vmem:[#allocation2 + $0x18] sm:$0xff] }
 0x45d   :  { %462 = vperm.xlu0 %1653, %v456_v14   ;;  %v601_v14 = vld [vmem:[%s2833_s12] sm:$0xff] }
 0x464   :  { %467 = vperm.xlu2 %1652, %v457_v15   ;;  %v602_v15 = vld [vmem:[%s2833_s12 + $0x8] sm:$0xff] }
 0x4ae   :  { %v406_v16 = vpop.permute.xlu2 %405 }
 0x4af   :  { %410 = vst.msk [vmem:[%s2830_s22 + $0x8] sm:$0xff] %vm190_vm3, %v406_v16 }
 0x4b0   :  { %431 = vst.msk [vmem:[#allocation2 + $0x28] sm:$0xff] %vm190_vm3, %v406_v16 }
 0x4b1   :  { %435 = vst.msk [vmem:[#allocation2 + $0x28] sm:$0xff] %vm194_vm4, %v1656_v5 }
 0x4b2   :  { %441 = vst.msk [vmem:[#allocation2 + $0x28] sm:$0xff] %vm200_vm5, %v406_v16  ;;  %v603_v16 = vld [vmem:[%s2833_s12 + $0x10] sm:$0xff] }
 0x4b3   :  { %445 = vst.msk [vmem:[#allocation2 + $0x28] sm:$0xff] %vm204_vm6, %v1656_v5 }
 0x4b6   :  { %v421_v17 = vpop.permute.xlu2 %420 }
 0x4b7   :  { %426 = vst.msk [vmem:[#allocation2] sm:$0xff] %vm183_vm15, %v421_v17 }
 0x4b8   :  { %432 = vst.msk [vmem:[#allocation2] sm:$0xff] %vm192_vm0, %v1656_v5 }
 0x4b9   :  { %436 = vst.msk [vmem:[#allocation2] sm:$0xff] %vm196_vm1, %v421_v17  ;;  %v604_v17 = vld [vmem:[%s2833_s12 + $0x18] sm:$0xff] }
 0x4ba   :  { %442 = vst.msk [vmem:[#allocation2] sm:$0xff] %vm202_vm2, %v1656_v5  ;;  %v455_v18 = vld [vmem:[#allocation2 + $0x28] sm:$0xff] }
 0x4bb   :  { %502 = vmatpush.msrb.mxu1 %v455_v18 }
 0x4be   :  { %v404_v19 = vpop.permute.xlu0 %403  ;;  %v468_v37 = vpop.permute.xlu2 %467 }
 0x4bf   :  { %409 = vst.msk [vmem:[%s2830_s22] sm:$0xff] %vm190_vm3, %v404_v19 }
 0x4c0   :  { %430 = vst.msk [vmem:[#allocation2 + $0x20] sm:$0xff] %vm190_vm3, %v404_v19 }
 0x4c1   :  { %434 = vst.msk [vmem:[#allocation2 + $0x20] sm:$0xff] %vm194_vm4, %v1656_v5  ;;  %v450_v25 = vld [vmem:[#allocation2] sm:$0xff] }
 0x4c2   :  { %440 = vst.msk [vmem:[#allocation2 + $0x20] sm:$0xff] %vm200_vm5, %v404_v19 }
 0x4c3   :  { %444 = vst.msk [vmem:[#allocation2 + $0x20] sm:$0xff] %vm204_vm6, %v1656_v5 }
 0x4c6   :  { %v423_v20 = vpop.permute.xlu1 %422 }
 0x4c7   :  { %427 = vst.msk [vmem:[#allocation2 + $0x8] sm:$0xff] %vm183_vm15, %v423_v20  ;;  %v478_v30 = vpop.permute.xlu0 %477 }
 0x4c8   :  { %433 = vst.msk [vmem:[#allocation2 + $0x8] sm:$0xff] %vm192_vm0, %v1656_v5 }
 0x4c9   :  { %437 = vst.msk [vmem:[#allocation2 + $0x8] sm:$0xff] %vm196_vm1, %v423_v20 }
 0x4ca   :  { %443 = vst.msk [vmem:[#allocation2 + $0x8] sm:$0xff] %vm202_vm2, %v1656_v5  ;;  %v454_v21 = vld [vmem:[#allocation2 + $0x20] sm:$0xff] }
 0x4cb   :  { %503 = vmatpush.msrb.mxu1 %v454_v21 }
 0x4cd   :  { %504 = vmatpush.msrb.mxu1 %v453_v22 }
 0x4ce   :  { %v473_v42 = vpop.permute.xlu1 %472 }
 0x4cf   :  { %505 = vmatpush.msrb.mxu1 %v452_v23  ;;  %v463_v31 = vpop.permute.xlu0 %462 }
 0x4d1   :  { %v451_v24 = vld [vmem:[#allocation2 + $0x8] sm:$0xff] }
 0x4d2   :  { %506 = vmatpush.msrb.mxu1 %v451_v24 }
 0x4d4   :  { %507 = vmatpush.msrb.mxu1 %v450_v25 }
 0x4d5   :  { %1607 = vmatmul.msk.f32.vlgmr.msrb.gmra.mxu1 %vm369_vm9, %v446_v26 }
 0x4dd   :  { %1608 = vmatmul.msk.f32.gmra.mxu1 %vm369_vm9, %v447_v27 }
 0x4e5   :  { %1609 = vmatmul.msk.f32.gmra.mxu1 %vm369_vm9, %v448_v28 }
 0x4ed   :  { %1610 = vmatmul.msk.f32.gmra.mxu1 %vm369_vm9, %v449_v29 }
 0x552   :  { %v509_v32 = vpop.f32.mrf.mxu1 }
 0x553   :  { %v510_v33 = vadd.f32 %v509_v32, %v463_v31 }
 0x555   :  { %vm521_vm10 = vcmp.gt.f32.partialorder %v510_v33, 0.0  ;;  %v525_v35 = vmul.f32 0.2, %v510_v33 }
 0x557   :  { %v2052_v36 = vsel %vm521_vm10, %v510_v33, %v525_v35  ;;  %v803_v35 = vld [vmem:[%s2834_s15 + $0x38] sm:$0xff] }
 0x558   :  { %553 = vst.msk [vmem:[#allocation2 + $0x20] sm:$0xff] %vm185_vm13, %v2052_v36 }
 0x559   :  { %585 = vst.msk [vmem:[#allocation2 + $0x20] sm:$0xff] %vm198_vm14, %v2052_v36 }
 0x55a   :  { %v512_v38 = vpop.f32.mrf.mxu1 }
 0x55b   :  { %v513_v39 = vadd.f32 %v512_v38, %v468_v37  ;;  %v801_v37 = vld [vmem:[%s2834_s15 + $0x28] sm:$0xff] }
 0x55c   :  { %v797_v38 = vld [vmem:[%s2834_s15 + $0x8] sm:$0xff] }
 0x55d   :  { %vm522_vm11 = vcmp.gt.f32.partialorder %v513_v39, 0.0  ;;  %v526_v40 = vmul.f32 0.2, %v513_v39 }
 0x55f   :  { %v2058_v41 = vsel %vm522_vm11, %v513_v39, %v526_v40  ;;  %v798_v39 = vld [vmem:[%s2834_s15 + $0x10] sm:$0xff] }
 0x560   :  { %554 = vst.msk [vmem:[#allocation2 + $0x28] sm:$0xff] %vm185_vm13, %v2058_v41  ;;  %559 = vrot.lane.b32.xlu0 %v2058_v41, %s1663_s7  ;;  %v609_v8 = vld [vmem:[#allocation2 + $0x20] sm:$0xff]  ;;  %v802_v40 = vld [vmem:[%s2834_s15 + $0x30] sm:$0xff] }
 0x561   :  { %586 = vst.msk [vmem:[#allocation2 + $0x28] sm:$0xff] %vm198_vm14, %v2058_v41 }
 0x562   :  { %v515_v43 = vpop.f32.mrf.mxu1 }
 0x563   :  { %v516_v44 = vadd.f32 %v515_v43, %v473_v42  ;;  %v796_v42 = vld [vmem:[%s2834_s15] sm:$0xff] }
 0x565   :  { %vm523_vm12 = vcmp.gt.f32.partialorder %v516_v44, 0.0  ;;  %v527_v45 = vmul.f32 0.2, %v516_v44 }
 0x567   :  { %v2066_v46 = vsel %vm523_vm12, %v516_v44, %v527_v45 }
 0x568   :  { %555 = vst.msk [vmem:[#allocation2 + $0x30] sm:$0xff] %vm185_vm13, %v2066_v46  ;;  %561 = vrot.lane.b32.xlu2 %v2066_v46, %s1663_s7  ;;  %541 = vrot.lane.b32.xlu0 %v2066_v46, %s1659_s21  ;;  %v610_v6 = vld [vmem:[#allocation2 + $0x28] sm:$0xff] }
 0x569   :  { %587 = vst.msk [vmem:[#allocation2 + $0x30] sm:$0xff] %vm198_vm14, %v2066_v46 }
 0x56a   :  { %v518_v47 = vpop.f32.mrf.mxu1 }
 0x56b   :  { %v519_v48 = vadd.f32 %v518_v47, %v478_v30 }
 0x56d   :  { %vm524_vm7 = vcmp.gt.f32.partialorder %v519_v48, 0.0  ;;  %v528_v49 = vmul.f32 0.2, %v519_v48 }
 0x56f   :  { %v2079_v51 = vsel %vm524_vm7, %v519_v48, %v528_v49 }
 0x570   :  { %556 = vst.msk [vmem:[#allocation2 + $0x38] sm:$0xff] %vm185_vm13, %v2079_v51  ;;  %563 = vrot.lane.b32.xlu1 %v2079_v51, %s1663_s7  ;;  %543 = vrot.lane.b32.xlu2 %v2079_v51, %s1659_s21  ;;  %v611_v4 = vld [vmem:[#allocation2 + $0x30] sm:$0xff] }
 0x571   :  { %588 = vst.msk [vmem:[#allocation2 + $0x38] sm:$0xff] %vm198_vm14, %v2079_v51  ;;  %638 = vperm.xlu0 %1653, %v620_v50  }
 0x578   :  { %537 = vrot.lane.b32.xlu2 %v2052_v36, %s1659_s21  ;;  %557 = vrot.lane.b32.xlu1 %v2052_v36, %s1663_s7  ;;  %v612_v3 = vld [vmem:[#allocation2 + $0x38] sm:$0xff] }
 0x579   :  { %623 = vperm.xlu0 %1653, %v617_v52  }
 0x580   :  { %628 = vperm.xlu2 %1652, %v618_v53   ;;  %539 = vrot.lane.b32.xlu1 %v2058_v41, %s1659_s21 }
 0x588   :  { %633 = vperm.xlu1 %1654, %v619_v54  }
 0x5c2   :  { %v562_v55 = vpop.permute.xlu2 %561 }
 0x5c3   :  { %571 = vst.msk [vmem:[#allocation2 + $0x50] sm:$0xff] %vm190_vm3, %v562_v55 }
 0x5c4   :  { %579 = vst.msk [vmem:[#allocation2 + $0x50] sm:$0xff] %vm194_vm4, %v1656_v5 }
 0x5c5   :  { %591 = vst.msk [vmem:[#allocation2 + $0x50] sm:$0xff] %vm200_vm5, %v562_v55 }
 0x5c6   :  { %599 = vst.msk [vmem:[#allocation2 + $0x50] sm:$0xff] %vm204_vm6, %v1656_v5 }
 0x5ca   :  { %v544_v56 = vpop.permute.xlu2 %543 }
 0x5cb   :  { %552 = vst.msk [vmem:[#allocation2 + $0x18] sm:$0xff] %vm183_vm15, %v544_v56 }
 0x5cc   :  { %576 = vst.msk [vmem:[#allocation2 + $0x18] sm:$0xff] %vm192_vm0, %v1656_v5 }
 0x5cd   :  { %584 = vst.msk [vmem:[#allocation2 + $0x18] sm:$0xff] %vm196_vm1, %v544_v56  ;;  %v615_v63 = vld [vmem:[#allocation2 + $0x50] sm:$0xff] }
 0x5ce   :  { %596 = vst.msk [vmem:[#allocation2 + $0x18] sm:$0xff] %vm202_vm2, %v1656_v5 }
 0x5d2   :  { %v560_v57 = vpop.permute.xlu0 %559  ;;  %v538_v58 = vpop.permute.xlu2 %537 }
 0x5d3   :  { %570 = vst.msk [vmem:[#allocation2 + $0x48] sm:$0xff] %vm190_vm3, %v560_v57 }
 0x5d4   :  { %578 = vst.msk [vmem:[#allocation2 + $0x48] sm:$0xff] %vm194_vm4, %v1656_v5 }
 0x5d5   :  { %590 = vst.msk [vmem:[#allocation2 + $0x48] sm:$0xff] %vm200_vm5, %v560_v57  ;;  %v608_v9 = vld [vmem:[#allocation2 + $0x18] sm:$0xff] }
 0x5d6   :  { %598 = vst.msk [vmem:[#allocation2 + $0x48] sm:$0xff] %vm204_vm6, %v1656_v5 }
 0x5d7   :  { %549 = vst.msk [vmem:[#allocation2] sm:$0xff] %vm183_vm15, %v538_v58 }
 0x5d8   :  { %573 = vst.msk [vmem:[#allocation2] sm:$0xff] %vm192_vm0, %v1656_v5 }
 0x5d9   :  { %581 = vst.msk [vmem:[#allocation2] sm:$0xff] %vm196_vm1, %v538_v58 }
 0x5da   :  { %593 = vst.msk [vmem:[#allocation2] sm:$0xff] %vm202_vm2, %v1656_v5  ;;  %v542_v59 = vpop.permute.xlu0 %541  ;;  %v629_v23 = vpop.permute.xlu2 %628 }
 0x5db   :  { %551 = vst.msk [vmem:[#allocation2 + $0x10] sm:$0xff] %vm183_vm15, %v542_v59 }
 0x5dc   :  { %575 = vst.msk [vmem:[#allocation2 + $0x10] sm:$0xff] %vm192_vm0, %v1656_v5 }
 0x5dd   :  { %583 = vst.msk [vmem:[#allocation2 + $0x10] sm:$0xff] %vm196_vm1, %v542_v59  ;;  %v614_v0 = vld [vmem:[#allocation2 + $0x48] sm:$0xff] }
 0x5de   :  { %595 = vst.msk [vmem:[#allocation2 + $0x10] sm:$0xff] %vm202_vm2, %v1656_v5 }
 0x5e1   :  { %v605_v13 = vld [vmem:[#allocation2] sm:$0xff] }
 0x5e2   :  { %v564_v60 = vpop.permute.xlu1 %563 }
 0x5e3   :  { %572 = vst.msk [vmem:[#allocation2 + $0x58] sm:$0xff] %vm190_vm3, %v564_v60  ;;  %v639_v18 = vpop.permute.xlu0 %638 }
 0x5e4   :  { %580 = vst.msk [vmem:[#allocation2 + $0x58] sm:$0xff] %vm194_vm4, %v1656_v5 }
 0x5e5   :  { %592 = vst.msk [vmem:[#allocation2 + $0x58] sm:$0xff] %vm200_vm5, %v564_v60  ;;  %v607_v10 = vld [vmem:[#allocation2 + $0x10] sm:$0xff] }
 0x5e6   :  { %600 = vst.msk [vmem:[#allocation2 + $0x58] sm:$0xff] %vm204_vm6, %v1656_v5 }
 0x5ea   :  { %v558_v61 = vpop.permute.xlu1 %557 }
 0x5eb   :  { %569 = vst.msk [vmem:[#allocation2 + $0x40] sm:$0xff] %vm190_vm3, %v558_v61  ;;  %v624_v19 = vpop.permute.xlu0 %623 }
 0x5ec   :  { %577 = vst.msk [vmem:[#allocation2 + $0x40] sm:$0xff] %vm194_vm4, %v1656_v5 }
 0x5ed   :  { %589 = vst.msk [vmem:[#allocation2 + $0x40] sm:$0xff] %vm200_vm5, %v558_v61  ;;  %v616_v62 = vld [vmem:[#allocation2 + $0x58] sm:$0xff] }
 0x5ee   :  { %597 = vst.msk [vmem:[#allocation2 + $0x40] sm:$0xff] %vm204_vm6, %v1656_v5  ;;  %658 = vmatpush.msra.mxu1 %v616_v62 }
 0x5f0   :  { %659 = vmatpush.msra.mxu1 %v615_v63  ;;  %v776_v63 = vld [vmem:[%s2836_s14] sm:$0xff] }
 0x5f2   :  { %v540_v1 = vpop.permute.xlu1 %539  ;;  %660 = vmatpush.msra.mxu1 %v614_v0  ;;  %v777_v0 = vld [vmem:[%s2836_s14 + $0x8] sm:$0xff] }
 0x5f3   :  { %550 = vst.msk [vmem:[#allocation2 + $0x8] sm:$0xff] %vm183_vm15, %v540_v1 }
 0x5f4   :  { %574 = vst.msk [vmem:[#allocation2 + $0x8] sm:$0xff] %vm192_vm0, %v1656_v5 }
 0x5f5   :  { %582 = vst.msk [vmem:[#allocation2 + $0x8] sm:$0xff] %vm196_vm1, %v540_v1  ;;  %v613_v2 = vld [vmem:[#allocation2 + $0x40] sm:$0xff]  ;;  %v778_v1 = vld [vmem:[%s2836_s14 + $0x10] sm:$0xff] }
 0x5f6   :  { %594 = vst.msk [vmem:[#allocation2 + $0x8] sm:$0xff] %vm202_vm2, %v1656_v5  ;;  %661 = vmatpush.msra.mxu1 %v613_v2  ;;  %v779_v2 = vld [vmem:[%s2836_s14 + $0x18] sm:$0xff] }
 0x5f8   :  { %662 = vmatpush.msra.mxu1 %v612_v3  ;;  %v780_v3 = vld [vmem:[%s2836_s14 + $0x20] sm:$0xff] }
 0x5fa   :  { %663 = vmatpush.msra.mxu1 %v611_v4  ;;  %v634_v27 = vpop.permute.xlu1 %633  ;;  %v781_v4 = vld [vmem:[%s2836_s14 + $0x28] sm:$0xff] }
 0x5fc   :  { %664 = vmatpush.msra.mxu1 %v610_v6  ;;  %v782_v6 = vld [vmem:[%s2836_s14 + $0x30] sm:$0xff] }
 0x5fd   :  { %v606_v12 = vld [vmem:[#allocation2 + $0x8] sm:$0xff] }
 0x5fe   :  { %665 = vmatpush.msra.mxu1 %v609_v8  ;;  %v783_v8 = vld [vmem:[%s2836_s14 + $0x38] sm:$0xff]  ;;  %s1664_s14 = smov 119  }
 0x600   :  { %666 = vmatpush.msra.mxu1 %v608_v9 }
 0x602   :  { %667 = vmatpush.msra.mxu1 %v607_v10 }
 0x604   :  { %668 = vmatpush.msra.mxu1 %v606_v12 }
 0x606   :  { %669 = vmatpush.msra.mxu1 %v605_v13 }
 0x607   :  { %1611 = vmatmul.msk.f32.vlgmr.msra.gmra.mxu1 %vm641_vm8, %v601_v14 }
 0x60f   :  { %1612 = vmatmul.msk.f32.gmra.mxu1 %vm641_vm8, %v602_v15 }
 0x617   :  { %1613 = vmatmul.msk.f32.gmra.mxu1 %vm641_vm8, %v603_v16 }
 0x61f   :  { %1614 = vmatmul.msk.f32.gmra.mxu1 %vm641_vm8, %v604_v17 }
 0x684   :  { %v671_v20 = vpop.f32.mrf.mxu1 }
 0x685   :  { %v672_v21 = vadd.f32 %v671_v20, %v624_v19 }
 0x687   :  { %v2169_v22 = vadd.f32 %v672_v21, %v2052_v36  ;;  %v800_v36 = vld [vmem:[%s2834_s15 + $0x20] sm:$0xff] }
 0x689   :  { %740 = vst.msk [vmem:[#allocation2 + $0x20] sm:$0xff] %vm185_vm13, %v2169_v22 }
 0x68a   :  { %760 = vst.msk [vmem:[#allocation2 + $0x20] sm:$0xff] %vm198_vm14, %v2169_v22 }
 0x68c   :  { %v674_v24 = vpop.f32.mrf.mxu1 }
 0x68d   :  { %v675_v25 = vadd.f32 %v674_v24, %v629_v23 }
 0x68f   :  { %v2176_v26 = vadd.f32 %v675_v25, %v2058_v41  ;;  %v799_v41 = vld [vmem:[%s2834_s15 + $0x18] sm:$0xff] }
 0x691   :  { %741 = vst.msk [vmem:[#allocation2 + $0x28] sm:$0xff] %vm185_vm13, %v2176_v26  ;;  %693 = vrot.lane.b32.xlu0 %v2176_v26, %s1663_s7  ;;  %v788_v58 = vld [vmem:[#allocation2 + $0x20] sm:$0xff] }
 0x692   :  { %761 = vst.msk [vmem:[#allocation2 + $0x28] sm:$0xff] %vm198_vm14, %v2176_v26 }
 0x694   :  { %v677_v28 = vpop.f32.mrf.mxu1 }
 0x695   :  { %v678_v29 = vadd.f32 %v677_v28, %v634_v27 }
 0x697   :  { %v2185_v30 = vadd.f32 %v678_v29, %v2066_v46 }
 0x699   :  { %742 = vst.msk [vmem:[#allocation2 + $0x30] sm:$0xff] %vm185_vm13, %v2185_v30  ;;  %695 = vrot.lane.b32.xlu2 %v2185_v30, %s1663_s7  ;;  %728 = vrot.lane.b32.xlu0 %v2185_v30, %s1659_s21  ;;  %v789_v57 = vld [vmem:[#allocation2 + $0x28] sm:$0xff] }
 0x69a   :  { %762 = vst.msk [vmem:[#allocation2 + $0x30] sm:$0xff] %vm198_vm14, %v2185_v30 }
 0x69c   :  { %v680_v31 = vpop.f32.mrf.mxu1 }
 0x69d   :  { %v681_v32 = vadd.f32 %v680_v31, %v639_v18 }
 0x69f   :  { %v2196_v33 = vadd.f32 %v681_v32, %v2079_v51 }
 0x6a1   :  { %743 = vst.msk [vmem:[#allocation2 + $0x38] sm:$0xff] %vm185_vm13, %v2196_v33  ;;  %697 = vrot.lane.b32.xlu1 %v2196_v33, %s1663_s7  ;;  %730 = vrot.lane.b32.xlu2 %v2196_v33, %s1659_s21  ;;  %v790_v56 = vld [vmem:[#allocation2 + $0x30] sm:$0xff] }
 0x6a2   :  { %763 = vst.msk [vmem:[#allocation2 + $0x38] sm:$0xff] %vm198_vm14, %v2196_v33  ;;  %841 = vperm.xlu0 %1653, %v803_v35  }
 0x6a9   :  { %724 = vrot.lane.b32.xlu2 %v2169_v22, %s1659_s21  ;;  %691 = vrot.lane.b32.xlu1 %v2169_v22, %s1663_s7  ;;  %v791_v55 = vld [vmem:[#allocation2 + $0x38] sm:$0xff] }
 0x6aa   :  { %826 = vperm.xlu0 %1653, %v800_v36  }
 0x6b1   :  { %831 = vperm.xlu2 %1652, %v801_v37   ;;  %726 = vrot.lane.b32.xlu1 %v2176_v26, %s1659_s21 }
 0x6b2   :  { %811 = vperm.xlu0 %1653, %v797_v38  }
 0x6b9   :  { %816 = vperm.xlu2 %1652, %v798_v39   ;;  %836 = vperm.xlu1 %1654, %v802_v40  }
 0x6c1   :  { %821 = vperm.xlu1 %1654, %v799_v41  }
 0x6c9   :  { %806 = vperm.xlu1 %1654, %v796_v42  }
 0x6f3   :  { %v696_v43 = vpop.permute.xlu2 %695 }
 0x6f4   :  { %705 = vst.msk [vmem:[%s2835_s23 + $0x10] sm:$0xff] %vm190_vm3, %v696_v43 }
 0x6f5   :  { %746 = vst.msk [vmem:[#allocation2 + $0x50] sm:$0xff] %vm190_vm3, %v696_v43 }
 0x6f6   :  { %754 = vst.msk [vmem:[#allocation2 + $0x50] sm:$0xff] %vm194_vm4, %v1656_v5 }
 0x6f7   :  { %766 = vst.msk [vmem:[#allocation2 + $0x50] sm:$0xff] %vm200_vm5, %v696_v43 }
 0x6f8   :  { %774 = vst.msk [vmem:[#allocation2 + $0x50] sm:$0xff] %vm204_vm6, %v1656_v5 }
 0x6fb   :  { %v731_v44 = vpop.permute.xlu2 %730 }
 0x6fc   :  { %739 = vst.msk [vmem:[#allocation2 + $0x18] sm:$0xff] %vm183_vm15, %v731_v44 }
 0x6fd   :  { %751 = vst.msk [vmem:[#allocation2 + $0x18] sm:$0xff] %vm192_vm0, %v1656_v5 }
 0x6fe   :  { %759 = vst.msk [vmem:[#allocation2 + $0x18] sm:$0xff] %vm196_vm1, %v731_v44 }
 0x6ff   :  { %771 = vst.msk [vmem:[#allocation2 + $0x18] sm:$0xff] %vm202_vm2, %v1656_v5  ;;  %v794_v51 = vld [vmem:[#allocation2 + $0x50] sm:$0xff] }
 0x703   :  { %v694_v45 = vpop.permute.xlu0 %693  ;;  %v725_v46 = vpop.permute.xlu2 %724 }
 0x704   :  { %704 = vst.msk [vmem:[%s2835_s23 + $0x8] sm:$0xff] %vm190_vm3, %v694_v45 }
 0x705   :  { %745 = vst.msk [vmem:[#allocation2 + $0x48] sm:$0xff] %vm190_vm3, %v694_v45 }
 0x706   :  { %753 = vst.msk [vmem:[#allocation2 + $0x48] sm:$0xff] %vm194_vm4, %v1656_v5  ;;  %v787_v59 = vld [vmem:[#allocation2 + $0x18] sm:$0xff] }
 0x707   :  { %765 = vst.msk [vmem:[#allocation2 + $0x48] sm:$0xff] %vm200_vm5, %v694_v45 }
 0x708   :  { %773 = vst.msk [vmem:[#allocation2 + $0x48] sm:$0xff] %vm204_vm6, %v1656_v5 }
 0x709   :  { %736 = vst.msk [vmem:[#allocation2] sm:$0xff] %vm183_vm15, %v725_v46 }
 0x70a   :  { %748 = vst.msk [vmem:[#allocation2] sm:$0xff] %vm192_vm0, %v1656_v5 }
 0x70b   :  { %756 = vst.msk [vmem:[#allocation2] sm:$0xff] %vm196_vm1, %v725_v46  ;;  %v729_v47 = vpop.permute.xlu0 %728  ;;  %v832_v19 = vpop.permute.xlu2 %831 }
 0x70c   :  { %768 = vst.msk [vmem:[#allocation2] sm:$0xff] %vm202_vm2, %v1656_v5 }
 0x70d   :  { %738 = vst.msk [vmem:[#allocation2 + $0x10] sm:$0xff] %vm183_vm15, %v729_v47 }
 0x70e   :  { %750 = vst.msk [vmem:[#allocation2 + $0x10] sm:$0xff] %vm192_vm0, %v1656_v5 }
 0x70f   :  { %758 = vst.msk [vmem:[#allocation2 + $0x10] sm:$0xff] %vm196_vm1, %v729_v47  ;;  %v793_v52 = vld [vmem:[#allocation2 + $0x48] sm:$0xff] }
 0x710   :  { %770 = vst.msk [vmem:[#allocation2 + $0x10] sm:$0xff] %vm202_vm2, %v1656_v5 }
 0x713   :  { %v698_v48 = vpop.permute.xlu1 %697  ;;  %v784_v62 = vld [vmem:[#allocation2] sm:$0xff]  ;;  %v817_v27 = vpop.permute.xlu2 %816 }
 0x714   :  { %706 = vst.msk [vmem:[%s2835_s23 + $0x18] sm:$0xff] %vm190_vm3, %v698_v48  ;;  %v2332_v10 = vpop.permute.xlu0 %841 }
 0x715   :  { %747 = vst.msk [vmem:[#allocation2 + $0x58] sm:$0xff] %vm190_vm3, %v698_v48 }
 0x716   :  { %755 = vst.msk [vmem:[#allocation2 + $0x58] sm:$0xff] %vm194_vm4, %v1656_v5 }
 0x717   :  { %767 = vst.msk [vmem:[#allocation2 + $0x58] sm:$0xff] %vm200_vm5, %v698_v48  ;;  %v786_v60 = vld [vmem:[#allocation2 + $0x10] sm:$0xff] }
 0x718   :  { %775 = vst.msk [vmem:[#allocation2 + $0x58] sm:$0xff] %vm204_vm6, %v1656_v5 }
 0x71b   :  { %v692_v49 = vpop.permute.xlu1 %691 }
 0x71c   :  { %703 = vst.msk [vmem:[%s2835_s23] sm:$0xff] %vm190_vm3, %v692_v49  ;;  %v827_v13 = vpop.permute.xlu0 %826 }
 0x71d   :  { %744 = vst.msk [vmem:[#allocation2 + $0x40] sm:$0xff] %vm190_vm3, %v692_v49 }
 0x71e   :  { %752 = vst.msk [vmem:[#allocation2 + $0x40] sm:$0xff] %vm194_vm4, %v1656_v5 }
 0x71f   :  { %764 = vst.msk [vmem:[#allocation2 + $0x40] sm:$0xff] %vm200_vm5, %v692_v49  ;;  %v795_v50 = vld [vmem:[#allocation2 + $0x58] sm:$0xff] }
 0x720   :  { %772 = vst.msk [vmem:[#allocation2 + $0x40] sm:$0xff] %vm204_vm6, %v1656_v5  ;;  %872 = vmatpush.msrb.mxu2 %v795_v50 }
 0x722   :  { %873 = vmatpush.msrb.mxu2 %v794_v51 }
 0x723   :  { %v727_v53 = vpop.permute.xlu1 %726 }
 0x724   :  { %737 = vst.msk [vmem:[#allocation2 + $0x8] sm:$0xff] %vm183_vm15, %v727_v53  ;;  %874 = vmatpush.msrb.mxu2 %v793_v52  ;;  %v812_v20 = vpop.permute.xlu0 %811 }
 0x725   :  { %749 = vst.msk [vmem:[#allocation2 + $0x8] sm:$0xff] %vm192_vm0, %v1656_v5 }
 0x726   :  { %757 = vst.msk [vmem:[#allocation2 + $0x8] sm:$0xff] %vm196_vm1, %v727_v53 }
 0x727   :  { %769 = vst.msk [vmem:[#allocation2 + $0x8] sm:$0xff] %vm202_vm2, %v1656_v5  ;;  %v792_v54 = vld [vmem:[#allocation2 + $0x40] sm:$0xff] }
 0x728   :  { %875 = vmatpush.msrb.mxu2 %v792_v54 }
 0x72a   :  { %876 = vmatpush.msrb.mxu2 %v791_v55 }
 0x72b   :  { %v837_v9 = vpop.permute.xlu1 %836 }
 0x72c   :  { %877 = vmatpush.msrb.mxu2 %v790_v56 }
 0x72e   :  { %878 = vmatpush.msrb.mxu2 %v789_v57  ;;  %v785_v61 = vld [vmem:[#allocation2 + $0x8] sm:$0xff] }
 0x730   :  { %879 = vmatpush.msrb.mxu2 %v788_v58 }
 0x732   :  { %880 = vmatpush.msrb.mxu2 %v787_v59 }
 0x733   :  { %v822_v12 = vpop.permute.xlu1 %821 }
 0x734   :  { %881 = vmatpush.msrb.mxu2 %v786_v60 }
 0x736   :  { %882 = vmatpush.msrb.mxu2 %v785_v61 }
 0x738   :  { %883 = vmatpush.msrb.mxu2 %v784_v62 }
 0x739   :  { %1619 = vmatmul.msk.f32.vlgmr.msrb.gmra.mxu2 %vm641_vm8, %v776_v63  ;;  %v1109_v63 = vld [vmem:[%s2837_s17] sm:$0xff] }
 0x73b   :  { %v807_v14 = vpop.permute.xlu1 %806 }
 0x741   :  { %1620 = vmatmul.msk.f32.gmra.mxu2 %vm641_vm8, %v777_v0  ;;  %v1116_v0 = vld [vmem:[%s2837_s17 + $0x38] sm:$0xff] }
 0x749   :  { %1621 = vmatmul.msk.f32.gmra.mxu2 %vm641_vm8, %v778_v1 }
 0x751   :  { %1622 = vmatmul.msk.f32.gmra.mxu2 %vm641_vm8, %v779_v2 }
 0x759   :  { %1623 = vmatmul.msk.f32.gmra.mxu2 %vm641_vm8, %v780_v3 }
 0x761   :  { %1624 = vmatmul.msk.f32.gmra.mxu2 %vm641_vm8, %v781_v4 }
 0x769   :  { %1625 = vmatmul.msk.f32.gmra.mxu2 %vm641_vm8, %v782_v6 }
 0x771   :  { %1626 = vmatmul.msk.f32.gmra.mxu2 %vm641_vm8, %v783_v8 }
 0x7bc   :  { %v885_v15 = vpop.f32.mrf.mxu2 }
 0x7bd   :  { %v886_v16 = vadd.f32 %v885_v15, %v807_v14 }
 0x7bf   :  { %vm909_vm9 = vcmp.gt.f32.partialorder %v886_v16, 0.0  ;;  %v917_v17 = vmul.f32 0.2, %v886_v16 }
 0x7c1   :  { %v2334_v18 = vsel %vm909_vm9, %v886_v16, %v917_v17 }
 0x7c2   :  { %973 = vst.msk [vmem:[#allocation2 + $0x40] sm:$0xff] %vm185_vm13, %v2334_v18 }
 0x7c3   :  { %1037 = vst.msk [vmem:[#allocation2 + $0x40] sm:$0xff] %vm198_vm14, %v2334_v18 }
 0x7c4   :  { %v888_v21 = vpop.f32.mrf.mxu2 }
 0x7c5   :  { %v889_v23 = vadd.f32 %v888_v21, %v812_v20 }
 0x7c7   :  { %vm910_vm10 = vcmp.gt.f32.partialorder %v889_v23, 0.0  ;;  %v918_v24 = vmul.f32 0.2, %v889_v23 }
 0x7c9   :  { %v2340_v25 = vsel %vm910_vm10, %v889_v23, %v918_v24 }
 0x7ca   :  { %974 = vst.msk [vmem:[#allocation2 + $0x48] sm:$0xff] %vm185_vm13, %v2340_v25  ;;  %943 = vrot.lane.b32.xlu1 %v2340_v25, %s1659_s21  ;;  %v1093_v62 = vld [vmem:[#allocation2 + $0x40] sm:$0xff] }
 0x7cb   :  { %1038 = vst.msk [vmem:[#allocation2 + $0x48] sm:$0xff] %vm198_vm14, %v2340_v25 }
 0x7cc   :  { %v891_v28 = vpop.f32.mrf.mxu2 }
 0x7cd   :  { %v892_v29 = vadd.f32 %v891_v28, %v817_v27 }
 0x7cf   :  { %vm911_vm11 = vcmp.gt.f32.partialorder %v892_v29, 0.0  ;;  %v919_v31 = vmul.f32 0.2, %v892_v29 }
 0x7d1   :  { %v2348_v32 = vsel %vm911_vm11, %v892_v29, %v919_v31  ;;  %v2531_v29 = vld [vmem:[%s2838_s18] sm:$0xff]  ;;  %v1347_v31 = vld [vmem:[%s2838_s18 + $0x10] sm:$0xff] }
 0x7d2   :  { %975 = vst.msk [vmem:[#allocation2 + $0x50] sm:$0xff] %vm185_vm13, %v2348_v32  ;;  %945 = vrot.lane.b32.xlu2 %v2348_v32, %s1659_s21  ;;  %v1094_v61 = vld [vmem:[#allocation2 + $0x48] sm:$0xff] }
 0x7d3   :  { %1039 = vst.msk [vmem:[#allocation2 + $0x50] sm:$0xff] %vm198_vm14, %v2348_v32 }
 0x7d4   :  { %v894_v35 = vpop.f32.mrf.mxu2 }
 0x7d5   :  { %v895_v36 = vadd.f32 %v894_v35, %v822_v12 }
 0x7d7   :  { %vm912_vm12 = vcmp.gt.f32.partialorder %v895_v36, 0.0  ;;  %v920_v37 = vmul.f32 0.2, %v895_v36 }
 0x7d9   :  { %v2356_v38 = vsel %vm912_vm12, %v895_v36, %v920_v37 }
 0x7da   :  { %976 = vst.msk [vmem:[#allocation2 + $0x58] sm:$0xff] %vm185_vm13, %v2356_v38  ;;  %947 = vrot.lane.b32.xlu0 %v2356_v38, %s1659_s21  ;;  %v1095_v60 = vld [vmem:[#allocation2 + $0x50] sm:$0xff] }
 0x7db   :  { %1040 = vst.msk [vmem:[#allocation2 + $0x58] sm:$0xff] %vm198_vm14, %v2356_v38 }
 0x7dc   :  { %v897_v39 = vpop.f32.mrf.mxu2 }
 0x7dd   :  { %v898_v40 = vadd.f32 %v897_v39, %v827_v13 }
 0x7df   :  { %vm913_vm7 = vcmp.gt.f32.partialorder %v898_v40, 0.0  ;;  %v921_v41 = vmul.f32 0.2, %v898_v40 }
 0x7e1   :  { %v2364_v42 = vsel %vm913_vm7, %v898_v40, %v921_v41  ;;  %v1348_v41 = vld [vmem:[%s2838_s18 + $0x18] sm:$0xff] }
 0x7e2   :  { %977 = vst.msk [vmem:[#allocation2 + $0x60] sm:$0xff] %vm185_vm13, %v2364_v42  ;;  %949 = vrot.lane.b32.xlu2 %v2364_v42, %s1659_s21  ;;  %v1096_v59 = vld [vmem:[#allocation2 + $0x58] sm:$0xff] }
 0x7e3   :  { %1041 = vst.msk [vmem:[#allocation2 + $0x60] sm:$0xff] %vm198_vm14, %v2364_v42 }
 0x7e4   :  { %v900_v43 = vpop.f32.mrf.mxu2 }
 0x7e5   :  { %v901_v44 = vadd.f32 %v900_v43, %v832_v19  ;;  %v1350_v43 = vld [vmem:[%s2838_s18 + $0x28] sm:$0xff] }
 0x7e7   :  { %vm914_vm8 = vcmp.gt.f32.partialorder %v901_v44, 0.0  ;;  %v922_v45 = vmul.f32 0.2, %v901_v44 }
 0x7e9   :  { %v2372_v46 = vsel %vm914_vm8, %v901_v44, %v922_v45 }
 0x7ea   :  { %978 = vst.msk [vmem:[#allocation2 + $0x68] sm:$0xff] %vm185_vm13, %v2372_v46  ;;  %951 = vrot.lane.b32.xlu1 %v2372_v46, %s1659_s21  ;;  %v1097_v58 = vld [vmem:[#allocation2 + $0x60] sm:$0xff] }
 0x7eb   :  { %1042 = vst.msk [vmem:[#allocation2 + $0x68] sm:$0xff] %vm198_vm14, %v2372_v46 }
 0x7ec   :  { %v903_v47 = vpop.f32.mrf.mxu2 }
 0x7ed   :  { %v904_v48 = vadd.f32 %v903_v47, %v837_v9 }
 0x7ef   :  { %vm915_vm9 = vcmp.gt.f32.partialorder %v904_v48, 0.0  ;;  %v923_v49 = vmul.f32 0.2, %v904_v48 }
 0x7f1   :  { %v2380_v50 = vsel %vm915_vm9, %v904_v48, %v923_v49 }
 0x7f2   :  { %979 = vst.msk [vmem:[#allocation2 + $0x70] sm:$0xff] %vm185_vm13, %v2380_v50  ;;  %953 = vrot.lane.b32.xlu0 %v2380_v50, %s1659_s21  ;;  %v1098_v57 = vld [vmem:[#allocation2 + $0x68] sm:$0xff] }
 0x7f3   :  { %1043 = vst.msk [vmem:[#allocation2 + $0x70] sm:$0xff] %vm198_vm14, %v2380_v50 }
 0x7f4   :  { %v906_v51 = vpop.f32.mrf.mxu2 }
 0x7f5   :  { %v907_v52 = vadd.f32 %v906_v51, %v2332_v10  ;;  %v1069_v51 = vld [vmem:[%s2839_s16] sm:$0xff] }
 0x7f7   :  { %vm916_vm10 = vcmp.gt.f32.partialorder %v907_v52, 0.0  ;;  %v924_v53 = vmul.f32 0.2, %v907_v52 }
 0x7f9   :  { %v2389_v54 = vsel %vm916_vm10, %v907_v52, %v924_v53  ;;  %v1351_v53 = vld [vmem:[%s2838_s18 + $0x30] sm:$0xff] }
 0x7fa   :  { %980 = vst.msk [vmem:[#allocation2 + $0x78] sm:$0xff] %vm185_vm13, %v2389_v54  ;;  %993 = vrot.lane.b32.xlu0 %v2380_v50, %s1663_s7  ;;  %955 = vrot.lane.b32.xlu2 %v2389_v54, %s1659_s21  ;;  %v1099_v56 = vld [vmem:[#allocation2 + $0x70] sm:$0xff]  ;;  %vm1157_vm13 = vcmask 523264  }
 0x7fb   :  { %1044 = vst.msk [vmem:[#allocation2 + $0x78] sm:$0xff] %vm198_vm14, %v2389_v54  ;;  %995 = vrot.lane.b32.xlu1 %v2389_v54, %s1663_s7 }
 0x802   :  { %991 = vrot.lane.b32.xlu2 %v2372_v46, %s1663_s7  ;;  %941 = vrot.lane.b32.xlu0 %v2334_v18, %s1659_s21  ;;  %v1100_v55 = vld [vmem:[#allocation2 + $0x78] sm:$0xff] }
 0x803   :  { %989 = vrot.lane.b32.xlu1 %v2364_v42, %s1663_s7  ;;  %1182 = vmatpush.msra.mxu3 %v1100_v55  ;;  %v1346_v55 = vld [vmem:[%s2838_s18 + $0x8] sm:$0xff] }
 0x805   :  { %1183 = vmatpush.msra.mxu3 %v1099_v56 }
 0x807   :  { %1184 = vmatpush.msra.mxu3 %v1098_v57  ;;  %v1071_v57 = vld [vmem:[%s2839_s16 + $0x10] sm:$0xff] }
 0x809   :  { %1185 = vmatpush.msra.mxu3 %v1097_v58 }
 0x80a   :  { %987 = vrot.lane.b32.xlu2 %v2356_v38, %s1663_s7  ;;  %985 = vrot.lane.b32.xlu0 %v2348_v32, %s1663_s7 }
 0x80b   :  { %983 = vrot.lane.b32.xlu1 %v2340_v25, %s1663_s7  ;;  %1186 = vmatpush.msra.mxu3 %v1096_v59 }
 0x80d   :  { %1187 = vmatpush.msra.mxu3 %v1095_v60  ;;  %v1349_v60 = vld [vmem:[%s2838_s18 + $0x20] sm:$0xff] }
 0x80f   :  { %1188 = vmatpush.msra.mxu3 %v1094_v61 }
 0x811   :  { %1189 = vmatpush.msra.mxu3 %v1093_v62  ;;  %v1070_v62 = vld [vmem:[%s2839_s16 + $0x8] sm:$0xff] }
 0x812   :  { %981 = vrot.lane.b32.xlu2 %v2334_v18, %s1663_s7  ;;  %245 = vrot.lane.b32.xlu0 %v1889_v34, %s1664_s14  ;;  %v1110_v34 = vld [vmem:[%s2837_s17 + $0x8] sm:$0xff] }
 0x813   :  { %411 = vrot.lane.b32.xlu1 %v1972_v7, %s1664_s14  ;;  %v1111_v7 = vld [vmem:[%s2837_s17 + $0x10] sm:$0xff] }
 0x81a   :  { %413 = vrot.lane.b32.xlu2 %v1980_v11, %s1664_s14  ;;  %707 = vrot.lane.b32.xlu0 %v2169_v22, %s1664_s14  ;;  %v1112_v11 = vld [vmem:[%s2837_s17 + $0x18] sm:$0xff] }
 0x81b   :  { %709 = vrot.lane.b32.xlu1 %v2176_v26, %s1664_s14  ;;  %v1113_v26 = vld [vmem:[%s2837_s17 + $0x20] sm:$0xff] }
 0x822   :  { %711 = vrot.lane.b32.xlu2 %v2185_v30, %s1664_s14  ;;  %713 = vrot.lane.b32.xlu0 %v2196_v33, %s1664_s14  ;;  %v1114_v30 = vld [vmem:[%s2837_s17 + $0x28] sm:$0xff]  ;;  %v1115_v33 = vld [vmem:[%s2837_s17 + $0x30] sm:$0xff] }
 0x823   :  { %1119 = vperm.xlu1 %1654, %v1109_v63  }
 0x82a   :  { %1124 = vperm.xlu2 %1652, %v1110_v34   ;;  %1129 = vperm.xlu0 %1653, %v1111_v7   ;;  %v1073_v34 = vld [vmem:[%s2839_s16 + $0x20] sm:$0xff]  ;;  %v1072_v7 = vld [vmem:[%s2839_s16 + $0x18] sm:$0xff] }
 0x82b   :  { %1134 = vperm.xlu1 %1654, %v1112_v11   ;;  %v1075_v11 = vld [vmem:[%s2839_s16 + $0x30] sm:$0xff] }
 0x82c   :  { %v946_v22 = vpop.permute.xlu2 %945 }
 0x82d   :  { %967 = vst.msk [vmem:[#allocation2 + $0x10] sm:$0xff] %vm183_vm15, %v946_v22 }
 0x82e   :  { %1015 = vst.msk [vmem:[#allocation2 + $0x10] sm:$0xff] %vm192_vm0, %v1656_v5 }
 0x82f   :  { %1031 = vst.msk [vmem:[#allocation2 + $0x10] sm:$0xff] %vm196_vm1, %v946_v22  ;;  %v1074_v22 = vld [vmem:[%s2839_s16 + $0x28] sm:$0xff] }
 0x830   :  { %1055 = vst.msk [vmem:[#allocation2 + $0x10] sm:$0xff] %vm202_vm2, %v1656_v5 }
 0x832   :  { %1139 = vperm.xlu2 %1652, %v1113_v26   ;;  %1144 = vperm.xlu0 %1653, %v1114_v30   ;;  %v1077_v26 = vld [vmem:[%s2839_s16 + $0x40] sm:$0xff]  ;;  %v1076_v30 = vld [vmem:[%s2839_s16 + $0x38] sm:$0xff] }
 0x833   :  { %1149 = vperm.xlu1 %1654, %v1115_v33   ;;  %v1079_v33 = vld [vmem:[%s2839_s16 + $0x50] sm:$0xff] }
 0x837   :  { %v1087_v24 = vld [vmem:[#allocation2 + $0x10] sm:$0xff] }
 0x83a   :  { %1154 = vperm.xlu2 %1652, %v1116_v0   ;;  %1367 = vrot.lane.b32.xlu0 %v1347_v31, %s1659_s21  ;;  %v1352_v0 = vld [vmem:[%s2838_s18 + $0x38] sm:$0xff] }
 0x83b   :  { %1363 = vrot.lane.b32.xlu1 %v2531_v29, %s1659_s21 }
 0x83c   :  { %v950_v1 = vpop.permute.xlu2 %949  ;;  %v944_v2 = vpop.permute.xlu1 %943 }
 0x83d   :  { %969 = vst.msk [vmem:[#allocation2 + $0x20] sm:$0xff] %vm183_vm15, %v950_v1 }
 0x83e   :  { %1017 = vst.msk [vmem:[#allocation2 + $0x20] sm:$0xff] %vm192_vm0, %v1656_v5 }
 0x83f   :  { %1033 = vst.msk [vmem:[#allocation2 + $0x20] sm:$0xff] %vm196_vm1, %v950_v1  ;;  %v1078_v1 = vld [vmem:[%s2839_s16 + $0x48] sm:$0xff] }
 0x840   :  { %1057 = vst.msk [vmem:[#allocation2 + $0x20] sm:$0xff] %vm202_vm2, %v1656_v5 }
 0x841   :  { %966 = vst.msk [vmem:[#allocation2 + $0x8] sm:$0xff] %vm183_vm15, %v944_v2 }
 0x842   :  { %1014 = vst.msk [vmem:[#allocation2 + $0x8] sm:$0xff] %vm192_vm0, %v1656_v5  ;;  %1373 = vrot.lane.b32.xlu0 %v1350_v43, %s1659_s21  ;;  %1365 = vrot.lane.b32.xlu2 %v1346_v55, %s1659_s21 }
 0x843   :  { %1030 = vst.msk [vmem:[#allocation2 + $0x8] sm:$0xff] %vm196_vm1, %v944_v2  ;;  %1369 = vrot.lane.b32.xlu1 %v1348_v41, %s1659_s21  ;;  %v1081_v2 = vld [vmem:[%s2839_s16 + $0x60] sm:$0xff] }
 0x844   :  { %1054 = vst.msk [vmem:[#allocation2 + $0x8] sm:$0xff] %vm202_vm2, %v1656_v5 }
 0x847   :  { %v1089_v19 = vld [vmem:[#allocation2 + $0x20] sm:$0xff] }
 0x84a   :  { %1468 = vrot.lane.b32.xlu0 %v1346_v55, %s1661_s1  ;;  %1371 = vrot.lane.b32.xlu2 %v1349_v60, %s1659_s21 }
 0x84b   :  { %v1086_v27 = vld [vmem:[#allocation2 + $0x8] sm:$0xff]  ;;  %1375 = vrot.lane.b32.xlu1 %v1351_v53, %s1659_s21 }
 0x84c   :  { %v948_v3 = vpop.permute.xlu0 %947 }
 0x84d   :  { %968 = vst.msk [vmem:[#allocation2 + $0x18] sm:$0xff] %vm183_vm15, %v948_v3 }
 0x84e   :  { %1016 = vst.msk [vmem:[#allocation2 + $0x18] sm:$0xff] %vm192_vm0, %v1656_v5 }
 0x84f   :  { %1032 = vst.msk [vmem:[#allocation2 + $0x18] sm:$0xff] %vm196_vm1, %v948_v3  ;;  %v1080_v3 = vld [vmem:[%s2839_s16 + $0x58] sm:$0xff] }
 0x850   :  { %1056 = vst.msk [vmem:[#allocation2 + $0x18] sm:$0xff] %vm202_vm2, %v1656_v5 }
 0x852   :  { %1474 = vrot.lane.b32.xlu0 %v1349_v60, %s1661_s1  ;;  %1466 = vrot.lane.b32.xlu2 %v2531_v29, %s1661_s1 }
 0x853   :  { %1470 = vrot.lane.b32.xlu1 %v1347_v31, %s1661_s1 }
 0x854   :  { %v956_v4 = vpop.permute.xlu2 %955 }
 0x855   :  { %972 = vst.msk [vmem:[#allocation2 + $0x38] sm:$0xff] %vm183_vm15, %v956_v4 }
 0x856   :  { %1020 = vst.msk [vmem:[#allocation2 + $0x38] sm:$0xff] %vm192_vm0, %v1656_v5 }
 0x857   :  { %1036 = vst.msk [vmem:[#allocation2 + $0x38] sm:$0xff] %vm196_vm1, %v956_v4  ;;  %v1088_v20 = vld [vmem:[#allocation2 + $0x18] sm:$0xff]  ;;  %v1083_v4 = vld [vmem:[%s2839_s16 + $0x70] sm:$0xff] }
 0x858   :  { %1060 = vst.msk [vmem:[#allocation2 + $0x38] sm:$0xff] %vm202_vm2, %v1656_v5 }
 0x85a   :  { %1472 = vrot.lane.b32.xlu2 %v1348_v41, %s1661_s1  ;;  %1377 = vrot.lane.b32.xlu0 %v1352_v0, %s1659_s21 }
 0x85b   :  { %1476 = vrot.lane.b32.xlu1 %v1350_v43, %s1661_s1 }
 0x85c   :  { %v992_v6 = vpop.permute.xlu2 %991  ;;  %v952_v8 = vpop.permute.xlu1 %951 }
 0x85d   :  { %1010 = vst.msk [vmem:[#allocation2 + $0xa8] sm:$0xff] %vm190_vm3, %v992_v6 }
 0x85e   :  { %1026 = vst.msk [vmem:[#allocation2 + $0xa8] sm:$0xff] %vm194_vm4, %v1656_v5 }
 0x85f   :  { %1050 = vst.msk [vmem:[#allocation2 + $0xa8] sm:$0xff] %vm200_vm5, %v992_v6  ;;  %v1092_v9 = vld [vmem:[#allocation2 + $0x38] sm:$0xff]  ;;  %v1082_v6 = vld [vmem:[%s2839_s16 + $0x68] sm:$0xff] }
 0x860   :  { %1066 = vst.msk [vmem:[#allocation2 + $0xa8] sm:$0xff] %vm204_vm6, %v1656_v5  ;;  %1190 = vmatpush.msra.mxu3 %v1092_v9 }
 0x861   :  { %970 = vst.msk [vmem:[#allocation2 + $0x28] sm:$0xff] %vm183_vm15, %v952_v8 }
 0x862   :  { %1018 = vst.msk [vmem:[#allocation2 + $0x28] sm:$0xff] %vm192_vm0, %v1656_v5  ;;  %1478 = vrot.lane.b32.xlu2 %v1351_v53, %s1661_s1 }
 0x863   :  { %1034 = vst.msk [vmem:[#allocation2 + $0x28] sm:$0xff] %vm196_vm1, %v952_v8  ;;  %1480 = vrot.lane.b32.xlu1 %v1352_v0, %s1661_s1  ;;  %v1084_v8 = vld [vmem:[%s2839_s16 + $0x78] sm:$0xff] }
 0x864   :  { %1058 = vst.msk [vmem:[#allocation2 + $0x28] sm:$0xff] %vm202_vm2, %v1656_v5  ;;  %v954_v10 = vpop.permute.xlu0 %953  ;;  %v988_v12 = vpop.permute.xlu2 %987 }
 0x865   :  { %971 = vst.msk [vmem:[#allocation2 + $0x30] sm:$0xff] %vm183_vm15, %v954_v10 }
 0x866   :  { %1019 = vst.msk [vmem:[#allocation2 + $0x30] sm:$0xff] %vm192_vm0, %v1656_v5 }
 0x867   :  { %1035 = vst.msk [vmem:[#allocation2 + $0x30] sm:$0xff] %vm196_vm1, %v954_v10  ;;  %v1106_v40 = vld [vmem:[#allocation2 + $0xa8] sm:$0xff] }
 0x868   :  { %1059 = vst.msk [vmem:[#allocation2 + $0x30] sm:$0xff] %vm202_vm2, %v1656_v5 }
 0x869   :  { %1008 = vst.msk [vmem:[#allocation2 + $0x98] sm:$0xff] %vm190_vm3, %v988_v12 }
 0x86a   :  { %1024 = vst.msk [vmem:[#allocation2 + $0x98] sm:$0xff] %vm194_vm4, %v1656_v5 }
 0x86b   :  { %1048 = vst.msk [vmem:[#allocation2 + $0x98] sm:$0xff] %vm200_vm5, %v988_v12  ;;  %v1090_v17 = vld [vmem:[#allocation2 + $0x28] sm:$0xff] }
 0x86c   :  { %1064 = vst.msk [vmem:[#allocation2 + $0x98] sm:$0xff] %vm204_vm6, %v1656_v5  ;;  %v994_v13 = vpop.permute.xlu0 %993  ;;  %v982_v15 = vpop.permute.xlu2 %981 }
 0x86d   :  { %1011 = vst.msk [vmem:[#allocation2 + $0xb0] sm:$0xff] %vm190_vm3, %v994_v13  ;;  %v996_v14 = vpop.permute.xlu1 %995 }
 0x86e   :  { %1027 = vst.msk [vmem:[#allocation2 + $0xb0] sm:$0xff] %vm194_vm4, %v1656_v5 }
 0x86f   :  { %1051 = vst.msk [vmem:[#allocation2 + $0xb0] sm:$0xff] %vm200_vm5, %v994_v13  ;;  %v1091_v16 = vld [vmem:[#allocation2 + $0x30] sm:$0xff] }
 0x870   :  { %1067 = vst.msk [vmem:[#allocation2 + $0xb0] sm:$0xff] %vm204_vm6, %v1656_v5  ;;  %1191 = vmatpush.msra.mxu3 %v1091_v16 }
 0x871   :  { %1012 = vst.msk [vmem:[#allocation2 + $0xb8] sm:$0xff] %vm190_vm3, %v996_v14 }
 0x872   :  { %1028 = vst.msk [vmem:[#allocation2 + $0xb8] sm:$0xff] %vm194_vm4, %v1656_v5  ;;  %1192 = vmatpush.msra.mxu3 %v1090_v17 }
 0x873   :  { %1052 = vst.msk [vmem:[#allocation2 + $0xb8] sm:$0xff] %vm200_vm5, %v996_v14  ;;  %v1104_v47 = vld [vmem:[#allocation2 + $0x98] sm:$0xff] }
 0x874   :  { %1068 = vst.msk [vmem:[#allocation2 + $0xb8] sm:$0xff] %vm204_vm6, %v1656_v5  ;;  %v942_v21 = vpop.permute.xlu0 %941  ;;  %1193 = vmatpush.msra.mxu3 %v1089_v19  ;;  %v414_v28 = vpop.permute.xlu2 %413 }
 0x875   :  { %1005 = vst.msk [vmem:[#allocation2 + $0x80] sm:$0xff] %vm190_vm3, %v982_v15  ;;  %v990_v23 = vpop.permute.xlu1 %989 }
 0x876   :  { %1021 = vst.msk [vmem:[#allocation2 + $0x80] sm:$0xff] %vm194_vm4, %v1656_v5  ;;  %1194 = vmatpush.msra.mxu3 %v1088_v20 }
 0x877   :  { %1045 = vst.msk [vmem:[#allocation2 + $0x80] sm:$0xff] %vm200_vm5, %v982_v15  ;;  %v1107_v36 = vld [vmem:[#allocation2 + $0xb0] sm:$0xff] }
 0x878   :  { %1061 = vst.msk [vmem:[#allocation2 + $0x80] sm:$0xff] %vm204_vm6, %v1656_v5  ;;  %1195 = vmatpush.msra.mxu3 %v1087_v24 }
 0x879   :  { %1009 = vst.msk [vmem:[#allocation2 + $0xa0] sm:$0xff] %vm190_vm3, %v990_v23 }
 0x87a   :  { %1025 = vst.msk [vmem:[#allocation2 + $0xa0] sm:$0xff] %vm194_vm4, %v1656_v5  ;;  %1196 = vmatpush.msra.mxu3 %v1086_v27 }
 0x87b   :  { %1049 = vst.msk [vmem:[#allocation2 + $0xa0] sm:$0xff] %vm200_vm5, %v990_v23  ;;  %v1108_v35 = vld [vmem:[#allocation2 + $0xb8] sm:$0xff] }
 0x87c   :  { %1065 = vst.msk [vmem:[#allocation2 + $0xa0] sm:$0xff] %vm204_vm6, %v1656_v5  ;;  %v986_v37 = vpop.permute.xlu0 %985  ;;  %1231 = vmatpush.msra.mxu0 %v1108_v35  ;;  %v712_v44 = vpop.permute.xlu2 %711 }
 0x87d   :  { %1606 = vst.msk [vmem:[%s2830_s22 + $0x18] sm:$0xff] %vm190_vm3, %v414_v28  ;;  %v984_v39 = vpop.permute.xlu1 %983 }
 0x87e   :  { %965 = vst.msk [vmem:[#allocation2] sm:$0xff] %vm183_vm15, %v942_v21  ;;  %1232 = vmatpush.msra.mxu0 %v1107_v36 }
 0x87f   :  { %1013 = vst.msk [vmem:[#allocation2] sm:$0xff] %vm192_vm0, %v1656_v5  ;;  %v1101_v61 = vld [vmem:[#allocation2 + $0x80] sm:$0xff]  ;;  %vm1574_vm0 = vcmask 1024  }
 0x880   :  { %1029 = vst.msk [vmem:[#allocation2] sm:$0xff] %vm196_vm1, %v942_v21  ;;  %1233 = vmatpush.msra.mxu0 %v1106_v40 }
 0x881   :  { %1053 = vst.msk [vmem:[#allocation2] sm:$0xff] %vm202_vm2, %v1656_v5 }
 0x882   :  { %1006 = vst.msk [vmem:[#allocation2 + $0x88] sm:$0xff] %vm190_vm3, %v984_v39 }
 0x883   :  { %1022 = vst.msk [vmem:[#allocation2 + $0x88] sm:$0xff] %vm194_vm4, %v1656_v5  ;;  %v1105_v45 = vld [vmem:[#allocation2 + $0xa0] sm:$0xff] }
 0x884   :  { %1046 = vst.msk [vmem:[#allocation2 + $0x88] sm:$0xff] %vm200_vm5, %v984_v39  ;;  %1234 = vmatpush.msra.mxu0 %v1105_v45  ;;  %v246_v48 = vpop.permute.xlu0 %245  ;;  %v1125_v9 = vpop.permute.xlu2 %1124 }
 0x885   :  { %1062 = vst.msk [vmem:[#allocation2 + $0x88] sm:$0xff] %vm204_vm6, %v1656_v5  ;;  %v412_v49 = vpop.permute.xlu1 %411 }
 0x886   :  { %1617 = vst.msk [vmem:[%s2835_s23 + $0x30] sm:$0xff] %vm190_vm3, %v712_v44  ;;  %1235 = vmatpush.msra.mxu0 %v1104_v47 }
 0x887   :  { %1007 = vst.msk [vmem:[#allocation2 + $0x90] sm:$0xff] %vm190_vm3, %v986_v37 }
 0x888   :  { %1023 = vst.msk [vmem:[#allocation2 + $0x90] sm:$0xff] %vm194_vm4, %v1656_v5  ;;  %v1085_v52 = vld [vmem:[#allocation2] sm:$0xff] }
 0x889   :  { %1047 = vst.msk [vmem:[#allocation2 + $0x90] sm:$0xff] %vm200_vm5, %v986_v37  ;;  %1197 = vmatpush.msra.mxu3 %v1085_v52 }
 0x88a   :  { %1063 = vst.msk [vmem:[#allocation2 + $0x90] sm:$0xff] %vm204_vm6, %v1656_v5  ;;  %1198 = vmatmul.f32.vlgmr.msra.gmra.mxu3 %v1069_v51 }
 0x88b   :  { %1605 = vst.msk [vmem:[%s2830_s22 + $0x10] sm:$0xff] %vm190_vm3, %v412_v49 }
 0x88c   :  { %1600 = vst.msk [vmem:[%s2865_s5 + $0x8] sm:$0xff] %vm190_vm3, %v246_v48  ;;  %v708_v5 = vpop.permute.xlu0 %707  ;;  %v1102_v59 = vld [vmem:[#allocation2 + $0x88] sm:$0xff]  ;;  %v1140_v10 = vpop.permute.xlu2 %1139 }
 0x88d   :  { %v710_v56 = vpop.permute.xlu1 %709  ;;  %1615 = vst.msk [vmem:[%s2835_s23 + $0x20] sm:$0xff] %vm190_vm3, %v708_v5 }
 0x88e   :  { %1616 = vst.msk [vmem:[%s2835_s23 + $0x28] sm:$0xff] %vm190_vm3, %v710_v56 }
 0x891   :  { %v1103_v58 = vld [vmem:[#allocation2 + $0x90] sm:$0xff] }
 0x892   :  { %1236 = vmatpush.msra.mxu0 %v1103_v58  ;;  %1201 = vmatmul.f32.gmra.mxu3 %v1071_v57 }
 0x894   :  { %1237 = vmatpush.msra.mxu0 %v1102_v59  ;;  %v714_v63 = vpop.permute.xlu0 %713  ;;  %v2677_v13 = vpop.permute.xlu2 %1154 }
 0x895   :  { %1618 = vst.msk [vmem:[%s2835_s23 + $0x38] sm:$0xff] %vm190_vm3, %v714_v63  ;;  %v1120_v12 = vpop.permute.xlu1 %1119 }
 0x896   :  { %1238 = vmatpush.msra.mxu0 %v1101_v61 }
 0x897   :  { %1627 = vmatmul.msk.f32.vlgmr.msra.gmra.mxu0 %vm1157_vm13, %v1070_v62 }
 0x89a   :  { %1204 = vmatmul.f32.gmra.mxu3 %v1073_v34 }
 0x89c   :  { %v1130_v15 = vpop.permute.xlu0 %1129  ;;  %v1366_v16 = vpop.permute.xlu2 %1365 }
 0x89d   :  { %v1135_v14 = vpop.permute.xlu1 %1134 }
 0x89f   :  { %1628 = vmatmul.msk.f32.gmra.mxu0 %vm1157_vm13, %v1072_v7 }
 0x8a2   :  { %1207 = vmatmul.f32.gmra.mxu3 %v1075_v11 }
 0x8a4   :  { %v2681_v19 = vpop.permute.xlu0 %1144  ;;  %v2683_v20 = vpop.permute.xlu2 %1371 }
 0x8a5   :  { %v2679_v17 = vpop.permute.xlu1 %1149 }
 0x8a7   :  { %1629 = vmatmul.msk.f32.gmra.mxu0 %vm1157_vm13, %v1074_v22 }
 0x8aa   :  { %1210 = vmatmul.f32.gmra.mxu3 %v1077_v26 }
 0x8ac   :  { %v1368_v24 = vpop.permute.xlu0 %1367  ;;  %v1467_v35 = vpop.permute.xlu2 %1466 }
 0x8ad   :  { %v1364_v23 = vpop.permute.xlu1 %1363 }
 0x8af   :  { %1630 = vmatmul.msk.f32.gmra.mxu0 %vm1157_vm13, %v1076_v30 }
 0x8b2   :  { %1213 = vmatmul.f32.gmra.mxu3 %v1079_v33 }
 0x8b4   :  { %v1374_v40 = vpop.permute.xlu0 %1373  ;;  %v1473_v7 = vpop.permute.xlu2 %1472 }
 0x8b5   :  { %v1370_v37 = vpop.permute.xlu1 %1369 }
 0x8b7   :  { %1631 = vmatmul.msk.f32.gmra.mxu0 %vm1157_vm13, %v1078_v1 }
 0x8ba   :  { %1216 = vmatmul.f32.gmra.mxu3 %v1081_v2 }
 0x8bc   :  { %v1469_v51 = vpop.permute.xlu0 %1468 }
 0x8bf   :  { %1632 = vmatmul.msk.f32.gmra.mxu0 %vm1157_vm13, %v1080_v3 }
 0x8c2   :  { %1219 = vmatmul.f32.gmra.mxu3 %v1083_v4 }
 0x8c4   :  { %v1475_v2 = vpop.permute.xlu0 %1474 }
 0x8c7   :  { %1633 = vmatmul.msk.f32.gmra.mxu0 %vm1157_vm13, %v1082_v6 }
 0x8cf   :  { %1634 = vmatmul.msk.f32.gmra.mxu0 %vm1157_vm13, %v1084_v8 }
 0x90d   :  { %v1199_v21 = vpop.f32.mrf.mxu3 }
 0x90e   :  { %v1200_v27 = vadd.f32 %v1199_v21, %v1120_v12 }
 0x914   :  { %v1240_v28 = vpop.f32.mrf.mxu0 }
 0x915   :  { %v1241_v29 = vadd.f32 %v1240_v28, %v1200_v27  ;;  %v1202_v31 = vpop.f32.mrf.mxu3  ;;  %v1378_v27 = vpop.permute.xlu0 %1377 }
 0x916   :  { %v1203_v41 = vadd.f32 %v1202_v31, %v1125_v9 }
 0x917   :  { %v1264_v36 = vadd.f32 %v1241_v29, %v2334_v18  ;;  %v2692_v18 = vpop.permute.xlu1 %1375 }
 0x919   :  { %v1490_v39 = vmul.f32 %v1467_v35, %v1264_v36  ;;  %1312 = vrot.lane.b32.xlu2 %v1264_v36, %s1664_s14  ;;  %1280 = vrot.lane.b32.xlu0 %v1264_v36, %s1663_s7  ;;  %v1387_v48 = vmul.f32 %v1364_v23, %v1264_v36 }
 0x91b   :  { %1506 = vrot.lane.b32.xlu1 %v1490_v39, %s1664_s14 }
 0x91c   :  { %v1243_v43 = vpop.f32.mrf.mxu0 }
 0x91d   :  { %v1244_v44 = vadd.f32 %v1243_v43, %v1203_v41  ;;  %v1205_v45 = vpop.f32.mrf.mxu3 }
 0x91e   :  { %v1206_v49 = vadd.f32 %v1205_v45, %v1130_v15 }
 0x91f   :  { %v1265_v47 = vadd.f32 %v1244_v44, %v2340_v25  ;;  %v1471_v25 = vpop.permute.xlu1 %1470 }
 0x921   :  { %1314 = vrot.lane.b32.xlu0 %v1265_v47, %s1664_s14  ;;  %1403 = vrot.lane.b32.xlu2 %v1387_v48, %s1663_s7  ;;  %v1491_v55 = vmul.f32 %v1469_v51, %v1265_v47  ;;  %v1388_v5 = vmul.f32 %v1366_v16, %v1265_v47 }
 0x923   :  { %1282 = vrot.lane.b32.xlu1 %v1265_v47, %s1663_s7 }
 0x924   :  { %v1246_v52 = vpop.f32.mrf.mxu0 }
 0x925   :  { %v1247_v53 = vadd.f32 %v1246_v52, %v1206_v49  ;;  %v1208_v56 = vpop.f32.mrf.mxu3 }
 0x926   :  { %v1209_v59 = vadd.f32 %v1208_v56, %v1135_v14 }
 0x927   :  { %v1266_v57 = vadd.f32 %v1247_v53, %v2348_v32 }
 0x929   :  { %1405 = vrot.lane.b32.xlu0 %v1388_v5, %s1663_s7  ;;  %1508 = vrot.lane.b32.xlu2 %v1491_v55, %s1664_s14  ;;  %v1492_v60 = vmul.f32 %v1471_v25, %v1266_v57  ;;  %v1389_v62 = vmul.f32 %v1368_v24, %v1266_v57 }
 0x92b   :  { %1316 = vrot.lane.b32.xlu1 %v1266_v57, %s1664_s14 }
 0x92c   :  { %v1249_v58 = vpop.f32.mrf.mxu0 }
 0x92d   :  { %v1250_v61 = vadd.f32 %v1249_v58, %v1209_v59  ;;  %v1211_v63 = vpop.f32.mrf.mxu3 }
 0x92e   :  { %v1212_v11 = vadd.f32 %v1211_v63, %v1140_v10 }
 0x92f   :  { %v1267_v34 = vadd.f32 %v1250_v61, %v2356_v38 }
 0x931   :  { %1510 = vrot.lane.b32.xlu0 %v1492_v60, %s1664_s14  ;;  %1284 = vrot.lane.b32.xlu2 %v1266_v57, %s1663_s7  ;;  %v1493_v22 = vmul.f32 %v1473_v7, %v1267_v34  ;;  %v1390_v1 = vmul.f32 %v1370_v37, %v1267_v34 }
 0x933   :  { %1407 = vrot.lane.b32.xlu1 %v1389_v62, %s1663_s7 }
 0x934   :  { %v1252_v32 = vpop.f32.mrf.mxu0 }
 0x935   :  { %v1253_v26 = vadd.f32 %v1252_v32, %v1212_v11  ;;  %v1214_v30 = vpop.f32.mrf.mxu3 }
 0x936   :  { %v1215_v38 = vadd.f32 %v1214_v30, %v2681_v19 }
 0x937   :  { %v1268_v0 = vadd.f32 %v1253_v26, %v2364_v42  ;;  %v1477_v42 = vpop.permute.xlu1 %1476 }
 0x939   :  { %1286 = vrot.lane.b32.xlu0 %v1267_v34, %s1663_s7  ;;  %1318 = vrot.lane.b32.xlu2 %v1267_v34, %s1664_s14  ;;  %v1494_v6 = vmul.f32 %v1475_v2, %v1268_v0  ;;  %v1391_v8 = vmul.f32 %v2683_v20, %v1268_v0 }
 0x93b   :  { %1512 = vrot.lane.b32.xlu1 %v1493_v22, %s1664_s14 }
 0x93c   :  { %v1255_v33 = vpop.f32.mrf.mxu0 }
 0x93d   :  { %v1256_v3 = vadd.f32 %v1255_v33, %v1215_v38  ;;  %v1217_v4 = vpop.f32.mrf.mxu3 }
 0x93e   :  { %v1218_v15 = vadd.f32 %v1217_v4, %v2679_v17  ;;  %v1479_v17 = vpop.permute.xlu2 %1478 }
 0x93f   :  { %v1269_v10 = vadd.f32 %v1256_v3, %v2372_v46 }
 0x941   :  { %1320 = vrot.lane.b32.xlu0 %v1268_v0, %s1664_s14  ;;  %1409 = vrot.lane.b32.xlu2 %v1390_v1, %s1663_s7  ;;  %v1392_v12 = vmul.f32 %v1374_v40, %v1269_v10  ;;  %v1495_v16 = vmul.f32 %v1477_v42, %v1269_v10 }
 0x943   :  { %1288 = vrot.lane.b32.xlu1 %v1268_v0, %s1663_s7 }
 0x944   :  { %v1258_v9 = vpop.f32.mrf.mxu0 }
 0x945   :  { %v1220_v14 = vpop.f32.mrf.mxu3  ;;  %v1259_v20 = vadd.f32 %v1258_v9, %v1218_v15 }
 0x946   :  { %v1221_v46 = vadd.f32 %v1220_v14, %v2677_v13 }
 0x947   :  { %v1270_v23 = vadd.f32 %v1259_v20, %v2380_v50  ;;  %v1481_v50 = vpop.permute.xlu1 %1480 }
 0x949   :  { %1411 = vrot.lane.b32.xlu0 %v1391_v8, %s1663_s7  ;;  %1514 = vrot.lane.b32.xlu2 %v1494_v6, %s1664_s14  ;;  %v1496_v28 = vmul.f32 %v1479_v17, %v1270_v23  ;;  %v1393_v29 = vmul.f32 %v2692_v18, %v1270_v23 }
 0x94b   :  { %1322 = vrot.lane.b32.xlu1 %v1269_v10, %s1664_s14 }
 0x94c   :  { %v1261_v19 = vpop.f32.mrf.mxu0 }
 0x94d   :  { %v1262_v21 = vadd.f32 %v1261_v19, %v1221_v46 }
 0x94f   :  { %v1271_v24 = vadd.f32 %v1262_v21, %v2389_v54 }
 0x951   :  { %1413 = vrot.lane.b32.xlu0 %v1392_v12, %s1663_s7  ;;  %1290 = vrot.lane.b32.xlu2 %v1269_v10, %s1663_s7  ;;  %v1394_v31 = vmul.f32 %v1378_v27, %v1271_v24  ;;  %v1497_v54 = vmul.f32 %v1481_v50, %v1271_v24 }
 0x953   :  { %1516 = vrot.lane.b32.xlu1 %v1495_v16, %s1664_s14 }
 0x959   :  { %1292 = vrot.lane.b32.xlu0 %v1270_v23, %s1663_s7  ;;  %1324 = vrot.lane.b32.xlu2 %v1270_v23, %s1664_s14  ;;  %v30_v23 = vstv %s2841_s19 }
 0x95a   :  { %31 = vst [vmem:[#allocation3] sm:$0x1] %v30_v23 }
 0x95b   :  { %1294 = vrot.lane.b32.xlu1 %v1271_v24, %s1663_s7 }
 0x961   :  { %1518 = vrot.lane.b32.xlu0 %v1496_v28, %s1664_s14  ;;  %1415 = vrot.lane.b32.xlu2 %v1393_v29, %s1663_s7 }
 0x963   :  { %1417 = vrot.lane.b32.xlu1 %v1394_v31, %s1663_s7 }
 0x969   :  { %1326 = vrot.lane.b32.xlu0 %v1271_v24, %s1664_s14  ;;  %1520 = vrot.lane.b32.xlu2 %v1497_v54, %s1664_s14 }
 0x973   :  { %v1313_v13 = vpop.permute.xlu2 %1312 }
 0x974   :  { %1635 = vst.msk [vmem:[%s2840_s24 + $0x40] sm:$0xff] %vm190_vm3, %v1313_v13 }
 0x97b   :  { %v1404_v35 = vpop.permute.xlu2 %1403 }
 0x97c   :  { %v1427_v43 = vsel %vm190_vm3, %v1404_v35, 0.0 }
 0x983   :  { %v1509_v36 = vpop.permute.xlu2 %1508 }
 0x984   :  { %v1533_v48 = vsel %vm190_vm3, %v1509_v36, 0.0 }
 0x98b   :  { %v1281_v37 = vpop.permute.xlu0 %1280  ;;  %v1285_v39 = vpop.permute.xlu2 %1284 }
 0x98c   :  { %1304 = vst.msk [vmem:[%s2840_s24] sm:$0xff] %vm190_vm3, %v1281_v37 }
 0x98d   :  { %1306 = vst.msk [vmem:[%s2840_s24 + $0x10] sm:$0xff] %vm190_vm3, %v1285_v39  ;;  %v1507_v40 = vpop.permute.xlu1 %1506 }
 0x98e   :  { %v1530_v41 = vsel %vm190_vm3, %v1507_v40, 0.0 }
 0x992   :  { %1531 = vadd.xlane.f32.xlu2 %v1530_v41 }
 0x993   :  { %v1315_v44 = vpop.permute.xlu0 %1314  ;;  %1428 = vadd.xlane.f32.xlu0 %v1427_v43  ;;  %v1319_v45 = vpop.permute.xlu2 %1318 }
 0x994   :  { %1636 = vst.msk [vmem:[%s2840_s24 + $0x48] sm:$0xff] %vm190_vm3, %v1315_v44 }
 0x995   :  { %1638 = vst.msk [vmem:[%s2840_s24 + $0x58] sm:$0xff] %vm190_vm3, %v1319_v45  ;;  %v1283_v47 = vpop.permute.xlu1 %1282 }
 0x996   :  { %1305 = vst.msk [vmem:[%s2840_s24 + $0x8] sm:$0xff] %vm190_vm3, %v1283_v47 }
 0x99a   :  { %1534 = vadd.xlane.f32.xlu2 %v1533_v48 }
 0x99b   :  { %v1406_v18 = vpop.permute.xlu0 %1405  ;;  %v1410_v49 = vpop.permute.xlu2 %1409 }
 0x99c   :  { %v1430_v51 = vsel %vm190_vm3, %v1406_v18, 0.0  ;;  %v1436_v53 = vsel %vm190_vm3, %v1410_v49, 0.0 }
 0x99d   :  { %1431 = vadd.xlane.f32.xlu1 %v1430_v51  ;;  %v1317_v52 = vpop.permute.xlu1 %1316 }
 0x99e   :  { %1637 = vst.msk [vmem:[%s2840_s24 + $0x50] sm:$0xff] %vm190_vm3, %v1317_v52 }
 0x9a2   :  { %1437 = vadd.xlane.f32.xlu2 %v1436_v53 }
 0x9a3   :  { %v1511_v55 = vpop.permute.xlu0 %1510  ;;  %v1515_v5 = vpop.permute.xlu2 %1514 }
 0x9a4   :  { %v1536_v56 = vsel %vm190_vm3, %v1511_v55, 0.0  ;;  %v1542_v58 = vsel %vm190_vm3, %v1515_v5, 0.0  ;;  %v1353_v55 = vlaneseq }
 0x9a5   :  { %1537 = vadd.xlane.f32.xlu1 %v1536_v56  ;;  %v1408_v57 = vpop.permute.xlu1 %1407 }
 0x9a6   :  { %v1433_v25 = vsel %vm190_vm3, %v1408_v57, 0.0 }
 0x9a7   :  { %1434 = vadd.xlane.f32.xlu0 %v1433_v25 }
 0x9aa   :  { %1543 = vadd.xlane.f32.xlu2 %v1542_v58  ;;  %v1354_v58 = vshrl.u32 %v1353_v55, 7 }
 0x9ab   :  { %v1287_v59 = vpop.permute.xlu0 %1286  ;;  %v1291_v60 = vpop.permute.xlu2 %1290 }
 0x9ac   :  { %1307 = vst.msk [vmem:[%s2840_s24 + $0x18] sm:$0xff] %vm190_vm3, %v1287_v59  ;;  %vm1464_vm14 = vcmp.eq.s32.totalorder %v1354_v58, 0  ;;  %vm1567_vm15 = vcmp.eq.s32.totalorder %v1354_v58, 1 }
 0x9ad   :  { %1309 = vst.msk [vmem:[%s2840_s24 + $0x28] sm:$0xff] %vm190_vm3, %v1291_v60  ;;  %v1513_v61 = vpop.permute.xlu1 %1512 }
 0x9ae   :  { %v1539_v62 = vsel %vm190_vm3, %v1513_v61, 0.0 }
 0x9af   :  { %1540 = vadd.xlane.f32.xlu0 %v1539_v62 }
 0x9b3   :  { %v1321_v63 = vpop.permute.xlu0 %1320  ;;  %v1325_v32 = vpop.permute.xlu2 %1324 }
 0x9b4   :  { %1639 = vst.msk [vmem:[%s2840_s24 + $0x60] sm:$0xff] %vm190_vm3, %v1321_v63 }
 0x9b5   :  { %1641 = vst.msk [vmem:[%s2840_s24 + $0x70] sm:$0xff] %vm190_vm3, %v1325_v32  ;;  %v1289_v34 = vpop.permute.xlu1 %1288  ;;  %v1655_v32 = vld [vmem:[#allocation3] ss:$0 sm:$0xff] }
 0x9b6   :  { %1308 = vst.msk [vmem:[%s2840_s24 + $0x20] sm:$0xff] %vm190_vm3, %v1289_v34 }
 0x9bb   :  { %v1412_v7 = vpop.permute.xlu0 %1411  ;;  %v1416_v11 = vpop.permute.xlu2 %1415 }
 0x9bc   :  { %v1445_v22 = vsel %vm190_vm3, %v1416_v11, 0.0  ;;  %v1439_v26 = vsel %vm190_vm3, %v1412_v7, 0.0 }
 0x9bd   :  { %1440 = vadd.xlane.f32.xlu1 %v1439_v26  ;;  %v1323_v30 = vpop.permute.xlu1 %1322  ;;  %1446 = vadd.xlane.f32.xlu2 %v1445_v22 }
 0x9be   :  { %1640 = vst.msk [vmem:[%s2840_s24 + $0x68] sm:$0xff] %vm190_vm3, %v1323_v30 }
 0x9c3   :  { %v1414_v33 = vpop.permute.xlu0 %1413  ;;  %v1521_v0 = vpop.permute.xlu2 %1520 }
 0x9c4   :  { %v1551_v1 = vsel %vm190_vm3, %v1521_v0, 0.0  ;;  %v1442_v38 = vsel %vm190_vm3, %v1414_v33, 0.0 }
 0x9c5   :  { %v1517_v2 = vpop.permute.xlu1 %1516  ;;  %1443 = vadd.xlane.f32.xlu0 %v1442_v38  ;;  %1552 = vadd.xlane.f32.xlu2 %v1551_v1 }
 0x9c6   :  { %v1545_v3 = vsel %vm190_vm3, %v1517_v2, 0.0 }
 0x9c7   :  { %1546 = vadd.xlane.f32.xlu1 %v1545_v3 }
 0x9cb   :  { %v1293_v4 = vpop.permute.xlu0 %1292 }
 0x9cc   :  { %1310 = vst.msk [vmem:[%s2840_s24 + $0x30] sm:$0xff] %vm190_vm3, %v1293_v4 }
 0x9cd   :  { %v1295_v6 = vpop.permute.xlu1 %1294 }
 0x9ce   :  { %1311 = vst.msk [vmem:[%s2840_s24 + $0x38] sm:$0xff] %vm190_vm3, %v1295_v6 }
 0x9d3   :  { %v1519_v8 = vpop.permute.xlu0 %1518 }
 0x9d4   :  { %v1548_v9 = vsel %vm190_vm3, %v1519_v8, 0.0 }
 0x9d5   :  { %v1418_v10 = vpop.permute.xlu1 %1417  ;;  %1549 = vadd.xlane.f32.xlu0 %v1548_v9 }
 0x9d6   :  { %v1448_v42 = vsel %vm190_vm3, %v1418_v10, 0.0 }
 0x9d7   :  { %1449 = vadd.xlane.f32.xlu1 %v1448_v42 }
 0x9db   :  { %v1327_v12 = vpop.permute.xlu0 %1326 }
 0x9dc   :  { %1642 = vst.msk [vmem:[%s2840_s24 + $0x78] sm:$0xff] %vm190_vm3, %v1327_v12 }
 0xa05   :  { %v1532_v14 = vpop.xlane.xlu2 %1531 }
 0xa06   :  { %v1429_v16 = vpop.xlane.xlu0 %1428 }
 0xa0d   :  { %v1535_v15 = vpop.xlane.xlu2 %1534 }
 0xa0e   :  { %v1554_v29 = vadd.f32 %v1535_v15, %v1532_v14 }
 0xa10   :  { %v1432_v19 = vpop.xlane.xlu1 %1431 }
 0xa11   :  { %v1451_v28 = vadd.f32 %v1432_v19, %v1429_v16 }
 0xa15   :  { %v1438_v20 = vpop.xlane.xlu2 %1437 }
 0xa18   :  { %v1538_v21 = vpop.xlane.xlu1 %1537 }
 0xa19   :  { %v1555_v50 = vadd.f32 %v1554_v29, %v1538_v21 }
 0xa1a   :  { %v1435_v46 = vpop.xlane.xlu0 %1434 }
 0xa1b   :  { %v1452_v31 = vadd.f32 %v1451_v28, %v1435_v46 }
 0xa1d   :  { %v1544_v24 = vpop.xlane.xlu2 %1543  ;;  %v1453_v36 = vadd.f32 %v1452_v31, %v1438_v20 }
 0xa22   :  { %v1541_v17 = vpop.xlane.xlu0 %1540 }
 0xa23   :  { %v1556_v35 = vadd.f32 %v1555_v50, %v1541_v17 }
 0xa25   :  { %v1557_v41 = vadd.f32 %v1556_v35, %v1544_v24 }
 0xa30   :  { %v1441_v27 = vpop.xlane.xlu1 %1440  ;;  %v1447_v54 = vpop.xlane.xlu2 %1446 }
 0xa31   :  { %v1454_v39 = vadd.f32 %v1453_v36, %v1441_v27 }
 0xa38   :  { %v1444_v13 = vpop.xlane.xlu0 %1443  ;;  %v1553_v48 = vpop.xlane.xlu2 %1552 }
 0xa39   :  { %v1455_v40 = vadd.f32 %v1454_v39, %v1444_v13 }
 0xa3a   :  { %v1547_v37 = vpop.xlane.xlu1 %1546 }
 0xa3b   :  { %v1558_v43 = vadd.f32 %v1557_v41, %v1547_v37  ;;  %v1456_v47 = vadd.f32 %v1455_v40, %v1447_v54 }
 0xa48   :  { %v1550_v44 = vpop.xlane.xlu0 %1549 }
 0xa49   :  { %v1559_v45 = vadd.f32 %v1558_v43, %v1550_v44 }
 0xa4a   :  { %v1450_v18 = vpop.xlane.xlu1 %1449 }
 0xa4b   :  { %v1560_v49 = vadd.f32 %v1559_v45, %v1553_v48  ;;  %v1457_v51 = vadd.f32 %v1456_v47, %v1450_v18 }
 0xa4d   :  { %v1561_v52 = vrot.slane %v1560_v49, 4  ;;  %v1458_v53 = vrot.slane %v1457_v51, 4 }
 0xa4f   :  { %v1562_v5 = vadd.f32 %v1561_v52, %v1560_v49  ;;  %v1459_v56 = vadd.f32 %v1458_v53, %v1457_v51 }
 0xa51   :  { %v1563_v57 = vrot.slane %v1562_v5, 2  ;;  %v1460_v25 = vrot.slane %v1459_v56, 2 }
 0xa53   :  { %v1564_v59 = vadd.f32 %v1563_v57, %v1562_v5  ;;  %v1461_v60 = vadd.f32 %v1460_v25, %v1459_v56 }
 0xa55   :  { %v1565_v61 = vrot.slane %v1564_v59, 1  ;;  %v1462_v62 = vrot.slane %v1461_v60, 1 }
 0xa57   :  { %v1566_v63 = vadd.f32 %v1565_v61, %v1564_v59  ;;  %v1463_v34 = vadd.f32 %v1462_v62, %v1461_v60 }
 0xa59   :  { %v1465_v7 = vsel %vm1464_vm14, %v1463_v34, 0.0 }
 0xa5a   :  { %v1568_v11 = vsel %vm1567_vm15, %v1566_v63, %v1465_v7 }
 0xa5b   :  { %v1573_v22 = vadd.f32 %v1655_v32, %v1568_v11 }
 0xa5d   :  { %1575 = vst.msk [vmem:[%s2842_s20] sm:$0x3] %vm1574_vm0, %v1573_v22 }

// kernel: multi_discriminator_forward.3
= control target key start
LH: loop header
LB: loop body
LE: loop exit
PB: predicated region body
PF: predicated region fallthrough
CT: control target
= control target key end

     0   :  { %s2893_s0 = inlined_call_operand.vmem [shape: f32[2,4,18], index: 0, kind: input, shape index: {}]   ;;  %s2894_s1 = inlined_call_operand.vmem [shape: f32[2,4,18], index: 1, kind: input, shape index: {}]   ;;  %s2895_s2 = inlined_call_operand.vmem [shape: f32[8,24], index: 2, kind: input, shape index: {}]   ;;  %s2896_s3 = inlined_call_operand.vmem [shape: f32[8,1], index: 3, kind: input, shape index: {}]   ;;  %s2897_s4 = inlined_call_operand.vmem [shape: f32[8,24], index: 4, kind: input, shape index: {}]   ;;  %s2898_s5 = inlined_call_operand.vmem [shape: f32[8,1], index: 5, kind: input, shape index: {}]   ;;  %s2899_s6 = inlined_call_operand.vmem [shape: f32[16,24], index: 6, kind: input, shape index: {}]   ;;  %s2900_s7 = inlined_call_operand.vmem [shape: f32[16,1], index: 7, kind: input, shape index: {}]   ;;  %s2901_s8 = inlined_call_operand.vmem [shape: f32[16,48], index: 8, kind: input, shape index: {}]   ;;  %s2902_s9 = inlined_call_operand.vmem [shape: f32[16,1], index: 9, kind: input, shape index: {}]   ;;  %s2903_s10 = inlined_call_operand.vmem [shape: f32[32,48], index: 10, kind: input, shape index: {}]   ;;  %s2904_s11 = inlined_call_operand.vmem [shape: f32[32,1], index: 11, kind: input, shape index: {}]   ;;  %s2905_s12 = inlined_call_operand.vmem [shape: f32[32,96], index: 12, kind: input, shape index: {}]   ;;  %s2906_s13 = inlined_call_operand.vmem [shape: f32[32,1], index: 13, kind: input, shape index: {}]   ;;  %s2907_s14 = inlined_call_operand.vmem [shape: f32[64,96], index: 14, kind: input, shape index: {}]   ;;  %s2908_s15 = inlined_call_operand.vmem [shape: f32[64,1], index: 15, kind: input, shape index: {}]   ;;  %s2909_s16 = inlined_call_operand.vmem [shape: f32[64,192], index: 16, kind: input, shape index: {}]   ;;  %s2910_s17 = inlined_call_operand.vmem [shape: f32[64,1], index: 17, kind: input, shape index: {}]   ;;  %s2911_s18 = inlined_call_operand.vmem [shape: f32[64,18], index: 18, kind: input, shape index: {}]   ;;  %s2912_s19 = inlined_call_operand.<no memory space> [shape: f32[1,1], index: 19, kind: input, shape index: {}]   ;;  %s2913_s20 = inlined_call_operand.vmem [shape: f32[2,1], index: 20, kind: output, shape index: {0}]   ;;  %s2914_s21 = inlined_call_operand.hbm [shape: f32[2,8,18], index: 21, kind: output, shape index: {1}]   ;;  %s2915_s22 = inlined_call_operand.hbm [shape: f32[2,16,18], index: 22, kind: output, shape index: {2}]   ;;  %s2916_s23 = inlined_call_operand.vmem [shape: f32[2,32,18], index: 23, kind: output, shape index: {3}]   ;;  %s2917_s24 = inlined_call_operand.vmem [shape: f32[2,64,18], index: 24, kind: output, shape index: {4}]  }
   0x1   :  { %2923 = sst [smem:[#allocation10_spill]] %s2893_s0  ;;  %v30_v0 = vstv %s2912_s19 }
   0x2   :  { %2924 = sst [smem:[#allocation11_spill]] %s2894_s1  ;;  %31 = vst [vmem:[#allocation3] sm:$0x1] %v30_v0 }
   0x3   :  { %2925 = sst [smem:[#allocation12_spill]] %s2895_s2 }
   0x4   :  { %2926 = sst [smem:[#allocation13_spill]] %s2896_s3 }
   0x5   :  { %2927 = sst [smem:[#allocation14_spill]] %s2897_s4 }
   0x6   :  { %2928 = sst [smem:[#allocation15_spill]] %s2898_s5 }
   0x7   :  { %2929 = sst [smem:[#allocation16_spill]] %s2899_s6 }
   0x8   :  { %2930 = sst [smem:[#allocation17_spill]] %s2900_s7 }
   0x9   :  { %2931 = sst [smem:[#allocation18_spill]] %s2901_s8 }
   0xa   :  { %32 = vsyncpa [#allocation5], 0  ;;  %s2932_s6 = sld [smem:[#allocation10_spill]]  ;;  %s1739_s19 = smov 20  }
   0xb   :  { %s2933_s0 = sld [smem:[#allocation11_spill]]  ;;  %s1740_s8 = smov 22  }
  0x10   :  { %v1626_v1 = vld [vmem:[%s2932_s6 + $0x4] sm:$0xf]  ;;  %v99_v4 = vld [vmem:[%s2932_s6] sm:$0xf] }
  0x11   :  { %v1627_v2 = vld [vmem:[%s2933_s0 + $0x4] sm:$0xf]  ;;  %v100_v5 = vld [vmem:[%s2933_s0] sm:$0xf] }
  0x12   :  { %v106_v3 = vadd.f32 %v1627_v2, %v1626_v1  ;;  %v101_v6 = vadd.f32 %v100_v5, %v99_v4 }
  0x14   :  { %135 = vrot.lane.b32.xlu0 %v106_v3, %s1739_s19  ;;  %125 = vrot.lane.b32.xlu2 %v106_v3, %s1740_s8 }
  0x15   :  { %33 = vsyncpa [#allocation7], 0  ;;  %s1741_s4 = smov 1   ;;  %s1742_s1 = smov 2   ;;  %vm118_vm0 = vcmask 142336   ;;  %vm122_vm1 = vcmask 150672  }
  0x16   :  { %113 = vrot.lane.b32.xlu1 %v101_v6, %s1741_s4  ;;  %s1743_s5 = smov 21   ;;  %vm74_vm2 = vcmask 326656   ;;  %v1744_v7 = vmov 0.0   ;;  %s2934_s28 = sld [smem:[#allocation13_spill]]  ;;  %v1745_v9 = vmov 0   ;;  %vm138_vm3 = vcmask 306336  }
  0x17   :  { %77 = vst.msk [vmem:[#allocation2 + $0x10] sm:$0xff] %vm74_vm2, %v1744_v7  ;;  %1683 = vset.pattern.permute.xlu2 %v1745_v9  ;;  %1684 = vset.pattern.permute.xlu0 %v1745_v9  ;;  %s2935_s29 = sld [smem:[#allocation15_spill]]  ;;  %vm142_vm4 = vcmask 314672   ;;  %vm116_vm5 = vcmask 150536   ;;  %vm111_vm6 = vcmask 158736   ;;  %vm133_vm7 = vcmask 314536  }
  0x18   :  { %119 = vst.msk [vmem:[#allocation2 + $0x10] sm:$0xf] %vm118_vm0, %v101_v6  ;;  %1685 = vset.pattern.permute.xlu1 %v1745_v9  ;;  %s2936_s30 = sld [smem:[#allocation17_spill]]  ;;  %vm120_vm8 = vcmask 11272   ;;  %vm128_vm9 = vcmask 322736   ;;  %vm140_vm10 = vcmask 175272  }
  0x19   :  { %123 = vst.msk [vmem:[#allocation2 + $0x10] sm:$0xf] %vm122_vm1, %v1744_v7  ;;  %s2937_s19 = sld [smem:[#allocation12_spill]]  ;;  %vm154_vm11 = vcmask 195584   ;;  %vm187_vm13 = vcmask 154632   ;;  %vm200_vm14 = vcmask 318632  }
  0x1a   :  { %75 = vst.msk [vmem:[#allocation2] sm:$0xff] %vm74_vm2, %v1744_v7  ;;  %s1746_s8 = smov 127   ;;  %vm185_vm15 = vcmask 162832   ;;  %vm194_vm0 = vcmask 15368   ;;  %vm198_vm1 = vcmask 326832   ;;  %s2938_s27 = sld [smem:[#allocation14_spill]] }
  0x1b   :  { %76 = vst.msk [vmem:[#allocation2 + $0x8] sm:$0xff] %vm74_vm2, %v1744_v7  ;;  %v360_v39 = vld [vmem:[%s2902_s9 + $0x8] sm:$0xff]  ;;  %v359_v57 = vld [vmem:[%s2902_s9] sm:$0xff]  ;;  %s1750_s6 = smov 8  }
  0x1c   :  { %108 = vrot.lane.b32.xlu0 %v101_v6, %s1742_s1  ;;  %78 = vst.msk [vmem:[#allocation2 + $0x18] sm:$0xff] %vm74_vm2, %v1744_v7  ;;  %v148_v8 = vld [vmem:[%s2934_s28] sm:$0xff]  ;;  %s1748_s1 = smov [#allocation4]   ;;  %s1749_s28 = smov 128  }
  0x1d   :  { %79 = vst.msk [vmem:[#allocation2 + $0x20] sm:$0xff] %vm74_vm2, %v1744_v7  ;;  %151 = vperm.xlu2 %1683, %v148_v8   ;;  %v212_v10 = vld [vmem:[%s2935_s29] sm:$0xff] }
  0x1e   :  { %130 = vrot.lane.b32.xlu1 %v106_v3, %s1743_s5  ;;  %80 = vst.msk [vmem:[#allocation2 + $0x28] sm:$0xff] %vm74_vm2, %v1744_v7  ;;  %v271_v13 = vld [vmem:[%s2936_s30 + $0x8] sm:$0xff]  ;;  %v270_v36 = vld [vmem:[%s2936_s30] sm:$0xff]  ;;  %s2939_s30 = sld [smem:[#allocation16_spill]] }
  0x1f   :  { %81 = vst.msk [vmem:[#allocation2 + $0x30] sm:$0xff] %vm74_vm2, %v1744_v7  ;;  %v144_v19 = vld [vmem:[%s2937_s19] sm:$0xff] }
  0x20   :  { %82 = vst.msk [vmem:[#allocation2 + $0x38] sm:$0xff] %vm74_vm2, %v1744_v7  ;;  %v208_v31 = vld [vmem:[%s2938_s27] sm:$0xff]  ;;  %s2940_s27 = sld [smem:[#allocation18_spill]] }
  0x21   :  { %83 = vst.msk [vmem:[#allocation2 + $0x40] sm:$0xff] %vm74_vm2, %v1744_v7 }
  0x22   :  { %84 = vst.msk [vmem:[#allocation2 + $0x48] sm:$0xff] %vm74_vm2, %v1744_v7 }
  0x23   :  { %85 = vst.msk [vmem:[#allocation2 + $0x50] sm:$0xff] %vm74_vm2, %v1744_v7 }
  0x24   :  { %86 = vst.msk [vmem:[#allocation2 + $0x58] sm:$0xff] %vm74_vm2, %v1744_v7  ;;  %v265_v43 = vld [vmem:[%s2939_s30] sm:$0xff]  ;;  %v266_v44 = vld [vmem:[%s2939_s30 + $0x8] sm:$0xff] }
  0x25   :  { %87 = vst.msk [vmem:[#allocation2 + $0x60] sm:$0xff] %vm74_vm2, %v1744_v7  ;;  %215 = vperm.xlu2 %1683, %v212_v10  }
  0x26   :  { %88 = vst.msk [vmem:[#allocation2 + $0x68] sm:$0xff] %vm74_vm2, %v1744_v7  ;;  %v351_v2 = vld [vmem:[%s2940_s27] sm:$0xff]  ;;  %v352_v3 = vld [vmem:[%s2940_s27 + $0x8] sm:$0xff]  ;;  %s1586_s27 = sshll.u32 %s2914_s21, 4  ;;  %s1587_s27 = int_to_ptr.hbm [resolvable:$true] %s1586_s27 }
  0x27   :  { %89 = vst.msk [vmem:[#allocation2 + $0x70] sm:$0xff] %vm74_vm2, %v1744_v7 }
  0x28   :  { %90 = vst.msk [vmem:[#allocation2 + $0x78] sm:$0xff] %vm74_vm2, %v1744_v7 }
  0x29   :  { %91 = vst.msk [vmem:[#allocation2 + $0x80] sm:$0xff] %vm74_vm2, %v1744_v7 }
  0x2a   :  { %92 = vst.msk [vmem:[#allocation2 + $0x88] sm:$0xff] %vm74_vm2, %v1744_v7 }
  0x2b   :  { %93 = vst.msk [vmem:[#allocation2 + $0x90] sm:$0xff] %vm74_vm2, %v1744_v7 }
  0x2c   :  { %94 = vst.msk [vmem:[#allocation2 + $0x98] sm:$0xff] %vm74_vm2, %v1744_v7 }
  0x2d   :  { %95 = vst.msk [vmem:[#allocation2 + $0xa0] sm:$0xff] %vm74_vm2, %v1744_v7  ;;  %279 = vperm.xlu2 %1683, %v271_v13   ;;  %v461_v13 = vld [vmem:[%s2904_s11 + $0x18] sm:$0xff] }
  0x2e   :  { %96 = vst.msk [vmem:[#allocation2 + $0xa8] sm:$0xff] %vm74_vm2, %v1744_v7 }
  0x2f   :  { %97 = vst.msk [vmem:[#allocation2 + $0xb0] sm:$0xff] %vm74_vm2, %v1744_v7 }
  0x30   :  { %98 = vst.msk [vmem:[#allocation2 + $0xb8] sm:$0xff] %vm74_vm2, %v1744_v7  ;;  %vm204_vm2 = vcmask 179368  }
  0x6e   :  { %v126_v16 = vpop.permute.xlu2 %125 }
  0x77   :  { %v152_v21 = vpop.permute.xlu2 %151 }
  0x7f   :  { %v216_v32 = vpop.permute.xlu2 %215 }
  0x86   :  { %v136_v11 = vpop.permute.xlu0 %135 }
  0x87   :  { %139 = vst.msk [vmem:[#allocation2 + $0x10] sm:$0xf] %vm138_vm3, %v136_v11  ;;  %vm192_vm3 = vcmask 146432   ;;  %v280_v50 = vpop.permute.xlu2 %279 }
  0x88   :  { %v114_v12 = vpop.permute.xlu1 %113  ;;  %143 = vst.msk [vmem:[#allocation2 + $0x10] sm:$0xf] %vm142_vm4, %v1744_v7  ;;  %vm196_vm4 = vcmask 154768  }
  0x89   :  { %117 = vst.msk [vmem:[#allocation2 + $0x8] sm:$0xf] %vm116_vm5, %v114_v12  ;;  %vm202_vm5 = vcmask 310432  }
  0x8e   :  { %v109_v14 = vpop.permute.xlu0 %108 }
  0x8f   :  { %112 = vst.msk [vmem:[#allocation2] sm:$0xf] %vm111_vm6, %v109_v14  ;;  %v147_v17 = vld [vmem:[#allocation2 + $0x10] sm:$0xff]  ;;  %vm206_vm6 = vcmask 318768  }
  0x90   :  { %v131_v15 = vpop.permute.xlu1 %130  ;;  %171 = vmatpush.msra.mxu0 %v147_v17  ;;  %121 = vst.msk [vmem:[#allocation2] sm:$0xf] %vm120_vm8, %v1744_v7  ;;  %v460_v14 = vld [vmem:[%s2904_s11 + $0x10] sm:$0xff] }
  0x91   :  { %134 = vst.msk [vmem:[#allocation2 + $0x8] sm:$0xf] %vm133_vm7, %v131_v15  ;;  %v458_v15 = vld [vmem:[%s2904_s11] sm:$0xff] }
  0x92   :  { %129 = vst.msk [vmem:[#allocation2] sm:$0xf] %vm128_vm9, %v126_v16  ;;  %vm371_vm9 = vcmask 392192   ;;  %v459_v16 = vld [vmem:[%s2904_s11 + $0x8] sm:$0xff] }
  0x93   :  { %141 = vst.msk [vmem:[#allocation2] sm:$0xf] %vm140_vm10, %v1744_v7 }
  0x98   :  { %v146_v18 = vld [vmem:[#allocation2 + $0x8] sm:$0xff] }
  0x99   :  { %172 = vmatpush.msra.mxu0 %v146_v18 }
  0x9a   :  { %v145_v20 = vld [vmem:[#allocation2] sm:$0xff] }
  0x9b   :  { %173 = vmatpush.msra.mxu0 %v145_v20 }
  0x9c   :  { %1628 = vmatmul.msk.f32.vlgmr.msra.gmra.mxu0 %vm154_vm11, %v144_v19 }
 0x119   :  { %v175_v22 = vpop.f32.mrf.mxu0 }
 0x11a   :  { %v176_v23 = vadd.f32 %v175_v22, %v152_v21 }
 0x11c   :  { %vm178_vm12 = vcmp.gt.f32.partialorder %v176_v23, 0.0  ;;  %v179_v24 = vmul.f32 0.2, %v176_v23 }
 0x11e   :  { %v180_v25 = vsel %vm178_vm12, %v176_v23, %v179_v24 }
 0x11f   :  { %188 = vst.msk [vmem:[#allocation2 + $0x8] sm:$0xff] %vm187_vm13, %v180_v25  ;;  %182 = vrot.lane.b32.xlu1 %v180_v25, %s1741_s4  ;;  %189 = vrot.lane.b32.xlu0 %v180_v25, %s1746_s8 }
 0x120   :  { %201 = vst.msk [vmem:[#allocation2 + $0x8] sm:$0xff] %vm200_vm14, %v180_v25 }
 0x127   :  { %v210_v29 = vld [vmem:[#allocation2 + $0x8] sm:$0xff] }
 0x191   :  { %v183_v26 = vpop.permute.xlu1 %182  ;;  %v190_v27 = vpop.permute.xlu0 %189 }
 0x192   :  { %186 = vst.msk [vmem:[#allocation2] sm:$0xff] %vm185_vm15, %v183_v26 }
 0x193   :  { %195 = vst.msk [vmem:[#allocation2] sm:$0xff] %vm194_vm0, %v1744_v7 }
 0x194   :  { %199 = vst.msk [vmem:[#allocation2] sm:$0xff] %vm198_vm1, %v183_v26 }
 0x195   :  { %205 = vst.msk [vmem:[#allocation2] sm:$0xff] %vm204_vm2, %v1744_v7 }
 0x196   :  { %193 = vst.msk [vmem:[#allocation2 + $0x10] sm:$0xff] %vm192_vm3, %v190_v27 }
 0x197   :  { %197 = vst.msk [vmem:[#allocation2 + $0x10] sm:$0xff] %vm196_vm4, %v1744_v7 }
 0x198   :  { %203 = vst.msk [vmem:[#allocation2 + $0x10] sm:$0xff] %vm202_vm5, %v190_v27  ;;  %v448_v27 = vld [vmem:[%s2903_s10] sm:$0xff] }
 0x199   :  { %207 = vst.msk [vmem:[#allocation2 + $0x10] sm:$0xff] %vm206_vm6, %v1744_v7 }
 0x19c   :  { %v209_v30 = vld [vmem:[#allocation2] sm:$0xff] }
 0x1a0   :  { %v211_v28 = vld [vmem:[#allocation2 + $0x10] sm:$0xff] }
 0x1a1   :  { %234 = vmatpush.msrb.mxu0 %v211_v28  ;;  %v449_v28 = vld [vmem:[%s2903_s10 + $0x8] sm:$0xff] }
 0x1a3   :  { %235 = vmatpush.msrb.mxu0 %v210_v29  ;;  %v450_v29 = vld [vmem:[%s2903_s10 + $0x10] sm:$0xff] }
 0x1a5   :  { %236 = vmatpush.msrb.mxu0 %v209_v30  ;;  %v451_v30 = vld [vmem:[%s2903_s10 + $0x18] sm:$0xff]  ;;  %s1599_s10 = sshll.u32 %s2915_s22, 4  ;;  %s1600_s10 = int_to_ptr.hbm [resolvable:$true] %s1599_s10 }
 0x1a6   :  { %1629 = vmatmul.msk.f32.vlgmr.msrb.gmra.mxu0 %vm154_vm11, %v208_v31 }
 0x223   :  { %v238_v33 = vpop.f32.mrf.mxu0 }
 0x224   :  { %v239_v34 = vadd.f32 %v238_v33, %v216_v32 }
 0x226   :  { %v1979_v35 = vadd.f32 %v239_v34, %v180_v25 }
 0x228   :  { %256 = vst.msk [vmem:[#allocation2 + $0x8] sm:$0xff] %vm187_vm13, %v1979_v35  ;;  %252 = vrot.lane.b32.xlu1 %v1979_v35, %s1741_s4  ;;  %243 = vrot.lane.b32.xlu0 %v1979_v35, %s1746_s8 }
 0x229   :  { %261 = vst.msk [vmem:[#allocation2 + $0x8] sm:$0xff] %vm200_vm14, %v1979_v35 }
 0x230   :  { %274 = vperm.xlu0 %1684, %v270_v36   ;;  %v268_v41 = vld [vmem:[#allocation2 + $0x8] sm:$0xff] }
 0x238   :  { %368 = vperm.xlu0 %1684, %v360_v39  }
 0x29a   :  { %v253_v37 = vpop.permute.xlu1 %252  ;;  %v244_v38 = vpop.permute.xlu0 %243 }
 0x29b   :  { %255 = vst.msk [vmem:[#allocation2] sm:$0xff] %vm185_vm15, %v253_v37 }
 0x29c   :  { %258 = vst.msk [vmem:[#allocation2] sm:$0xff] %vm194_vm0, %v1744_v7 }
 0x29d   :  { %260 = vst.msk [vmem:[#allocation2] sm:$0xff] %vm198_vm1, %v253_v37 }
 0x29e   :  { %263 = vst.msk [vmem:[#allocation2] sm:$0xff] %vm204_vm2, %v1744_v7 }
 0x29f   :  { %246 = vst.msk [vmem:[#allocation4] sm:$0xff] %vm192_vm3, %v244_v38 }
 0x2a0   :  { %257 = vst.msk [vmem:[#allocation2 + $0x10] sm:$0xff] %vm192_vm3, %v244_v38 }
 0x2a1   :  { %259 = vst.msk [vmem:[#allocation2 + $0x10] sm:$0xff] %vm196_vm4, %v1744_v7 }
 0x2a2   :  { %262 = vst.msk [vmem:[#allocation2 + $0x10] sm:$0xff] %vm202_vm5, %v244_v38  ;;  %v275_v45 = vpop.permute.xlu0 %274 }
 0x2a3   :  { %264 = vst.msk [vmem:[#allocation2 + $0x10] sm:$0xff] %vm206_vm6, %v1744_v7 }
 0x2a5   :  { %v267_v42 = vld [vmem:[#allocation2] sm:$0xff] }
 0x2aa   :  { %v269_v40 = vld [vmem:[#allocation2 + $0x10] sm:$0xff]  ;;  %v369_v9 = vpop.permute.xlu0 %368 }
 0x2ab   :  { %301 = vmatpush.msra.mxu2 %v269_v40 }
 0x2ad   :  { %302 = vmatpush.msra.mxu2 %v268_v41 }
 0x2af   :  { %303 = vmatpush.msra.mxu2 %v267_v42 }
 0x2b0   :  { %1630 = vmatmul.msk.f32.vlgmr.msra.gmra.mxu2 %vm154_vm11, %v265_v43 }
 0x2b8   :  { %1631 = vmatmul.msk.f32.gmra.mxu2 %vm154_vm11, %v266_v44 }
 0x333   :  { %v305_v46 = vpop.f32.mrf.mxu2 }
 0x334   :  { %v306_v47 = vadd.f32 %v305_v46, %v275_v45 }
 0x336   :  { %vm311_vm7 = vcmp.gt.f32.partialorder %v306_v47, 0.0  ;;  %v313_v48 = vmul.f32 0.2, %v306_v47 }
 0x338   :  { %v315_v49 = vsel %vm311_vm7, %v306_v47, %v313_v48 }
 0x339   :  { %327 = vst.msk [vmem:[#allocation2 + $0x10] sm:$0xff] %vm187_vm13, %v315_v49  ;;  %329 = vrot.lane.b32.xlu2 %v315_v49, %s1746_s8 }
 0x33a   :  { %343 = vst.msk [vmem:[#allocation2 + $0x10] sm:$0xff] %vm200_vm14, %v315_v49 }
 0x33b   :  { %v308_v51 = vpop.f32.mrf.mxu2 }
 0x33c   :  { %v309_v52 = vadd.f32 %v308_v51, %v280_v50  ;;  %v622_v51 = vld [vmem:[%s2906_s13 + $0x18] sm:$0xff] }
 0x33e   :  { %vm312_vm8 = vcmp.gt.f32.partialorder %v309_v52, 0.0  ;;  %v314_v53 = vmul.f32 0.2, %v309_v52 }
 0x340   :  { %v316_v54 = vsel %vm312_vm8, %v309_v52, %v314_v53  ;;  %v619_v53 = vld [vmem:[%s2906_s13] sm:$0xff]  ;;  %vm643_vm8 = vcmask 785408  }
 0x341   :  { %328 = vst.msk [vmem:[#allocation2 + $0x18] sm:$0xff] %vm187_vm13, %v316_v54  ;;  %331 = vrot.lane.b32.xlu1 %v316_v54, %s1746_s8  ;;  %319 = vrot.lane.b32.xlu2 %v315_v49, %s1741_s4  ;;  %v355_v63 = vld [vmem:[#allocation2 + $0x10] sm:$0xff] }
 0x342   :  { %344 = vst.msk [vmem:[#allocation2 + $0x18] sm:$0xff] %vm200_vm14, %v316_v54 }
 0x349   :  { %321 = vrot.lane.b32.xlu1 %v316_v54, %s1741_s4  ;;  %v356_v62 = vld [vmem:[#allocation2 + $0x18] sm:$0xff] }
 0x351   :  { %363 = vperm.xlu1 %1685, %v359_v57  }
 0x393   :  { %v330_v55 = vpop.permute.xlu2 %329 }
 0x394   :  { %335 = vst.msk [vmem:[#allocation2 + $0x20] sm:$0xff] %vm192_vm3, %v330_v55 }
 0x395   :  { %339 = vst.msk [vmem:[#allocation2 + $0x20] sm:$0xff] %vm196_vm4, %v1744_v7 }
 0x396   :  { %345 = vst.msk [vmem:[#allocation2 + $0x20] sm:$0xff] %vm202_vm5, %v330_v55  ;;  %v621_v55 = vld [vmem:[%s2906_s13 + $0x10] sm:$0xff] }
 0x397   :  { %349 = vst.msk [vmem:[#allocation2 + $0x20] sm:$0xff] %vm206_vm6, %v1744_v7 }
 0x39b   :  { %v320_v56 = vpop.permute.xlu2 %319 }
 0x39c   :  { %325 = vst.msk [vmem:[#allocation2] sm:$0xff] %vm185_vm15, %v320_v56 }
 0x39d   :  { %337 = vst.msk [vmem:[#allocation2] sm:$0xff] %vm194_vm0, %v1744_v7 }
 0x39e   :  { %341 = vst.msk [vmem:[#allocation2] sm:$0xff] %vm198_vm1, %v320_v56  ;;  %v357_v61 = vld [vmem:[#allocation2 + $0x20] sm:$0xff] }
 0x39f   :  { %347 = vst.msk [vmem:[#allocation2] sm:$0xff] %vm204_vm2, %v1744_v7 }
 0x3a6   :  { %v353_v1 = vld [vmem:[#allocation2] sm:$0xff] }
 0x3b3   :  { %v332_v58 = vpop.permute.xlu1 %331 }
 0x3b4   :  { %336 = vst.msk [vmem:[#allocation2 + $0x28] sm:$0xff] %vm192_vm3, %v332_v58 }
 0x3b5   :  { %340 = vst.msk [vmem:[#allocation2 + $0x28] sm:$0xff] %vm196_vm4, %v1744_v7 }
 0x3b6   :  { %346 = vst.msk [vmem:[#allocation2 + $0x28] sm:$0xff] %vm202_vm5, %v332_v58 }
 0x3b7   :  { %350 = vst.msk [vmem:[#allocation2 + $0x28] sm:$0xff] %vm206_vm6, %v1744_v7 }
 0x3bb   :  { %v322_v59 = vpop.permute.xlu1 %321 }
 0x3bc   :  { %326 = vst.msk [vmem:[#allocation2 + $0x8] sm:$0xff] %vm185_vm15, %v322_v59 }
 0x3bd   :  { %338 = vst.msk [vmem:[#allocation2 + $0x8] sm:$0xff] %vm194_vm0, %v1744_v7 }
 0x3be   :  { %342 = vst.msk [vmem:[#allocation2 + $0x8] sm:$0xff] %vm198_vm1, %v322_v59  ;;  %v358_v60 = vld [vmem:[#allocation2 + $0x28] sm:$0xff] }
 0x3bf   :  { %348 = vst.msk [vmem:[#allocation2 + $0x8] sm:$0xff] %vm204_vm2, %v1744_v7  ;;  %388 = vmatpush.msra.mxu1 %v358_v60 }
 0x3c1   :  { %389 = vmatpush.msra.mxu1 %v357_v61 }
 0x3c3   :  { %390 = vmatpush.msra.mxu1 %v356_v62  ;;  %v364_v4 = vpop.permute.xlu1 %363 }
 0x3c5   :  { %391 = vmatpush.msra.mxu1 %v355_v63 }
 0x3c6   :  { %v354_v0 = vld [vmem:[#allocation2 + $0x8] sm:$0xff] }
 0x3c7   :  { %392 = vmatpush.msra.mxu1 %v354_v0 }
 0x3c9   :  { %393 = vmatpush.msra.mxu1 %v353_v1 }
 0x3ca   :  { %1632 = vmatmul.msk.f32.vlgmr.msra.gmra.mxu1 %vm371_vm9, %v351_v2 }
 0x3d2   :  { %1633 = vmatmul.msk.f32.gmra.mxu1 %vm371_vm9, %v352_v3 }
 0x447   :  { %v395_v5 = vpop.f32.mrf.mxu1 }
 0x448   :  { %v396_v6 = vadd.f32 %v395_v5, %v364_v4 }
 0x44a   :  { %v2059_v8 = vadd.f32 %v396_v6, %v315_v49 }
 0x44c   :  { %430 = vst.msk [vmem:[#allocation2 + $0x10] sm:$0xff] %vm187_vm13, %v2059_v8  ;;  %405 = vrot.lane.b32.xlu0 %v2059_v8, %s1746_s8 }
 0x44d   :  { %440 = vst.msk [vmem:[#allocation2 + $0x10] sm:$0xff] %vm200_vm14, %v2059_v8 }
 0x44f   :  { %v398_v10 = vpop.f32.mrf.mxu1 }
 0x450   :  { %v399_v11 = vadd.f32 %v398_v10, %v369_v9 }
 0x452   :  { %v2067_v12 = vadd.f32 %v399_v11, %v316_v54  ;;  %v620_v54 = vld [vmem:[%s2906_s13 + $0x8] sm:$0xff] }
 0x454   :  { %431 = vst.msk [vmem:[#allocation2 + $0x18] sm:$0xff] %vm187_vm13, %v2067_v12  ;;  %424 = vrot.lane.b32.xlu1 %v2067_v12, %s1741_s4  ;;  %407 = vrot.lane.b32.xlu2 %v2067_v12, %s1746_s8  ;;  %v454_v24 = vld [vmem:[#allocation2 + $0x10] sm:$0xff] }
 0x455   :  { %441 = vst.msk [vmem:[#allocation2 + $0x18] sm:$0xff] %vm200_vm14, %v2067_v12  ;;  %479 = vperm.xlu0 %1684, %v461_v13  }
 0x45c   :  { %474 = vperm.xlu1 %1685, %v460_v14   ;;  %422 = vrot.lane.b32.xlu2 %v2059_v8, %s1741_s4  ;;  %v455_v23 = vld [vmem:[#allocation2 + $0x18] sm:$0xff] }
 0x45d   :  { %464 = vperm.xlu0 %1684, %v458_v15   ;;  %v603_v15 = vld [vmem:[%s2905_s12] sm:$0xff] }
 0x464   :  { %469 = vperm.xlu2 %1683, %v459_v16   ;;  %v604_v16 = vld [vmem:[%s2905_s12 + $0x8] sm:$0xff] }
 0x4ae   :  { %v408_v17 = vpop.permute.xlu2 %407 }
 0x4af   :  { %412 = vst.msk [vmem:[#allocation6 + $0x8] sm:$0xff] %vm192_vm3, %v408_v17 }
 0x4b0   :  { %433 = vst.msk [vmem:[#allocation2 + $0x28] sm:$0xff] %vm192_vm3, %v408_v17 }
 0x4b1   :  { %437 = vst.msk [vmem:[#allocation2 + $0x28] sm:$0xff] %vm196_vm4, %v1744_v7 }
 0x4b2   :  { %443 = vst.msk [vmem:[#allocation2 + $0x28] sm:$0xff] %vm202_vm5, %v408_v17  ;;  %v605_v17 = vld [vmem:[%s2905_s12 + $0x10] sm:$0xff] }
 0x4b3   :  { %447 = vst.msk [vmem:[#allocation2 + $0x28] sm:$0xff] %vm206_vm6, %v1744_v7 }
 0x4b6   :  { %v423_v18 = vpop.permute.xlu2 %422 }
 0x4b7   :  { %428 = vst.msk [vmem:[#allocation2] sm:$0xff] %vm185_vm15, %v423_v18 }
 0x4b8   :  { %434 = vst.msk [vmem:[#allocation2] sm:$0xff] %vm194_vm0, %v1744_v7 }
 0x4b9   :  { %438 = vst.msk [vmem:[#allocation2] sm:$0xff] %vm198_vm1, %v423_v18  ;;  %v606_v18 = vld [vmem:[%s2905_s12 + $0x18] sm:$0xff] }
 0x4ba   :  { %444 = vst.msk [vmem:[#allocation2] sm:$0xff] %vm204_vm2, %v1744_v7  ;;  %v457_v19 = vld [vmem:[#allocation2 + $0x28] sm:$0xff] }
 0x4bb   :  { %504 = vmatpush.msrb.mxu1 %v457_v19 }
 0x4be   :  { %v406_v20 = vpop.permute.xlu0 %405  ;;  %v470_v38 = vpop.permute.xlu2 %469 }
 0x4bf   :  { %411 = vst.msk [vmem:[#allocation6] sm:$0xff] %vm192_vm3, %v406_v20 }
 0x4c0   :  { %432 = vst.msk [vmem:[#allocation2 + $0x20] sm:$0xff] %vm192_vm3, %v406_v20 }
 0x4c1   :  { %436 = vst.msk [vmem:[#allocation2 + $0x20] sm:$0xff] %vm196_vm4, %v1744_v7  ;;  %v452_v26 = vld [vmem:[#allocation2] sm:$0xff] }
 0x4c2   :  { %442 = vst.msk [vmem:[#allocation2 + $0x20] sm:$0xff] %vm202_vm5, %v406_v20 }
 0x4c3   :  { %446 = vst.msk [vmem:[#allocation2 + $0x20] sm:$0xff] %vm206_vm6, %v1744_v7 }
 0x4c6   :  { %v425_v21 = vpop.permute.xlu1 %424 }
 0x4c7   :  { %429 = vst.msk [vmem:[#allocation2 + $0x8] sm:$0xff] %vm185_vm15, %v425_v21  ;;  %v480_v31 = vpop.permute.xlu0 %479 }
 0x4c8   :  { %435 = vst.msk [vmem:[#allocation2 + $0x8] sm:$0xff] %vm194_vm0, %v1744_v7 }
 0x4c9   :  { %439 = vst.msk [vmem:[#allocation2 + $0x8] sm:$0xff] %vm198_vm1, %v425_v21 }
 0x4ca   :  { %445 = vst.msk [vmem:[#allocation2 + $0x8] sm:$0xff] %vm204_vm2, %v1744_v7  ;;  %v456_v22 = vld [vmem:[#allocation2 + $0x20] sm:$0xff] }
 0x4cb   :  { %505 = vmatpush.msrb.mxu1 %v456_v22 }
 0x4cd   :  { %506 = vmatpush.msrb.mxu1 %v455_v23 }
 0x4ce   :  { %v475_v43 = vpop.permute.xlu1 %474 }
 0x4cf   :  { %507 = vmatpush.msrb.mxu1 %v454_v24  ;;  %v465_v32 = vpop.permute.xlu0 %464 }
 0x4d1   :  { %v453_v25 = vld [vmem:[#allocation2 + $0x8] sm:$0xff] }
 0x4d2   :  { %508 = vmatpush.msrb.mxu1 %v453_v25 }
 0x4d4   :  { %509 = vmatpush.msrb.mxu1 %v452_v26 }
 0x4d5   :  { %1634 = vmatmul.msk.f32.vlgmr.msrb.gmra.mxu1 %vm371_vm9, %v448_v27 }
 0x4dd   :  { %1635 = vmatmul.msk.f32.gmra.mxu1 %vm371_vm9, %v449_v28 }
 0x4e5   :  { %1636 = vmatmul.msk.f32.gmra.mxu1 %vm371_vm9, %v450_v29 }
 0x4ed   :  { %1637 = vmatmul.msk.f32.gmra.mxu1 %vm371_vm9, %v451_v30 }
 0x552   :  { %v511_v33 = vpop.f32.mrf.mxu1 }
 0x553   :  { %v512_v34 = vadd.f32 %v511_v33, %v465_v32 }
 0x555   :  { %vm523_vm10 = vcmp.gt.f32.partialorder %v512_v34, 0.0  ;;  %v527_v36 = vmul.f32 0.2, %v512_v34 }
 0x557   :  { %v2133_v37 = vsel %vm523_vm10, %v512_v34, %v527_v36  ;;  %v805_v36 = vld [vmem:[%s2908_s15 + $0x38] sm:$0xff] }
 0x558   :  { %555 = vst.msk [vmem:[#allocation2 + $0x20] sm:$0xff] %vm187_vm13, %v2133_v37 }
 0x559   :  { %587 = vst.msk [vmem:[#allocation2 + $0x20] sm:$0xff] %vm200_vm14, %v2133_v37 }
 0x55a   :  { %v514_v39 = vpop.f32.mrf.mxu1 }
 0x55b   :  { %v515_v40 = vadd.f32 %v514_v39, %v470_v38  ;;  %v803_v38 = vld [vmem:[%s2908_s15 + $0x28] sm:$0xff] }
 0x55c   :  { %v799_v39 = vld [vmem:[%s2908_s15 + $0x8] sm:$0xff] }
 0x55d   :  { %vm524_vm11 = vcmp.gt.f32.partialorder %v515_v40, 0.0  ;;  %v528_v41 = vmul.f32 0.2, %v515_v40 }
 0x55f   :  { %v2139_v42 = vsel %vm524_vm11, %v515_v40, %v528_v41  ;;  %v800_v40 = vld [vmem:[%s2908_s15 + $0x10] sm:$0xff] }
 0x560   :  { %556 = vst.msk [vmem:[#allocation2 + $0x28] sm:$0xff] %vm187_vm13, %v2139_v42  ;;  %561 = vrot.lane.b32.xlu0 %v2139_v42, %s1746_s8  ;;  %v611_v9 = vld [vmem:[#allocation2 + $0x20] sm:$0xff]  ;;  %v804_v41 = vld [vmem:[%s2908_s15 + $0x30] sm:$0xff] }
 0x561   :  { %588 = vst.msk [vmem:[#allocation2 + $0x28] sm:$0xff] %vm200_vm14, %v2139_v42 }
 0x562   :  { %v517_v44 = vpop.f32.mrf.mxu1 }
 0x563   :  { %v518_v45 = vadd.f32 %v517_v44, %v475_v43  ;;  %v798_v43 = vld [vmem:[%s2908_s15] sm:$0xff] }
 0x565   :  { %vm525_vm12 = vcmp.gt.f32.partialorder %v518_v45, 0.0  ;;  %v529_v46 = vmul.f32 0.2, %v518_v45 }
 0x567   :  { %v2147_v47 = vsel %vm525_vm12, %v518_v45, %v529_v46 }
 0x568   :  { %557 = vst.msk [vmem:[#allocation2 + $0x30] sm:$0xff] %vm187_vm13, %v2147_v47  ;;  %563 = vrot.lane.b32.xlu2 %v2147_v47, %s1746_s8  ;;  %543 = vrot.lane.b32.xlu0 %v2147_v47, %s1741_s4  ;;  %v612_v6 = vld [vmem:[#allocation2 + $0x28] sm:$0xff] }
 0x569   :  { %589 = vst.msk [vmem:[#allocation2 + $0x30] sm:$0xff] %vm200_vm14, %v2147_v47 }
 0x56a   :  { %v520_v48 = vpop.f32.mrf.mxu1 }
 0x56b   :  { %v521_v49 = vadd.f32 %v520_v48, %v480_v31 }
 0x56d   :  { %vm526_vm7 = vcmp.gt.f32.partialorder %v521_v49, 0.0  ;;  %v530_v50 = vmul.f32 0.2, %v521_v49 }
 0x56f   :  { %v2160_v52 = vsel %vm526_vm7, %v521_v49, %v530_v50 }
 0x570   :  { %558 = vst.msk [vmem:[#allocation2 + $0x38] sm:$0xff] %vm187_vm13, %v2160_v52  ;;  %565 = vrot.lane.b32.xlu1 %v2160_v52, %s1746_s8  ;;  %545 = vrot.lane.b32.xlu2 %v2160_v52, %s1741_s4  ;;  %v613_v5 = vld [vmem:[#allocation2 + $0x30] sm:$0xff] }
 0x571   :  { %590 = vst.msk [vmem:[#allocation2 + $0x38] sm:$0xff] %vm200_vm14, %v2160_v52  ;;  %640 = vperm.xlu0 %1684, %v622_v51  }
 0x578   :  { %539 = vrot.lane.b32.xlu2 %v2133_v37, %s1741_s4  ;;  %559 = vrot.lane.b32.xlu1 %v2133_v37, %s1746_s8  ;;  %v614_v4 = vld [vmem:[#allocation2 + $0x38] sm:$0xff] }
 0x579   :  { %625 = vperm.xlu0 %1684, %v619_v53  }
 0x580   :  { %630 = vperm.xlu2 %1683, %v620_v54   ;;  %541 = vrot.lane.b32.xlu1 %v2139_v42, %s1741_s4 }
 0x588   :  { %635 = vperm.xlu1 %1685, %v621_v55  }
 0x5c2   :  { %v564_v56 = vpop.permute.xlu2 %563 }
 0x5c3   :  { %573 = vst.msk [vmem:[#allocation2 + $0x50] sm:$0xff] %vm192_vm3, %v564_v56 }
 0x5c4   :  { %581 = vst.msk [vmem:[#allocation2 + $0x50] sm:$0xff] %vm196_vm4, %v1744_v7 }
 0x5c5   :  { %593 = vst.msk [vmem:[#allocation2 + $0x50] sm:$0xff] %vm202_vm5, %v564_v56 }
 0x5c6   :  { %601 = vst.msk [vmem:[#allocation2 + $0x50] sm:$0xff] %vm206_vm6, %v1744_v7 }
 0x5ca   :  { %v546_v57 = vpop.permute.xlu2 %545 }
 0x5cb   :  { %554 = vst.msk [vmem:[#allocation2 + $0x18] sm:$0xff] %vm185_vm15, %v546_v57 }
 0x5cc   :  { %578 = vst.msk [vmem:[#allocation2 + $0x18] sm:$0xff] %vm194_vm0, %v1744_v7 }
 0x5cd   :  { %586 = vst.msk [vmem:[#allocation2 + $0x18] sm:$0xff] %vm198_vm1, %v546_v57  ;;  %v617_v0 = vld [vmem:[#allocation2 + $0x50] sm:$0xff] }
 0x5ce   :  { %598 = vst.msk [vmem:[#allocation2 + $0x18] sm:$0xff] %vm204_vm2, %v1744_v7 }
 0x5d2   :  { %v562_v58 = vpop.permute.xlu0 %561  ;;  %v540_v59 = vpop.permute.xlu2 %539 }
 0x5d3   :  { %572 = vst.msk [vmem:[#allocation2 + $0x48] sm:$0xff] %vm192_vm3, %v562_v58 }
 0x5d4   :  { %580 = vst.msk [vmem:[#allocation2 + $0x48] sm:$0xff] %vm196_vm4, %v1744_v7 }
 0x5d5   :  { %592 = vst.msk [vmem:[#allocation2 + $0x48] sm:$0xff] %vm202_vm5, %v562_v58  ;;  %v610_v10 = vld [vmem:[#allocation2 + $0x18] sm:$0xff] }
 0x5d6   :  { %600 = vst.msk [vmem:[#allocation2 + $0x48] sm:$0xff] %vm206_vm6, %v1744_v7 }
 0x5d7   :  { %551 = vst.msk [vmem:[#allocation2] sm:$0xff] %vm185_vm15, %v540_v59 }
 0x5d8   :  { %575 = vst.msk [vmem:[#allocation2] sm:$0xff] %vm194_vm0, %v1744_v7 }
 0x5d9   :  { %583 = vst.msk [vmem:[#allocation2] sm:$0xff] %vm198_vm1, %v540_v59 }
 0x5da   :  { %595 = vst.msk [vmem:[#allocation2] sm:$0xff] %vm204_vm2, %v1744_v7  ;;  %v544_v60 = vpop.permute.xlu0 %543  ;;  %v631_v24 = vpop.permute.xlu2 %630 }
 0x5db   :  { %553 = vst.msk [vmem:[#allocation2 + $0x10] sm:$0xff] %vm185_vm15, %v544_v60 }
 0x5dc   :  { %577 = vst.msk [vmem:[#allocation2 + $0x10] sm:$0xff] %vm194_vm0, %v1744_v7 }
 0x5dd   :  { %585 = vst.msk [vmem:[#allocation2 + $0x10] sm:$0xff] %vm198_vm1, %v544_v60  ;;  %v616_v1 = vld [vmem:[#allocation2 + $0x48] sm:$0xff] }
 0x5de   :  { %597 = vst.msk [vmem:[#allocation2 + $0x10] sm:$0xff] %vm204_vm2, %v1744_v7 }
 0x5e1   :  { %v607_v14 = vld [vmem:[#allocation2] sm:$0xff] }
 0x5e2   :  { %v566_v61 = vpop.permute.xlu1 %565 }
 0x5e3   :  { %574 = vst.msk [vmem:[#allocation2 + $0x58] sm:$0xff] %vm192_vm3, %v566_v61  ;;  %v641_v19 = vpop.permute.xlu0 %640 }
 0x5e4   :  { %582 = vst.msk [vmem:[#allocation2 + $0x58] sm:$0xff] %vm196_vm4, %v1744_v7 }
 0x5e5   :  { %594 = vst.msk [vmem:[#allocation2 + $0x58] sm:$0xff] %vm202_vm5, %v566_v61  ;;  %v609_v11 = vld [vmem:[#allocation2 + $0x10] sm:$0xff] }
 0x5e6   :  { %602 = vst.msk [vmem:[#allocation2 + $0x58] sm:$0xff] %vm206_vm6, %v1744_v7 }
 0x5ea   :  { %v560_v62 = vpop.permute.xlu1 %559 }
 0x5eb   :  { %571 = vst.msk [vmem:[#allocation2 + $0x40] sm:$0xff] %vm192_vm3, %v560_v62  ;;  %v626_v20 = vpop.permute.xlu0 %625 }
 0x5ec   :  { %579 = vst.msk [vmem:[#allocation2 + $0x40] sm:$0xff] %vm196_vm4, %v1744_v7 }
 0x5ed   :  { %591 = vst.msk [vmem:[#allocation2 + $0x40] sm:$0xff] %vm202_vm5, %v560_v62  ;;  %v618_v63 = vld [vmem:[#allocation2 + $0x58] sm:$0xff] }
 0x5ee   :  { %599 = vst.msk [vmem:[#allocation2 + $0x40] sm:$0xff] %vm206_vm6, %v1744_v7  ;;  %660 = vmatpush.msra.mxu1 %v618_v63 }
 0x5f0   :  { %661 = vmatpush.msra.mxu1 %v617_v0  ;;  %v778_v0 = vld [vmem:[%s2907_s14] sm:$0xff] }
 0x5f2   :  { %v542_v2 = vpop.permute.xlu1 %541  ;;  %662 = vmatpush.msra.mxu1 %v616_v1  ;;  %v779_v1 = vld [vmem:[%s2907_s14 + $0x8] sm:$0xff] }
 0x5f3   :  { %552 = vst.msk [vmem:[#allocation2 + $0x8] sm:$0xff] %vm185_vm15, %v542_v2 }
 0x5f4   :  { %576 = vst.msk [vmem:[#allocation2 + $0x8] sm:$0xff] %vm194_vm0, %v1744_v7 }
 0x5f5   :  { %584 = vst.msk [vmem:[#allocation2 + $0x8] sm:$0xff] %vm198_vm1, %v542_v2  ;;  %v615_v3 = vld [vmem:[#allocation2 + $0x40] sm:$0xff]  ;;  %v780_v2 = vld [vmem:[%s2907_s14 + $0x10] sm:$0xff] }
 0x5f6   :  { %596 = vst.msk [vmem:[#allocation2 + $0x8] sm:$0xff] %vm204_vm2, %v1744_v7  ;;  %663 = vmatpush.msra.mxu1 %v615_v3  ;;  %v781_v3 = vld [vmem:[%s2907_s14 + $0x18] sm:$0xff] }
 0x5f8   :  { %664 = vmatpush.msra.mxu1 %v614_v4  ;;  %v782_v4 = vld [vmem:[%s2907_s14 + $0x20] sm:$0xff] }
 0x5fa   :  { %665 = vmatpush.msra.mxu1 %v613_v5  ;;  %v636_v28 = vpop.permute.xlu1 %635  ;;  %v783_v5 = vld [vmem:[%s2907_s14 + $0x28] sm:$0xff] }
 0x5fc   :  { %666 = vmatpush.msra.mxu1 %v612_v6  ;;  %v784_v6 = vld [vmem:[%s2907_s14 + $0x30] sm:$0xff] }
 0x5fd   :  { %v608_v13 = vld [vmem:[#allocation2 + $0x8] sm:$0xff] }
 0x5fe   :  { %667 = vmatpush.msra.mxu1 %v611_v9  ;;  %v785_v9 = vld [vmem:[%s2907_s14 + $0x38] sm:$0xff]  ;;  %s1747_s14 = smov 107  }
 0x600   :  { %668 = vmatpush.msra.mxu1 %v610_v10 }
 0x602   :  { %669 = vmatpush.msra.mxu1 %v609_v11 }
 0x604   :  { %670 = vmatpush.msra.mxu1 %v608_v13 }
 0x606   :  { %671 = vmatpush.msra.mxu1 %v607_v14 }
 0x607   :  { %1638 = vmatmul.msk.f32.vlgmr.msra.gmra.mxu1 %vm643_vm8, %v603_v15 }
 0x60f   :  { %1639 = vmatmul.msk.f32.gmra.mxu1 %vm643_vm8, %v604_v16 }
 0x617   :  { %1640 = vmatmul.msk.f32.gmra.mxu1 %vm643_vm8, %v605_v17 }
 0x61f   :  { %1641 = vmatmul.msk.f32.gmra.mxu1 %vm643_vm8, %v606_v18 }
 0x684   :  { %v673_v21 = vpop.f32.mrf.mxu1 }
 0x685   :  { %v674_v22 = vadd.f32 %v673_v21, %v626_v20 }
 0x687   :  { %v2250_v23 = vadd.f32 %v674_v22, %v2133_v37  ;;  %v802_v37 = vld [vmem:[%s2908_s15 + $0x20] sm:$0xff] }
 0x689   :  { %742 = vst.msk [vmem:[#allocation2 + $0x20] sm:$0xff] %vm187_vm13, %v2250_v23 }
 0x68a   :  { %762 = vst.msk [vmem:[#allocation2 + $0x20] sm:$0xff] %vm200_vm14, %v2250_v23 }
 0x68c   :  { %v676_v25 = vpop.f32.mrf.mxu1 }
 0x68d   :  { %v677_v26 = vadd.f32 %v676_v25, %v631_v24 }
 0x68f   :  { %v2257_v27 = vadd.f32 %v677_v26, %v2139_v42  ;;  %v801_v42 = vld [vmem:[%s2908_s15 + $0x18] sm:$0xff] }
 0x691   :  { %743 = vst.msk [vmem:[#allocation2 + $0x28] sm:$0xff] %vm187_vm13, %v2257_v27  ;;  %695 = vrot.lane.b32.xlu0 %v2257_v27, %s1746_s8  ;;  %v790_v59 = vld [vmem:[#allocation2 + $0x20] sm:$0xff] }
 0x692   :  { %763 = vst.msk [vmem:[#allocation2 + $0x28] sm:$0xff] %vm200_vm14, %v2257_v27 }
 0x694   :  { %v679_v29 = vpop.f32.mrf.mxu1 }
 0x695   :  { %v680_v30 = vadd.f32 %v679_v29, %v636_v28 }
 0x697   :  { %v2266_v31 = vadd.f32 %v680_v30, %v2147_v47 }
 0x699   :  { %744 = vst.msk [vmem:[#allocation2 + $0x30] sm:$0xff] %vm187_vm13, %v2266_v31  ;;  %697 = vrot.lane.b32.xlu2 %v2266_v31, %s1746_s8  ;;  %730 = vrot.lane.b32.xlu0 %v2266_v31, %s1741_s4  ;;  %v791_v58 = vld [vmem:[#allocation2 + $0x28] sm:$0xff] }
 0x69a   :  { %764 = vst.msk [vmem:[#allocation2 + $0x30] sm:$0xff] %vm200_vm14, %v2266_v31 }
 0x69c   :  { %v682_v32 = vpop.f32.mrf.mxu1 }
 0x69d   :  { %v683_v33 = vadd.f32 %v682_v32, %v641_v19 }
 0x69f   :  { %v2277_v34 = vadd.f32 %v683_v33, %v2160_v52 }
 0x6a1   :  { %745 = vst.msk [vmem:[#allocation2 + $0x38] sm:$0xff] %vm187_vm13, %v2277_v34  ;;  %699 = vrot.lane.b32.xlu1 %v2277_v34, %s1746_s8  ;;  %732 = vrot.lane.b32.xlu2 %v2277_v34, %s1741_s4  ;;  %v792_v57 = vld [vmem:[#allocation2 + $0x30] sm:$0xff] }
 0x6a2   :  { %765 = vst.msk [vmem:[#allocation2 + $0x38] sm:$0xff] %vm200_vm14, %v2277_v34  ;;  %843 = vperm.xlu0 %1684, %v805_v36  }
 0x6a9   :  { %726 = vrot.lane.b32.xlu2 %v2250_v23, %s1741_s4  ;;  %693 = vrot.lane.b32.xlu1 %v2250_v23, %s1746_s8  ;;  %v793_v56 = vld [vmem:[#allocation2 + $0x38] sm:$0xff] }
 0x6aa   :  { %828 = vperm.xlu0 %1684, %v802_v37  }
 0x6b1   :  { %833 = vperm.xlu2 %1683, %v803_v38   ;;  %728 = vrot.lane.b32.xlu1 %v2257_v27, %s1741_s4 }
 0x6b2   :  { %813 = vperm.xlu0 %1684, %v799_v39  }
 0x6b9   :  { %818 = vperm.xlu2 %1683, %v800_v40   ;;  %838 = vperm.xlu1 %1685, %v804_v41  }
 0x6c1   :  { %823 = vperm.xlu1 %1685, %v801_v42  }
 0x6c9   :  { %808 = vperm.xlu1 %1685, %v798_v43  }
 0x6f3   :  { %v698_v44 = vpop.permute.xlu2 %697 }
 0x6f4   :  { %707 = vst.msk [vmem:[%s2916_s23 + $0x10] sm:$0xff] %vm192_vm3, %v698_v44 }
 0x6f5   :  { %748 = vst.msk [vmem:[#allocation2 + $0x50] sm:$0xff] %vm192_vm3, %v698_v44 }
 0x6f6   :  { %756 = vst.msk [vmem:[#allocation2 + $0x50] sm:$0xff] %vm196_vm4, %v1744_v7 }
 0x6f7   :  { %768 = vst.msk [vmem:[#allocation2 + $0x50] sm:$0xff] %vm202_vm5, %v698_v44 }
 0x6f8   :  { %776 = vst.msk [vmem:[#allocation2 + $0x50] sm:$0xff] %vm206_vm6, %v1744_v7 }
 0x6fb   :  { %v733_v45 = vpop.permute.xlu2 %732 }
 0x6fc   :  { %741 = vst.msk [vmem:[#allocation2 + $0x18] sm:$0xff] %vm185_vm15, %v733_v45 }
 0x6fd   :  { %753 = vst.msk [vmem:[#allocation2 + $0x18] sm:$0xff] %vm194_vm0, %v1744_v7 }
 0x6fe   :  { %761 = vst.msk [vmem:[#allocation2 + $0x18] sm:$0xff] %vm198_vm1, %v733_v45 }
 0x6ff   :  { %773 = vst.msk [vmem:[#allocation2 + $0x18] sm:$0xff] %vm204_vm2, %v1744_v7  ;;  %v796_v52 = vld [vmem:[#allocation2 + $0x50] sm:$0xff] }
 0x703   :  { %v696_v46 = vpop.permute.xlu0 %695  ;;  %v727_v47 = vpop.permute.xlu2 %726 }
 0x704   :  { %706 = vst.msk [vmem:[%s2916_s23 + $0x8] sm:$0xff] %vm192_vm3, %v696_v46 }
 0x705   :  { %747 = vst.msk [vmem:[#allocation2 + $0x48] sm:$0xff] %vm192_vm3, %v696_v46 }
 0x706   :  { %755 = vst.msk [vmem:[#allocation2 + $0x48] sm:$0xff] %vm196_vm4, %v1744_v7  ;;  %v789_v60 = vld [vmem:[#allocation2 + $0x18] sm:$0xff] }
 0x707   :  { %767 = vst.msk [vmem:[#allocation2 + $0x48] sm:$0xff] %vm202_vm5, %v696_v46 }
 0x708   :  { %775 = vst.msk [vmem:[#allocation2 + $0x48] sm:$0xff] %vm206_vm6, %v1744_v7 }
 0x709   :  { %738 = vst.msk [vmem:[#allocation2] sm:$0xff] %vm185_vm15, %v727_v47 }
 0x70a   :  { %750 = vst.msk [vmem:[#allocation2] sm:$0xff] %vm194_vm0, %v1744_v7 }
 0x70b   :  { %758 = vst.msk [vmem:[#allocation2] sm:$0xff] %vm198_vm1, %v727_v47  ;;  %v731_v48 = vpop.permute.xlu0 %730  ;;  %v834_v20 = vpop.permute.xlu2 %833 }
 0x70c   :  { %770 = vst.msk [vmem:[#allocation2] sm:$0xff] %vm204_vm2, %v1744_v7 }
 0x70d   :  { %740 = vst.msk [vmem:[#allocation2 + $0x10] sm:$0xff] %vm185_vm15, %v731_v48 }
 0x70e   :  { %752 = vst.msk [vmem:[#allocation2 + $0x10] sm:$0xff] %vm194_vm0, %v1744_v7 }
 0x70f   :  { %760 = vst.msk [vmem:[#allocation2 + $0x10] sm:$0xff] %vm198_vm1, %v731_v48  ;;  %v795_v53 = vld [vmem:[#allocation2 + $0x48] sm:$0xff] }
 0x710   :  { %772 = vst.msk [vmem:[#allocation2 + $0x10] sm:$0xff] %vm204_vm2, %v1744_v7 }
 0x713   :  { %v700_v49 = vpop.permute.xlu1 %699  ;;  %v786_v63 = vld [vmem:[#allocation2] sm:$0xff]  ;;  %v819_v28 = vpop.permute.xlu2 %818 }
 0x714   :  { %708 = vst.msk [vmem:[%s2916_s23 + $0x18] sm:$0xff] %vm192_vm3, %v700_v49  ;;  %v2413_v11 = vpop.permute.xlu0 %843 }
 0x715   :  { %749 = vst.msk [vmem:[#allocation2 + $0x58] sm:$0xff] %vm192_vm3, %v700_v49 }
 0x716   :  { %757 = vst.msk [vmem:[#allocation2 + $0x58] sm:$0xff] %vm196_vm4, %v1744_v7 }
 0x717   :  { %769 = vst.msk [vmem:[#allocation2 + $0x58] sm:$0xff] %vm202_vm5, %v700_v49  ;;  %v788_v61 = vld [vmem:[#allocation2 + $0x10] sm:$0xff] }
 0x718   :  { %777 = vst.msk [vmem:[#allocation2 + $0x58] sm:$0xff] %vm206_vm6, %v1744_v7 }
 0x71b   :  { %v694_v50 = vpop.permute.xlu1 %693 }
 0x71c   :  { %705 = vst.msk [vmem:[%s2916_s23] sm:$0xff] %vm192_vm3, %v694_v50  ;;  %v829_v14 = vpop.permute.xlu0 %828 }
 0x71d   :  { %746 = vst.msk [vmem:[#allocation2 + $0x40] sm:$0xff] %vm192_vm3, %v694_v50 }
 0x71e   :  { %754 = vst.msk [vmem:[#allocation2 + $0x40] sm:$0xff] %vm196_vm4, %v1744_v7 }
 0x71f   :  { %766 = vst.msk [vmem:[#allocation2 + $0x40] sm:$0xff] %vm202_vm5, %v694_v50  ;;  %v797_v51 = vld [vmem:[#allocation2 + $0x58] sm:$0xff] }
 0x720   :  { %774 = vst.msk [vmem:[#allocation2 + $0x40] sm:$0xff] %vm206_vm6, %v1744_v7  ;;  %874 = vmatpush.msrb.mxu2 %v797_v51 }
 0x722   :  { %875 = vmatpush.msrb.mxu2 %v796_v52 }
 0x723   :  { %v729_v54 = vpop.permute.xlu1 %728 }
 0x724   :  { %739 = vst.msk [vmem:[#allocation2 + $0x8] sm:$0xff] %vm185_vm15, %v729_v54  ;;  %876 = vmatpush.msrb.mxu2 %v795_v53  ;;  %v814_v21 = vpop.permute.xlu0 %813 }
 0x725   :  { %751 = vst.msk [vmem:[#allocation2 + $0x8] sm:$0xff] %vm194_vm0, %v1744_v7 }
 0x726   :  { %759 = vst.msk [vmem:[#allocation2 + $0x8] sm:$0xff] %vm198_vm1, %v729_v54 }
 0x727   :  { %771 = vst.msk [vmem:[#allocation2 + $0x8] sm:$0xff] %vm204_vm2, %v1744_v7  ;;  %v794_v55 = vld [vmem:[#allocation2 + $0x40] sm:$0xff] }
 0x728   :  { %877 = vmatpush.msrb.mxu2 %v794_v55 }
 0x72a   :  { %878 = vmatpush.msrb.mxu2 %v793_v56 }
 0x72b   :  { %v839_v10 = vpop.permute.xlu1 %838 }
 0x72c   :  { %879 = vmatpush.msrb.mxu2 %v792_v57 }
 0x72e   :  { %880 = vmatpush.msrb.mxu2 %v791_v58  ;;  %v787_v62 = vld [vmem:[#allocation2 + $0x8] sm:$0xff] }
 0x730   :  { %881 = vmatpush.msrb.mxu2 %v790_v59 }
 0x732   :  { %882 = vmatpush.msrb.mxu2 %v789_v60 }
 0x733   :  { %v824_v13 = vpop.permute.xlu1 %823 }
 0x734   :  { %883 = vmatpush.msrb.mxu2 %v788_v61 }
 0x736   :  { %884 = vmatpush.msrb.mxu2 %v787_v62 }
 0x738   :  { %885 = vmatpush.msrb.mxu2 %v786_v63 }
 0x739   :  { %1646 = vmatmul.msk.f32.vlgmr.msrb.gmra.mxu2 %vm643_vm8, %v778_v0  ;;  %v1111_v0 = vld [vmem:[%s2910_s17] sm:$0xff] }
 0x73b   :  { %v809_v15 = vpop.permute.xlu1 %808 }
 0x741   :  { %1647 = vmatmul.msk.f32.gmra.mxu2 %vm643_vm8, %v779_v1  ;;  %v1118_v1 = vld [vmem:[%s2910_s17 + $0x38] sm:$0xff] }
 0x749   :  { %1648 = vmatmul.msk.f32.gmra.mxu2 %vm643_vm8, %v780_v2 }
 0x751   :  { %1649 = vmatmul.msk.f32.gmra.mxu2 %vm643_vm8, %v781_v3 }
 0x759   :  { %1650 = vmatmul.msk.f32.gmra.mxu2 %vm643_vm8, %v782_v4 }
 0x761   :  { %1651 = vmatmul.msk.f32.gmra.mxu2 %vm643_vm8, %v783_v5 }
 0x769   :  { %1652 = vmatmul.msk.f32.gmra.mxu2 %vm643_vm8, %v784_v6 }
 0x771   :  { %1653 = vmatmul.msk.f32.gmra.mxu2 %vm643_vm8, %v785_v9 }
 0x7bc   :  { %v887_v16 = vpop.f32.mrf.mxu2 }
 0x7bd   :  { %v888_v17 = vadd.f32 %v887_v16, %v809_v15 }
 0x7bf   :  { %vm911_vm9 = vcmp.gt.f32.partialorder %v888_v17, 0.0  ;;  %v919_v18 = vmul.f32 0.2, %v888_v17 }
 0x7c1   :  { %v2415_v19 = vsel %vm911_vm9, %v888_v17, %v919_v18 }
 0x7c2   :  { %975 = vst.msk [vmem:[#allocation2 + $0x40] sm:$0xff] %vm187_vm13, %v2415_v19 }
 0x7c3   :  { %1039 = vst.msk [vmem:[#allocation2 + $0x40] sm:$0xff] %vm200_vm14, %v2415_v19 }
 0x7c4   :  { %v890_v22 = vpop.f32.mrf.mxu2 }
 0x7c5   :  { %v891_v24 = vadd.f32 %v890_v22, %v814_v21 }
 0x7c7   :  { %vm912_vm10 = vcmp.gt.f32.partialorder %v891_v24, 0.0  ;;  %v920_v25 = vmul.f32 0.2, %v891_v24 }
 0x7c9   :  { %v2421_v26 = vsel %vm912_vm10, %v891_v24, %v920_v25 }
 0x7ca   :  { %976 = vst.msk [vmem:[#allocation2 + $0x48] sm:$0xff] %vm187_vm13, %v2421_v26  ;;  %945 = vrot.lane.b32.xlu1 %v2421_v26, %s1741_s4  ;;  %v1095_v63 = vld [vmem:[#allocation2 + $0x40] sm:$0xff] }
 0x7cb   :  { %1040 = vst.msk [vmem:[#allocation2 + $0x48] sm:$0xff] %vm200_vm14, %v2421_v26 }
 0x7cc   :  { %v893_v29 = vpop.f32.mrf.mxu2 }
 0x7cd   :  { %v894_v30 = vadd.f32 %v893_v29, %v819_v28 }
 0x7cf   :  { %vm913_vm11 = vcmp.gt.f32.partialorder %v894_v30, 0.0  ;;  %v921_v32 = vmul.f32 0.2, %v894_v30 }
 0x7d1   :  { %v2429_v33 = vsel %vm913_vm11, %v894_v30, %v921_v32  ;;  %v2612_v30 = vld [vmem:[%s2911_s18] sm:$0xff]  ;;  %v1349_v32 = vld [vmem:[%s2911_s18 + $0x10] sm:$0xff] }
 0x7d2   :  { %977 = vst.msk [vmem:[#allocation2 + $0x50] sm:$0xff] %vm187_vm13, %v2429_v33  ;;  %947 = vrot.lane.b32.xlu2 %v2429_v33, %s1741_s4  ;;  %v1096_v62 = vld [vmem:[#allocation2 + $0x48] sm:$0xff] }
 0x7d3   :  { %1041 = vst.msk [vmem:[#allocation2 + $0x50] sm:$0xff] %vm200_vm14, %v2429_v33 }
 0x7d4   :  { %v896_v36 = vpop.f32.mrf.mxu2 }
 0x7d5   :  { %v897_v37 = vadd.f32 %v896_v36, %v824_v13 }
 0x7d7   :  { %vm914_vm12 = vcmp.gt.f32.partialorder %v897_v37, 0.0  ;;  %v922_v38 = vmul.f32 0.2, %v897_v37 }
 0x7d9   :  { %v2437_v39 = vsel %vm914_vm12, %v897_v37, %v922_v38 }
 0x7da   :  { %978 = vst.msk [vmem:[#allocation2 + $0x58] sm:$0xff] %vm187_vm13, %v2437_v39  ;;  %949 = vrot.lane.b32.xlu0 %v2437_v39, %s1741_s4  ;;  %v1097_v61 = vld [vmem:[#allocation2 + $0x50] sm:$0xff] }
 0x7db   :  { %1042 = vst.msk [vmem:[#allocation2 + $0x58] sm:$0xff] %vm200_vm14, %v2437_v39 }
 0x7dc   :  { %v899_v40 = vpop.f32.mrf.mxu2 }
 0x7dd   :  { %v900_v41 = vadd.f32 %v899_v40, %v829_v14 }
 0x7df   :  { %vm915_vm7 = vcmp.gt.f32.partialorder %v900_v41, 0.0  ;;  %v923_v42 = vmul.f32 0.2, %v900_v41 }
 0x7e1   :  { %v2445_v43 = vsel %vm915_vm7, %v900_v41, %v923_v42  ;;  %v1350_v42 = vld [vmem:[%s2911_s18 + $0x18] sm:$0xff] }
 0x7e2   :  { %979 = vst.msk [vmem:[#allocation2 + $0x60] sm:$0xff] %vm187_vm13, %v2445_v43  ;;  %951 = vrot.lane.b32.xlu2 %v2445_v43, %s1741_s4  ;;  %v1098_v60 = vld [vmem:[#allocation2 + $0x58] sm:$0xff] }
 0x7e3   :  { %1043 = vst.msk [vmem:[#allocation2 + $0x60] sm:$0xff] %vm200_vm14, %v2445_v43 }
 0x7e4   :  { %v902_v44 = vpop.f32.mrf.mxu2 }
 0x7e5   :  { %v903_v45 = vadd.f32 %v902_v44, %v834_v20  ;;  %v1352_v44 = vld [vmem:[%s2911_s18 + $0x28] sm:$0xff] }
 0x7e7   :  { %vm916_vm8 = vcmp.gt.f32.partialorder %v903_v45, 0.0  ;;  %v924_v46 = vmul.f32 0.2, %v903_v45 }
 0x7e9   :  { %v2453_v47 = vsel %vm916_vm8, %v903_v45, %v924_v46 }
 0x7ea   :  { %980 = vst.msk [vmem:[#allocation2 + $0x68] sm:$0xff] %vm187_vm13, %v2453_v47  ;;  %953 = vrot.lane.b32.xlu1 %v2453_v47, %s1741_s4  ;;  %v1099_v59 = vld [vmem:[#allocation2 + $0x60] sm:$0xff] }
 0x7eb   :  { %1044 = vst.msk [vmem:[#allocation2 + $0x68] sm:$0xff] %vm200_vm14, %v2453_v47 }
 0x7ec   :  { %v905_v48 = vpop.f32.mrf.mxu2 }
 0x7ed   :  { %v906_v49 = vadd.f32 %v905_v48, %v839_v10 }
 0x7ef   :  { %vm917_vm9 = vcmp.gt.f32.partialorder %v906_v49, 0.0  ;;  %v925_v50 = vmul.f32 0.2, %v906_v49 }
 0x7f1   :  { %v2461_v51 = vsel %vm917_vm9, %v906_v49, %v925_v50 }
 0x7f2   :  { %981 = vst.msk [vmem:[#allocation2 + $0x70] sm:$0xff] %vm187_vm13, %v2461_v51  ;;  %955 = vrot.lane.b32.xlu0 %v2461_v51, %s1741_s4  ;;  %v1100_v58 = vld [vmem:[#allocation2 + $0x68] sm:$0xff] }
 0x7f3   :  { %1045 = vst.msk [vmem:[#allocation2 + $0x70] sm:$0xff] %vm200_vm14, %v2461_v51 }
 0x7f4   :  { %v908_v52 = vpop.f32.mrf.mxu2 }
 0x7f5   :  { %v909_v53 = vadd.f32 %v908_v52, %v2413_v11  ;;  %v1071_v52 = vld [vmem:[%s2909_s16] sm:$0xff] }
 0x7f7   :  { %vm918_vm10 = vcmp.gt.f32.partialorder %v909_v53, 0.0  ;;  %v926_v54 = vmul.f32 0.2, %v909_v53 }
 0x7f9   :  { %v2470_v55 = vsel %vm918_vm10, %v909_v53, %v926_v54  ;;  %v1353_v54 = vld [vmem:[%s2911_s18 + $0x30] sm:$0xff] }
 0x7fa   :  { %982 = vst.msk [vmem:[#allocation2 + $0x78] sm:$0xff] %vm187_vm13, %v2470_v55  ;;  %995 = vrot.lane.b32.xlu0 %v2461_v51, %s1746_s8  ;;  %957 = vrot.lane.b32.xlu2 %v2470_v55, %s1741_s4  ;;  %v1101_v57 = vld [vmem:[#allocation2 + $0x70] sm:$0xff]  ;;  %vm1159_vm13 = vcmask 523264  }
 0x7fb   :  { %1046 = vst.msk [vmem:[#allocation2 + $0x78] sm:$0xff] %vm200_vm14, %v2470_v55  ;;  %997 = vrot.lane.b32.xlu1 %v2470_v55, %s1746_s8 }
 0x802   :  { %993 = vrot.lane.b32.xlu2 %v2453_v47, %s1746_s8  ;;  %943 = vrot.lane.b32.xlu0 %v2415_v19, %s1741_s4  ;;  %v1102_v56 = vld [vmem:[#allocation2 + $0x78] sm:$0xff] }
 0x803   :  { %991 = vrot.lane.b32.xlu1 %v2445_v43, %s1746_s8  ;;  %1184 = vmatpush.msra.mxu3 %v1102_v56  ;;  %v1348_v56 = vld [vmem:[%s2911_s18 + $0x8] sm:$0xff] }
 0x805   :  { %1185 = vmatpush.msra.mxu3 %v1101_v57 }
 0x807   :  { %1186 = vmatpush.msra.mxu3 %v1100_v58  ;;  %v1073_v58 = vld [vmem:[%s2909_s16 + $0x10] sm:$0xff] }
 0x809   :  { %1187 = vmatpush.msra.mxu3 %v1099_v59 }
 0x80a   :  { %989 = vrot.lane.b32.xlu2 %v2437_v39, %s1746_s8  ;;  %987 = vrot.lane.b32.xlu0 %v2429_v33, %s1746_s8 }
 0x80b   :  { %985 = vrot.lane.b32.xlu1 %v2421_v26, %s1746_s8  ;;  %1188 = vmatpush.msra.mxu3 %v1098_v60 }
 0x80d   :  { %1189 = vmatpush.msra.mxu3 %v1097_v61  ;;  %v1351_v61 = vld [vmem:[%s2911_s18 + $0x20] sm:$0xff] }
 0x80f   :  { %1190 = vmatpush.msra.mxu3 %v1096_v62 }
 0x811   :  { %1191 = vmatpush.msra.mxu3 %v1095_v63  ;;  %v1072_v63 = vld [vmem:[%s2909_s16 + $0x8] sm:$0xff] }
 0x812   :  { %983 = vrot.lane.b32.xlu2 %v2415_v19, %s1746_s8  ;;  %247 = vrot.lane.b32.xlu0 %v1979_v35, %s1747_s14  ;;  %v1112_v35 = vld [vmem:[%s2910_s17 + $0x8] sm:$0xff] }
 0x813   :  { %413 = vrot.lane.b32.xlu1 %v2059_v8, %s1747_s14  ;;  %v1113_v8 = vld [vmem:[%s2910_s17 + $0x10] sm:$0xff] }
 0x81a   :  { %415 = vrot.lane.b32.xlu2 %v2067_v12, %s1747_s14  ;;  %709 = vrot.lane.b32.xlu0 %v2250_v23, %s1747_s14  ;;  %v1114_v12 = vld [vmem:[%s2910_s17 + $0x18] sm:$0xff] }
 0x81b   :  { %711 = vrot.lane.b32.xlu1 %v2257_v27, %s1747_s14  ;;  %v1115_v27 = vld [vmem:[%s2910_s17 + $0x20] sm:$0xff] }
 0x822   :  { %713 = vrot.lane.b32.xlu2 %v2266_v31, %s1747_s14  ;;  %715 = vrot.lane.b32.xlu0 %v2277_v34, %s1747_s14  ;;  %v1116_v31 = vld [vmem:[%s2910_s17 + $0x28] sm:$0xff]  ;;  %v1117_v34 = vld [vmem:[%s2910_s17 + $0x30] sm:$0xff]  ;;  %s1751_s17 = smov [#allocation6]  }
 0x823   :  { %1121 = vperm.xlu1 %1685, %v1111_v0   ;;  %s1597_s15 = sshll.u32 %s1751_s17, 4  ;;  %s1598_s15 = int_to_ptr.vmem [resolvable:$true] %s1597_s15 }
 0x82a   :  { %1126 = vperm.xlu2 %1683, %v1112_v35   ;;  %1131 = vperm.xlu0 %1684, %v1113_v8   ;;  %v1075_v35 = vld [vmem:[%s2909_s16 + $0x20] sm:$0xff]  ;;  %v1074_v8 = vld [vmem:[%s2909_s16 + $0x18] sm:$0xff] }
 0x82b   :  { %1136 = vperm.xlu1 %1685, %v1114_v12   ;;  %v1077_v12 = vld [vmem:[%s2909_s16 + $0x30] sm:$0xff] }
 0x82c   :  { %v948_v23 = vpop.permute.xlu2 %947 }
 0x82d   :  { %969 = vst.msk [vmem:[#allocation2 + $0x10] sm:$0xff] %vm185_vm15, %v948_v23 }
 0x82e   :  { %1017 = vst.msk [vmem:[#allocation2 + $0x10] sm:$0xff] %vm194_vm0, %v1744_v7 }
 0x82f   :  { %1033 = vst.msk [vmem:[#allocation2 + $0x10] sm:$0xff] %vm198_vm1, %v948_v23  ;;  %v1076_v23 = vld [vmem:[%s2909_s16 + $0x28] sm:$0xff] }
 0x830   :  { %1057 = vst.msk [vmem:[#allocation2 + $0x10] sm:$0xff] %vm204_vm2, %v1744_v7 }
 0x832   :  { %1141 = vperm.xlu2 %1683, %v1115_v27   ;;  %1146 = vperm.xlu0 %1684, %v1116_v31   ;;  %v1079_v27 = vld [vmem:[%s2909_s16 + $0x40] sm:$0xff]  ;;  %v1078_v31 = vld [vmem:[%s2909_s16 + $0x38] sm:$0xff] }
 0x833   :  { %1151 = vperm.xlu1 %1685, %v1117_v34   ;;  %v1081_v34 = vld [vmem:[%s2909_s16 + $0x50] sm:$0xff] }
 0x837   :  { %v1089_v25 = vld [vmem:[#allocation2 + $0x10] sm:$0xff] }
 0x83a   :  { %1156 = vperm.xlu2 %1683, %v1118_v1   ;;  %1369 = vrot.lane.b32.xlu0 %v1349_v32, %s1741_s4  ;;  %v1354_v1 = vld [vmem:[%s2911_s18 + $0x38] sm:$0xff] }
 0x83b   :  { %1365 = vrot.lane.b32.xlu1 %v2612_v30, %s1741_s4 }
 0x83c   :  { %v952_v2 = vpop.permute.xlu2 %951  ;;  %v946_v3 = vpop.permute.xlu1 %945 }
 0x83d   :  { %971 = vst.msk [vmem:[#allocation2 + $0x20] sm:$0xff] %vm185_vm15, %v952_v2 }
 0x83e   :  { %1019 = vst.msk [vmem:[#allocation2 + $0x20] sm:$0xff] %vm194_vm0, %v1744_v7 }
 0x83f   :  { %1035 = vst.msk [vmem:[#allocation2 + $0x20] sm:$0xff] %vm198_vm1, %v952_v2  ;;  %v1080_v2 = vld [vmem:[%s2909_s16 + $0x48] sm:$0xff] }
 0x840   :  { %1059 = vst.msk [vmem:[#allocation2 + $0x20] sm:$0xff] %vm204_vm2, %v1744_v7 }
 0x841   :  { %968 = vst.msk [vmem:[#allocation2 + $0x8] sm:$0xff] %vm185_vm15, %v946_v3 }
 0x842   :  { %1016 = vst.msk [vmem:[#allocation2 + $0x8] sm:$0xff] %vm194_vm0, %v1744_v7  ;;  %1375 = vrot.lane.b32.xlu0 %v1352_v44, %s1741_s4  ;;  %1367 = vrot.lane.b32.xlu2 %v1348_v56, %s1741_s4 }
 0x843   :  { %1032 = vst.msk [vmem:[#allocation2 + $0x8] sm:$0xff] %vm198_vm1, %v946_v3  ;;  %1371 = vrot.lane.b32.xlu1 %v1350_v42, %s1741_s4  ;;  %v1083_v3 = vld [vmem:[%s2909_s16 + $0x60] sm:$0xff] }
 0x844   :  { %1056 = vst.msk [vmem:[#allocation2 + $0x8] sm:$0xff] %vm204_vm2, %v1744_v7 }
 0x847   :  { %v1091_v20 = vld [vmem:[#allocation2 + $0x20] sm:$0xff] }
 0x84a   :  { %1470 = vrot.lane.b32.xlu0 %v1348_v56, %s1743_s5  ;;  %1373 = vrot.lane.b32.xlu2 %v1351_v61, %s1741_s4 }
 0x84b   :  { %v1088_v28 = vld [vmem:[#allocation2 + $0x8] sm:$0xff]  ;;  %1377 = vrot.lane.b32.xlu1 %v1353_v54, %s1741_s4 }
 0x84c   :  { %v950_v4 = vpop.permute.xlu0 %949 }
 0x84d   :  { %970 = vst.msk [vmem:[#allocation2 + $0x18] sm:$0xff] %vm185_vm15, %v950_v4 }
 0x84e   :  { %1018 = vst.msk [vmem:[#allocation2 + $0x18] sm:$0xff] %vm194_vm0, %v1744_v7 }
 0x84f   :  { %1034 = vst.msk [vmem:[#allocation2 + $0x18] sm:$0xff] %vm198_vm1, %v950_v4  ;;  %v1082_v4 = vld [vmem:[%s2909_s16 + $0x58] sm:$0xff] }
 0x850   :  { %1058 = vst.msk [vmem:[#allocation2 + $0x18] sm:$0xff] %vm204_vm2, %v1744_v7 }
 0x852   :  { %1476 = vrot.lane.b32.xlu0 %v1351_v61, %s1743_s5  ;;  %1468 = vrot.lane.b32.xlu2 %v2612_v30, %s1743_s5 }
 0x853   :  { %1472 = vrot.lane.b32.xlu1 %v1349_v32, %s1743_s5 }
 0x854   :  { %v958_v5 = vpop.permute.xlu2 %957 }
 0x855   :  { %974 = vst.msk [vmem:[#allocation2 + $0x38] sm:$0xff] %vm185_vm15, %v958_v5 }
 0x856   :  { %1022 = vst.msk [vmem:[#allocation2 + $0x38] sm:$0xff] %vm194_vm0, %v1744_v7 }
 0x857   :  { %1038 = vst.msk [vmem:[#allocation2 + $0x38] sm:$0xff] %vm198_vm1, %v958_v5  ;;  %v1090_v21 = vld [vmem:[#allocation2 + $0x18] sm:$0xff]  ;;  %v1085_v5 = vld [vmem:[%s2909_s16 + $0x70] sm:$0xff] }
 0x858   :  { %1062 = vst.msk [vmem:[#allocation2 + $0x38] sm:$0xff] %vm204_vm2, %v1744_v7 }
 0x85a   :  { %1474 = vrot.lane.b32.xlu2 %v1350_v42, %s1743_s5  ;;  %1379 = vrot.lane.b32.xlu0 %v1354_v1, %s1741_s4 }
 0x85b   :  { %1478 = vrot.lane.b32.xlu1 %v1352_v44, %s1743_s5 }
 0x85c   :  { %v994_v6 = vpop.permute.xlu2 %993  ;;  %v954_v9 = vpop.permute.xlu1 %953 }
 0x85d   :  { %1012 = vst.msk [vmem:[#allocation2 + $0xa8] sm:$0xff] %vm192_vm3, %v994_v6 }
 0x85e   :  { %1028 = vst.msk [vmem:[#allocation2 + $0xa8] sm:$0xff] %vm196_vm4, %v1744_v7 }
 0x85f   :  { %1052 = vst.msk [vmem:[#allocation2 + $0xa8] sm:$0xff] %vm202_vm5, %v994_v6  ;;  %v1094_v10 = vld [vmem:[#allocation2 + $0x38] sm:$0xff]  ;;  %v1084_v6 = vld [vmem:[%s2909_s16 + $0x68] sm:$0xff] }
 0x860   :  { %1068 = vst.msk [vmem:[#allocation2 + $0xa8] sm:$0xff] %vm206_vm6, %v1744_v7  ;;  %1192 = vmatpush.msra.mxu3 %v1094_v10 }
 0x861   :  { %972 = vst.msk [vmem:[#allocation2 + $0x28] sm:$0xff] %vm185_vm15, %v954_v9 }
 0x862   :  { %1020 = vst.msk [vmem:[#allocation2 + $0x28] sm:$0xff] %vm194_vm0, %v1744_v7  ;;  %1480 = vrot.lane.b32.xlu2 %v1353_v54, %s1743_s5 }
 0x863   :  { %1036 = vst.msk [vmem:[#allocation2 + $0x28] sm:$0xff] %vm198_vm1, %v954_v9  ;;  %1482 = vrot.lane.b32.xlu1 %v1354_v1, %s1743_s5  ;;  %v1086_v9 = vld [vmem:[%s2909_s16 + $0x78] sm:$0xff] }
 0x864   :  { %1060 = vst.msk [vmem:[#allocation2 + $0x28] sm:$0xff] %vm204_vm2, %v1744_v7  ;;  %v956_v11 = vpop.permute.xlu0 %955  ;;  %v990_v13 = vpop.permute.xlu2 %989 }
 0x865   :  { %973 = vst.msk [vmem:[#allocation2 + $0x30] sm:$0xff] %vm185_vm15, %v956_v11 }
 0x866   :  { %1021 = vst.msk [vmem:[#allocation2 + $0x30] sm:$0xff] %vm194_vm0, %v1744_v7 }
 0x867   :  { %1037 = vst.msk [vmem:[#allocation2 + $0x30] sm:$0xff] %vm198_vm1, %v956_v11  ;;  %v1108_v41 = vld [vmem:[#allocation2 + $0xa8] sm:$0xff] }
 0x868   :  { %1061 = vst.msk [vmem:[#allocation2 + $0x30] sm:$0xff] %vm204_vm2, %v1744_v7 }
 0x869   :  { %1010 = vst.msk [vmem:[#allocation2 + $0x98] sm:$0xff] %vm192_vm3, %v990_v13 }
 0x86a   :  { %1026 = vst.msk [vmem:[#allocation2 + $0x98] sm:$0xff] %vm196_vm4, %v1744_v7 }
 0x86b   :  { %1050 = vst.msk [vmem:[#allocation2 + $0x98] sm:$0xff] %vm202_vm5, %v990_v13  ;;  %v1092_v18 = vld [vmem:[#allocation2 + $0x28] sm:$0xff] }
 0x86c   :  { %1066 = vst.msk [vmem:[#allocation2 + $0x98] sm:$0xff] %vm206_vm6, %v1744_v7  ;;  %v996_v14 = vpop.permute.xlu0 %995  ;;  %v984_v16 = vpop.permute.xlu2 %983 }
 0x86d   :  { %1013 = vst.msk [vmem:[#allocation2 + $0xb0] sm:$0xff] %vm192_vm3, %v996_v14  ;;  %v998_v15 = vpop.permute.xlu1 %997 }
 0x86e   :  { %1029 = vst.msk [vmem:[#allocation2 + $0xb0] sm:$0xff] %vm196_vm4, %v1744_v7 }
 0x86f   :  { %1053 = vst.msk [vmem:[#allocation2 + $0xb0] sm:$0xff] %vm202_vm5, %v996_v14  ;;  %v1093_v17 = vld [vmem:[#allocation2 + $0x30] sm:$0xff] }
 0x870   :  { %1069 = vst.msk [vmem:[#allocation2 + $0xb0] sm:$0xff] %vm206_vm6, %v1744_v7  ;;  %1193 = vmatpush.msra.mxu3 %v1093_v17 }
 0x871   :  { %1014 = vst.msk [vmem:[#allocation2 + $0xb8] sm:$0xff] %vm192_vm3, %v998_v15 }
 0x872   :  { %1030 = vst.msk [vmem:[#allocation2 + $0xb8] sm:$0xff] %vm196_vm4, %v1744_v7  ;;  %1194 = vmatpush.msra.mxu3 %v1092_v18 }
 0x873   :  { %1054 = vst.msk [vmem:[#allocation2 + $0xb8] sm:$0xff] %vm202_vm5, %v998_v15  ;;  %v1106_v48 = vld [vmem:[#allocation2 + $0x98] sm:$0xff] }
 0x874   :  { %1070 = vst.msk [vmem:[#allocation2 + $0xb8] sm:$0xff] %vm206_vm6, %v1744_v7  ;;  %v944_v22 = vpop.permute.xlu0 %943  ;;  %1195 = vmatpush.msra.mxu3 %v1091_v20  ;;  %v416_v29 = vpop.permute.xlu2 %415 }
 0x875   :  { %1007 = vst.msk [vmem:[#allocation2 + $0x80] sm:$0xff] %vm192_vm3, %v984_v16  ;;  %v992_v24 = vpop.permute.xlu1 %991 }
 0x876   :  { %1023 = vst.msk [vmem:[#allocation2 + $0x80] sm:$0xff] %vm196_vm4, %v1744_v7  ;;  %1196 = vmatpush.msra.mxu3 %v1090_v21 }
 0x877   :  { %1047 = vst.msk [vmem:[#allocation2 + $0x80] sm:$0xff] %vm202_vm5, %v984_v16  ;;  %v1109_v37 = vld [vmem:[#allocation2 + $0xb0] sm:$0xff] }
 0x878   :  { %1063 = vst.msk [vmem:[#allocation2 + $0x80] sm:$0xff] %vm206_vm6, %v1744_v7  ;;  %1197 = vmatpush.msra.mxu3 %v1089_v25 }
 0x879   :  { %1011 = vst.msk [vmem:[#allocation2 + $0xa0] sm:$0xff] %vm192_vm3, %v992_v24 }
 0x87a   :  { %1027 = vst.msk [vmem:[#allocation2 + $0xa0] sm:$0xff] %vm196_vm4, %v1744_v7  ;;  %1198 = vmatpush.msra.mxu3 %v1088_v28 }
 0x87b   :  { %1051 = vst.msk [vmem:[#allocation2 + $0xa0] sm:$0xff] %vm202_vm5, %v992_v24  ;;  %v1110_v36 = vld [vmem:[#allocation2 + $0xb8] sm:$0xff] }
 0x87c   :  { %1067 = vst.msk [vmem:[#allocation2 + $0xa0] sm:$0xff] %vm206_vm6, %v1744_v7  ;;  %v988_v38 = vpop.permute.xlu0 %987  ;;  %1233 = vmatpush.msra.mxu0 %v1110_v36  ;;  %v714_v45 = vpop.permute.xlu2 %713 }
 0x87d   :  { %421 = vst.msk [vmem:[#allocation6 + $0x18] sm:$0xff] %vm192_vm3, %v416_v29  ;;  %v986_v40 = vpop.permute.xlu1 %985 }
 0x87e   :  { %967 = vst.msk [vmem:[#allocation2] sm:$0xff] %vm185_vm15, %v944_v22  ;;  %1234 = vmatpush.msra.mxu0 %v1109_v37 }
 0x87f   :  { %1015 = vst.msk [vmem:[#allocation2] sm:$0xff] %vm194_vm0, %v1744_v7  ;;  %v1103_v62 = vld [vmem:[#allocation2 + $0x80] sm:$0xff]  ;;  %vm1576_vm0 = vcmask 1024  }
 0x880   :  { %1031 = vst.msk [vmem:[#allocation2] sm:$0xff] %vm198_vm1, %v944_v22  ;;  %1235 = vmatpush.msra.mxu0 %v1108_v41 }
 0x881   :  { %1055 = vst.msk [vmem:[#allocation2] sm:$0xff] %vm204_vm2, %v1744_v7 }
 0x882   :  { %1008 = vst.msk [vmem:[#allocation2 + $0x88] sm:$0xff] %vm192_vm3, %v986_v40 }
 0x883   :  { %1024 = vst.msk [vmem:[#allocation2 + $0x88] sm:$0xff] %vm196_vm4, %v1744_v7  ;;  %v1107_v46 = vld [vmem:[#allocation2 + $0xa0] sm:$0xff] }
 0x884   :  { %1048 = vst.msk [vmem:[#allocation2 + $0x88] sm:$0xff] %vm202_vm5, %v986_v40  ;;  %1236 = vmatpush.msra.mxu0 %v1107_v46  ;;  %v248_v49 = vpop.permute.xlu0 %247  ;;  %v1127_v10 = vpop.permute.xlu2 %1126 }
 0x885   :  { %1064 = vst.msk [vmem:[#allocation2 + $0x88] sm:$0xff] %vm206_vm6, %v1744_v7  ;;  %v414_v50 = vpop.permute.xlu1 %413 }
 0x886   :  { %1644 = vst.msk [vmem:[%s2916_s23 + $0x30] sm:$0xff] %vm192_vm3, %v714_v45  ;;  %1237 = vmatpush.msra.mxu0 %v1106_v48 }
 0x887   :  { %1009 = vst.msk [vmem:[#allocation2 + $0x90] sm:$0xff] %vm192_vm3, %v988_v38 }
 0x888   :  { %1025 = vst.msk [vmem:[#allocation2 + $0x90] sm:$0xff] %vm196_vm4, %v1744_v7  ;;  %v1087_v53 = vld [vmem:[#allocation2] sm:$0xff] }
 0x889   :  { %1049 = vst.msk [vmem:[#allocation2 + $0x90] sm:$0xff] %vm202_vm5, %v988_v38  ;;  %1199 = vmatpush.msra.mxu3 %v1087_v53 }
 0x88a   :  { %1065 = vst.msk [vmem:[#allocation2 + $0x90] sm:$0xff] %vm206_vm6, %v1744_v7  ;;  %1200 = vmatmul.f32.vlgmr.msra.gmra.mxu3 %v1071_v52 }
 0x88b   :  { %420 = vst.msk [vmem:[#allocation6 + $0x10] sm:$0xff] %vm192_vm3, %v414_v50 }
 0x88c   :  { %251 = vst.msk [vmem:[#allocation4 + $0x8] sm:$0xff] %vm192_vm3, %v248_v49  ;;  %v710_v57 = vpop.permute.xlu0 %709  ;;  %v1104_v60 = vld [vmem:[#allocation2 + $0x88] sm:$0xff]  ;;  %v1142_v11 = vpop.permute.xlu2 %1141  ;;  %1605 = dma.vmem_to_hbm [thread:$0]  %s1598_s15, 512, %s1600_s10, [#allocation7], %s1749_s28, %s1749_s28, %s1750_s6  }
 0x88d   :  { %v712_v7 = vpop.permute.xlu1 %711  ;;  %1642 = vst.msk [vmem:[%s2916_s23 + $0x20] sm:$0xff] %vm192_vm3, %v710_v57 }
 0x88e   :  { %1643 = vst.msk [vmem:[%s2916_s23 + $0x28] sm:$0xff] %vm192_vm3, %v712_v7 }
 0x891   :  { %v1105_v59 = vld [vmem:[#allocation2 + $0x90] sm:$0xff] }
 0x892   :  { %1238 = vmatpush.msra.mxu0 %v1105_v59  ;;  %1203 = vmatmul.f32.gmra.mxu3 %v1073_v58 }
 0x894   :  { %1239 = vmatpush.msra.mxu0 %v1104_v60  ;;  %v716_v0 = vpop.permute.xlu0 %715  ;;  %v2749_v14 = vpop.permute.xlu2 %1156 }
 0x895   :  { %1645 = vst.msk [vmem:[%s2916_s23 + $0x38] sm:$0xff] %vm192_vm3, %v716_v0  ;;  %v1122_v13 = vpop.permute.xlu1 %1121 }
 0x896   :  { %1240 = vmatpush.msra.mxu0 %v1103_v62 }
 0x897   :  { %1654 = vmatmul.msk.f32.vlgmr.msra.gmra.mxu0 %vm1159_vm13, %v1072_v63 }
 0x89a   :  { %1206 = vmatmul.f32.gmra.mxu3 %v1075_v35 }
 0x89c   :  { %v1132_v16 = vpop.permute.xlu0 %1131  ;;  %v1368_v17 = vpop.permute.xlu2 %1367 }
 0x89d   :  { %v1137_v15 = vpop.permute.xlu1 %1136 }
 0x89f   :  { %1655 = vmatmul.msk.f32.gmra.mxu0 %vm1159_vm13, %v1074_v8 }
 0x8a2   :  { %1209 = vmatmul.f32.gmra.mxu3 %v1077_v12 }
 0x8a4   :  { %v2753_v20 = vpop.permute.xlu0 %1146  ;;  %v2755_v21 = vpop.permute.xlu2 %1373 }
 0x8a5   :  { %v2751_v18 = vpop.permute.xlu1 %1151 }
 0x8a7   :  { %1656 = vmatmul.msk.f32.gmra.mxu0 %vm1159_vm13, %v1076_v23 }
 0x8aa   :  { %1212 = vmatmul.f32.gmra.mxu3 %v1079_v27 }
 0x8ac   :  { %v1370_v25 = vpop.permute.xlu0 %1369  ;;  %v1469_v36 = vpop.permute.xlu2 %1468 }
 0x8ad   :  { %v1366_v24 = vpop.permute.xlu1 %1365 }
 0x8af   :  { %1657 = vmatmul.msk.f32.gmra.mxu0 %vm1159_vm13, %v1078_v31 }
 0x8b2   :  { %1215 = vmatmul.f32.gmra.mxu3 %v1081_v34 }
 0x8b4   :  { %v1376_v41 = vpop.permute.xlu0 %1375  ;;  %v1475_v8 = vpop.permute.xlu2 %1474 }
 0x8b5   :  { %v1372_v38 = vpop.permute.xlu1 %1371 }
 0x8b7   :  { %1658 = vmatmul.msk.f32.gmra.mxu0 %vm1159_vm13, %v1080_v2 }
 0x8ba   :  { %1218 = vmatmul.f32.gmra.mxu3 %v1083_v3 }
 0x8bc   :  { %v1471_v52 = vpop.permute.xlu0 %1470 }
 0x8bf   :  { %1659 = vmatmul.msk.f32.gmra.mxu0 %vm1159_vm13, %v1082_v4 }
 0x8c2   :  { %1221 = vmatmul.f32.gmra.mxu3 %v1085_v5 }
 0x8c4   :  { %v1477_v3 = vpop.permute.xlu0 %1476 }
 0x8c7   :  { %1660 = vmatmul.msk.f32.gmra.mxu0 %vm1159_vm13, %v1084_v6 }
 0x8cf   :  { %1661 = vmatmul.msk.f32.gmra.mxu0 %vm1159_vm13, %v1086_v9 }
 0x90d   :  { %v1201_v22 = vpop.f32.mrf.mxu3 }
 0x90e   :  { %v1202_v28 = vadd.f32 %v1201_v22, %v1122_v13 }
 0x914   :  { %v1242_v29 = vpop.f32.mrf.mxu0 }
 0x915   :  { %v1243_v30 = vadd.f32 %v1242_v29, %v1202_v28  ;;  %v1204_v32 = vpop.f32.mrf.mxu3  ;;  %v1380_v28 = vpop.permute.xlu0 %1379 }
 0x916   :  { %v1205_v42 = vadd.f32 %v1204_v32, %v1127_v10 }
 0x917   :  { %v1266_v37 = vadd.f32 %v1243_v30, %v2415_v19  ;;  %v2764_v19 = vpop.permute.xlu1 %1377 }
 0x919   :  { %v1492_v40 = vmul.f32 %v1469_v36, %v1266_v37  ;;  %1314 = vrot.lane.b32.xlu2 %v1266_v37, %s1747_s14  ;;  %1282 = vrot.lane.b32.xlu0 %v1266_v37, %s1746_s8  ;;  %v1389_v49 = vmul.f32 %v1366_v24, %v1266_v37 }
 0x91b   :  { %1508 = vrot.lane.b32.xlu1 %v1492_v40, %s1747_s14 }
 0x91c   :  { %v1245_v44 = vpop.f32.mrf.mxu0 }
 0x91d   :  { %v1246_v45 = vadd.f32 %v1245_v44, %v1205_v42  ;;  %v1207_v46 = vpop.f32.mrf.mxu3 }
 0x91e   :  { %v1208_v50 = vadd.f32 %v1207_v46, %v1132_v16 }
 0x91f   :  { %v1267_v48 = vadd.f32 %v1246_v45, %v2421_v26  ;;  %v1473_v26 = vpop.permute.xlu1 %1472 }
 0x921   :  { %1316 = vrot.lane.b32.xlu0 %v1267_v48, %s1747_s14  ;;  %1405 = vrot.lane.b32.xlu2 %v1389_v49, %s1746_s8  ;;  %v1493_v56 = vmul.f32 %v1471_v52, %v1267_v48  ;;  %v1390_v57 = vmul.f32 %v1368_v17, %v1267_v48 }
 0x923   :  { %1284 = vrot.lane.b32.xlu1 %v1267_v48, %s1746_s8 }
 0x924   :  { %v1248_v53 = vpop.f32.mrf.mxu0 }
 0x925   :  { %v1249_v54 = vadd.f32 %v1248_v53, %v1208_v50  ;;  %v1210_v7 = vpop.f32.mrf.mxu3 }
 0x926   :  { %v1211_v60 = vadd.f32 %v1210_v7, %v1137_v15 }
 0x927   :  { %v1268_v58 = vadd.f32 %v1249_v54, %v2429_v33 }
 0x929   :  { %1407 = vrot.lane.b32.xlu0 %v1390_v57, %s1746_s8  ;;  %1510 = vrot.lane.b32.xlu2 %v1493_v56, %s1747_s14  ;;  %v1494_v61 = vmul.f32 %v1473_v26, %v1268_v58  ;;  %v1391_v63 = vmul.f32 %v1370_v25, %v1268_v58 }
 0x92b   :  { %1318 = vrot.lane.b32.xlu1 %v1268_v58, %s1747_s14 }
 0x92c   :  { %v1251_v59 = vpop.f32.mrf.mxu0 }
 0x92d   :  { %v1252_v62 = vadd.f32 %v1251_v59, %v1211_v60  ;;  %v1213_v0 = vpop.f32.mrf.mxu3 }
 0x92e   :  { %v1214_v12 = vadd.f32 %v1213_v0, %v1142_v11 }
 0x92f   :  { %v1269_v35 = vadd.f32 %v1252_v62, %v2437_v39 }
 0x931   :  { %1512 = vrot.lane.b32.xlu0 %v1494_v61, %s1747_s14  ;;  %1286 = vrot.lane.b32.xlu2 %v1268_v58, %s1746_s8  ;;  %v1495_v23 = vmul.f32 %v1475_v8, %v1269_v35  ;;  %v1392_v2 = vmul.f32 %v1372_v38, %v1269_v35 }
 0x933   :  { %1409 = vrot.lane.b32.xlu1 %v1391_v63, %s1746_s8 }
 0x934   :  { %v1254_v33 = vpop.f32.mrf.mxu0 }
 0x935   :  { %v1255_v27 = vadd.f32 %v1254_v33, %v1214_v12  ;;  %v1216_v31 = vpop.f32.mrf.mxu3 }
 0x936   :  { %v1217_v39 = vadd.f32 %v1216_v31, %v2753_v20 }
 0x937   :  { %v1270_v1 = vadd.f32 %v1255_v27, %v2445_v43  ;;  %v1479_v43 = vpop.permute.xlu1 %1478 }
 0x939   :  { %1288 = vrot.lane.b32.xlu0 %v1269_v35, %s1746_s8  ;;  %1320 = vrot.lane.b32.xlu2 %v1269_v35, %s1747_s14  ;;  %v1496_v6 = vmul.f32 %v1477_v3, %v1270_v1  ;;  %v1393_v9 = vmul.f32 %v2755_v21, %v1270_v1 }
 0x93b   :  { %1514 = vrot.lane.b32.xlu1 %v1495_v23, %s1747_s14 }
 0x93c   :  { %v1257_v34 = vpop.f32.mrf.mxu0 }
 0x93d   :  { %v1258_v4 = vadd.f32 %v1257_v34, %v1217_v39  ;;  %v1219_v5 = vpop.f32.mrf.mxu3 }
 0x93e   :  { %v1220_v16 = vadd.f32 %v1219_v5, %v2751_v18  ;;  %v1481_v18 = vpop.permute.xlu2 %1480 }
 0x93f   :  { %v1271_v11 = vadd.f32 %v1258_v4, %v2453_v47 }
 0x941   :  { %1322 = vrot.lane.b32.xlu0 %v1270_v1, %s1747_s14  ;;  %1411 = vrot.lane.b32.xlu2 %v1392_v2, %s1746_s8  ;;  %v1394_v13 = vmul.f32 %v1376_v41, %v1271_v11  ;;  %v1497_v17 = vmul.f32 %v1479_v43, %v1271_v11 }
 0x943   :  { %1290 = vrot.lane.b32.xlu1 %v1270_v1, %s1746_s8 }
 0x944   :  { %v1260_v10 = vpop.f32.mrf.mxu0 }
 0x945   :  { %v1222_v15 = vpop.f32.mrf.mxu3  ;;  %v1261_v21 = vadd.f32 %v1260_v10, %v1220_v16 }
 0x946   :  { %v1223_v47 = vadd.f32 %v1222_v15, %v2749_v14 }
 0x947   :  { %v1272_v24 = vadd.f32 %v1261_v21, %v2461_v51  ;;  %v1483_v51 = vpop.permute.xlu1 %1482 }
 0x949   :  { %1413 = vrot.lane.b32.xlu0 %v1393_v9, %s1746_s8  ;;  %1516 = vrot.lane.b32.xlu2 %v1496_v6, %s1747_s14  ;;  %v1498_v29 = vmul.f32 %v1481_v18, %v1272_v24  ;;  %v1395_v30 = vmul.f32 %v2764_v19, %v1272_v24 }
 0x94b   :  { %1324 = vrot.lane.b32.xlu1 %v1271_v11, %s1747_s14 }
 0x94c   :  { %v1263_v20 = vpop.f32.mrf.mxu0 }
 0x94d   :  { %v1264_v22 = vadd.f32 %v1263_v20, %v1223_v47 }
 0x94f   :  { %v1273_v25 = vadd.f32 %v1264_v22, %v2470_v55 }
 0x951   :  { %1415 = vrot.lane.b32.xlu0 %v1394_v13, %s1746_s8  ;;  %1292 = vrot.lane.b32.xlu2 %v1271_v11, %s1746_s8  ;;  %v1396_v32 = vmul.f32 %v1380_v28, %v1273_v25  ;;  %v1499_v55 = vmul.f32 %v1483_v51, %v1273_v25 }
 0x953   :  { %1518 = vrot.lane.b32.xlu1 %v1497_v17, %s1747_s14 }
 0x959   :  { %1294 = vrot.lane.b32.xlu0 %v1272_v24, %s1746_s8  ;;  %1326 = vrot.lane.b32.xlu2 %v1272_v24, %s1747_s14 }
 0x95b   :  { %1296 = vrot.lane.b32.xlu1 %v1273_v25, %s1746_s8 }
 0x961   :  { %1520 = vrot.lane.b32.xlu0 %v1498_v29, %s1747_s14  ;;  %1417 = vrot.lane.b32.xlu2 %v1395_v30, %s1746_s8 }
 0x963   :  { %1419 = vrot.lane.b32.xlu1 %v1396_v32, %s1746_s8 }
 0x969   :  { %1328 = vrot.lane.b32.xlu0 %v1273_v25, %s1747_s14  ;;  %1522 = vrot.lane.b32.xlu2 %v1499_v55, %s1747_s14  ;;  %s1584_s14 = sshll.u32 %s1748_s1, 4  ;;  %s1585_s14 = int_to_ptr.vmem [resolvable:$true] %s1584_s14 }
 0x96a   :  { %1592 = dma.vmem_to_hbm [thread:$0]  %s1585_s14, 256, %s1587_s27, [#allocation5], %s1749_s28, %s1749_s28, %s1750_s6  }
 0x973   :  { %v1315_v14 = vpop.permute.xlu2 %1314 }
 0x974   :  { %1662 = vst.msk [vmem:[%s2917_s24 + $0x40] sm:$0xff] %vm192_vm3, %v1315_v14 }
 0x97b   :  { %v1406_v36 = vpop.permute.xlu2 %1405 }
 0x97c   :  { %v1429_v44 = vsel %vm192_vm3, %v1406_v36, 0.0 }
 0x983   :  { %v1511_v37 = vpop.permute.xlu2 %1510 }
 0x984   :  { %v1535_v49 = vsel %vm192_vm3, %v1511_v37, 0.0 }
 0x98b   :  { %v1283_v38 = vpop.permute.xlu0 %1282  ;;  %v1287_v40 = vpop.permute.xlu2 %1286 }
 0x98c   :  { %1306 = vst.msk [vmem:[%s2917_s24] sm:$0xff] %vm192_vm3, %v1283_v38 }
 0x98d   :  { %1308 = vst.msk [vmem:[%s2917_s24 + $0x10] sm:$0xff] %vm192_vm3, %v1287_v40  ;;  %v1509_v41 = vpop.permute.xlu1 %1508 }
 0x98e   :  { %v1532_v42 = vsel %vm192_vm3, %v1509_v41, 0.0 }
 0x992   :  { %1533 = vadd.xlane.f32.xlu2 %v1532_v42 }
 0x993   :  { %v1317_v45 = vpop.permute.xlu0 %1316  ;;  %1430 = vadd.xlane.f32.xlu0 %v1429_v44  ;;  %v1321_v46 = vpop.permute.xlu2 %1320 }
 0x994   :  { %1663 = vst.msk [vmem:[%s2917_s24 + $0x48] sm:$0xff] %vm192_vm3, %v1317_v45 }
 0x995   :  { %1665 = vst.msk [vmem:[%s2917_s24 + $0x58] sm:$0xff] %vm192_vm3, %v1321_v46  ;;  %v1285_v48 = vpop.permute.xlu1 %1284 }
 0x996   :  { %1307 = vst.msk [vmem:[%s2917_s24 + $0x8] sm:$0xff] %vm192_vm3, %v1285_v48 }
 0x99a   :  { %1536 = vadd.xlane.f32.xlu2 %v1535_v49 }
 0x99b   :  { %v1408_v19 = vpop.permute.xlu0 %1407  ;;  %v1412_v50 = vpop.permute.xlu2 %1411 }
 0x99c   :  { %v1432_v52 = vsel %vm192_vm3, %v1408_v19, 0.0  ;;  %v1438_v54 = vsel %vm192_vm3, %v1412_v50, 0.0 }
 0x99d   :  { %1433 = vadd.xlane.f32.xlu1 %v1432_v52  ;;  %v1319_v53 = vpop.permute.xlu1 %1318 }
 0x99e   :  { %1664 = vst.msk [vmem:[%s2917_s24 + $0x50] sm:$0xff] %vm192_vm3, %v1319_v53 }
 0x9a2   :  { %1439 = vadd.xlane.f32.xlu2 %v1438_v54  ;;  %v1355_v54 = vlaneseq }
 0x9a3   :  { %v1513_v56 = vpop.permute.xlu0 %1512  ;;  %v1517_v57 = vpop.permute.xlu2 %1516 }
 0x9a4   :  { %v1538_v7 = vsel %vm192_vm3, %v1513_v56, 0.0  ;;  %v1544_v59 = vsel %vm192_vm3, %v1517_v57, 0.0 }
 0x9a5   :  { %1539 = vadd.xlane.f32.xlu1 %v1538_v7  ;;  %v1410_v58 = vpop.permute.xlu1 %1409 }
 0x9a6   :  { %v1435_v26 = vsel %vm192_vm3, %v1410_v58, 0.0 }
 0x9a7   :  { %1436 = vadd.xlane.f32.xlu0 %v1435_v26  ;;  %v1356_v26 = vshrl.u32 %v1355_v54, 7 }
 0x9a9   :  { %vm1466_vm14 = vcmp.eq.s32.totalorder %v1356_v26, 0  ;;  %vm1569_vm15 = vcmp.eq.s32.totalorder %v1356_v26, 1 }
 0x9aa   :  { %1545 = vadd.xlane.f32.xlu2 %v1544_v59 }
 0x9ab   :  { %v1289_v60 = vpop.permute.xlu0 %1288  ;;  %v1293_v61 = vpop.permute.xlu2 %1292 }
 0x9ac   :  { %1309 = vst.msk [vmem:[%s2917_s24 + $0x18] sm:$0xff] %vm192_vm3, %v1289_v60 }
 0x9ad   :  { %1311 = vst.msk [vmem:[%s2917_s24 + $0x28] sm:$0xff] %vm192_vm3, %v1293_v61  ;;  %v1515_v62 = vpop.permute.xlu1 %1514 }
 0x9ae   :  { %v1541_v63 = vsel %vm192_vm3, %v1515_v62, 0.0 }
 0x9af   :  { %1542 = vadd.xlane.f32.xlu0 %v1541_v63 }
 0x9b3   :  { %v1323_v0 = vpop.permute.xlu0 %1322  ;;  %v1327_v33 = vpop.permute.xlu2 %1326 }
 0x9b4   :  { %1666 = vst.msk [vmem:[%s2917_s24 + $0x60] sm:$0xff] %vm192_vm3, %v1323_v0  ;;  %v1686_v0 = vld [vmem:[#allocation3] ss:$0 sm:$0xff] }
 0x9b5   :  { %1668 = vst.msk [vmem:[%s2917_s24 + $0x70] sm:$0xff] %vm192_vm3, %v1327_v33  ;;  %v1291_v35 = vpop.permute.xlu1 %1290 }
 0x9b6   :  { %1310 = vst.msk [vmem:[%s2917_s24 + $0x20] sm:$0xff] %vm192_vm3, %v1291_v35 }
 0x9bb   :  { %v1414_v8 = vpop.permute.xlu0 %1413  ;;  %v1418_v12 = vpop.permute.xlu2 %1417 }
 0x9bc   :  { %v1447_v23 = vsel %vm192_vm3, %v1418_v12, 0.0  ;;  %v1441_v27 = vsel %vm192_vm3, %v1414_v8, 0.0 }
 0x9bd   :  { %1442 = vadd.xlane.f32.xlu1 %v1441_v27  ;;  %v1325_v31 = vpop.permute.xlu1 %1324  ;;  %1448 = vadd.xlane.f32.xlu2 %v1447_v23 }
 0x9be   :  { %1667 = vst.msk [vmem:[%s2917_s24 + $0x68] sm:$0xff] %vm192_vm3, %v1325_v31 }
 0x9c3   :  { %v1416_v34 = vpop.permute.xlu0 %1415  ;;  %v1523_v1 = vpop.permute.xlu2 %1522 }
 0x9c4   :  { %v1553_v2 = vsel %vm192_vm3, %v1523_v1, 0.0  ;;  %v1444_v39 = vsel %vm192_vm3, %v1416_v34, 0.0 }
 0x9c5   :  { %v1519_v3 = vpop.permute.xlu1 %1518  ;;  %1445 = vadd.xlane.f32.xlu0 %v1444_v39  ;;  %1554 = vadd.xlane.f32.xlu2 %v1553_v2 }
 0x9c6   :  { %v1547_v4 = vsel %vm192_vm3, %v1519_v3, 0.0 }
 0x9c7   :  { %1548 = vadd.xlane.f32.xlu1 %v1547_v4 }
 0x9cb   :  { %v1295_v5 = vpop.permute.xlu0 %1294 }
 0x9cc   :  { %1312 = vst.msk [vmem:[%s2917_s24 + $0x30] sm:$0xff] %vm192_vm3, %v1295_v5 }
 0x9cd   :  { %v1297_v6 = vpop.permute.xlu1 %1296 }
 0x9ce   :  { %1313 = vst.msk [vmem:[%s2917_s24 + $0x38] sm:$0xff] %vm192_vm3, %v1297_v6 }
 0x9d3   :  { %v1521_v9 = vpop.permute.xlu0 %1520 }
 0x9d4   :  { %v1550_v10 = vsel %vm192_vm3, %v1521_v9, 0.0 }
 0x9d5   :  { %v1420_v11 = vpop.permute.xlu1 %1419  ;;  %1551 = vadd.xlane.f32.xlu0 %v1550_v10 }
 0x9d6   :  { %v1450_v43 = vsel %vm192_vm3, %v1420_v11, 0.0 }
 0x9d7   :  { %1451 = vadd.xlane.f32.xlu1 %v1450_v43 }
 0x9db   :  { %v1329_v13 = vpop.permute.xlu0 %1328 }
 0x9dc   :  { %1669 = vst.msk [vmem:[%s2917_s24 + $0x78] sm:$0xff] %vm192_vm3, %v1329_v13 }
 0xa05   :  { %v1534_v15 = vpop.xlane.xlu2 %1533 }
 0xa06   :  { %v1431_v17 = vpop.xlane.xlu0 %1430 }
 0xa0d   :  { %v1537_v16 = vpop.xlane.xlu2 %1536 }
 0xa0e   :  { %v1556_v29 = vadd.f32 %v1537_v16, %v1534_v15 }
 0xa10   :  { %v1434_v20 = vpop.xlane.xlu1 %1433 }
 0xa11   :  { %v1453_v28 = vadd.f32 %v1434_v20, %v1431_v17 }
 0xa15   :  { %v1440_v21 = vpop.xlane.xlu2 %1439 }
 0xa18   :  { %v1540_v22 = vpop.xlane.xlu1 %1539 }
 0xa19   :  { %v1557_v32 = vadd.f32 %v1556_v29, %v1540_v22 }
 0xa1a   :  { %v1437_v47 = vpop.xlane.xlu0 %1436 }
 0xa1b   :  { %v1454_v30 = vadd.f32 %v1453_v28, %v1437_v47 }
 0xa1d   :  { %v1546_v24 = vpop.xlane.xlu2 %1545  ;;  %v1455_v36 = vadd.f32 %v1454_v30, %v1440_v21 }
 0xa22   :  { %v1543_v25 = vpop.xlane.xlu0 %1542 }
 0xa23   :  { %v1558_v14 = vadd.f32 %v1557_v32, %v1543_v25 }
 0xa25   :  { %v1559_v41 = vadd.f32 %v1558_v14, %v1546_v24 }
 0xa30   :  { %v1443_v18 = vpop.xlane.xlu1 %1442  ;;  %v1449_v51 = vpop.xlane.xlu2 %1448 }
 0xa31   :  { %v1456_v38 = vadd.f32 %v1455_v36, %v1443_v18 }
 0xa38   :  { %v1446_v55 = vpop.xlane.xlu0 %1445  ;;  %v1555_v48 = vpop.xlane.xlu2 %1554 }
 0xa39   :  { %v1457_v40 = vadd.f32 %v1456_v38, %v1446_v55 }
 0xa3a   :  { %v1549_v37 = vpop.xlane.xlu1 %1548 }
 0xa3b   :  { %v1560_v42 = vadd.f32 %v1559_v41, %v1549_v37  ;;  %v1458_v46 = vadd.f32 %v1457_v40, %v1449_v51 }
 0xa48   :  { %v1552_v44 = vpop.xlane.xlu0 %1551 }
 0xa49   :  { %v1561_v45 = vadd.f32 %v1560_v42, %v1552_v44 }
 0xa4a   :  { %v1452_v49 = vpop.xlane.xlu1 %1451 }
 0xa4b   :  { %v1562_v19 = vadd.f32 %v1561_v45, %v1555_v48  ;;  %v1459_v50 = vadd.f32 %v1458_v46, %v1452_v49 }
 0xa4d   :  { %v1563_v52 = vrot.slane %v1562_v19, 4  ;;  %v1460_v53 = vrot.slane %v1459_v50, 4 }
 0xa4f   :  { %v1564_v56 = vadd.f32 %v1563_v52, %v1562_v19  ;;  %v1461_v57 = vadd.f32 %v1460_v53, %v1459_v50 }
 0xa51   :  { %v1565_v7 = vrot.slane %v1564_v56, 2  ;;  %v1462_v58 = vrot.slane %v1461_v57, 2 }
 0xa53   :  { %v1566_v59 = vadd.f32 %v1565_v7, %v1564_v56  ;;  %v1463_v60 = vadd.f32 %v1462_v58, %v1461_v57 }
 0xa55   :  { %v1567_v61 = vrot.slane %v1566_v59, 1  ;;  %v1464_v62 = vrot.slane %v1463_v60, 1 }
 0xa57   :  { %v1568_v63 = vadd.f32 %v1567_v61, %v1566_v59  ;;  %v1465_v33 = vadd.f32 %v1464_v62, %v1463_v60 }
 0xa59   :  { %v1467_v35 = vsel %vm1466_vm14, %v1465_v33, 0.0 }
 0xa5a   :  { %v1570_v8 = vsel %vm1569_vm15, %v1568_v63, %v1467_v35 }
 0xa5b   :  { %v1575_v12 = vadd.f32 %v1686_v0, %v1570_v8 }
 0xa5d   :  { %1577 = vst.msk [vmem:[%s2913_s20] sm:$0x3] %vm1576_vm0, %v1575_v12 }
 0xa5e   :  { %1735 = dma.done.wait [#allocation5], 256  }
 0xa5f   :  { %1736 = vsyncadd [#allocation5], 4294967040 }
 0xa60   :  { %1737 = dma.done.wait [#allocation7], 512  }
 0xa61   :  { %1738 = vsyncadd [#allocation7], 4294966784 }
 0xa62   :  { %1624 = vsyncpa [#allocation5], 1 }
 0xa63   :  { %1625 = vsyncpa [#allocation7], 1 }

</bundles_post_ra>
